<compile_context>
chip_gen: v5e
topology: v5e:2x2
jax: 0.10.0
libtpu: 0.0.40
codegen_flags: <defaults>
</compile_context>

<pallas_src>
import jax
import jax.numpy as jnp
from jax.experimental import pallas as pl
from jax.experimental.pallas import tpu as pltpu


# ----------------------------------------------------------------------------
# Stage planning
# ----------------------------------------------------------------------------
def _stage_metas(params, N, H, W):
    """Static per-stage geometry + lane-dense output packing factors."""
    metas = []
    h, w = H, W
    for p in params:
        kh, kw, cin, cout = p["w"].shape
        assert kh == 3 and kw == 3, "backbone uses 3x3 convs"
        s = int(p["stride"])
        ho = (h + 2 - kh) // s + 1
        wo = (w + 2 - kw) // s + 1
        m = N * ho * wo
        # Pack the (M, Cout) stage output into (R, 128): Cout alone (8/16/32)
        # would force masked partial stores; 128-lane slabs store dense.
        if cout < 128 and 128 % cout == 0 and m % (128 // cout) == 0:
            k = 128 // cout
        else:
            k = 1  # fallback: unpacked output
        metas.append(dict(cin=cin, cout=cout, stride=s, ho=ho, wo=wo,
                          M=m, K=9 * cin, k=k, R=m // k, L=k * cout))
        h, w = ho, wo
    return metas


def _scratch_shapes(metas, N):
    """Per stage: im2col patch buffer, (optional) row-aligned flatten buffer,
    stage-output staging buffer, and (except last) the zero-padded halo
    activation handed to the next stage.  All live purely in VMEM."""
    shapes = []
    ns = len(metas)
    for i, m in enumerate(metas):
        shapes.append(pltpu.VMEM((N, m["ho"], m["wo"], m["K"]), jnp.float32))
        if m["wo"] % 8 != 0:  # sublane-misaligned spatial rows -> copy-flatten
            shapes.append(pltpu.VMEM((m["M"], m["K"]), jnp.float32))
        shapes.append(pltpu.VMEM((m["M"], m["cout"]), jnp.float32))
        if i + 1 < ns:
            shapes.append(
                pltpu.VMEM((N, m["ho"] + 2, m["wo"] + 2, m["cout"]), jnp.float32))
    return shapes


# ----------------------------------------------------------------------------
# Fused kernel: all conv3x3+ReLU stages in one pallas_call, VMEM-resident.
# ----------------------------------------------------------------------------
def _build_fused_kernel(metas, N):
    ns = len(metas)

    def kernel(*refs):
        x_ref = refs[0]                                    # padded NHWC input
        w_refs = [refs[1 + 2 * i] for i in range(ns)]      # (9*Cin, Cout)
        b_refs = [refs[2 + 2 * i] for i in range(ns)]      # (1, Cout)
        o_refs = list(refs[1 + 2 * ns:1 + 3 * ns])         # packed (R, 128)
        scratch = list(refs[1 + 3 * ns:])

        # Unpack scratch in the exact order of _scratch_shapes.
        st, idx = [], 0
        for i, m in enumerate(metas):
            ent = {"p4": scratch[idx]}; idx += 1
            if m["wo"] % 8 != 0:
                ent["p2"] = scratch[idx]; idx += 1
            ent["y"] = scratch[idx]; idx += 1
            if i + 1 < ns:
                ent["a"] = scratch[idx]; idx += 1
            st.append(ent)

        src = x_ref  # zero-padded (N, H+2, W+2, Cin0) activation, in VMEM
        for i, m in enumerate(metas):
            s, ho, wo = m["stride"], m["ho"], m["wo"]
            cin, cout, K, M = m["cin"], m["cout"], m["K"], m["M"]
            p4 = st[i]["p4"]

            # --- in-VMEM im2col: gather the 9 shifted (strided) taps ---------
            for di in range(3):
                for dj in range(3):
                    if s == 1:
                        tap = src[:, di:di + ho, dj:dj + wo, :]
                    else:
                        tap = src[:, pl.ds(di, ho, stride=s),
                                  pl.ds(dj, wo, stride=s), :]
                    t = 3 * di + dj
                    p4[:, :, :, t * cin:(t + 1) * cin] = tap

            # --- flatten patches to (M, 9*Cin) --------------------------------
            if wo % 8 == 0:
                patches = p4[...].reshape(M, K)
            else:
                # sublane-misaligned rows: flatten via row-block copies.
                p2 = st[i]["p2"]
                for n in range(N):
                    for h in range(ho):
                        r0 = (n * ho + h) * wo
                        p2[r0:r0 + wo, :] = p4[n, h, :, :]
                patches = p2[...]

            # --- conv = one MXU matmul (f32 accumulate) + bias + ReLU ---------
            acc = jnp.dot(patches, w_refs[i][...],
                          preferred_element_type=jnp.float32)
            acc = jnp.maximum(acc + b_refs[i][...], 0.0)

            # --- stage output: lane-dense packed (R, 128) slab to HBM ---------
            y = st[i]["y"]
            y[...] = acc
            k, R = m["k"], m["R"]
            if k == 1:
                o_refs[i][...] = acc.astype(o_refs[i].dtype)
            else:
                for j in range(k):
                    o_refs[i][:, j * cout:(j + 1) * cout] = (
                        y[pl.ds(j, R, stride=k), :].astype(o_refs[i].dtype))

            # --- hand off to next stage: zero-padded halo stays in VMEM -------
            if i + 1 < ns:
                a_nx = st[i]["a"]
                a_nx[...] = jnp.zeros(a_nx.shape, a_nx.dtype)
                if wo % 8 == 0:
                    a_nx[:, 1:1 + ho, 1:1 + wo, :] = acc.reshape(N, ho, wo, cout)
                else:
                    for n in range(N):
                        for h in range(ho):
                            r0 = (n * ho + h) * wo
                            a_nx[n, 1 + h, 1:1 + wo, :] = y[r0:r0 + wo, :]
                src = a_nx

    return kernel


# ----------------------------------------------------------------------------
# FeatureGraphNet-style forward: list of intermediate feature maps (NCHW)
# ----------------------------------------------------------------------------
def feature_graph_net_forward(params, x_nchw, out_indices=(0, 1, 2)):
    N, _, H, W = x_nchw.shape
    metas = _stage_metas(params, N, H, W)

    # layout: NCHW in/out (PyTorch convention); NHWC + pre-padded halo inside.
    x = jnp.transpose(x_nchw, (0, 2, 3, 1)).astype(jnp.float32)
    x = jnp.pad(x, ((0, 0), (1, 1), (1, 1), (0, 0)))

    inputs = [x]
    in_specs = [pl.BlockSpec(x.shape, lambda i: (0, 0, 0, 0))]
    for p, m in zip(params, metas):
        w2d = p["w"].astype(jnp.float32).reshape(m["K"], m["cout"])
        b2d = p["b"].astype(jnp.float32).reshape(1, m["cout"])
        inputs += [w2d, b2d]
        in_specs += [pl.BlockSpec((m["K"], m["cout"]), lambda i: (0, 0)),
                     pl.BlockSpec((1, m["cout"]), lambda i: (0, 0))]

    out_shape = [jax.ShapeDtypeStruct((m["R"], m["L"]), jnp.float32) for m in metas]
    out_specs = [pl.BlockSpec((m["R"], m["L"]), lambda i: (0, 0)) for m in metas]

    outs = pl.pallas_call(
        _build_fused_kernel(metas, N),
        out_shape=out_shape,
        grid_spec=pltpu.PrefetchScalarGridSpec(
            num_scalar_prefetch=0,
            grid=(1,),
            in_specs=in_specs,
            out_specs=out_specs,
            scratch_shapes=_scratch_shapes(metas, N),
        ),
        compiler_params=pltpu.CompilerParams(
            dimension_semantics=("arbitrary",)),
    )(*inputs)

    feats = []
    for i, (o, m) in enumerate(zip(outs, metas)):
        if i in out_indices:
            # (R, 128) -> (M, Cout) -> NHWC is a pure metadata reshape; the
            # final NCHW transpose is one tiny XLA op per returned feature.
            f = o.reshape(N, m["ho"], m["wo"], m["cout"]).transpose(0, 3, 1, 2)
            feats.append(f)
    return feats


# ----------------------------------------------------------------------------
# Synthetic backbone params + pure-JAX reference
# ----------------------------------------------------------------------------
def init_backbone_params(key):
    """3 stages: (4->8 s1), (8->16 s2), (16->32 s2); deterministic init."""
    cfg = [(4, 8, 1), (8, 16, 2), (16, 32, 2)]
    params = []
    for idx, (cin, cout, stride) in enumerate(cfg):
        kw_key, kb_key = jax.random.split(jax.random.fold_in(key, idx))
        fan_in = 3 * 3 * cin
        w = jax.random.normal(kw_key, (3, 3, cin, cout), jnp.float32) * (2.0 / fan_in) ** 0.5
        b = jax.random.normal(kb_key, (cout,), jnp.float32) * 0.01
        params.append({"w": w, "b": b, "stride": stride})
    return params


def _reference_forward(params, x_nchw, out_indices=(0, 1, 2)):
    x = x_nchw
    feats = []
    for i, p in enumerate(params):
        w = jnp.transpose(p["w"], (3, 2, 0, 1))  # OIHW
        y = jax.lax.conv_general_dilated(
            x, w, window_strides=(p["stride"], p["stride"]),
            padding=((1, 1), (1, 1)),
            dimension_numbers=("NCHW", "OIHW", "NCHW"))
        y = jnp.maximum(y + p["b"].reshape(1, -1, 1, 1), 0.0)
        x = y
        if i in out_indices:
            feats.append(y)
    return feats


if __name__ == "__main__":
    key = jax.random.PRNGKey(0)
    pkey, xkey = jax.random.split(key)

    params = init_backbone_params(pkey)
    x = jax.random.normal(xkey, (2, 4, 16, 16), jnp.float32)  # NCHW

    feats = feature_graph_net_forward(params, x, out_indices=(0, 1, 2))
    feats = [jax.block_until_ready(f) for f in feats]

    # sanity: shapes follow the backbone reductions
    assert feats[0].shape == (2, 8, 16, 16)
    assert feats[1].shape == (2, 16, 8, 8)
    assert feats[2].shape == (2, 32, 4, 4)

    # sanity: numerics match a pure-JAX conv reference
    ref = _reference_forward(params, x, out_indices=(0, 1, 2))
    for a, b in zip(feats, ref):
        assert jnp.allclose(a, b, atol=1e-4, rtol=1e-4)

    print("KERNEL_OK")
</pallas_src>

<mosaic_0001>
module attributes {stable_mosaic.version = 11 : i64} {
  func.func @kernel(%arg0: i32, %arg1: memref<2x18x18x4xf32, #tpu.memory_space<vmem>>, %arg2: memref<36x8xf32, #tpu.memory_space<vmem>>, %arg3: memref<1x8xf32, #tpu.memory_space<vmem>>, %arg4: memref<72x16xf32, #tpu.memory_space<vmem>>, %arg5: memref<1x16xf32, #tpu.memory_space<vmem>>, %arg6: memref<144x32xf32, #tpu.memory_space<vmem>>, %arg7: memref<1x32xf32, #tpu.memory_space<vmem>>, %arg8: memref<32x128xf32, #tpu.memory_space<vmem>>, %arg9: memref<16x128xf32, #tpu.memory_space<vmem>>, %arg10: memref<8x128xf32, #tpu.memory_space<vmem>>, %arg11: memref<2x16x16x36xf32, #tpu.memory_space<vmem>>, %arg12: memref<512x8xf32, #tpu.memory_space<vmem>>, %arg13: memref<2x18x18x8xf32, #tpu.memory_space<vmem>>, %arg14: memref<2x8x8x72xf32, #tpu.memory_space<vmem>>, %arg15: memref<128x16xf32, #tpu.memory_space<vmem>>, %arg16: memref<2x10x10x16xf32, #tpu.memory_space<vmem>>, %arg17: memref<2x4x4x144xf32, #tpu.memory_space<vmem>>, %arg18: memref<32x144xf32, #tpu.memory_space<vmem>>, %arg19: memref<32x32xf32, #tpu.memory_space<vmem>>) attributes {dimension_semantics = [#tpu.dimension_semantics<arbitrary>], iteration_bounds = array<i64: 1>, scalar_prefetch = 0 : i64, scratch_operands = 9 : i64, tpu.core_type = #tpu.core_type<tc>, window_params = [{pipeline_mode = #tpu.pipeline_mode<synchronous>, transform_indices = @transform_0, window_bounds = array<i64: 2, 18, 18, 4>}, {pipeline_mode = #tpu.pipeline_mode<synchronous>, transform_indices = @transform_1, window_bounds = array<i64: 36, 8>}, {pipeline_mode = #tpu.pipeline_mode<synchronous>, transform_indices = @transform_2, window_bounds = array<i64: 1, 8>}, {pipeline_mode = #tpu.pipeline_mode<synchronous>, transform_indices = @transform_3, window_bounds = array<i64: 72, 16>}, {pipeline_mode = #tpu.pipeline_mode<synchronous>, transform_indices = @transform_4, window_bounds = array<i64: 1, 16>}, {pipeline_mode = #tpu.pipeline_mode<synchronous>, transform_indices = @transform_5, window_bounds = array<i64: 144, 32>}, {pipeline_mode = #tpu.pipeline_mode<synchronous>, transform_indices = @transform_6, window_bounds = array<i64: 1, 32>}, {pipeline_mode = #tpu.pipeline_mode<synchronous>, transform_indices = @transform_7, window_bounds = array<i64: 32, 128>}, {pipeline_mode = #tpu.pipeline_mode<synchronous>, transform_indices = @transform_8, window_bounds = array<i64: 16, 128>}, {pipeline_mode = #tpu.pipeline_mode<synchronous>, transform_indices = @transform_9, window_bounds = array<i64: 8, 128>}]} {
    %c0 = arith.constant 0 : index
    %c0_0 = arith.constant 0 : index
    %c0_1 = arith.constant 0 : index
    %c0_2 = arith.constant 0 : index
    %0 = vector.load %arg1[%c0, %c0_0, %c0_1, %c0_2] : memref<2x18x18x4xf32, #tpu.memory_space<vmem>>, vector<2x16x16x4xf32>
    %c0_3 = arith.constant 0 : index
    %c0_4 = arith.constant 0 : index
    %c0_5 = arith.constant 0 : index
    %c0_6 = arith.constant 0 : index
    %1 = vector.load %arg11[%c0_3, %c0_4, %c0_5, %c0_6] : memref<2x16x16x36xf32, #tpu.memory_space<vmem>>, vector<2x16x16x4xf32>
    tpu.vector_store %arg11[%c0_3, %c0_4, %c0_5, %c0_6], %0 {strides = array<i32>} : memref<2x16x16x36xf32, #tpu.memory_space<vmem>>, vector<2x16x16x4xf32>,
    %c0_7 = arith.constant 0 : index
    %c0_8 = arith.constant 0 : index
    %c1 = arith.constant 1 : index
    %c0_9 = arith.constant 0 : index
    %2 = vector.load %arg1[%c0_7, %c0_8, %c1, %c0_9] : memref<2x18x18x4xf32, #tpu.memory_space<vmem>>, vector<2x16x16x4xf32>
    %c0_10 = arith.constant 0 : index
    %c0_11 = arith.constant 0 : index
    %c0_12 = arith.constant 0 : index
    %c4 = arith.constant 4 : index
    %3 = vector.load %arg11[%c0_10, %c0_11, %c0_12, %c4] : memref<2x16x16x36xf32, #tpu.memory_space<vmem>>, vector<2x16x16x4xf32>
    tpu.vector_store %arg11[%c0_10, %c0_11, %c0_12, %c4], %2 {strides = array<i32>} : memref<2x16x16x36xf32, #tpu.memory_space<vmem>>, vector<2x16x16x4xf32>,
    %c0_13 = arith.constant 0 : index
    %c0_14 = arith.constant 0 : index
    %c2 = arith.constant 2 : index
    %c0_15 = arith.constant 0 : index
    %4 = vector.load %arg1[%c0_13, %c0_14, %c2, %c0_15] : memref<2x18x18x4xf32, #tpu.memory_space<vmem>>, vector<2x16x16x4xf32>
    %c0_16 = arith.constant 0 : index
    %c0_17 = arith.constant 0 : index
    %c0_18 = arith.constant 0 : index
    %c8 = arith.constant 8 : index
    %5 = vector.load %arg11[%c0_16, %c0_17, %c0_18, %c8] : memref<2x16x16x36xf32, #tpu.memory_space<vmem>>, vector<2x16x16x4xf32>
    tpu.vector_store %arg11[%c0_16, %c0_17, %c0_18, %c8], %4 {strides = array<i32>} : memref<2x16x16x36xf32, #tpu.memory_space<vmem>>, vector<2x16x16x4xf32>,
    %c0_19 = arith.constant 0 : index
    %c1_20 = arith.constant 1 : index
    %c0_21 = arith.constant 0 : index
    %c0_22 = arith.constant 0 : index
    %6 = vector.load %arg1[%c0_19, %c1_20, %c0_21, %c0_22] : memref<2x18x18x4xf32, #tpu.memory_space<vmem>>, vector<2x16x16x4xf32>
    %c0_23 = arith.constant 0 : index
    %c0_24 = arith.constant 0 : index
    %c0_25 = arith.constant 0 : index
    %c12 = arith.constant 12 : index
    %7 = vector.load %arg11[%c0_23, %c0_24, %c0_25, %c12] : memref<2x16x16x36xf32, #tpu.memory_space<vmem>>, vector<2x16x16x4xf32>
    tpu.vector_store %arg11[%c0_23, %c0_24, %c0_25, %c12], %6 {strides = array<i32>} : memref<2x16x16x36xf32, #tpu.memory_space<vmem>>, vector<2x16x16x4xf32>,
    %c0_26 = arith.constant 0 : index
    %c1_27 = arith.constant 1 : index
    %c1_28 = arith.constant 1 : index
    %c0_29 = arith.constant 0 : index
    %8 = vector.load %arg1[%c0_26, %c1_27, %c1_28, %c0_29] : memref<2x18x18x4xf32, #tpu.memory_space<vmem>>, vector<2x16x16x4xf32>
    %c0_30 = arith.constant 0 : index
    %c0_31 = arith.constant 0 : index
    %c0_32 = arith.constant 0 : index
    %c16 = arith.constant 16 : index
    %9 = vector.load %arg11[%c0_30, %c0_31, %c0_32, %c16] : memref<2x16x16x36xf32, #tpu.memory_space<vmem>>, vector<2x16x16x4xf32>
    tpu.vector_store %arg11[%c0_30, %c0_31, %c0_32, %c16], %8 {strides = array<i32>} : memref<2x16x16x36xf32, #tpu.memory_space<vmem>>, vector<2x16x16x4xf32>,
    %c0_33 = arith.constant 0 : index
    %c1_34 = arith.constant 1 : index
    %c2_35 = arith.constant 2 : index
    %c0_36 = arith.constant 0 : index
    %10 = vector.load %arg1[%c0_33, %c1_34, %c2_35, %c0_36] : memref<2x18x18x4xf32, #tpu.memory_space<vmem>>, vector<2x16x16x4xf32>
    %c0_37 = arith.constant 0 : index
    %c0_38 = arith.constant 0 : index
    %c0_39 = arith.constant 0 : index
    %c20 = arith.constant 20 : index
    %11 = vector.load %arg11[%c0_37, %c0_38, %c0_39, %c20] : memref<2x16x16x36xf32, #tpu.memory_space<vmem>>, vector<2x16x16x4xf32>
    tpu.vector_store %arg11[%c0_37, %c0_38, %c0_39, %c20], %10 {strides = array<i32>} : memref<2x16x16x36xf32, #tpu.memory_space<vmem>>, vector<2x16x16x4xf32>,
    %c0_40 = arith.constant 0 : index
    %c2_41 = arith.constant 2 : index
    %c0_42 = arith.constant 0 : index
    %c0_43 = arith.constant 0 : index
    %12 = vector.load %arg1[%c0_40, %c2_41, %c0_42, %c0_43] : memref<2x18x18x4xf32, #tpu.memory_space<vmem>>, vector<2x16x16x4xf32>
    %c0_44 = arith.constant 0 : index
    %c0_45 = arith.constant 0 : index
    %c0_46 = arith.constant 0 : index
    %c24 = arith.constant 24 : index
    %13 = vector.load %arg11[%c0_44, %c0_45, %c0_46, %c24] : memref<2x16x16x36xf32, #tpu.memory_space<vmem>>, vector<2x16x16x4xf32>
    tpu.vector_store %arg11[%c0_44, %c0_45, %c0_46, %c24], %12 {strides = array<i32>} : memref<2x16x16x36xf32, #tpu.memory_space<vmem>>, vector<2x16x16x4xf32>,
    %c0_47 = arith.constant 0 : index
    %c2_48 = arith.constant 2 : index
    %c1_49 = arith.constant 1 : index
    %c0_50 = arith.constant 0 : index
    %14 = vector.load %arg1[%c0_47, %c2_48, %c1_49, %c0_50] : memref<2x18x18x4xf32, #tpu.memory_space<vmem>>, vector<2x16x16x4xf32>
    %c0_51 = arith.constant 0 : index
    %c0_52 = arith.constant 0 : index
    %c0_53 = arith.constant 0 : index
    %c28 = arith.constant 28 : index
    %15 = vector.load %arg11[%c0_51, %c0_52, %c0_53, %c28] : memref<2x16x16x36xf32, #tpu.memory_space<vmem>>, vector<2x16x16x4xf32>
    tpu.vector_store %arg11[%c0_51, %c0_52, %c0_53, %c28], %14 {strides = array<i32>} : memref<2x16x16x36xf32, #tpu.memory_space<vmem>>, vector<2x16x16x4xf32>,
    %c0_54 = arith.constant 0 : index
    %c2_55 = arith.constant 2 : index
    %c2_56 = arith.constant 2 : index
    %c0_57 = arith.constant 0 : index
    %16 = vector.load %arg1[%c0_54, %c2_55, %c2_56, %c0_57] : memref<2x18x18x4xf32, #tpu.memory_space<vmem>>, vector<2x16x16x4xf32>
    %c0_58 = arith.constant 0 : index
    %c0_59 = arith.constant 0 : index
    %c0_60 = arith.constant 0 : index
    %c32 = arith.constant 32 : index
    %17 = vector.load %arg11[%c0_58, %c0_59, %c0_60, %c32] : memref<2x16x16x36xf32, #tpu.memory_space<vmem>>, vector<2x16x16x4xf32>
    tpu.vector_store %arg11[%c0_58, %c0_59, %c0_60, %c32], %16 {strides = array<i32>} : memref<2x16x16x36xf32, #tpu.memory_space<vmem>>, vector<2x16x16x4xf32>,
    %c0_61 = arith.constant 0 : index
    %c0_62 = arith.constant 0 : index
    %c0_63 = arith.constant 0 : index
    %c0_64 = arith.constant 0 : index
    %18 = vector.load %arg11[%c0_61, %c0_62, %c0_63, %c0_64] : memref<2x16x16x36xf32, #tpu.memory_space<vmem>>, vector<2x16x16x36xf32>
    %19 = vector.shape_cast %18 : vector<2x16x16x36xf32> to vector<512x36xf32>
    %c0_65 = arith.constant 0 : index
    %c0_66 = arith.constant 0 : index
    %20 = vector.load %arg2[%c0_65, %c0_66] : memref<36x8xf32, #tpu.memory_space<vmem>>, vector<36x8xf32>
    %cst = arith.constant dense<0.000000e+00> : vector<512x8xf32>
    %21 = tpu.matmul %19, %20, %cst {dimension_numbers = #tpu.dot_dimension_numbers<[1], [0], [0], [1], [0, 0, 1, 1], [], []>} : vector<512x36xf32>, vector<36x8xf32>, vector<512x8xf32> -> vector<512x8xf32>
    %c0_67 = arith.constant 0 : index
    %c0_68 = arith.constant 0 : index
    %22 = vector.load %arg3[%c0_67, %c0_68] : memref<1x8xf32, #tpu.memory_space<vmem>>, vector<1x8xf32>
    %23 = vector.broadcast %22 : vector<1x8xf32> to vector<512x8xf32>
    %24 = arith.addf %21, %23 : vector<512x8xf32>
    %cst_69 = arith.constant 0.000000e+00 : f32
    %25 = vector.broadcast %cst_69 : f32 to vector<512x8xf32>
    %26 = arith.maximumf %24, %25 : vector<512x8xf32>
    %c0_70 = arith.constant 0 : index
    %c0_71 = arith.constant 0 : index
    %27 = vector.load %arg12[%c0_70, %c0_71] : memref<512x8xf32, #tpu.memory_space<vmem>>, vector<512x8xf32>
    tpu.vector_store %arg12[%c0_70, %c0_71], %26 {strides = array<i32>} : memref<512x8xf32, #tpu.memory_space<vmem>>, vector<512x8xf32>,
    %c0_72 = arith.constant 0 : index
    %c0_73 = arith.constant 0 : index
    %28 = tpu.strided_load %arg12[%c0_72, %c0_73] {strides = array<i32: 16, 1>} : memref<512x8xf32, #tpu.memory_space<vmem>>, vector<32x8xf32>
    %c0_74 = arith.constant 0 : index
    %c0_75 = arith.constant 0 : index
    %29 = vector.load %arg8[%c0_74, %c0_75] : memref<32x128xf32, #tpu.memory_space<vmem>>, vector<32x8xf32>
    tpu.vector_store %arg8[%c0_74, %c0_75], %28 {strides = array<i32>} : memref<32x128xf32, #tpu.memory_space<vmem>>, vector<32x8xf32>,
    %c1_76 = arith.constant 1 : index
    %c0_77 = arith.constant 0 : index
    %30 = tpu.strided_load %arg12[%c1_76, %c0_77] {strides = array<i32: 16, 1>} : memref<512x8xf32, #tpu.memory_space<vmem>>, vector<32x8xf32>
    %c0_78 = arith.constant 0 : index
    %c8_79 = arith.constant 8 : index
    %31 = vector.load %arg8[%c0_78, %c8_79] : memref<32x128xf32, #tpu.memory_space<vmem>>, vector<32x8xf32>
    tpu.vector_store %arg8[%c0_78, %c8_79], %30 {strides = array<i32>} : memref<32x128xf32, #tpu.memory_space<vmem>>, vector<32x8xf32>,
    %c2_80 = arith.constant 2 : index
    %c0_81 = arith.constant 0 : index
    %32 = tpu.strided_load %arg12[%c2_80, %c0_81] {strides = array<i32: 16, 1>} : memref<512x8xf32, #tpu.memory_space<vmem>>, vector<32x8xf32>
    %c0_82 = arith.constant 0 : index
    %c16_83 = arith.constant 16 : index
    %33 = vector.load %arg8[%c0_82, %c16_83] : memref<32x128xf32, #tpu.memory_space<vmem>>, vector<32x8xf32>
    tpu.vector_store %arg8[%c0_82, %c16_83], %32 {strides = array<i32>} : memref<32x128xf32, #tpu.memory_space<vmem>>, vector<32x8xf32>,
    %c3 = arith.constant 3 : index
    %c0_84 = arith.constant 0 : index
    %34 = tpu.strided_load %arg12[%c3, %c0_84] {strides = array<i32: 16, 1>} : memref<512x8xf32, #tpu.memory_space<vmem>>, vector<32x8xf32>
    %c0_85 = arith.constant 0 : index
    %c24_86 = arith.constant 24 : index
    %35 = vector.load %arg8[%c0_85, %c24_86] : memref<32x128xf32, #tpu.memory_space<vmem>>, vector<32x8xf32>
    tpu.vector_store %arg8[%c0_85, %c24_86], %34 {strides = array<i32>} : memref<32x128xf32, #tpu.memory_space<vmem>>, vector<32x8xf32>,
    %c4_87 = arith.constant 4 : index
    %c0_88 = arith.constant 0 : index
    %36 = tpu.strided_load %arg12[%c4_87, %c0_88] {strides = array<i32: 16, 1>} : memref<512x8xf32, #tpu.memory_space<vmem>>, vector<32x8xf32>
    %c0_89 = arith.constant 0 : index
    %c32_90 = arith.constant 32 : index
    %37 = vector.load %arg8[%c0_89, %c32_90] : memref<32x128xf32, #tpu.memory_space<vmem>>, vector<32x8xf32>
    tpu.vector_store %arg8[%c0_89, %c32_90], %36 {strides = array<i32>} : memref<32x128xf32, #tpu.memory_space<vmem>>, vector<32x8xf32>,
    %c5 = arith.constant 5 : index
    %c0_91 = arith.constant 0 : index
    %38 = tpu.strided_load %arg12[%c5, %c0_91] {strides = array<i32: 16, 1>} : memref<512x8xf32, #tpu.memory_space<vmem>>, vector<32x8xf32>
    %c0_92 = arith.constant 0 : index
    %c40 = arith.constant 40 : index
    %39 = vector.load %arg8[%c0_92, %c40] : memref<32x128xf32, #tpu.memory_space<vmem>>, vector<32x8xf32>
    tpu.vector_store %arg8[%c0_92, %c40], %38 {strides = array<i32>} : memref<32x128xf32, #tpu.memory_space<vmem>>, vector<32x8xf32>,
    %c6 = arith.constant 6 : index
    %c0_93 = arith.constant 0 : index
    %40 = tpu.strided_load %arg12[%c6, %c0_93] {strides = array<i32: 16, 1>} : memref<512x8xf32, #tpu.memory_space<vmem>>, vector<32x8xf32>
    %c0_94 = arith.constant 0 : index
    %c48 = arith.constant 48 : index
    %41 = vector.load %arg8[%c0_94, %c48] : memref<32x128xf32, #tpu.memory_space<vmem>>, vector<32x8xf32>
    tpu.vector_store %arg8[%c0_94, %c48], %40 {strides = array<i32>} : memref<32x128xf32, #tpu.memory_space<vmem>>, vector<32x8xf32>,
    %c7 = arith.constant 7 : index
    %c0_95 = arith.constant 0 : index
    %42 = tpu.strided_load %arg12[%c7, %c0_95] {strides = array<i32: 16, 1>} : memref<512x8xf32, #tpu.memory_space<vmem>>, vector<32x8xf32>
    %c0_96 = arith.constant 0 : index
    %c56 = arith.constant 56 : index
    %43 = vector.load %arg8[%c0_96, %c56] : memref<32x128xf32, #tpu.memory_space<vmem>>, vector<32x8xf32>
    tpu.vector_store %arg8[%c0_96, %c56], %42 {strides = array<i32>} : memref<32x128xf32, #tpu.memory_space<vmem>>, vector<32x8xf32>,
    %c8_97 = arith.constant 8 : index
    %c0_98 = arith.constant 0 : index
    %44 = tpu.strided_load %arg12[%c8_97, %c0_98] {strides = array<i32: 16, 1>} : memref<512x8xf32, #tpu.memory_space<vmem>>, vector<32x8xf32>
    %c0_99 = arith.constant 0 : index
    %c64 = arith.constant 64 : index
    %45 = vector.load %arg8[%c0_99, %c64] : memref<32x128xf32, #tpu.memory_space<vmem>>, vector<32x8xf32>
    tpu.vector_store %arg8[%c0_99, %c64], %44 {strides = array<i32>} : memref<32x128xf32, #tpu.memory_space<vmem>>, vector<32x8xf32>,
    %c9 = arith.constant 9 : index
    %c0_100 = arith.constant 0 : index
    %46 = tpu.strided_load %arg12[%c9, %c0_100] {strides = array<i32: 16, 1>} : memref<512x8xf32, #tpu.memory_space<vmem>>, vector<32x8xf32>
    %c0_101 = arith.constant 0 : index
    %c72 = arith.constant 72 : index
    %47 = vector.load %arg8[%c0_101, %c72] : memref<32x128xf32, #tpu.memory_space<vmem>>, vector<32x8xf32>
    tpu.vector_store %arg8[%c0_101, %c72], %46 {strides = array<i32>} : memref<32x128xf32, #tpu.memory_space<vmem>>, vector<32x8xf32>,
    %c10 = arith.constant 10 : index
    %c0_102 = arith.constant 0 : index
    %48 = tpu.strided_load %arg12[%c10, %c0_102] {strides = array<i32: 16, 1>} : memref<512x8xf32, #tpu.memory_space<vmem>>, vector<32x8xf32>
    %c0_103 = arith.constant 0 : index
    %c80 = arith.constant 80 : index
    %49 = vector.load %arg8[%c0_103, %c80] : memref<32x128xf32, #tpu.memory_space<vmem>>, vector<32x8xf32>
    tpu.vector_store %arg8[%c0_103, %c80], %48 {strides = array<i32>} : memref<32x128xf32, #tpu.memory_space<vmem>>, vector<32x8xf32>,
    %c11 = arith.constant 11 : index
    %c0_104 = arith.constant 0 : index
    %50 = tpu.strided_load %arg12[%c11, %c0_104] {strides = array<i32: 16, 1>} : memref<512x8xf32, #tpu.memory_space<vmem>>, vector<32x8xf32>
    %c0_105 = arith.constant 0 : index
    %c88 = arith.constant 88 : index
    %51 = vector.load %arg8[%c0_105, %c88] : memref<32x128xf32, #tpu.memory_space<vmem>>, vector<32x8xf32>
    tpu.vector_store %arg8[%c0_105, %c88], %50 {strides = array<i32>} : memref<32x128xf32, #tpu.memory_space<vmem>>, vector<32x8xf32>,
    %c12_106 = arith.constant 12 : index
    %c0_107 = arith.constant 0 : index
    %52 = tpu.strided_load %arg12[%c12_106, %c0_107] {strides = array<i32: 16, 1>} : memref<512x8xf32, #tpu.memory_space<vmem>>, vector<32x8xf32>
    %c0_108 = arith.constant 0 : index
    %c96 = arith.constant 96 : index
    %53 = vector.load %arg8[%c0_108, %c96] : memref<32x128xf32, #tpu.memory_space<vmem>>, vector<32x8xf32>
    tpu.vector_store %arg8[%c0_108, %c96], %52 {strides = array<i32>} : memref<32x128xf32, #tpu.memory_space<vmem>>, vector<32x8xf32>,
    %c13 = arith.constant 13 : index
    %c0_109 = arith.constant 0 : index
    %54 = tpu.strided_load %arg12[%c13, %c0_109] {strides = array<i32: 16, 1>} : memref<512x8xf32, #tpu.memory_space<vmem>>, vector<32x8xf32>
    %c0_110 = arith.constant 0 : index
    %c104 = arith.constant 104 : index
    %55 = vector.load %arg8[%c0_110, %c104] : memref<32x128xf32, #tpu.memory_space<vmem>>, vector<32x8xf32>
    tpu.vector_store %arg8[%c0_110, %c104], %54 {strides = array<i32>} : memref<32x128xf32, #tpu.memory_space<vmem>>, vector<32x8xf32>,
    %c14 = arith.constant 14 : index
    %c0_111 = arith.constant 0 : index
    %56 = tpu.strided_load %arg12[%c14, %c0_111] {strides = array<i32: 16, 1>} : memref<512x8xf32, #tpu.memory_space<vmem>>, vector<32x8xf32>
    %c0_112 = arith.constant 0 : index
    %c112 = arith.constant 112 : index
    %57 = vector.load %arg8[%c0_112, %c112] : memref<32x128xf32, #tpu.memory_space<vmem>>, vector<32x8xf32>
    tpu.vector_store %arg8[%c0_112, %c112], %56 {strides = array<i32>} : memref<32x128xf32, #tpu.memory_space<vmem>>, vector<32x8xf32>,
    %c15 = arith.constant 15 : index
    %c0_113 = arith.constant 0 : index
    %58 = tpu.strided_load %arg12[%c15, %c0_113] {strides = array<i32: 16, 1>} : memref<512x8xf32, #tpu.memory_space<vmem>>, vector<32x8xf32>
    %c0_114 = arith.constant 0 : index
    %c120 = arith.constant 120 : index
    %59 = vector.load %arg8[%c0_114, %c120] : memref<32x128xf32, #tpu.memory_space<vmem>>, vector<32x8xf32>
    tpu.vector_store %arg8[%c0_114, %c120], %58 {strides = array<i32>} : memref<32x128xf32, #tpu.memory_space<vmem>>, vector<32x8xf32>,
    %cst_115 = arith.constant 0.000000e+00 : f32
    %60 = vector.broadcast %cst_115 : f32 to vector<2x18x18x8xf32>
    %c0_116 = arith.constant 0 : index
    %c0_117 = arith.constant 0 : index
    %c0_118 = arith.constant 0 : index
    %c0_119 = arith.constant 0 : index
    %61 = vector.load %arg13[%c0_116, %c0_117, %c0_118, %c0_119] : memref<2x18x18x8xf32, #tpu.memory_space<vmem>>, vector<2x18x18x8xf32>
    tpu.vector_store %arg13[%c0_116, %c0_117, %c0_118, %c0_119], %60 {strides = array<i32>} : memref<2x18x18x8xf32, #tpu.memory_space<vmem>>, vector<2x18x18x8xf32>,
    %62 = vector.shape_cast %26 : vector<512x8xf32> to vector<2x16x16x8xf32>
    %c0_120 = arith.constant 0 : index
    %c1_121 = arith.constant 1 : index
    %c1_122 = arith.constant 1 : index
    %c0_123 = arith.constant 0 : index
    %63 = vector.load %arg13[%c0_120, %c1_121, %c1_122, %c0_123] : memref<2x18x18x8xf32, #tpu.memory_space<vmem>>, vector<2x16x16x8xf32>
    tpu.vector_store %arg13[%c0_120, %c1_121, %c1_122, %c0_123], %62 {strides = array<i32>} : memref<2x18x18x8xf32, #tpu.memory_space<vmem>>, vector<2x16x16x8xf32>,
    %c0_124 = arith.constant 0 : index
    %c0_125 = arith.constant 0 : index
    %c0_126 = arith.constant 0 : index
    %c0_127 = arith.constant 0 : index
    %64 = tpu.strided_load %arg13[%c0_124, %c0_125, %c0_126, %c0_127] {strides = array<i32: 1, 2, 2, 1>} : memref<2x18x18x8xf32, #tpu.memory_space<vmem>>, vector<2x8x8x8xf32>
    %c0_128 = arith.constant 0 : index
    %c0_129 = arith.constant 0 : index
    %c0_130 = arith.constant 0 : index
    %c0_131 = arith.constant 0 : index
    %65 = vector.load %arg14[%c0_128, %c0_129, %c0_130, %c0_131] : memref<2x8x8x72xf32, #tpu.memory_space<vmem>>, vector<2x8x8x8xf32>
    tpu.vector_store %arg14[%c0_128, %c0_129, %c0_130, %c0_131], %64 {strides = array<i32>} : memref<2x8x8x72xf32, #tpu.memory_space<vmem>>, vector<2x8x8x8xf32>,
    %c0_132 = arith.constant 0 : index
    %c0_133 = arith.constant 0 : index
    %c1_134 = arith.constant 1 : index
    %c0_135 = arith.constant 0 : index
    %66 = tpu.strided_load %arg13[%c0_132, %c0_133, %c1_134, %c0_135] {strides = array<i32: 1, 2, 2, 1>} : memref<2x18x18x8xf32, #tpu.memory_space<vmem>>, vector<2x8x8x8xf32>
    %c0_136 = arith.constant 0 : index
    %c0_137 = arith.constant 0 : index
    %c0_138 = arith.constant 0 : index
    %c8_139 = arith.constant 8 : index
    %67 = vector.load %arg14[%c0_136, %c0_137, %c0_138, %c8_139] : memref<2x8x8x72xf32, #tpu.memory_space<vmem>>, vector<2x8x8x8xf32>
    tpu.vector_store %arg14[%c0_136, %c0_137, %c0_138, %c8_139], %66 {strides = array<i32>} : memref<2x8x8x72xf32, #tpu.memory_space<vmem>>, vector<2x8x8x8xf32>,
    %c0_140 = arith.constant 0 : index
    %c0_141 = arith.constant 0 : index
    %c2_142 = arith.constant 2 : index
    %c0_143 = arith.constant 0 : index
    %68 = tpu.strided_load %arg13[%c0_140, %c0_141, %c2_142, %c0_143] {strides = array<i32: 1, 2, 2, 1>} : memref<2x18x18x8xf32, #tpu.memory_space<vmem>>, vector<2x8x8x8xf32>
    %c0_144 = arith.constant 0 : index
    %c0_145 = arith.constant 0 : index
    %c0_146 = arith.constant 0 : index
    %c16_147 = arith.constant 16 : index
    %69 = vector.load %arg14[%c0_144, %c0_145, %c0_146, %c16_147] : memref<2x8x8x72xf32, #tpu.memory_space<vmem>>, vector<2x8x8x8xf32>
    tpu.vector_store %arg14[%c0_144, %c0_145, %c0_146, %c16_147], %68 {strides = array<i32>} : memref<2x8x8x72xf32, #tpu.memory_space<vmem>>, vector<2x8x8x8xf32>,
    %c0_148 = arith.constant 0 : index
    %c1_149 = arith.constant 1 : index
    %c0_150 = arith.constant 0 : index
    %c0_151 = arith.constant 0 : index
    %70 = tpu.strided_load %arg13[%c0_148, %c1_149, %c0_150, %c0_151] {strides = array<i32: 1, 2, 2, 1>} : memref<2x18x18x8xf32, #tpu.memory_space<vmem>>, vector<2x8x8x8xf32>
    %c0_152 = arith.constant 0 : index
    %c0_153 = arith.constant 0 : index
    %c0_154 = arith.constant 0 : index
    %c24_155 = arith.constant 24 : index
    %71 = vector.load %arg14[%c0_152, %c0_153, %c0_154, %c24_155] : memref<2x8x8x72xf32, #tpu.memory_space<vmem>>, vector<2x8x8x8xf32>
    tpu.vector_store %arg14[%c0_152, %c0_153, %c0_154, %c24_155], %70 {strides = array<i32>} : memref<2x8x8x72xf32, #tpu.memory_space<vmem>>, vector<2x8x8x8xf32>,
    %c0_156 = arith.constant 0 : index
    %c1_157 = arith.constant 1 : index
    %c1_158 = arith.constant 1 : index
    %c0_159 = arith.constant 0 : index
    %72 = tpu.strided_load %arg13[%c0_156, %c1_157, %c1_158, %c0_159] {strides = array<i32: 1, 2, 2, 1>} : memref<2x18x18x8xf32, #tpu.memory_space<vmem>>, vector<2x8x8x8xf32>
    %c0_160 = arith.constant 0 : index
    %c0_161 = arith.constant 0 : index
    %c0_162 = arith.constant 0 : index
    %c32_163 = arith.constant 32 : index
    %73 = vector.load %arg14[%c0_160, %c0_161, %c0_162, %c32_163] : memref<2x8x8x72xf32, #tpu.memory_space<vmem>>, vector<2x8x8x8xf32>
    tpu.vector_store %arg14[%c0_160, %c0_161, %c0_162, %c32_163], %72 {strides = array<i32>} : memref<2x8x8x72xf32, #tpu.memory_space<vmem>>, vector<2x8x8x8xf32>,
    %c0_164 = arith.constant 0 : index
    %c1_165 = arith.constant 1 : index
    %c2_166 = arith.constant 2 : index
    %c0_167 = arith.constant 0 : index
    %74 = tpu.strided_load %arg13[%c0_164, %c1_165, %c2_166, %c0_167] {strides = array<i32: 1, 2, 2, 1>} : memref<2x18x18x8xf32, #tpu.memory_space<vmem>>, vector<2x8x8x8xf32>
    %c0_168 = arith.constant 0 : index
    %c0_169 = arith.constant 0 : index
    %c0_170 = arith.constant 0 : index
    %c40_171 = arith.constant 40 : index
    %75 = vector.load %arg14[%c0_168, %c0_169, %c0_170, %c40_171] : memref<2x8x8x72xf32, #tpu.memory_space<vmem>>, vector<2x8x8x8xf32>
    tpu.vector_store %arg14[%c0_168, %c0_169, %c0_170, %c40_171], %74 {strides = array<i32>} : memref<2x8x8x72xf32, #tpu.memory_space<vmem>>, vector<2x8x8x8xf32>,
    %c0_172 = arith.constant 0 : index
    %c2_173 = arith.constant 2 : index
    %c0_174 = arith.constant 0 : index
    %c0_175 = arith.constant 0 : index
    %76 = tpu.strided_load %arg13[%c0_172, %c2_173, %c0_174, %c0_175] {strides = array<i32: 1, 2, 2, 1>} : memref<2x18x18x8xf32, #tpu.memory_space<vmem>>, vector<2x8x8x8xf32>
    %c0_176 = arith.constant 0 : index
    %c0_177 = arith.constant 0 : index
    %c0_178 = arith.constant 0 : index
    %c48_179 = arith.constant 48 : index
    %77 = vector.load %arg14[%c0_176, %c0_177, %c0_178, %c48_179] : memref<2x8x8x72xf32, #tpu.memory_space<vmem>>, vector<2x8x8x8xf32>
    tpu.vector_store %arg14[%c0_176, %c0_177, %c0_178, %c48_179], %76 {strides = array<i32>} : memref<2x8x8x72xf32, #tpu.memory_space<vmem>>, vector<2x8x8x8xf32>,
    %c0_180 = arith.constant 0 : index
    %c2_181 = arith.constant 2 : index
    %c1_182 = arith.constant 1 : index
    %c0_183 = arith.constant 0 : index
    %78 = tpu.strided_load %arg13[%c0_180, %c2_181, %c1_182, %c0_183] {strides = array<i32: 1, 2, 2, 1>} : memref<2x18x18x8xf32, #tpu.memory_space<vmem>>, vector<2x8x8x8xf32>
    %c0_184 = arith.constant 0 : index
    %c0_185 = arith.constant 0 : index
    %c0_186 = arith.constant 0 : index
    %c56_187 = arith.constant 56 : index
    %79 = vector.load %arg14[%c0_184, %c0_185, %c0_186, %c56_187] : memref<2x8x8x72xf32, #tpu.memory_space<vmem>>, vector<2x8x8x8xf32>
    tpu.vector_store %arg14[%c0_184, %c0_185, %c0_186, %c56_187], %78 {strides = array<i32>} : memref<2x8x8x72xf32, #tpu.memory_space<vmem>>, vector<2x8x8x8xf32>,
    %c0_188 = arith.constant 0 : index
    %c2_189 = arith.constant 2 : index
    %c2_190 = arith.constant 2 : index
    %c0_191 = arith.constant 0 : index
    %80 = tpu.strided_load %arg13[%c0_188, %c2_189, %c2_190, %c0_191] {strides = array<i32: 1, 2, 2, 1>} : memref<2x18x18x8xf32, #tpu.memory_space<vmem>>, vector<2x8x8x8xf32>
    %c0_192 = arith.constant 0 : index
    %c0_193 = arith.constant 0 : index
    %c0_194 = arith.constant 0 : index
    %c64_195 = arith.constant 64 : index
    %81 = vector.load %arg14[%c0_192, %c0_193, %c0_194, %c64_195] : memref<2x8x8x72xf32, #tpu.memory_space<vmem>>, vector<2x8x8x8xf32>
    tpu.vector_store %arg14[%c0_192, %c0_193, %c0_194, %c64_195], %80 {strides = array<i32>} : memref<2x8x8x72xf32, #tpu.memory_space<vmem>>, vector<2x8x8x8xf32>,
    %c0_196 = arith.constant 0 : index
    %c0_197 = arith.constant 0 : index
    %c0_198 = arith.constant 0 : index
    %c0_199 = arith.constant 0 : index
    %82 = vector.load %arg14[%c0_196, %c0_197, %c0_198, %c0_199] : memref<2x8x8x72xf32, #tpu.memory_space<vmem>>, vector<2x8x8x72xf32>
    %83 = vector.shape_cast %82 : vector<2x8x8x72xf32> to vector<128x72xf32>
    %c0_200 = arith.constant 0 : index
    %c0_201 = arith.constant 0 : index
    %84 = vector.load %arg4[%c0_200, %c0_201] : memref<72x16xf32, #tpu.memory_space<vmem>>, vector<72x16xf32>
    %cst_202 = arith.constant dense<0.000000e+00> : vector<128x16xf32>
    %85 = tpu.matmul %83, %84, %cst_202 {dimension_numbers = #tpu.dot_dimension_numbers<[1], [0], [0], [1], [0, 0, 1, 1], [], []>} : vector<128x72xf32>, vector<72x16xf32>, vector<128x16xf32> -> vector<128x16xf32>
    %c0_203 = arith.constant 0 : index
    %c0_204 = arith.constant 0 : index
    %86 = vector.load %arg5[%c0_203, %c0_204] : memref<1x16xf32, #tpu.memory_space<vmem>>, vector<1x16xf32>
    %87 = vector.broadcast %86 : vector<1x16xf32> to vector<128x16xf32>
    %88 = arith.addf %85, %87 : vector<128x16xf32>
    %cst_205 = arith.constant 0.000000e+00 : f32
    %89 = vector.broadcast %cst_205 : f32 to vector<128x16xf32>
    %90 = arith.maximumf %88, %89 : vector<128x16xf32>
    %c0_206 = arith.constant 0 : index
    %c0_207 = arith.constant 0 : index
    %91 = vector.load %arg15[%c0_206, %c0_207] : memref<128x16xf32, #tpu.memory_space<vmem>>, vector<128x16xf32>
    tpu.vector_store %arg15[%c0_206, %c0_207], %90 {strides = array<i32>} : memref<128x16xf32, #tpu.memory_space<vmem>>, vector<128x16xf32>,
    %c0_208 = arith.constant 0 : index
    %c0_209 = arith.constant 0 : index
    %92 = tpu.strided_load %arg15[%c0_208, %c0_209] {strides = array<i32: 8, 1>} : memref<128x16xf32, #tpu.memory_space<vmem>>, vector<16x16xf32>
    %c0_210 = arith.constant 0 : index
    %c0_211 = arith.constant 0 : index
    %93 = vector.load %arg9[%c0_210, %c0_211] : memref<16x128xf32, #tpu.memory_space<vmem>>, vector<16x16xf32>
    tpu.vector_store %arg9[%c0_210, %c0_211], %92 {strides = array<i32>} : memref<16x128xf32, #tpu.memory_space<vmem>>, vector<16x16xf32>,
    %c1_212 = arith.constant 1 : index
    %c0_213 = arith.constant 0 : index
    %94 = tpu.strided_load %arg15[%c1_212, %c0_213] {strides = array<i32: 8, 1>} : memref<128x16xf32, #tpu.memory_space<vmem>>, vector<16x16xf32>
    %c0_214 = arith.constant 0 : index
    %c16_215 = arith.constant 16 : index
    %95 = vector.load %arg9[%c0_214, %c16_215] : memref<16x128xf32, #tpu.memory_space<vmem>>, vector<16x16xf32>
    tpu.vector_store %arg9[%c0_214, %c16_215], %94 {strides = array<i32>} : memref<16x128xf32, #tpu.memory_space<vmem>>, vector<16x16xf32>,
    %c2_216 = arith.constant 2 : index
    %c0_217 = arith.constant 0 : index
    %96 = tpu.strided_load %arg15[%c2_216, %c0_217] {strides = array<i32: 8, 1>} : memref<128x16xf32, #tpu.memory_space<vmem>>, vector<16x16xf32>
    %c0_218 = arith.constant 0 : index
    %c32_219 = arith.constant 32 : index
    %97 = vector.load %arg9[%c0_218, %c32_219] : memref<16x128xf32, #tpu.memory_space<vmem>>, vector<16x16xf32>
    tpu.vector_store %arg9[%c0_218, %c32_219], %96 {strides = array<i32>} : memref<16x128xf32, #tpu.memory_space<vmem>>, vector<16x16xf32>,
    %c3_220 = arith.constant 3 : index
    %c0_221 = arith.constant 0 : index
    %98 = tpu.strided_load %arg15[%c3_220, %c0_221] {strides = array<i32: 8, 1>} : memref<128x16xf32, #tpu.memory_space<vmem>>, vector<16x16xf32>
    %c0_222 = arith.constant 0 : index
    %c48_223 = arith.constant 48 : index
    %99 = vector.load %arg9[%c0_222, %c48_223] : memref<16x128xf32, #tpu.memory_space<vmem>>, vector<16x16xf32>
    tpu.vector_store %arg9[%c0_222, %c48_223], %98 {strides = array<i32>} : memref<16x128xf32, #tpu.memory_space<vmem>>, vector<16x16xf32>,
    %c4_224 = arith.constant 4 : index
    %c0_225 = arith.constant 0 : index
    %100 = tpu.strided_load %arg15[%c4_224, %c0_225] {strides = array<i32: 8, 1>} : memref<128x16xf32, #tpu.memory_space<vmem>>, vector<16x16xf32>
    %c0_226 = arith.constant 0 : index
    %c64_227 = arith.constant 64 : index
    %101 = vector.load %arg9[%c0_226, %c64_227] : memref<16x128xf32, #tpu.memory_space<vmem>>, vector<16x16xf32>
    tpu.vector_store %arg9[%c0_226, %c64_227], %100 {strides = array<i32>} : memref<16x128xf32, #tpu.memory_space<vmem>>, vector<16x16xf32>,
    %c5_228 = arith.constant 5 : index
    %c0_229 = arith.constant 0 : index
    %102 = tpu.strided_load %arg15[%c5_228, %c0_229] {strides = array<i32: 8, 1>} : memref<128x16xf32, #tpu.memory_space<vmem>>, vector<16x16xf32>
    %c0_230 = arith.constant 0 : index
    %c80_231 = arith.constant 80 : index
    %103 = vector.load %arg9[%c0_230, %c80_231] : memref<16x128xf32, #tpu.memory_space<vmem>>, vector<16x16xf32>
    tpu.vector_store %arg9[%c0_230, %c80_231], %102 {strides = array<i32>} : memref<16x128xf32, #tpu.memory_space<vmem>>, vector<16x16xf32>,
    %c6_232 = arith.constant 6 : index
    %c0_233 = arith.constant 0 : index
    %104 = tpu.strided_load %arg15[%c6_232, %c0_233] {strides = array<i32: 8, 1>} : memref<128x16xf32, #tpu.memory_space<vmem>>, vector<16x16xf32>
    %c0_234 = arith.constant 0 : index
    %c96_235 = arith.constant 96 : index
    %105 = vector.load %arg9[%c0_234, %c96_235] : memref<16x128xf32, #tpu.memory_space<vmem>>, vector<16x16xf32>
    tpu.vector_store %arg9[%c0_234, %c96_235], %104 {strides = array<i32>} : memref<16x128xf32, #tpu.memory_space<vmem>>, vector<16x16xf32>,
    %c7_236 = arith.constant 7 : index
    %c0_237 = arith.constant 0 : index
    %106 = tpu.strided_load %arg15[%c7_236, %c0_237] {strides = array<i32: 8, 1>} : memref<128x16xf32, #tpu.memory_space<vmem>>, vector<16x16xf32>
    %c0_238 = arith.constant 0 : index
    %c112_239 = arith.constant 112 : index
    %107 = vector.load %arg9[%c0_238, %c112_239] : memref<16x128xf32, #tpu.memory_space<vmem>>, vector<16x16xf32>
    tpu.vector_store %arg9[%c0_238, %c112_239], %106 {strides = array<i32>} : memref<16x128xf32, #tpu.memory_space<vmem>>, vector<16x16xf32>,
    %cst_240 = arith.constant 0.000000e+00 : f32
    %108 = vector.broadcast %cst_240 : f32 to vector<2x10x10x16xf32>
    %c0_241 = arith.constant 0 : index
    %c0_242 = arith.constant 0 : index
    %c0_243 = arith.constant 0 : index
    %c0_244 = arith.constant 0 : index
    %109 = vector.load %arg16[%c0_241, %c0_242, %c0_243, %c0_244] : memref<2x10x10x16xf32, #tpu.memory_space<vmem>>, vector<2x10x10x16xf32>
    tpu.vector_store %arg16[%c0_241, %c0_242, %c0_243, %c0_244], %108 {strides = array<i32>} : memref<2x10x10x16xf32, #tpu.memory_space<vmem>>, vector<2x10x10x16xf32>,
    %110 = vector.shape_cast %90 : vector<128x16xf32> to vector<2x8x8x16xf32>
    %c0_245 = arith.constant 0 : index
    %c1_246 = arith.constant 1 : index
    %c1_247 = arith.constant 1 : index
    %c0_248 = arith.constant 0 : index
    %111 = vector.load %arg16[%c0_245, %c1_246, %c1_247, %c0_248] : memref<2x10x10x16xf32, #tpu.memory_space<vmem>>, vector<2x8x8x16xf32>
    tpu.vector_store %arg16[%c0_245, %c1_246, %c1_247, %c0_248], %110 {strides = array<i32>} : memref<2x10x10x16xf32, #tpu.memory_space<vmem>>, vector<2x8x8x16xf32>,
    %c0_249 = arith.constant 0 : index
    %c0_250 = arith.constant 0 : index
    %c0_251 = arith.constant 0 : index
    %c0_252 = arith.constant 0 : index
    %112 = tpu.strided_load %arg16[%c0_249, %c0_250, %c0_251, %c0_252] {strides = array<i32: 1, 2, 2, 1>} : memref<2x10x10x16xf32, #tpu.memory_space<vmem>>, vector<2x4x4x16xf32>
    %c0_253 = arith.constant 0 : index
    %c0_254 = arith.constant 0 : index
    %c0_255 = arith.constant 0 : index
    %c0_256 = arith.constant 0 : index
    %113 = vector.load %arg17[%c0_253, %c0_254, %c0_255, %c0_256] : memref<2x4x4x144xf32, #tpu.memory_space<vmem>>, vector<2x4x4x16xf32>
    tpu.vector_store %arg17[%c0_253, %c0_254, %c0_255, %c0_256], %112 {strides = array<i32>} : memref<2x4x4x144xf32, #tpu.memory_space<vmem>>, vector<2x4x4x16xf32>,
    %c0_257 = arith.constant 0 : index
    %c0_258 = arith.constant 0 : index
    %c1_259 = arith.constant 1 : index
    %c0_260 = arith.constant 0 : index
    %114 = tpu.strided_load %arg16[%c0_257, %c0_258, %c1_259, %c0_260] {strides = array<i32: 1, 2, 2, 1>} : memref<2x10x10x16xf32, #tpu.memory_space<vmem>>, vector<2x4x4x16xf32>
    %c0_261 = arith.constant 0 : index
    %c0_262 = arith.constant 0 : index
    %c0_263 = arith.constant 0 : index
    %c16_264 = arith.constant 16 : index
    %115 = vector.load %arg17[%c0_261, %c0_262, %c0_263, %c16_264] : memref<2x4x4x144xf32, #tpu.memory_space<vmem>>, vector<2x4x4x16xf32>
    tpu.vector_store %arg17[%c0_261, %c0_262, %c0_263, %c16_264], %114 {strides = array<i32>} : memref<2x4x4x144xf32, #tpu.memory_space<vmem>>, vector<2x4x4x16xf32>,
    %c0_265 = arith.constant 0 : index
    %c0_266 = arith.constant 0 : index
    %c2_267 = arith.constant 2 : index
    %c0_268 = arith.constant 0 : index
    %116 = tpu.strided_load %arg16[%c0_265, %c0_266, %c2_267, %c0_268] {strides = array<i32: 1, 2, 2, 1>} : memref<2x10x10x16xf32, #tpu.memory_space<vmem>>, vector<2x4x4x16xf32>
    %c0_269 = arith.constant 0 : index
    %c0_270 = arith.constant 0 : index
    %c0_271 = arith.constant 0 : index
    %c32_272 = arith.constant 32 : index
    %117 = vector.load %arg17[%c0_269, %c0_270, %c0_271, %c32_272] : memref<2x4x4x144xf32, #tpu.memory_space<vmem>>, vector<2x4x4x16xf32>
    tpu.vector_store %arg17[%c0_269, %c0_270, %c0_271, %c32_272], %116 {strides = array<i32>} : memref<2x4x4x144xf32, #tpu.memory_space<vmem>>, vector<2x4x4x16xf32>,
    %c0_273 = arith.constant 0 : index
    %c1_274 = arith.constant 1 : index
    %c0_275 = arith.constant 0 : index
    %c0_276 = arith.constant 0 : index
    %118 = tpu.strided_load %arg16[%c0_273, %c1_274, %c0_275, %c0_276] {strides = array<i32: 1, 2, 2, 1>} : memref<2x10x10x16xf32, #tpu.memory_space<vmem>>, vector<2x4x4x16xf32>
    %c0_277 = arith.constant 0 : index
    %c0_278 = arith.constant 0 : index
    %c0_279 = arith.constant 0 : index
    %c48_280 = arith.constant 48 : index
    %119 = vector.load %arg17[%c0_277, %c0_278, %c0_279, %c48_280] : memref<2x4x4x144xf32, #tpu.memory_space<vmem>>, vector<2x4x4x16xf32>
    tpu.vector_store %arg17[%c0_277, %c0_278, %c0_279, %c48_280], %118 {strides = array<i32>} : memref<2x4x4x144xf32, #tpu.memory_space<vmem>>, vector<2x4x4x16xf32>,
    %c0_281 = arith.constant 0 : index
    %c1_282 = arith.constant 1 : index
    %c1_283 = arith.constant 1 : index
    %c0_284 = arith.constant 0 : index
    %120 = tpu.strided_load %arg16[%c0_281, %c1_282, %c1_283, %c0_284] {strides = array<i32: 1, 2, 2, 1>} : memref<2x10x10x16xf32, #tpu.memory_space<vmem>>, vector<2x4x4x16xf32>
    %c0_285 = arith.constant 0 : index
    %c0_286 = arith.constant 0 : index
    %c0_287 = arith.constant 0 : index
    %c64_288 = arith.constant 64 : index
    %121 = vector.load %arg17[%c0_285, %c0_286, %c0_287, %c64_288] : memref<2x4x4x144xf32, #tpu.memory_space<vmem>>, vector<2x4x4x16xf32>
    tpu.vector_store %arg17[%c0_285, %c0_286, %c0_287, %c64_288], %120 {strides = array<i32>} : memref<2x4x4x144xf32, #tpu.memory_space<vmem>>, vector<2x4x4x16xf32>,
    %c0_289 = arith.constant 0 : index
    %c1_290 = arith.constant 1 : index
    %c2_291 = arith.constant 2 : index
    %c0_292 = arith.constant 0 : index
    %122 = tpu.strided_load %arg16[%c0_289, %c1_290, %c2_291, %c0_292] {strides = array<i32: 1, 2, 2, 1>} : memref<2x10x10x16xf32, #tpu.memory_space<vmem>>, vector<2x4x4x16xf32>
    %c0_293 = arith.constant 0 : index
    %c0_294 = arith.constant 0 : index
    %c0_295 = arith.constant 0 : index
    %c80_296 = arith.constant 80 : index
    %123 = vector.load %arg17[%c0_293, %c0_294, %c0_295, %c80_296] : memref<2x4x4x144xf32, #tpu.memory_space<vmem>>, vector<2x4x4x16xf32>
    tpu.vector_store %arg17[%c0_293, %c0_294, %c0_295, %c80_296], %122 {strides = array<i32>} : memref<2x4x4x144xf32, #tpu.memory_space<vmem>>, vector<2x4x4x16xf32>,
    %c0_297 = arith.constant 0 : index
    %c2_298 = arith.constant 2 : index
    %c0_299 = arith.constant 0 : index
    %c0_300 = arith.constant 0 : index
    %124 = tpu.strided_load %arg16[%c0_297, %c2_298, %c0_299, %c0_300] {strides = array<i32: 1, 2, 2, 1>} : memref<2x10x10x16xf32, #tpu.memory_space<vmem>>, vector<2x4x4x16xf32>
    %c0_301 = arith.constant 0 : index
    %c0_302 = arith.constant 0 : index
    %c0_303 = arith.constant 0 : index
    %c96_304 = arith.constant 96 : index
    %125 = vector.load %arg17[%c0_301, %c0_302, %c0_303, %c96_304] : memref<2x4x4x144xf32, #tpu.memory_space<vmem>>, vector<2x4x4x16xf32>
    tpu.vector_store %arg17[%c0_301, %c0_302, %c0_303, %c96_304], %124 {strides = array<i32>} : memref<2x4x4x144xf32, #tpu.memory_space<vmem>>, vector<2x4x4x16xf32>,
    %c0_305 = arith.constant 0 : index
    %c2_306 = arith.constant 2 : index
    %c1_307 = arith.constant 1 : index
    %c0_308 = arith.constant 0 : index
    %126 = tpu.strided_load %arg16[%c0_305, %c2_306, %c1_307, %c0_308] {strides = array<i32: 1, 2, 2, 1>} : memref<2x10x10x16xf32, #tpu.memory_space<vmem>>, vector<2x4x4x16xf32>
    %c0_309 = arith.constant 0 : index
    %c0_310 = arith.constant 0 : index
    %c0_311 = arith.constant 0 : index
    %c112_312 = arith.constant 112 : index
    %127 = vector.load %arg17[%c0_309, %c0_310, %c0_311, %c112_312] : memref<2x4x4x144xf32, #tpu.memory_space<vmem>>, vector<2x4x4x16xf32>
    tpu.vector_store %arg17[%c0_309, %c0_310, %c0_311, %c112_312], %126 {strides = array<i32>} : memref<2x4x4x144xf32, #tpu.memory_space<vmem>>, vector<2x4x4x16xf32>,
    %c0_313 = arith.constant 0 : index
    %c2_314 = arith.constant 2 : index
    %c2_315 = arith.constant 2 : index
    %c0_316 = arith.constant 0 : index
    %128 = tpu.strided_load %arg16[%c0_313, %c2_314, %c2_315, %c0_316] {strides = array<i32: 1, 2, 2, 1>} : memref<2x10x10x16xf32, #tpu.memory_space<vmem>>, vector<2x4x4x16xf32>
    %c0_317 = arith.constant 0 : index
    %c0_318 = arith.constant 0 : index
    %c0_319 = arith.constant 0 : index
    %c128 = arith.constant 128 : index
    %129 = vector.load %arg17[%c0_317, %c0_318, %c0_319, %c128] : memref<2x4x4x144xf32, #tpu.memory_space<vmem>>, vector<2x4x4x16xf32>
    tpu.vector_store %arg17[%c0_317, %c0_318, %c0_319, %c128], %128 {strides = array<i32>} : memref<2x4x4x144xf32, #tpu.memory_space<vmem>>, vector<2x4x4x16xf32>,
    %c0_320 = arith.constant 0 : index
    %c0_321 = arith.constant 0 : index
    %c0_322 = arith.constant 0 : index
    %c0_323 = arith.constant 0 : index
    %130 = vector.load %arg17[%c0_320, %c0_321, %c0_322, %c0_323] : memref<2x4x4x144xf32, #tpu.memory_space<vmem>>, vector<1x1x4x144xf32>
    %131 = vector.shape_cast %130 : vector<1x1x4x144xf32> to vector<4x144xf32>
    %c0_324 = arith.constant 0 : index
    %c0_325 = arith.constant 0 : index
    %132 = vector.load %arg18[%c0_324, %c0_325] : memref<32x144xf32, #tpu.memory_space<vmem>>, vector<4x144xf32>
    tpu.vector_store %arg18[%c0_324, %c0_325], %131 {strides = array<i32>} : memref<32x144xf32, #tpu.memory_space<vmem>>, vector<4x144xf32>,
    %c0_326 = arith.constant 0 : index
    %c1_327 = arith.constant 1 : index
    %c0_328 = arith.constant 0 : index
    %c0_329 = arith.constant 0 : index
    %133 = vector.load %arg17[%c0_326, %c1_327, %c0_328, %c0_329] : memref<2x4x4x144xf32, #tpu.memory_space<vmem>>, vector<1x1x4x144xf32>
    %134 = vector.shape_cast %133 : vector<1x1x4x144xf32> to vector<4x144xf32>
    %c4_330 = arith.constant 4 : index
    %c0_331 = arith.constant 0 : index
    %135 = vector.load %arg18[%c4_330, %c0_331] : memref<32x144xf32, #tpu.memory_space<vmem>>, vector<4x144xf32>
    tpu.vector_store %arg18[%c4_330, %c0_331], %134 {strides = array<i32>} : memref<32x144xf32, #tpu.memory_space<vmem>>, vector<4x144xf32>,
    %c0_332 = arith.constant 0 : index
    %c2_333 = arith.constant 2 : index
    %c0_334 = arith.constant 0 : index
    %c0_335 = arith.constant 0 : index
    %136 = vector.load %arg17[%c0_332, %c2_333, %c0_334, %c0_335] : memref<2x4x4x144xf32, #tpu.memory_space<vmem>>, vector<1x1x4x144xf32>
    %137 = vector.shape_cast %136 : vector<1x1x4x144xf32> to vector<4x144xf32>
    %c8_336 = arith.constant 8 : index
    %c0_337 = arith.constant 0 : index
    %138 = vector.load %arg18[%c8_336, %c0_337] : memref<32x144xf32, #tpu.memory_space<vmem>>, vector<4x144xf32>
    tpu.vector_store %arg18[%c8_336, %c0_337], %137 {strides = array<i32>} : memref<32x144xf32, #tpu.memory_space<vmem>>, vector<4x144xf32>,
    %c0_338 = arith.constant 0 : index
    %c3_339 = arith.constant 3 : index
    %c0_340 = arith.constant 0 : index
    %c0_341 = arith.constant 0 : index
    %139 = vector.load %arg17[%c0_338, %c3_339, %c0_340, %c0_341] : memref<2x4x4x144xf32, #tpu.memory_space<vmem>>, vector<1x1x4x144xf32>
    %140 = vector.shape_cast %139 : vector<1x1x4x144xf32> to vector<4x144xf32>
    %c12_342 = arith.constant 12 : index
    %c0_343 = arith.constant 0 : index
    %141 = vector.load %arg18[%c12_342, %c0_343] : memref<32x144xf32, #tpu.memory_space<vmem>>, vector<4x144xf32>
    tpu.vector_store %arg18[%c12_342, %c0_343], %140 {strides = array<i32>} : memref<32x144xf32, #tpu.memory_space<vmem>>, vector<4x144xf32>,
    %c1_344 = arith.constant 1 : index
    %c0_345 = arith.constant 0 : index
    %c0_346 = arith.constant 0 : index
    %c0_347 = arith.constant 0 : index
    %142 = vector.load %arg17[%c1_344, %c0_345, %c0_346, %c0_347] : memref<2x4x4x144xf32, #tpu.memory_space<vmem>>, vector<1x1x4x144xf32>
    %143 = vector.shape_cast %142 : vector<1x1x4x144xf32> to vector<4x144xf32>
    %c16_348 = arith.constant 16 : index
    %c0_349 = arith.constant 0 : index
    %144 = vector.load %arg18[%c16_348, %c0_349] : memref<32x144xf32, #tpu.memory_space<vmem>>, vector<4x144xf32>
    tpu.vector_store %arg18[%c16_348, %c0_349], %143 {strides = array<i32>} : memref<32x144xf32, #tpu.memory_space<vmem>>, vector<4x144xf32>,
    %c1_350 = arith.constant 1 : index
    %c1_351 = arith.constant 1 : index
    %c0_352 = arith.constant 0 : index
    %c0_353 = arith.constant 0 : index
    %145 = vector.load %arg17[%c1_350, %c1_351, %c0_352, %c0_353] : memref<2x4x4x144xf32, #tpu.memory_space<vmem>>, vector<1x1x4x144xf32>
    %146 = vector.shape_cast %145 : vector<1x1x4x144xf32> to vector<4x144xf32>
    %c20_354 = arith.constant 20 : index
    %c0_355 = arith.constant 0 : index
    %147 = vector.load %arg18[%c20_354, %c0_355] : memref<32x144xf32, #tpu.memory_space<vmem>>, vector<4x144xf32>
    tpu.vector_store %arg18[%c20_354, %c0_355], %146 {strides = array<i32>} : memref<32x144xf32, #tpu.memory_space<vmem>>, vector<4x144xf32>,
    %c1_356 = arith.constant 1 : index
    %c2_357 = arith.constant 2 : index
    %c0_358 = arith.constant 0 : index
    %c0_359 = arith.constant 0 : index
    %148 = vector.load %arg17[%c1_356, %c2_357, %c0_358, %c0_359] : memref<2x4x4x144xf32, #tpu.memory_space<vmem>>, vector<1x1x4x144xf32>
    %149 = vector.shape_cast %148 : vector<1x1x4x144xf32> to vector<4x144xf32>
    %c24_360 = arith.constant 24 : index
    %c0_361 = arith.constant 0 : index
    %150 = vector.load %arg18[%c24_360, %c0_361] : memref<32x144xf32, #tpu.memory_space<vmem>>, vector<4x144xf32>
    tpu.vector_store %arg18[%c24_360, %c0_361], %149 {strides = array<i32>} : memref<32x144xf32, #tpu.memory_space<vmem>>, vector<4x144xf32>,
    %c1_362 = arith.constant 1 : index
    %c3_363 = arith.constant 3 : index
    %c0_364 = arith.constant 0 : index
    %c0_365 = arith.constant 0 : index
    %151 = vector.load %arg17[%c1_362, %c3_363, %c0_364, %c0_365] : memref<2x4x4x144xf32, #tpu.memory_space<vmem>>, vector<1x1x4x144xf32>
    %152 = vector.shape_cast %151 : vector<1x1x4x144xf32> to vector<4x144xf32>
    %c28_366 = arith.constant 28 : index
    %c0_367 = arith.constant 0 : index
    %153 = vector.load %arg18[%c28_366, %c0_367] : memref<32x144xf32, #tpu.memory_space<vmem>>, vector<4x144xf32>
    tpu.vector_store %arg18[%c28_366, %c0_367], %152 {strides = array<i32>} : memref<32x144xf32, #tpu.memory_space<vmem>>, vector<4x144xf32>,
    %c0_368 = arith.constant 0 : index
    %c0_369 = arith.constant 0 : index
    %154 = vector.load %arg18[%c0_368, %c0_369] : memref<32x144xf32, #tpu.memory_space<vmem>>, vector<32x144xf32>
    %c0_370 = arith.constant 0 : index
    %c0_371 = arith.constant 0 : index
    %155 = vector.load %arg6[%c0_370, %c0_371] : memref<144x32xf32, #tpu.memory_space<vmem>>, vector<144x32xf32>
    %cst_372 = arith.constant dense<0.000000e+00> : vector<32x32xf32>
    %156 = tpu.matmul %154, %155, %cst_372 {dimension_numbers = #tpu.dot_dimension_numbers<[1], [0], [0], [1], [0, 0, 1, 1], [], []>} : vector<32x144xf32>, vector<144x32xf32>, vector<32x32xf32> -> vector<32x32xf32>
    %c0_373 = arith.constant 0 : index
    %c0_374 = arith.constant 0 : index
    %157 = vector.load %arg7[%c0_373, %c0_374] : memref<1x32xf32, #tpu.memory_space<vmem>>, vector<1x32xf32>
    %158 = vector.broadcast %157 : vector<1x32xf32> to vector<32x32xf32>
    %159 = arith.addf %156, %158 : vector<32x32xf32>
    %cst_375 = arith.constant 0.000000e+00 : f32
    %160 = vector.broadcast %cst_375 : f32 to vector<32x32xf32>
    %161 = arith.maximumf %159, %160 : vector<32x32xf32>
    %c0_376 = arith.constant 0 : index
    %c0_377 = arith.constant 0 : index
    %162 = vector.load %arg19[%c0_376, %c0_377] : memref<32x32xf32, #tpu.memory_space<vmem>>, vector<32x32xf32>
    tpu.vector_store %arg19[%c0_376, %c0_377], %161 {strides = array<i32>} : memref<32x32xf32, #tpu.memory_space<vmem>>, vector<32x32xf32>,
    %c0_378 = arith.constant 0 : index
    %c0_379 = arith.constant 0 : index
    %163 = tpu.strided_load %arg19[%c0_378, %c0_379] {strides = array<i32: 4, 1>} : memref<32x32xf32, #tpu.memory_space<vmem>>, vector<8x32xf32>
    %c0_380 = arith.constant 0 : index
    %c0_381 = arith.constant 0 : index
    %164 = vector.load %arg10[%c0_380, %c0_381] : memref<8x128xf32, #tpu.memory_space<vmem>>, vector<8x32xf32>
    tpu.vector_store %arg10[%c0_380, %c0_381], %163 {strides = array<i32>} : memref<8x128xf32, #tpu.memory_space<vmem>>, vector<8x32xf32>,
    %c1_382 = arith.constant 1 : index
    %c0_383 = arith.constant 0 : index
    %165 = tpu.strided_load %arg19[%c1_382, %c0_383] {strides = array<i32: 4, 1>} : memref<32x32xf32, #tpu.memory_space<vmem>>, vector<8x32xf32>
    %c0_384 = arith.constant 0 : index
    %c32_385 = arith.constant 32 : index
    %166 = vector.load %arg10[%c0_384, %c32_385] : memref<8x128xf32, #tpu.memory_space<vmem>>, vector<8x32xf32>
    tpu.vector_store %arg10[%c0_384, %c32_385], %165 {strides = array<i32>} : memref<8x128xf32, #tpu.memory_space<vmem>>, vector<8x32xf32>,
    %c2_386 = arith.constant 2 : index
    %c0_387 = arith.constant 0 : index
    %167 = tpu.strided_load %arg19[%c2_386, %c0_387] {strides = array<i32: 4, 1>} : memref<32x32xf32, #tpu.memory_space<vmem>>, vector<8x32xf32>
    %c0_388 = arith.constant 0 : index
    %c64_389 = arith.constant 64 : index
    %168 = vector.load %arg10[%c0_388, %c64_389] : memref<8x128xf32, #tpu.memory_space<vmem>>, vector<8x32xf32>
    tpu.vector_store %arg10[%c0_388, %c64_389], %167 {strides = array<i32>} : memref<8x128xf32, #tpu.memory_space<vmem>>, vector<8x32xf32>,
    %c3_390 = arith.constant 3 : index
    %c0_391 = arith.constant 0 : index
    %169 = tpu.strided_load %arg19[%c3_390, %c0_391] {strides = array<i32: 4, 1>} : memref<32x32xf32, #tpu.memory_space<vmem>>, vector<8x32xf32>
    %c0_392 = arith.constant 0 : index
    %c96_393 = arith.constant 96 : index
    %170 = vector.load %arg10[%c0_392, %c96_393] : memref<8x128xf32, #tpu.memory_space<vmem>>, vector<8x32xf32>
    tpu.vector_store %arg10[%c0_392, %c96_393], %169 {strides = array<i32>} : memref<8x128xf32, #tpu.memory_space<vmem>>, vector<8x32xf32>,
    return
  }
  func.func @transform_0(%arg0: i32) -> (i32, i32, i32, i32) {
    %c0_i32 = arith.constant 0 : i32
    %c0_i32_0 = arith.constant 0 : i32
    %c0_i32_1 = arith.constant 0 : i32
    %c0_i32_2 = arith.constant 0 : i32
    %c0_i32_3 = arith.constant 0 : i32
    return %c0_i32, %c0_i32_0, %c0_i32_1, %c0_i32_2 : i32, i32, i32, i32
  }
  func.func @transform_1(%arg0: i32) -> (i32, i32) {
    %c0_i32 = arith.constant 0 : i32
    %c0_i32_0 = arith.constant 0 : i32
    %c0_i32_1 = arith.constant 0 : i32
    return %c0_i32, %c0_i32_0 : i32, i32
  }
  func.func @transform_2(%arg0: i32) -> (i32, i32) {
    %c0_i32 = arith.constant 0 : i32
    %c0_i32_0 = arith.constant 0 : i32
    %c0_i32_1 = arith.constant 0 : i32
    return %c0_i32, %c0_i32_0 : i32, i32
  }
  func.func @transform_3(%arg0: i32) -> (i32, i32) {
    %c0_i32 = arith.constant 0 : i32
    %c0_i32_0 = arith.constant 0 : i32
    %c0_i32_1 = arith.constant 0 : i32
    return %c0_i32, %c0_i32_0 : i32, i32
  }
  func.func @transform_4(%arg0: i32) -> (i32, i32) {
    %c0_i32 = arith.constant 0 : i32
    %c0_i32_0 = arith.constant 0 : i32
    %c0_i32_1 = arith.constant 0 : i32
    return %c0_i32, %c0_i32_0 : i32, i32
  }
  func.func @transform_5(%arg0: i32) -> (i32, i32) {
    %c0_i32 = arith.constant 0 : i32
    %c0_i32_0 = arith.constant 0 : i32
    %c0_i32_1 = arith.constant 0 : i32
    return %c0_i32, %c0_i32_0 : i32, i32
  }
  func.func @transform_6(%arg0: i32) -> (i32, i32) {
    %c0_i32 = arith.constant 0 : i32
    %c0_i32_0 = arith.constant 0 : i32
    %c0_i32_1 = arith.constant 0 : i32
    return %c0_i32, %c0_i32_0 : i32, i32
  }
  func.func @transform_7(%arg0: i32) -> (i32, i32) {
    %c0_i32 = arith.constant 0 : i32
    %c0_i32_0 = arith.constant 0 : i32
    %c0_i32_1 = arith.constant 0 : i32
    return %c0_i32, %c0_i32_0 : i32, i32
  }
  func.func @transform_8(%arg0: i32) -> (i32, i32) {
    %c0_i32 = arith.constant 0 : i32
    %c0_i32_0 = arith.constant 0 : i32
    %c0_i32_1 = arith.constant 0 : i32
    return %c0_i32, %c0_i32_0 : i32, i32
  }
  func.func @transform_9(%arg0: i32) -> (i32, i32) {
    %c0_i32 = arith.constant 0 : i32
    %c0_i32_0 = arith.constant 0 : i32
    %c0_i32_1 = arith.constant 0 : i32
    return %c0_i32, %c0_i32_0 : i32, i32
  }
}

</mosaic_0001>

<bundles_post_ra>
// kernel: tpu_custom_call.1
= control target key start
LH: loop header
LB: loop body
LE: loop exit
PB: predicated region body
PF: predicated region fallthrough
CT: control target
= control target key end

     0   :  { %15 = vsyncpa [#allocation12], 0  ;;  %s7617_s13 = smov 4   ;;  %s11865_s0 = inlined_call_operand.vmem [shape: f32[2,18,18,4], index: 0, kind: input, shape index: {}]   ;;  %s11866_s1 = inlined_call_operand.vmem [shape: f32[36,8], index: 1, kind: input, shape index: {}]   ;;  %s11867_s2 = inlined_call_operand.vmem [shape: f32[1,8], index: 2, kind: input, shape index: {}]   ;;  %s11868_s3 = inlined_call_operand.vmem [shape: f32[72,16], index: 3, kind: input, shape index: {}]   ;;  %s11869_s4 = inlined_call_operand.vmem [shape: f32[1,16], index: 4, kind: input, shape index: {}]   ;;  %s11870_s5 = inlined_call_operand.vmem [shape: f32[144,32], index: 5, kind: input, shape index: {}]   ;;  %s11871_s6 = inlined_call_operand.vmem [shape: f32[1,32], index: 6, kind: input, shape index: {}]   ;;  %s11872_s7 = inlined_call_operand.hbm [shape: f32[32,128], index: 7, kind: output, shape index: {0}]   ;;  %s11873_s8 = inlined_call_operand.hbm [shape: f32[16,128], index: 8, kind: output, shape index: {1}]   ;;  %s11874_s9 = inlined_call_operand.hbm [shape: f32[8,128], index: 9, kind: output, shape index: {2}]  }
   0x1   :  { %v162_v0 = vld [vmem:[%s11865_s0 + $0x19] sm:$0xff]  ;;  %v160_v1 = vld [vmem:[%s11865_s0 + $0x1] sm:$0xff]  ;;  %v164_v2 = vld [vmem:[%s11865_s0 + $0x31] sm:$0xff] }
   0x2   :  { %292 = vrot.lane.b32.xlu1 %v162_v0, %s7617_s13  ;;  %288 = vrot.lane.b32.xlu0 %v160_v1, %s7617_s13 }
   0x3   :  { %296 = vrot.lane.b32.xlu2 %v164_v2, %s7617_s13 }
   0x4   :  { %16 = vsyncpa [#allocation14], 0  ;;  %v163_v3 = vld [vmem:[%s11865_s0 + $0x21] sm:$0xff]  ;;  %v161_v4 = vld [vmem:[%s11865_s0 + $0x9] sm:$0xff]  ;;  %vm95_vm0 = vcmask 31744   ;;  %vm480_vm1 = vcmask 64544  }
   0x5   :  { %v165_v5 = vld [vmem:[%s11865_s0 + $0x39] sm:$0xff]  ;;  %v167_v6 = vld [vmem:[%s11865_s0 + $0x51] sm:$0xff]  ;;  %v166_v7 = vld [vmem:[%s11865_s0 + $0x49] sm:$0xff]  ;;  %s7618_s24 = smov 8   ;;  %vm865_vm2 = vcmask 97344   ;;  %s7619_s14 = smov 12  }
   0x6   :  { %v168_v8 = vld [vmem:[%s11865_s0 + $0x61] sm:$0xff]  ;;  %v170_v9 = vld [vmem:[%s11865_s0 + $0x79] sm:$0xff]  ;;  %v169_v10 = vld [vmem:[%s11865_s0 + $0x69] sm:$0xff]  ;;  %vm1251_vm3 = vcmask 130144   ;;  %s7620_s28 = smov 16   ;;  %vm1636_vm4 = vcmask 162944  }
   0x7   :  { %v171_v11 = vld [vmem:[%s11865_s0 + $0x81] sm:$0xff]  ;;  %v173_v12 = vld [vmem:[%s11865_s0 + $0x99] sm:$0xff]  ;;  %v172_v13 = vld [vmem:[%s11865_s0 + $0x91] sm:$0xff]  ;;  %s7621_s20 = smov 20   ;;  %vm2021_vm5 = vcmask 195744   ;;  %s7622_s23 = smov 24  }
   0x8   :  { %v174_v14 = vld [vmem:[%s11865_s0 + $0xa9] sm:$0xff]  ;;  %v176_v15 = vld [vmem:[%s11865_s0 + $0xc1] sm:$0xff]  ;;  %v175_v16 = vld [vmem:[%s11865_s0 + $0xb1] sm:$0xff]  ;;  %vm2407_vm6 = vcmask 228544   ;;  %vm2792_vm7 = vcmask 261344   ;;  %s7624_s16 = smov 32  }
   0x9   :  { %v177_v17 = vld [vmem:[%s11865_s0 + $0xc9] sm:$0xff]  ;;  %v179_v18 = vld [vmem:[%s11865_s0 + $0xe1] sm:$0xff]  ;;  %v178_v19 = vld [vmem:[%s11865_s0 + $0xd9] sm:$0xff]  ;;  %vm3508_vm8 = vcmask 1043456   ;;  %vm3177_vm9 = vcmask 294144   ;;  %vm3315_vm10 = vcmask 293888  }
   0xa   :  { %294 = vrot.lane.b32.xlu1 %v163_v3, %s7617_s13  ;;  %290 = vrot.lane.b32.xlu0 %v161_v4, %s7617_s13  ;;  %v180_v20 = vld [vmem:[%s11865_s0 + $0xf1] sm:$0xff]  ;;  %v182_v21 = vld [vmem:[%s11865_s0 + $0x109] sm:$0xff]  ;;  %vm3785_vm11 = vcmask 64512   ;;  %vm4682_vm12 = vcmask 58368   ;;  %vm3933_vm13 = vcmask 130112   ;;  %vm3986_vm14 = vcmask 195712  }
   0xb   :  { %298 = vrot.lane.b32.xlu2 %v165_v5, %s7617_s13  ;;  %v181_v22 = vld [vmem:[%s11865_s0 + $0xf9] sm:$0xff]  ;;  %v183_v23 = vld [vmem:[%s11865_s0 + $0x111] sm:$0xff]  ;;  %v185_v24 = vld [vmem:[%s11865_s0 + $0x129] sm:$0xff]  ;;  %s7627_s15 = smov 48   ;;  %s7628_s17 = smov 56   ;;  %vm4039_vm15 = vcmask 261312  }
   0xc   :  { %v184_v25 = vld [vmem:[%s11865_s0 + $0x121] sm:$0xff]  ;;  %v186_v26 = vld [vmem:[%s11865_s0 + $0x139] sm:$0xff]  ;;  %v188_v27 = vld [vmem:[%s11865_s0 + $0x151] sm:$0xff]  ;;  %s7629_s18 = smov 64   ;;  %s7630_s19 = smov 72  }
   0xd   :  { %v187_v28 = vld [vmem:[%s11865_s0 + $0x141] sm:$0xff]  ;;  %v189_v29 = vld [vmem:[%s11865_s0 + $0x159] sm:$0xff]  ;;  %v191_v30 = vld [vmem:[%s11865_s0 + $0x171] sm:$0xff]  ;;  %s7631_s21 = smov 80   ;;  %s7632_s22 = smov 88  }
   0xe   :  { %v190_v31 = vld [vmem:[%s11865_s0 + $0x169] sm:$0xff]  ;;  %v192_v32 = vld [vmem:[%s11865_s0 + $0x1b1] sm:$0xff]  ;;  %v31_v34 = vld [vmem:[%s11865_s0] sm:$0xff]  ;;  %s7633_s25 = smov 96   ;;  %s7635_s26 = smov 112  }
   0xf   :  { %v7825_v33 = vld [vmem:[%s11865_s0 + $0x18] sm:$0xff]  ;;  %96 = vst.msk [vmem:[#allocation2] sm:$0xff] %vm95_vm0, %v31_v34  ;;  %v194_v35 = vld [vmem:[%s11865_s0 + $0x1c9] sm:$0xff]  ;;  %v7855_v39 = vld [vmem:[%s11865_s0 + $0x20] sm:$0xff]  ;;  %s7636_s27 = smov 120   ;;  %s6856_s12 = sshll.u32 %s11873_s8, 4  ;;  %s6857_s12 = int_to_ptr.hbm [resolvable:$true] %s6856_s12 }
  0x10   :  { %98 = vst.msk [vmem:[#allocation2 + $0x10] sm:$0xff] %vm95_vm0, %v7825_v33  ;;  %v193_v36 = vld [vmem:[%s11865_s0 + $0x1b9] sm:$0xff]  ;;  %v195_v37 = vld [vmem:[%s11865_s0 + $0x1d1] sm:$0xff]  ;;  %v32_v40 = vld [vmem:[%s11865_s0 + $0x8] sm:$0xff]  ;;  %s7640_s8 = smov [#allocation15]  }
  0x11   :  { %v7848_v38 = vld [vmem:[%s11865_s0 + $0x30] sm:$0xff]  ;;  %99 = vst.msk [vmem:[#allocation2 + $0x18] sm:$0xff] %vm95_vm0, %v7855_v39  ;;  %v196_v42 = vld [vmem:[%s11865_s0 + $0x1e1] sm:$0xff]  ;;  %v198_v44 = vld [vmem:[%s11865_s0 + $0x1f9] sm:$0xff] }
  0x12   :  { %302 = vrot.lane.b32.xlu1 %v167_v6, %s7617_s13  ;;  %300 = vrot.lane.b32.xlu0 %v166_v7, %s7617_s13  ;;  %100 = vst.msk [vmem:[#allocation2 + $0x20] sm:$0xff] %vm95_vm0, %v7848_v38  ;;  %v197_v41 = vld [vmem:[%s11865_s0 + $0x1e9] sm:$0xff]  ;;  %v7879_v45 = vld [vmem:[%s11865_s0 + $0x38] sm:$0xff] }
  0x13   :  { %304 = vrot.lane.b32.xlu2 %v168_v8, %s7617_s13  ;;  %97 = vst.msk [vmem:[#allocation2 + $0x8] sm:$0xff] %vm95_vm0, %v32_v40  ;;  %v7886_v46 = vld [vmem:[%s11865_s0 + $0x50] sm:$0xff]  ;;  %v7894_v47 = vld [vmem:[%s11865_s0 + $0x48] sm:$0xff]  ;;  %v201_v51 = vld [vmem:[%s11865_s0 + $0x219] sm:$0xff] }
  0x14   :  { %101 = vst.msk [vmem:[#allocation2 + $0x28] sm:$0xff] %vm95_vm0, %v7879_v45  ;;  %v200_v48 = vld [vmem:[%s11865_s0 + $0x211] sm:$0xff]  ;;  %v199_v49 = vld [vmem:[%s11865_s0 + $0x201] sm:$0xff]  ;;  %v202_v56 = vld [vmem:[%s11865_s0 + $0x229] sm:$0xff] }
  0x15   :  { %103 = vst.msk [vmem:[#allocation2 + $0x38] sm:$0xff] %vm95_vm0, %v7886_v46  ;;  %v7913_v52 = vld [vmem:[%s11865_s0 + $0x60] sm:$0xff]  ;;  %v7920_v53 = vld [vmem:[%s11865_s0 + $0x78] sm:$0xff]  ;;  %v7928_v54 = vld [vmem:[%s11865_s0 + $0x68] sm:$0xff] }
  0x16   :  { %102 = vst.msk [vmem:[#allocation2 + $0x30] sm:$0xff] %vm95_vm0, %v7894_v47  ;;  %v203_v55 = vld [vmem:[%s11865_s0 + $0x231] sm:$0xff]  ;;  %v204_v58 = vld [vmem:[%s11865_s0 + $0x241] sm:$0xff]  ;;  %v206_v0 = vld [vmem:[%s11865_s0 + $0x259] sm:$0xff] }
  0x17   :  { %104 = vst.msk [vmem:[#allocation2 + $0x40] sm:$0xff] %vm95_vm0, %v7913_v52  ;;  %v7947_v59 = vld [vmem:[%s11865_s0 + $0x80] sm:$0xff]  ;;  %v7954_v60 = vld [vmem:[%s11865_s0 + $0x98] sm:$0xff]  ;;  %v7963_v63 = vld [vmem:[%s11865_s0 + $0x90] sm:$0xff] }
  0x18   :  { %106 = vst.msk [vmem:[#allocation2 + $0x50] sm:$0xff] %vm95_vm0, %v7920_v53  ;;  %v205_v1 = vld [vmem:[%s11865_s0 + $0x249] sm:$0xff]  ;;  %v207_v3 = vld [vmem:[%s11865_s0 + $0x261] sm:$0xff]  ;;  %v217_v40 = vld [vmem:[%s11865_s0 + $0x2d9] sm:$0xff] }
  0x19   :  { %105 = vst.msk [vmem:[#allocation2 + $0x48] sm:$0xff] %vm95_vm0, %v7928_v54  ;;  %v7983_v4 = vld [vmem:[%s11865_s0 + $0xa8] sm:$0xff]  ;;  %v7990_v5 = vld [vmem:[%s11865_s0 + $0xc0] sm:$0xff]  ;;  %v7999_v8 = vld [vmem:[%s11865_s0 + $0xb0] sm:$0xff] }
  0x1a   :  { %308 = vrot.lane.b32.xlu1 %v170_v9, %s7617_s13  ;;  %306 = vrot.lane.b32.xlu0 %v169_v10, %s7617_s13  ;;  %107 = vst.msk [vmem:[#allocation2 + $0x58] sm:$0xff] %vm95_vm0, %v7947_v59  ;;  %v209_v9 = vld [vmem:[%s11865_s0 + $0x279] sm:$0xff]  ;;  %v208_v10 = vld [vmem:[%s11865_s0 + $0x271] sm:$0xff] }
  0x1b   :  { %310 = vrot.lane.b32.xlu2 %v171_v11, %s7617_s13  ;;  %109 = vst.msk [vmem:[#allocation2 + $0x68] sm:$0xff] %vm95_vm0, %v7954_v60 }
  0x1c   :  { %108 = vst.msk [vmem:[#allocation2 + $0x60] sm:$0xff] %vm95_vm0, %v7963_v63 }
  0x1d   :  { %110 = vst.msk [vmem:[#allocation2 + $0x70] sm:$0xff] %vm95_vm0, %v7983_v4 }
  0x1e   :  { %112 = vst.msk [vmem:[#allocation2 + $0x80] sm:$0xff] %vm95_vm0, %v7990_v5 }
  0x1f   :  { %111 = vst.msk [vmem:[#allocation2 + $0x78] sm:$0xff] %vm95_vm0, %v7999_v8 }
  0x22   :  { %314 = vrot.lane.b32.xlu1 %v173_v12, %s7617_s13  ;;  %312 = vrot.lane.b32.xlu0 %v172_v13, %s7617_s13  ;;  %v210_v12 = vld [vmem:[%s11865_s0 + $0x289] sm:$0xff] }
  0x23   :  { %316 = vrot.lane.b32.xlu2 %v174_v14, %s7617_s13  ;;  %v8019_v13 = vld [vmem:[%s11865_s0 + $0xc8] sm:$0xff]  ;;  %v8026_v14 = vld [vmem:[%s11865_s0 + $0xe0] sm:$0xff] }
  0x24   :  { %113 = vst.msk [vmem:[#allocation2 + $0x88] sm:$0xff] %vm95_vm0, %v8019_v13 }
  0x25   :  { %115 = vst.msk [vmem:[#allocation2 + $0x98] sm:$0xff] %vm95_vm0, %v8026_v14 }
  0x2a   :  { %320 = vrot.lane.b32.xlu1 %v176_v15, %s7617_s13  ;;  %318 = vrot.lane.b32.xlu0 %v175_v16, %s7617_s13 }
  0x2b   :  { %322 = vrot.lane.b32.xlu2 %v177_v17, %s7617_s13  ;;  %v8035_v17 = vld [vmem:[%s11865_s0 + $0xd8] sm:$0xff] }
  0x2c   :  { %114 = vst.msk [vmem:[#allocation2 + $0x90] sm:$0xff] %vm95_vm0, %v8035_v17 }
  0x32   :  { %326 = vrot.lane.b32.xlu1 %v179_v18, %s7617_s13  ;;  %324 = vrot.lane.b32.xlu0 %v178_v19, %s7617_s13  ;;  %v212_v18 = vld [vmem:[%s11865_s0 + $0x2a1] sm:$0xff]  ;;  %v211_v19 = vld [vmem:[%s11865_s0 + $0x291] sm:$0xff] }
  0x33   :  { %328 = vrot.lane.b32.xlu2 %v180_v20, %s7617_s13 }
  0x3a   :  { %332 = vrot.lane.b32.xlu1 %v182_v21, %s7617_s13  ;;  %330 = vrot.lane.b32.xlu0 %v181_v22, %s7617_s13  ;;  %v213_v21 = vld [vmem:[%s11865_s0 + $0x2a9] sm:$0xff] }
  0x3b   :  { %334 = vrot.lane.b32.xlu2 %v183_v23, %s7617_s13  ;;  %v8055_v22 = vld [vmem:[%s11865_s0 + $0xf0] sm:$0xff]  ;;  %v8062_v23 = vld [vmem:[%s11865_s0 + $0x108] sm:$0xff] }
  0x3c   :  { %116 = vst.msk [vmem:[#allocation2 + $0xa0] sm:$0xff] %vm95_vm0, %v8055_v22 }
  0x3d   :  { %118 = vst.msk [vmem:[#allocation2 + $0xb0] sm:$0xff] %vm95_vm0, %v8062_v23 }
  0x42   :  { %338 = vrot.lane.b32.xlu1 %v185_v24, %s7617_s13  ;;  %336 = vrot.lane.b32.xlu0 %v184_v25, %s7617_s13 }
  0x43   :  { %340 = vrot.lane.b32.xlu2 %v186_v26, %s7617_s13  ;;  %v8071_v26 = vld [vmem:[%s11865_s0 + $0xf8] sm:$0xff] }
  0x44   :  { %117 = vst.msk [vmem:[#allocation2 + $0xa8] sm:$0xff] %vm95_vm0, %v8071_v26 }
  0x4a   :  { %344 = vrot.lane.b32.xlu1 %v188_v27, %s7617_s13  ;;  %342 = vrot.lane.b32.xlu0 %v187_v28, %s7617_s13  ;;  %v215_v27 = vld [vmem:[%s11865_s0 + $0x2c1] sm:$0xff]  ;;  %v214_v28 = vld [vmem:[%s11865_s0 + $0x2b9] sm:$0xff] }
  0x4b   :  { %346 = vrot.lane.b32.xlu2 %v189_v29, %s7617_s13 }
  0x52   :  { %350 = vrot.lane.b32.xlu1 %v191_v30, %s7617_s13  ;;  %348 = vrot.lane.b32.xlu0 %v190_v31, %s7617_s13  ;;  %v216_v30 = vld [vmem:[%s11865_s0 + $0x2d1] sm:$0xff] }
  0x53   :  { %352 = vrot.lane.b32.xlu2 %v192_v32, %s7617_s13  ;;  %v8091_v31 = vld [vmem:[%s11865_s0 + $0x110] sm:$0xff]  ;;  %v8098_v32 = vld [vmem:[%s11865_s0 + $0x128] sm:$0xff] }
  0x54   :  { %119 = vst.msk [vmem:[#allocation2 + $0xb8] sm:$0xff] %vm95_vm0, %v8091_v31 }
  0x55   :  { %121 = vst.msk [vmem:[#allocation2 + $0xc8] sm:$0xff] %vm95_vm0, %v8098_v32 }
  0x5a   :  { %356 = vrot.lane.b32.xlu1 %v194_v35, %s7617_s13  ;;  %354 = vrot.lane.b32.xlu0 %v193_v36, %s7617_s13  ;;  %v8107_v36 = vld [vmem:[%s11865_s0 + $0x120] sm:$0xff] }
  0x5b   :  { %358 = vrot.lane.b32.xlu2 %v195_v37, %s7617_s13  ;;  %v218_v37 = vld [vmem:[%s11865_s0 + $0x2e9] sm:$0xff]  ;;  %120 = vst.msk [vmem:[#allocation2 + $0xc0] sm:$0xff] %vm95_vm0, %v8107_v36 }
  0x5d   :  { %v297_v43 = vpop.permute.xlu2 %296 }
  0x5e   :  { %485 = vst.msk [vmem:[#allocation2 + $0x20] sm:$0xff] %vm480_vm1, %v297_v43  ;;  %v8127_v43 = vld [vmem:[%s11865_s0 + $0x138] sm:$0xff] }
  0x5f   :  { %122 = vst.msk [vmem:[#allocation2 + $0xd0] sm:$0xff] %vm95_vm0, %v8127_v43 }
  0x62   :  { %362 = vrot.lane.b32.xlu1 %v197_v41, %s7617_s13  ;;  %360 = vrot.lane.b32.xlu0 %v196_v42, %s7617_s13  ;;  %v219_v42 = vld [vmem:[%s11865_s0 + $0x2f1] sm:$0xff] }
  0x63   :  { %364 = vrot.lane.b32.xlu2 %v198_v44, %s7617_s13  ;;  %v8134_v44 = vld [vmem:[%s11865_s0 + $0x150] sm:$0xff] }
  0x64   :  { %124 = vst.msk [vmem:[#allocation2 + $0xe0] sm:$0xff] %vm95_vm0, %v8134_v44 }
  0x65   :  { %v299_v50 = vpop.permute.xlu2 %298 }
  0x66   :  { %486 = vst.msk [vmem:[#allocation2 + $0x28] sm:$0xff] %vm480_vm1, %v299_v50  ;;  %v8143_v50 = vld [vmem:[%s11865_s0 + $0x140] sm:$0xff] }
  0x67   :  { %123 = vst.msk [vmem:[#allocation2 + $0xd8] sm:$0xff] %vm95_vm0, %v8143_v50 }
  0x6a   :  { %368 = vrot.lane.b32.xlu1 %v200_v48, %s7617_s13  ;;  %366 = vrot.lane.b32.xlu0 %v199_v49, %s7617_s13 }
  0x6b   :  { %370 = vrot.lane.b32.xlu2 %v201_v51, %s7617_s13  ;;  %v221_v51 = vld [vmem:[%s11865_s0 + $0x309] sm:$0xff] }
  0x6d   :  { %v305_v57 = vpop.permute.xlu2 %304 }
  0x6e   :  { %489 = vst.msk [vmem:[#allocation2 + $0x40] sm:$0xff] %vm480_vm1, %v305_v57  ;;  %v222_v57 = vld [vmem:[%s11865_s0 + $0x319] sm:$0xff] }
  0x72   :  { %374 = vrot.lane.b32.xlu1 %v203_v55, %s7617_s13  ;;  %372 = vrot.lane.b32.xlu0 %v202_v56, %s7617_s13  ;;  %v220_v55 = vld [vmem:[%s11865_s0 + $0x301] sm:$0xff] }
  0x73   :  { %376 = vrot.lane.b32.xlu2 %v204_v58, %s7617_s13  ;;  %v8163_v58 = vld [vmem:[%s11865_s0 + $0x158] sm:$0xff] }
  0x74   :  { %v293_v61 = vpop.permute.xlu1 %292  ;;  %v289_v62 = vpop.permute.xlu0 %288  ;;  %125 = vst.msk [vmem:[#allocation2 + $0xe8] sm:$0xff] %vm95_vm0, %v8163_v58 }
  0x75   :  { %483 = vst.msk [vmem:[#allocation2 + $0x10] sm:$0xff] %vm480_vm1, %v293_v61  ;;  %v311_v2 = vpop.permute.xlu2 %310  ;;  %v8170_v61 = vld [vmem:[%s11865_s0 + $0x170] sm:$0xff] }
  0x76   :  { %481 = vst.msk [vmem:[#allocation2] sm:$0xff] %vm480_vm1, %v289_v62 }
  0x77   :  { %492 = vst.msk [vmem:[#allocation2 + $0x58] sm:$0xff] %vm480_vm1, %v311_v2  ;;  %v545_v2 = vld [vmem:[%s11865_s0 + $0x2] sm:$0xff] }
  0x78   :  { %127 = vst.msk [vmem:[#allocation2 + $0xf8] sm:$0xff] %vm95_vm0, %v8170_v61 }
  0x7a   :  { %380 = vrot.lane.b32.xlu1 %v206_v0, %s7617_s13  ;;  %378 = vrot.lane.b32.xlu0 %v205_v1, %s7617_s13  ;;  %v8179_v1 = vld [vmem:[%s11865_s0 + $0x168] sm:$0xff] }
  0x7b   :  { %382 = vrot.lane.b32.xlu2 %v207_v3, %s7617_s13  ;;  %v223_v3 = vld [vmem:[%s11865_s0 + $0x321] sm:$0xff]  ;;  %126 = vst.msk [vmem:[#allocation2 + $0xf0] sm:$0xff] %vm95_vm0, %v8179_v1 }
  0x7c   :  { %v295_v6 = vpop.permute.xlu1 %294  ;;  %v291_v7 = vpop.permute.xlu0 %290 }
  0x7d   :  { %484 = vst.msk [vmem:[#allocation2 + $0x18] sm:$0xff] %vm480_vm1, %v295_v6  ;;  %v317_v11 = vpop.permute.xlu2 %316 }
  0x7e   :  { %482 = vst.msk [vmem:[#allocation2 + $0x8] sm:$0xff] %vm480_vm1, %v291_v7  ;;  %v546_v7 = vld [vmem:[%s11865_s0 + $0xa] sm:$0xff] }
  0x7f   :  { %495 = vst.msk [vmem:[#allocation2 + $0x70] sm:$0xff] %vm480_vm1, %v317_v11 }
  0x82   :  { %386 = vrot.lane.b32.xlu1 %v209_v9, %s7617_s13  ;;  %384 = vrot.lane.b32.xlu0 %v208_v10, %s7617_s13  ;;  %v63_v9 = vld [vmem:[%s11865_s0 + $0x1b0] sm:$0xff]  ;;  %v8203_v10 = vld [vmem:[%s11865_s0 + $0x1c8] sm:$0xff] }
  0x83   :  { %388 = vrot.lane.b32.xlu2 %v210_v12, %s7617_s13  ;;  %128 = vst.msk [vmem:[#allocation2 + $0x100] sm:$0xff] %vm95_vm0, %v63_v9 }
  0x84   :  { %v303_v15 = vpop.permute.xlu1 %302  ;;  %v301_v16 = vpop.permute.xlu0 %300  ;;  %130 = vst.msk [vmem:[#allocation2 + $0x110] sm:$0xff] %vm95_vm0, %v8203_v10 }
  0x85   :  { %488 = vst.msk [vmem:[#allocation2 + $0x38] sm:$0xff] %vm480_vm1, %v303_v15  ;;  %v323_v20 = vpop.permute.xlu2 %322  ;;  %v64_v15 = vld [vmem:[%s11865_s0 + $0x1b8] sm:$0xff] }
  0x86   :  { %487 = vst.msk [vmem:[#allocation2 + $0x30] sm:$0xff] %vm480_vm1, %v301_v16  ;;  %v548_v16 = vld [vmem:[%s11865_s0 + $0x22] sm:$0xff] }
  0x87   :  { %498 = vst.msk [vmem:[#allocation2 + $0x88] sm:$0xff] %vm480_vm1, %v323_v20  ;;  %v549_v20 = vld [vmem:[%s11865_s0 + $0x32] sm:$0xff] }
  0x88   :  { %129 = vst.msk [vmem:[#allocation2 + $0x108] sm:$0xff] %vm95_vm0, %v64_v15  ;;  %v8344_v15 = vld [vmem:[%s11865_s0 + $0x258] sm:$0xff] }
  0x89   :  { %142 = vst.msk [vmem:[#allocation2 + $0x170] sm:$0xff] %vm95_vm0, %v8344_v15 }
  0x8a   :  { %392 = vrot.lane.b32.xlu1 %v212_v18, %s7617_s13  ;;  %390 = vrot.lane.b32.xlu0 %v211_v19, %s7617_s13  ;;  %v547_v18 = vld [vmem:[%s11865_s0 + $0x1a] sm:$0xff] }
  0x8b   :  { %394 = vrot.lane.b32.xlu2 %v213_v21, %s7617_s13  ;;  %v8229_v21 = vld [vmem:[%s11865_s0 + $0x1d0] sm:$0xff] }
  0x8c   :  { %v309_v24 = vpop.permute.xlu1 %308  ;;  %v307_v25 = vpop.permute.xlu0 %306  ;;  %131 = vst.msk [vmem:[#allocation2 + $0x118] sm:$0xff] %vm95_vm0, %v8229_v21 }
  0x8d   :  { %491 = vst.msk [vmem:[#allocation2 + $0x50] sm:$0xff] %vm480_vm1, %v309_v24  ;;  %v329_v29 = vpop.permute.xlu2 %328  ;;  %v8236_v24 = vld [vmem:[%s11865_s0 + $0x1e8] sm:$0xff] }
  0x8e   :  { %490 = vst.msk [vmem:[#allocation2 + $0x48] sm:$0xff] %vm480_vm1, %v307_v25 }
  0x8f   :  { %501 = vst.msk [vmem:[#allocation2 + $0xa0] sm:$0xff] %vm480_vm1, %v329_v29  ;;  %v551_v29 = vld [vmem:[%s11865_s0 + $0x4a] sm:$0xff] }
  0x90   :  { %133 = vst.msk [vmem:[#allocation2 + $0x128] sm:$0xff] %vm95_vm0, %v8236_v24 }
  0x92   :  { %398 = vrot.lane.b32.xlu1 %v215_v27, %s7617_s13  ;;  %396 = vrot.lane.b32.xlu0 %v214_v28, %s7617_s13  ;;  %v8245_v28 = vld [vmem:[%s11865_s0 + $0x1e0] sm:$0xff] }
  0x93   :  { %400 = vrot.lane.b32.xlu2 %v216_v30, %s7617_s13  ;;  %v550_v30 = vld [vmem:[%s11865_s0 + $0x3a] sm:$0xff]  ;;  %132 = vst.msk [vmem:[#allocation2 + $0x120] sm:$0xff] %vm95_vm0, %v8245_v28 }
  0x94   :  { %v315_v34 = vpop.permute.xlu1 %314  ;;  %v313_v35 = vpop.permute.xlu0 %312 }
  0x95   :  { %494 = vst.msk [vmem:[#allocation2 + $0x68] sm:$0xff] %vm480_vm1, %v315_v34  ;;  %v335_v41 = vpop.permute.xlu2 %334 }
  0x96   :  { %493 = vst.msk [vmem:[#allocation2 + $0x60] sm:$0xff] %vm480_vm1, %v313_v35  ;;  %v552_v35 = vld [vmem:[%s11865_s0 + $0x52] sm:$0xff] }
  0x97   :  { %504 = vst.msk [vmem:[#allocation2 + $0xb8] sm:$0xff] %vm480_vm1, %v335_v41 }
  0x9a   :  { %404 = vrot.lane.b32.xlu1 %v218_v37, %s7617_s13  ;;  %402 = vrot.lane.b32.xlu0 %v217_v40, %s7617_s13  ;;  %v8265_v37 = vld [vmem:[%s11865_s0 + $0x1f8] sm:$0xff]  ;;  %v8272_v40 = vld [vmem:[%s11865_s0 + $0x210] sm:$0xff] }
  0x9b   :  { %406 = vrot.lane.b32.xlu2 %v219_v42, %s7617_s13  ;;  %134 = vst.msk [vmem:[#allocation2 + $0x130] sm:$0xff] %vm95_vm0, %v8265_v37 }
  0x9c   :  { %v321_v48 = vpop.permute.xlu1 %320  ;;  %v319_v49 = vpop.permute.xlu0 %318  ;;  %136 = vst.msk [vmem:[#allocation2 + $0x140] sm:$0xff] %vm95_vm0, %v8272_v40 }
  0x9d   :  { %497 = vst.msk [vmem:[#allocation2 + $0x80] sm:$0xff] %vm480_vm1, %v321_v48  ;;  %v341_v56 = vpop.permute.xlu2 %340  ;;  %v8281_v48 = vld [vmem:[%s11865_s0 + $0x200] sm:$0xff] }
  0x9e   :  { %496 = vst.msk [vmem:[#allocation2 + $0x78] sm:$0xff] %vm480_vm1, %v319_v49  ;;  %v554_v49 = vld [vmem:[%s11865_s0 + $0x6a] sm:$0xff] }
  0x9f   :  { %507 = vst.msk [vmem:[#allocation2 + $0xd0] sm:$0xff] %vm480_vm1, %v341_v56  ;;  %v555_v56 = vld [vmem:[%s11865_s0 + $0x7a] sm:$0xff] }
  0xa0   :  { %135 = vst.msk [vmem:[#allocation2 + $0x138] sm:$0xff] %vm95_vm0, %v8281_v48 }
  0xa2   :  { %410 = vrot.lane.b32.xlu1 %v221_v51, %s7617_s13  ;;  %408 = vrot.lane.b32.xlu0 %v220_v55, %s7617_s13  ;;  %v553_v51 = vld [vmem:[%s11865_s0 + $0x62] sm:$0xff] }
  0xa3   :  { %412 = vrot.lane.b32.xlu2 %v222_v57, %s7617_s13  ;;  %v8301_v57 = vld [vmem:[%s11865_s0 + $0x218] sm:$0xff] }
  0xa4   :  { %v327_v62 = vpop.permute.xlu1 %326  ;;  %v325_v0 = vpop.permute.xlu0 %324  ;;  %137 = vst.msk [vmem:[#allocation2 + $0x148] sm:$0xff] %vm95_vm0, %v8301_v57 }
  0xa5   :  { %500 = vst.msk [vmem:[#allocation2 + $0x98] sm:$0xff] %vm480_vm1, %v327_v62  ;;  %v347_v6 = vpop.permute.xlu2 %346  ;;  %v8308_v62 = vld [vmem:[%s11865_s0 + $0x230] sm:$0xff] }
  0xa6   :  { %499 = vst.msk [vmem:[#allocation2 + $0x90] sm:$0xff] %vm480_vm1, %v325_v0 }
  0xa7   :  { %510 = vst.msk [vmem:[#allocation2 + $0xe8] sm:$0xff] %vm480_vm1, %v347_v6  ;;  %v557_v6 = vld [vmem:[%s11865_s0 + $0x92] sm:$0xff] }
  0xa8   :  { %139 = vst.msk [vmem:[#allocation2 + $0x158] sm:$0xff] %vm95_vm0, %v8308_v62 }
  0xaa   :  { %673 = vrot.lane.b32.xlu1 %v545_v2, %s7618_s24  ;;  %414 = vrot.lane.b32.xlu0 %v223_v3, %s7617_s13  ;;  %v8317_v3 = vld [vmem:[%s11865_s0 + $0x228] sm:$0xff] }
  0xab   :  { %675 = vrot.lane.b32.xlu2 %v546_v7, %s7618_s24  ;;  %v556_v7 = vld [vmem:[%s11865_s0 + $0x82] sm:$0xff]  ;;  %138 = vst.msk [vmem:[#allocation2 + $0x150] sm:$0xff] %vm95_vm0, %v8317_v3 }
  0xac   :  { %v333_v11 = vpop.permute.xlu1 %332  ;;  %v331_v12 = vpop.permute.xlu0 %330 }
  0xad   :  { %503 = vst.msk [vmem:[#allocation2 + $0xb0] sm:$0xff] %vm480_vm1, %v333_v11  ;;  %v353_v19 = vpop.permute.xlu2 %352  ;;  %v558_v11 = vld [vmem:[%s11865_s0 + $0x9a] sm:$0xff] }
  0xae   :  { %502 = vst.msk [vmem:[#allocation2 + $0xa8] sm:$0xff] %vm480_vm1, %v331_v12  ;;  %v8337_v12 = vld [vmem:[%s11865_s0 + $0x240] sm:$0xff] }
  0xaf   :  { %513 = vst.msk [vmem:[#allocation2 + $0x100] sm:$0xff] %vm480_vm1, %v353_v19  ;;  %v8353_v19 = vld [vmem:[%s11865_s0 + $0x248] sm:$0xff] }
  0xb0   :  { %140 = vst.msk [vmem:[#allocation2 + $0x160] sm:$0xff] %vm95_vm0, %v8337_v12 }
  0xb1   :  { %141 = vst.msk [vmem:[#allocation2 + $0x168] sm:$0xff] %vm95_vm0, %v8353_v19 }
  0xb2   :  { %679 = vrot.lane.b32.xlu1 %v548_v16, %s7618_s24  ;;  %677 = vrot.lane.b32.xlu0 %v547_v18, %s7618_s24 }
  0xb3   :  { %681 = vrot.lane.b32.xlu2 %v549_v20, %s7618_s24  ;;  %v560_v20 = vld [vmem:[%s11865_s0 + $0xb2] sm:$0xff] }
  0xb4   :  { %v339_v25 = vpop.permute.xlu1 %338  ;;  %v337_v27 = vpop.permute.xlu0 %336 }
  0xb5   :  { %506 = vst.msk [vmem:[#allocation2 + $0xc8] sm:$0xff] %vm480_vm1, %v339_v25  ;;  %v359_v34 = vpop.permute.xlu2 %358  ;;  %v559_v25 = vld [vmem:[%s11865_s0 + $0xaa] sm:$0xff] }
  0xb6   :  { %505 = vst.msk [vmem:[#allocation2 + $0xc0] sm:$0xff] %vm480_vm1, %v337_v27 }
  0xb7   :  { %516 = vst.msk [vmem:[#allocation2 + $0x118] sm:$0xff] %vm480_vm1, %v359_v34  ;;  %v8380_v34 = vld [vmem:[%s11865_s0 + $0x278] sm:$0xff] }
  0xb8   :  { %145 = vst.msk [vmem:[#allocation2 + $0x188] sm:$0xff] %vm95_vm0, %v8380_v34 }
  0xba   :  { %685 = vrot.lane.b32.xlu1 %v551_v29, %s7618_s24  ;;  %683 = vrot.lane.b32.xlu0 %v550_v30, %s7618_s24  ;;  %v561_v29 = vld [vmem:[%s11865_s0 + $0xc2] sm:$0xff] }
  0xbb   :  { %687 = vrot.lane.b32.xlu2 %v552_v35, %s7618_s24  ;;  %v8373_v30 = vld [vmem:[%s11865_s0 + $0x260] sm:$0xff] }
  0xbc   :  { %v345_v41 = vpop.permute.xlu1 %344  ;;  %v343_v42 = vpop.permute.xlu0 %342  ;;  %143 = vst.msk [vmem:[#allocation2 + $0x178] sm:$0xff] %vm95_vm0, %v8373_v30 }
  0xbd   :  { %509 = vst.msk [vmem:[#allocation2 + $0xe0] sm:$0xff] %vm480_vm1, %v345_v41  ;;  %v365_v55 = vpop.permute.xlu2 %364 }
  0xbe   :  { %508 = vst.msk [vmem:[#allocation2 + $0xd8] sm:$0xff] %vm480_vm1, %v343_v42  ;;  %v8389_v42 = vld [vmem:[%s11865_s0 + $0x270] sm:$0xff] }
  0xbf   :  { %519 = vst.msk [vmem:[#allocation2 + $0x130] sm:$0xff] %vm480_vm1, %v365_v55 }
  0xc0   :  { %144 = vst.msk [vmem:[#allocation2 + $0x180] sm:$0xff] %vm95_vm0, %v8389_v42 }
  0xc2   :  { %691 = vrot.lane.b32.xlu1 %v554_v49, %s7618_s24  ;;  %689 = vrot.lane.b32.xlu0 %v553_v51, %s7618_s24  ;;  %v563_v49 = vld [vmem:[%s11865_s0 + $0xda] sm:$0xff]  ;;  %v562_v51 = vld [vmem:[%s11865_s0 + $0xca] sm:$0xff] }
  0xc3   :  { %693 = vrot.lane.b32.xlu2 %v555_v56, %s7618_s24  ;;  %v564_v56 = vld [vmem:[%s11865_s0 + $0xe2] sm:$0xff] }
  0xc4   :  { %v351_v0 = vpop.permute.xlu1 %350  ;;  %v349_v2 = vpop.permute.xlu0 %348 }
  0xc5   :  { %512 = vst.msk [vmem:[#allocation2 + $0xf8] sm:$0xff] %vm480_vm1, %v351_v0  ;;  %v371_v9 = vpop.permute.xlu2 %370  ;;  %v8409_v0 = vld [vmem:[%s11865_s0 + $0x288] sm:$0xff] }
  0xc6   :  { %511 = vst.msk [vmem:[#allocation2 + $0xf0] sm:$0xff] %vm480_vm1, %v349_v2  ;;  %v8416_v2 = vld [vmem:[%s11865_s0 + $0x2a0] sm:$0xff] }
  0xc7   :  { %522 = vst.msk [vmem:[#allocation2 + $0x148] sm:$0xff] %vm480_vm1, %v371_v9  ;;  %v8425_v9 = vld [vmem:[%s11865_s0 + $0x290] sm:$0xff] }
  0xc8   :  { %146 = vst.msk [vmem:[#allocation2 + $0x190] sm:$0xff] %vm95_vm0, %v8409_v0 }
  0xc9   :  { %148 = vst.msk [vmem:[#allocation2 + $0x1a0] sm:$0xff] %vm95_vm0, %v8416_v2 }
  0xca   :  { %697 = vrot.lane.b32.xlu1 %v557_v6, %s7618_s24  ;;  %695 = vrot.lane.b32.xlu0 %v556_v7, %s7618_s24  ;;  %147 = vst.msk [vmem:[#allocation2 + $0x198] sm:$0xff] %vm95_vm0, %v8425_v9 }
  0xcb   :  { %699 = vrot.lane.b32.xlu2 %v558_v11, %s7618_s24  ;;  %v566_v11 = vld [vmem:[%s11865_s0 + $0xfa] sm:$0xff] }
  0xcc   :  { %v357_v16 = vpop.permute.xlu1 %356  ;;  %v355_v18 = vpop.permute.xlu0 %354 }
  0xcd   :  { %515 = vst.msk [vmem:[#allocation2 + $0x110] sm:$0xff] %vm480_vm1, %v357_v16  ;;  %v377_v27 = vpop.permute.xlu2 %376  ;;  %v565_v16 = vld [vmem:[%s11865_s0 + $0xf2] sm:$0xff] }
  0xce   :  { %514 = vst.msk [vmem:[#allocation2 + $0x108] sm:$0xff] %vm480_vm1, %v355_v18 }
  0xcf   :  { %525 = vst.msk [vmem:[#allocation2 + $0x160] sm:$0xff] %vm480_vm1, %v377_v27  ;;  %v8452_v27 = vld [vmem:[%s11865_s0 + $0x2c0] sm:$0xff] }
  0xd0   :  { %151 = vst.msk [vmem:[#allocation2 + $0x1b8] sm:$0xff] %vm95_vm0, %v8452_v27 }
  0xd2   :  { %703 = vrot.lane.b32.xlu1 %v560_v20, %s7618_s24  ;;  %701 = vrot.lane.b32.xlu0 %v559_v25, %s7618_s24  ;;  %v567_v20 = vld [vmem:[%s11865_s0 + $0x10a] sm:$0xff] }
  0xd3   :  { %705 = vrot.lane.b32.xlu2 %v561_v29, %s7618_s24  ;;  %v8445_v25 = vld [vmem:[%s11865_s0 + $0x2a8] sm:$0xff] }
  0xd4   :  { %v363_v35 = vpop.permute.xlu1 %362  ;;  %v361_v41 = vpop.permute.xlu0 %360  ;;  %149 = vst.msk [vmem:[#allocation2 + $0x1a8] sm:$0xff] %vm95_vm0, %v8445_v25 }
  0xd5   :  { %518 = vst.msk [vmem:[#allocation2 + $0x128] sm:$0xff] %vm480_vm1, %v363_v35  ;;  %v383_v55 = vpop.permute.xlu2 %382 }
  0xd6   :  { %517 = vst.msk [vmem:[#allocation2 + $0x120] sm:$0xff] %vm480_vm1, %v361_v41  ;;  %v8461_v41 = vld [vmem:[%s11865_s0 + $0x2b8] sm:$0xff] }
  0xd7   :  { %528 = vst.msk [vmem:[#allocation2 + $0x178] sm:$0xff] %vm480_vm1, %v383_v55 }
  0xd8   :  { %150 = vst.msk [vmem:[#allocation2 + $0x1b0] sm:$0xff] %vm95_vm0, %v8461_v41 }
  0xda   :  { %709 = vrot.lane.b32.xlu1 %v563_v49, %s7618_s24  ;;  %707 = vrot.lane.b32.xlu0 %v562_v51, %s7618_s24  ;;  %v569_v49 = vld [vmem:[%s11865_s0 + $0x122] sm:$0xff]  ;;  %v568_v51 = vld [vmem:[%s11865_s0 + $0x112] sm:$0xff] }
  0xdb   :  { %711 = vrot.lane.b32.xlu2 %v564_v56, %s7618_s24  ;;  %v570_v56 = vld [vmem:[%s11865_s0 + $0x12a] sm:$0xff] }
  0xdc   :  { %v369_v6 = vpop.permute.xlu1 %368  ;;  %v367_v7 = vpop.permute.xlu0 %366 }
  0xdd   :  { %521 = vst.msk [vmem:[#allocation2 + $0x140] sm:$0xff] %vm480_vm1, %v369_v6  ;;  %v389_v18 = vpop.permute.xlu2 %388  ;;  %v8481_v6 = vld [vmem:[%s11865_s0 + $0x2d0] sm:$0xff] }
  0xde   :  { %520 = vst.msk [vmem:[#allocation2 + $0x138] sm:$0xff] %vm480_vm1, %v367_v7  ;;  %v8488_v7 = vld [vmem:[%s11865_s0 + $0x2e8] sm:$0xff] }
  0xdf   :  { %531 = vst.msk [vmem:[#allocation2 + $0x190] sm:$0xff] %vm480_vm1, %v389_v18  ;;  %v8497_v18 = vld [vmem:[%s11865_s0 + $0x2d8] sm:$0xff] }
  0xe0   :  { %152 = vst.msk [vmem:[#allocation2 + $0x1c0] sm:$0xff] %vm95_vm0, %v8481_v6 }
  0xe1   :  { %154 = vst.msk [vmem:[#allocation2 + $0x1d0] sm:$0xff] %vm95_vm0, %v8488_v7 }
  0xe2   :  { %715 = vrot.lane.b32.xlu1 %v566_v11, %s7618_s24  ;;  %713 = vrot.lane.b32.xlu0 %v565_v16, %s7618_s24  ;;  %153 = vst.msk [vmem:[#allocation2 + $0x1c8] sm:$0xff] %vm95_vm0, %v8497_v18 }
  0xe3   :  { %717 = vrot.lane.b32.xlu2 %v567_v20, %s7618_s24  ;;  %v572_v20 = vld [vmem:[%s11865_s0 + $0x142] sm:$0xff] }
  0xe4   :  { %v375_v29 = vpop.permute.xlu1 %374  ;;  %v373_v35 = vpop.permute.xlu0 %372 }
  0xe5   :  { %524 = vst.msk [vmem:[#allocation2 + $0x158] sm:$0xff] %vm480_vm1, %v375_v29  ;;  %v395_v55 = vpop.permute.xlu2 %394  ;;  %v571_v29 = vld [vmem:[%s11865_s0 + $0x13a] sm:$0xff] }
  0xe6   :  { %523 = vst.msk [vmem:[#allocation2 + $0x150] sm:$0xff] %vm480_vm1, %v373_v35 }
  0xe7   :  { %534 = vst.msk [vmem:[#allocation2 + $0x1a8] sm:$0xff] %vm480_vm1, %v395_v55  ;;  %v8524_v55 = vld [vmem:[%s11865_s0 + $0x308] sm:$0xff] }
  0xe8   :  { %157 = vst.msk [vmem:[#allocation2 + $0x1e8] sm:$0xff] %vm95_vm0, %v8524_v55 }
  0xea   :  { %721 = vrot.lane.b32.xlu1 %v569_v49, %s7618_s24  ;;  %719 = vrot.lane.b32.xlu0 %v568_v51, %s7618_s24  ;;  %v573_v49 = vld [vmem:[%s11865_s0 + $0x152] sm:$0xff] }
  0xeb   :  { %723 = vrot.lane.b32.xlu2 %v570_v56, %s7618_s24  ;;  %v8517_v51 = vld [vmem:[%s11865_s0 + $0x2f0] sm:$0xff] }
  0xec   :  { %v381_v11 = vpop.permute.xlu1 %380  ;;  %v379_v16 = vpop.permute.xlu0 %378  ;;  %155 = vst.msk [vmem:[#allocation2 + $0x1d8] sm:$0xff] %vm95_vm0, %v8517_v51 }
  0xed   :  { %527 = vst.msk [vmem:[#allocation2 + $0x170] sm:$0xff] %vm480_vm1, %v381_v11  ;;  %v401_v35 = vpop.permute.xlu2 %400 }
  0xee   :  { %526 = vst.msk [vmem:[#allocation2 + $0x168] sm:$0xff] %vm480_vm1, %v379_v16  ;;  %v8533_v16 = vld [vmem:[%s11865_s0 + $0x300] sm:$0xff] }
  0xef   :  { %537 = vst.msk [vmem:[#allocation2 + $0x1c0] sm:$0xff] %vm480_vm1, %v401_v35 }
  0xf0   :  { %11878 = vst [vmem:[#allocation18_spill] sm:$0xff] %v8533_v16 }
  0xf1   :  { %156 = vst.msk [vmem:[#allocation2 + $0x1e0] sm:$0xff] %vm95_vm0, %v8533_v16 }
  0xf2   :  { %727 = vrot.lane.b32.xlu1 %v572_v20, %s7618_s24  ;;  %725 = vrot.lane.b32.xlu0 %v571_v29, %s7618_s24  ;;  %v575_v20 = vld [vmem:[%s11865_s0 + $0x16a] sm:$0xff]  ;;  %v574_v29 = vld [vmem:[%s11865_s0 + $0x15a] sm:$0xff] }
  0xf3   :  { %729 = vrot.lane.b32.xlu2 %v573_v49, %s7618_s24  ;;  %v576_v49 = vld [vmem:[%s11865_s0 + $0x172] sm:$0xff] }
  0xf4   :  { %v387_v56 = vpop.permute.xlu1 %386  ;;  %v385_v11 = vpop.permute.xlu0 %384 }
  0xf5   :  { %530 = vst.msk [vmem:[#allocation2 + $0x188] sm:$0xff] %vm480_vm1, %v387_v56  ;;  %v407_v35 = vpop.permute.xlu2 %406  ;;  %v8553_v56 = vld [vmem:[%s11865_s0 + $0x318] sm:$0xff] }
  0xf6   :  { %529 = vst.msk [vmem:[#allocation2 + $0x180] sm:$0xff] %vm480_vm1, %v385_v11 }
  0xf7   :  { %540 = vst.msk [vmem:[#allocation2 + $0x1d8] sm:$0xff] %vm480_vm1, %v407_v35  ;;  %v577_v35 = vld [vmem:[%s11865_s0 + $0x1b2] sm:$0xff] }
  0xf8   :  { %11879 = vst [vmem:[#allocation19_spill] sm:$0xff] %v8553_v56 }
  0xf9   :  { %158 = vst.msk [vmem:[#allocation2 + $0x1f0] sm:$0xff] %vm95_vm0, %v8553_v56 }
  0xfa   :  { %733 = vrot.lane.b32.xlu1 %v575_v20, %s7618_s24  ;;  %731 = vrot.lane.b32.xlu0 %v574_v29, %s7618_s24  ;;  %v8562_v20 = vld [vmem:[%s11865_s0 + $0x320] sm:$0xff] }
  0xfb   :  { %735 = vrot.lane.b32.xlu2 %v576_v49, %s7618_s24  ;;  %11880 = vst [vmem:[#allocation20_spill] sm:$0xff] %v8562_v20  ;;  %v578_v29 = vld [vmem:[%s11865_s0 + $0x1ba] sm:$0xff] }
  0xfc   :  { %v393_v11 = vpop.permute.xlu1 %392  ;;  %v391_v16 = vpop.permute.xlu0 %390  ;;  %159 = vst.msk [vmem:[#allocation2 + $0x1f8] sm:$0xff] %vm95_vm0, %v8562_v20  ;;  %vm4092_vm0 = vcmask 326912  }
  0xfd   :  { %533 = vst.msk [vmem:[#allocation2 + $0x1a0] sm:$0xff] %vm480_vm1, %v393_v11  ;;  %v413_v56 = vpop.permute.xlu2 %412 }
  0xfe   :  { %532 = vst.msk [vmem:[#allocation2 + $0x198] sm:$0xff] %vm480_vm1, %v391_v16  ;;  %v579_v16 = vld [vmem:[%s11865_s0 + $0x1ca] sm:$0xff] }
  0xff   :  { %543 = vst.msk [vmem:[#allocation2 + $0x1f0] sm:$0xff] %vm480_vm1, %v413_v56  ;;  %v581_v56 = vld [vmem:[%s11865_s0 + $0x1e2] sm:$0xff] }
 0x102   :  { %739 = vrot.lane.b32.xlu1 %v578_v29, %s7618_s24  ;;  %737 = vrot.lane.b32.xlu0 %v577_v35, %s7618_s24  ;;  %v580_v29 = vld [vmem:[%s11865_s0 + $0x1d2] sm:$0xff] }
 0x103   :  { %741 = vrot.lane.b32.xlu2 %v579_v16, %s7618_s24  ;;  %v582_v16 = vld [vmem:[%s11865_s0 + $0x1ea] sm:$0xff] }
 0x104   :  { %v399_v49 = vpop.permute.xlu1 %398  ;;  %v397_v11 = vpop.permute.xlu0 %396 }
 0x105   :  { %536 = vst.msk [vmem:[#allocation2 + $0x1b8] sm:$0xff] %vm480_vm1, %v399_v49  ;;  %v676_v35 = vpop.permute.xlu2 %675 }
 0x106   :  { %535 = vst.msk [vmem:[#allocation2 + $0x1b0] sm:$0xff] %vm480_vm1, %v397_v11 }
 0x107   :  { %867 = vst.msk [vmem:[#allocation2 + $0x8] sm:$0xff] %vm865_vm2, %v676_v35  ;;  %v584_v35 = vld [vmem:[%s11865_s0 + $0x202] sm:$0xff] }
 0x10a   :  { %745 = vrot.lane.b32.xlu1 %v581_v56, %s7618_s24  ;;  %743 = vrot.lane.b32.xlu0 %v580_v29, %s7618_s24  ;;  %v583_v56 = vld [vmem:[%s11865_s0 + $0x1fa] sm:$0xff] }
 0x10b   :  { %747 = vrot.lane.b32.xlu2 %v582_v16, %s7618_s24  ;;  %v585_v16 = vld [vmem:[%s11865_s0 + $0x212] sm:$0xff] }
 0x10c   :  { %v405_v49 = vpop.permute.xlu1 %404  ;;  %v403_v11 = vpop.permute.xlu0 %402 }
 0x10d   :  { %539 = vst.msk [vmem:[#allocation2 + $0x1d0] sm:$0xff] %vm480_vm1, %v405_v49  ;;  %v682_v29 = vpop.permute.xlu2 %681 }
 0x10e   :  { %538 = vst.msk [vmem:[#allocation2 + $0x1c8] sm:$0xff] %vm480_vm1, %v403_v11 }
 0x10f   :  { %870 = vst.msk [vmem:[#allocation2 + $0x20] sm:$0xff] %vm865_vm2, %v682_v29  ;;  %v587_v29 = vld [vmem:[%s11865_s0 + $0x22a] sm:$0xff] }
 0x112   :  { %751 = vrot.lane.b32.xlu1 %v584_v35, %s7618_s24  ;;  %749 = vrot.lane.b32.xlu0 %v583_v56, %s7618_s24  ;;  %v586_v35 = vld [vmem:[%s11865_s0 + $0x21a] sm:$0xff] }
 0x113   :  { %753 = vrot.lane.b32.xlu2 %v585_v16, %s7618_s24  ;;  %v588_v16 = vld [vmem:[%s11865_s0 + $0x232] sm:$0xff] }
 0x114   :  { %v411_v49 = vpop.permute.xlu1 %410  ;;  %v409_v11 = vpop.permute.xlu0 %408 }
 0x115   :  { %542 = vst.msk [vmem:[#allocation2 + $0x1e8] sm:$0xff] %vm480_vm1, %v411_v49  ;;  %v688_v56 = vpop.permute.xlu2 %687 }
 0x116   :  { %541 = vst.msk [vmem:[#allocation2 + $0x1e0] sm:$0xff] %vm480_vm1, %v409_v11 }
 0x117   :  { %873 = vst.msk [vmem:[#allocation2 + $0x38] sm:$0xff] %vm865_vm2, %v688_v56  ;;  %v590_v56 = vld [vmem:[%s11865_s0 + $0x24a] sm:$0xff] }
 0x11a   :  { %757 = vrot.lane.b32.xlu1 %v587_v29, %s7618_s24  ;;  %755 = vrot.lane.b32.xlu0 %v586_v35, %s7618_s24  ;;  %v589_v29 = vld [vmem:[%s11865_s0 + $0x242] sm:$0xff] }
 0x11b   :  { %759 = vrot.lane.b32.xlu2 %v588_v16, %s7618_s24  ;;  %v591_v16 = vld [vmem:[%s11865_s0 + $0x25a] sm:$0xff] }
 0x11c   :  { %v674_v49 = vpop.permute.xlu1 %673  ;;  %v415_v11 = vpop.permute.xlu0 %414 }
 0x11d   :  { %866 = vst.msk [vmem:[#allocation2] sm:$0xff] %vm865_vm2, %v674_v49  ;;  %v694_v35 = vpop.permute.xlu2 %693 }
 0x11e   :  { %544 = vst.msk [vmem:[#allocation2 + $0x1f8] sm:$0xff] %vm480_vm1, %v415_v11  ;;  %vm4145_vm1 = vcmask 392512  }
 0x11f   :  { %876 = vst.msk [vmem:[#allocation2 + $0x50] sm:$0xff] %vm865_vm2, %v694_v35  ;;  %v593_v35 = vld [vmem:[%s11865_s0 + $0x272] sm:$0xff] }
 0x122   :  { %763 = vrot.lane.b32.xlu1 %v590_v56, %s7618_s24  ;;  %761 = vrot.lane.b32.xlu0 %v589_v29, %s7618_s24  ;;  %v592_v56 = vld [vmem:[%s11865_s0 + $0x262] sm:$0xff] }
 0x123   :  { %765 = vrot.lane.b32.xlu2 %v591_v16, %s7618_s24  ;;  %v594_v16 = vld [vmem:[%s11865_s0 + $0x27a] sm:$0xff] }
 0x124   :  { %v680_v49 = vpop.permute.xlu1 %679  ;;  %v678_v11 = vpop.permute.xlu0 %677 }
 0x125   :  { %869 = vst.msk [vmem:[#allocation2 + $0x18] sm:$0xff] %vm865_vm2, %v680_v49  ;;  %v700_v29 = vpop.permute.xlu2 %699 }
 0x126   :  { %868 = vst.msk [vmem:[#allocation2 + $0x10] sm:$0xff] %vm865_vm2, %v678_v11 }
 0x127   :  { %879 = vst.msk [vmem:[#allocation2 + $0x68] sm:$0xff] %vm865_vm2, %v700_v29  ;;  %v596_v29 = vld [vmem:[%s11865_s0 + $0x292] sm:$0xff] }
 0x12a   :  { %769 = vrot.lane.b32.xlu1 %v593_v35, %s7618_s24  ;;  %767 = vrot.lane.b32.xlu0 %v592_v56, %s7618_s24  ;;  %v595_v35 = vld [vmem:[%s11865_s0 + $0x28a] sm:$0xff] }
 0x12b   :  { %771 = vrot.lane.b32.xlu2 %v594_v16, %s7618_s24  ;;  %v597_v16 = vld [vmem:[%s11865_s0 + $0x2a2] sm:$0xff] }
 0x12c   :  { %v686_v49 = vpop.permute.xlu1 %685  ;;  %v684_v11 = vpop.permute.xlu0 %683 }
 0x12d   :  { %872 = vst.msk [vmem:[#allocation2 + $0x30] sm:$0xff] %vm865_vm2, %v686_v49  ;;  %v706_v56 = vpop.permute.xlu2 %705 }
 0x12e   :  { %871 = vst.msk [vmem:[#allocation2 + $0x28] sm:$0xff] %vm865_vm2, %v684_v11 }
 0x12f   :  { %882 = vst.msk [vmem:[#allocation2 + $0x80] sm:$0xff] %vm865_vm2, %v706_v56  ;;  %v599_v56 = vld [vmem:[%s11865_s0 + $0x2ba] sm:$0xff] }
 0x132   :  { %775 = vrot.lane.b32.xlu1 %v596_v29, %s7618_s24  ;;  %773 = vrot.lane.b32.xlu0 %v595_v35, %s7618_s24  ;;  %v598_v29 = vld [vmem:[%s11865_s0 + $0x2aa] sm:$0xff] }
 0x133   :  { %777 = vrot.lane.b32.xlu2 %v597_v16, %s7618_s24  ;;  %v600_v16 = vld [vmem:[%s11865_s0 + $0x2c2] sm:$0xff] }
 0x134   :  { %v692_v49 = vpop.permute.xlu1 %691  ;;  %v690_v11 = vpop.permute.xlu0 %689 }
 0x135   :  { %875 = vst.msk [vmem:[#allocation2 + $0x48] sm:$0xff] %vm865_vm2, %v692_v49  ;;  %v712_v35 = vpop.permute.xlu2 %711 }
 0x136   :  { %874 = vst.msk [vmem:[#allocation2 + $0x40] sm:$0xff] %vm865_vm2, %v690_v11 }
 0x137   :  { %885 = vst.msk [vmem:[#allocation2 + $0x98] sm:$0xff] %vm865_vm2, %v712_v35  ;;  %v602_v35 = vld [vmem:[%s11865_s0 + $0x2da] sm:$0xff] }
 0x13a   :  { %781 = vrot.lane.b32.xlu1 %v599_v56, %s7618_s24  ;;  %779 = vrot.lane.b32.xlu0 %v598_v29, %s7618_s24  ;;  %v601_v56 = vld [vmem:[%s11865_s0 + $0x2d2] sm:$0xff] }
 0x13b   :  { %783 = vrot.lane.b32.xlu2 %v600_v16, %s7618_s24  ;;  %v603_v16 = vld [vmem:[%s11865_s0 + $0x2ea] sm:$0xff] }
 0x13c   :  { %v698_v49 = vpop.permute.xlu1 %697  ;;  %v696_v11 = vpop.permute.xlu0 %695 }
 0x13d   :  { %878 = vst.msk [vmem:[#allocation2 + $0x60] sm:$0xff] %vm865_vm2, %v698_v49  ;;  %v718_v29 = vpop.permute.xlu2 %717 }
 0x13e   :  { %877 = vst.msk [vmem:[#allocation2 + $0x58] sm:$0xff] %vm865_vm2, %v696_v11 }
 0x13f   :  { %888 = vst.msk [vmem:[#allocation2 + $0xb0] sm:$0xff] %vm865_vm2, %v718_v29  ;;  %v605_v29 = vld [vmem:[%s11865_s0 + $0x302] sm:$0xff] }
 0x142   :  { %787 = vrot.lane.b32.xlu1 %v602_v35, %s7618_s24  ;;  %785 = vrot.lane.b32.xlu0 %v601_v56, %s7618_s24  ;;  %v604_v35 = vld [vmem:[%s11865_s0 + $0x2f2] sm:$0xff] }
 0x143   :  { %789 = vrot.lane.b32.xlu2 %v603_v16, %s7618_s24  ;;  %v606_v16 = vld [vmem:[%s11865_s0 + $0x30a] sm:$0xff] }
 0x144   :  { %v704_v49 = vpop.permute.xlu1 %703  ;;  %v702_v11 = vpop.permute.xlu0 %701 }
 0x145   :  { %881 = vst.msk [vmem:[#allocation2 + $0x78] sm:$0xff] %vm865_vm2, %v704_v49  ;;  %v724_v56 = vpop.permute.xlu2 %723 }
 0x146   :  { %880 = vst.msk [vmem:[#allocation2 + $0x70] sm:$0xff] %vm865_vm2, %v702_v11 }
 0x147   :  { %891 = vst.msk [vmem:[#allocation2 + $0xc8] sm:$0xff] %vm865_vm2, %v724_v56  ;;  %v608_v56 = vld [vmem:[%s11865_s0 + $0x322] sm:$0xff] }
 0x14a   :  { %793 = vrot.lane.b32.xlu1 %v605_v29, %s7618_s24  ;;  %791 = vrot.lane.b32.xlu0 %v604_v35, %s7618_s24  ;;  %v607_v29 = vld [vmem:[%s11865_s0 + $0x31a] sm:$0xff] }
 0x14b   :  { %795 = vrot.lane.b32.xlu2 %v606_v16, %s7618_s24 }
 0x14c   :  { %v710_v49 = vpop.permute.xlu1 %709  ;;  %v708_v11 = vpop.permute.xlu0 %707 }
 0x14d   :  { %884 = vst.msk [vmem:[#allocation2 + $0x90] sm:$0xff] %vm865_vm2, %v710_v49  ;;  %v730_v35 = vpop.permute.xlu2 %729 }
 0x14e   :  { %883 = vst.msk [vmem:[#allocation2 + $0x88] sm:$0xff] %vm865_vm2, %v708_v11 }
 0x14f   :  { %894 = vst.msk [vmem:[#allocation2 + $0xe0] sm:$0xff] %vm865_vm2, %v730_v35 }
 0x152   :  { %799 = vrot.lane.b32.xlu1 %v608_v56, %s7618_s24  ;;  %797 = vrot.lane.b32.xlu0 %v607_v29, %s7618_s24 }
 0x153   :  { %1059 = vrot.lane.b32.xlu2 %v7825_v33, %s7619_s14 }
 0x154   :  { %v716_v49 = vpop.permute.xlu1 %715  ;;  %v714_v20 = vpop.permute.xlu0 %713 }
 0x155   :  { %887 = vst.msk [vmem:[#allocation2 + $0xa8] sm:$0xff] %vm865_vm2, %v716_v49  ;;  %v736_v16 = vpop.permute.xlu2 %735 }
 0x156   :  { %886 = vst.msk [vmem:[#allocation2 + $0xa0] sm:$0xff] %vm865_vm2, %v714_v20 }
 0x157   :  { %897 = vst.msk [vmem:[#allocation2 + $0xf8] sm:$0xff] %vm865_vm2, %v736_v16 }
 0x15a   :  { %1063 = vrot.lane.b32.xlu1 %v7848_v38, %s7619_s14  ;;  %1061 = vrot.lane.b32.xlu0 %v7855_v39, %s7619_s14 }
 0x15b   :  { %1065 = vrot.lane.b32.xlu2 %v7879_v45, %s7619_s14 }
 0x15c   :  { %v722_v11 = vpop.permute.xlu1 %721  ;;  %v720_v56 = vpop.permute.xlu0 %719 }
 0x15d   :  { %890 = vst.msk [vmem:[#allocation2 + $0xc0] sm:$0xff] %vm865_vm2, %v722_v11  ;;  %v742_v33 = vpop.permute.xlu2 %741  ;;  %v11882_v11 = vld [vmem:[#allocation19_spill] sm:$0xff] }
 0x15e   :  { %889 = vst.msk [vmem:[#allocation2 + $0xb8] sm:$0xff] %vm865_vm2, %v720_v56 }
 0x15f   :  { %900 = vst.msk [vmem:[#allocation2 + $0x110] sm:$0xff] %vm865_vm2, %v742_v33  ;;  %v7091_v33 = vld [vmem:[%s11865_s0 + $0x338] sm:$0xff] }
 0x162   :  { %1069 = vrot.lane.b32.xlu1 %v7886_v46, %s7619_s14  ;;  %1067 = vrot.lane.b32.xlu0 %v7894_v47, %s7619_s14 }
 0x163   :  { %1071 = vrot.lane.b32.xlu2 %v7913_v52, %s7619_s14 }
 0x164   :  { %v728_v38 = vpop.permute.xlu1 %727  ;;  %v726_v39 = vpop.permute.xlu0 %725 }
 0x165   :  { %893 = vst.msk [vmem:[#allocation2 + $0xd8] sm:$0xff] %vm865_vm2, %v728_v38  ;;  %v748_v45 = vpop.permute.xlu2 %747 }
 0x166   :  { %892 = vst.msk [vmem:[#allocation2 + $0xd0] sm:$0xff] %vm865_vm2, %v726_v39 }
 0x167   :  { %903 = vst.msk [vmem:[#allocation2 + $0x128] sm:$0xff] %vm865_vm2, %v748_v45  ;;  %v7093_v45 = vld [vmem:[%s11865_s0 + $0x21] sm:$0xff] }
 0x16a   :  { %1075 = vrot.lane.b32.xlu1 %v7920_v53, %s7619_s14  ;;  %1073 = vrot.lane.b32.xlu0 %v7928_v54, %s7619_s14 }
 0x16b   :  { %1077 = vrot.lane.b32.xlu2 %v7947_v59, %s7619_s14 }
 0x16c   :  { %v734_v46 = vpop.permute.xlu1 %733  ;;  %v732_v47 = vpop.permute.xlu0 %731 }
 0x16d   :  { %896 = vst.msk [vmem:[#allocation2 + $0xf0] sm:$0xff] %vm865_vm2, %v734_v46  ;;  %v754_v52 = vpop.permute.xlu2 %753  ;;  %v7092_v46 = vld [vmem:[%s11865_s0 + $0x19] sm:$0xff] }
 0x16e   :  { %895 = vst.msk [vmem:[#allocation2 + $0xe8] sm:$0xff] %vm865_vm2, %v732_v47 }
 0x16f   :  { %906 = vst.msk [vmem:[#allocation2 + $0x140] sm:$0xff] %vm865_vm2, %v754_v52  ;;  %v7094_v52 = vld [vmem:[%s11865_s0 + $0x31] sm:$0xff] }
 0x172   :  { %1081 = vrot.lane.b32.xlu1 %v7954_v60, %s7619_s14  ;;  %1079 = vrot.lane.b32.xlu0 %v7963_v63, %s7619_s14 }
 0x173   :  { %1083 = vrot.lane.b32.xlu2 %v7983_v4, %s7619_s14 }
 0x174   :  { %v740_v53 = vpop.permute.xlu1 %739  ;;  %v738_v54 = vpop.permute.xlu0 %737 }
 0x175   :  { %899 = vst.msk [vmem:[#allocation2 + $0x108] sm:$0xff] %vm865_vm2, %v740_v53  ;;  %v760_v59 = vpop.permute.xlu2 %759 }
 0x176   :  { %898 = vst.msk [vmem:[#allocation2 + $0x100] sm:$0xff] %vm865_vm2, %v738_v54 }
 0x177   :  { %909 = vst.msk [vmem:[#allocation2 + $0x158] sm:$0xff] %vm865_vm2, %v760_v59  ;;  %v7096_v59 = vld [vmem:[%s11865_s0 + $0x49] sm:$0xff] }
 0x17a   :  { %1087 = vrot.lane.b32.xlu1 %v7990_v5, %s7619_s14  ;;  %1085 = vrot.lane.b32.xlu0 %v7999_v8, %s7619_s14 }
 0x17b   :  { %1089 = vrot.lane.b32.xlu2 %v8019_v13, %s7619_s14 }
 0x17c   :  { %v746_v60 = vpop.permute.xlu1 %745  ;;  %v744_v63 = vpop.permute.xlu0 %743 }
 0x17d   :  { %902 = vst.msk [vmem:[#allocation2 + $0x120] sm:$0xff] %vm865_vm2, %v746_v60  ;;  %v766_v4 = vpop.permute.xlu2 %765  ;;  %v7095_v60 = vld [vmem:[%s11865_s0 + $0x39] sm:$0xff] }
 0x17e   :  { %901 = vst.msk [vmem:[#allocation2 + $0x118] sm:$0xff] %vm865_vm2, %v744_v63 }
 0x17f   :  { %912 = vst.msk [vmem:[#allocation2 + $0x170] sm:$0xff] %vm865_vm2, %v766_v4  ;;  %v7097_v4 = vld [vmem:[%s11865_s0 + $0x51] sm:$0xff] }
 0x182   :  { %1093 = vrot.lane.b32.xlu1 %v8026_v14, %s7619_s14  ;;  %1091 = vrot.lane.b32.xlu0 %v8035_v17, %s7619_s14 }
 0x183   :  { %1095 = vrot.lane.b32.xlu2 %v8055_v22, %s7619_s14 }
 0x184   :  { %v752_v5 = vpop.permute.xlu1 %751  ;;  %v750_v8 = vpop.permute.xlu0 %749 }
 0x185   :  { %905 = vst.msk [vmem:[#allocation2 + $0x138] sm:$0xff] %vm865_vm2, %v752_v5  ;;  %v772_v13 = vpop.permute.xlu2 %771 }
 0x186   :  { %904 = vst.msk [vmem:[#allocation2 + $0x130] sm:$0xff] %vm865_vm2, %v750_v8 }
 0x187   :  { %915 = vst.msk [vmem:[#allocation2 + $0x188] sm:$0xff] %vm865_vm2, %v772_v13  ;;  %v7099_v13 = vld [vmem:[%s11865_s0 + $0x69] sm:$0xff] }
 0x18a   :  { %1099 = vrot.lane.b32.xlu1 %v8062_v23, %s7619_s14  ;;  %1097 = vrot.lane.b32.xlu0 %v8071_v26, %s7619_s14 }
 0x18b   :  { %1101 = vrot.lane.b32.xlu2 %v8091_v31, %s7619_s14 }
 0x18c   :  { %v758_v14 = vpop.permute.xlu1 %757  ;;  %v756_v17 = vpop.permute.xlu0 %755 }
 0x18d   :  { %908 = vst.msk [vmem:[#allocation2 + $0x150] sm:$0xff] %vm865_vm2, %v758_v14  ;;  %v778_v22 = vpop.permute.xlu2 %777  ;;  %v7098_v14 = vld [vmem:[%s11865_s0 + $0x61] sm:$0xff] }
 0x18e   :  { %907 = vst.msk [vmem:[#allocation2 + $0x148] sm:$0xff] %vm865_vm2, %v756_v17 }
 0x18f   :  { %918 = vst.msk [vmem:[#allocation2 + $0x1a0] sm:$0xff] %vm865_vm2, %v778_v22  ;;  %v7100_v22 = vld [vmem:[%s11865_s0 + $0x79] sm:$0xff] }
 0x192   :  { %1105 = vrot.lane.b32.xlu1 %v8098_v32, %s7619_s14  ;;  %1103 = vrot.lane.b32.xlu0 %v8107_v36, %s7619_s14 }
 0x193   :  { %1107 = vrot.lane.b32.xlu2 %v8127_v43, %s7619_s14 }
 0x194   :  { %v764_v23 = vpop.permute.xlu1 %763  ;;  %v762_v26 = vpop.permute.xlu0 %761 }
 0x195   :  { %911 = vst.msk [vmem:[#allocation2 + $0x168] sm:$0xff] %vm865_vm2, %v764_v23  ;;  %v784_v31 = vpop.permute.xlu2 %783 }
 0x196   :  { %910 = vst.msk [vmem:[#allocation2 + $0x160] sm:$0xff] %vm865_vm2, %v762_v26 }
 0x197   :  { %921 = vst.msk [vmem:[#allocation2 + $0x1b8] sm:$0xff] %vm865_vm2, %v784_v31  ;;  %v7102_v31 = vld [vmem:[%s11865_s0 + $0x91] sm:$0xff] }
 0x19a   :  { %1111 = vrot.lane.b32.xlu1 %v8134_v44, %s7619_s14  ;;  %1109 = vrot.lane.b32.xlu0 %v8143_v50, %s7619_s14  ;;  %v7058_v44 = vld [vmem:[%s11865_s0 + $0x180] sm:$0xff] }
 0x19b   :  { %1113 = vrot.lane.b32.xlu2 %v8163_v58, %s7619_s14  ;;  %v7059_v58 = vld [vmem:[%s11865_s0 + $0x188] sm:$0xff] }
 0x19c   :  { %v770_v32 = vpop.permute.xlu1 %769  ;;  %v768_v36 = vpop.permute.xlu0 %767 }
 0x19d   :  { %914 = vst.msk [vmem:[#allocation2 + $0x180] sm:$0xff] %vm865_vm2, %v770_v32  ;;  %v790_v43 = vpop.permute.xlu2 %789  ;;  %v7101_v32 = vld [vmem:[%s11865_s0 + $0x81] sm:$0xff] }
 0x19e   :  { %913 = vst.msk [vmem:[#allocation2 + $0x178] sm:$0xff] %vm865_vm2, %v768_v36 }
 0x19f   :  { %924 = vst.msk [vmem:[#allocation2 + $0x1d0] sm:$0xff] %vm865_vm2, %v790_v43  ;;  %v7103_v43 = vld [vmem:[%s11865_s0 + $0x99] sm:$0xff] }
 0x1a2   :  { %1117 = vrot.lane.b32.xlu1 %v8170_v61, %s7619_s14  ;;  %1115 = vrot.lane.b32.xlu0 %v8179_v1, %s7619_s14 }
 0x1a3   :  { %1119 = vrot.lane.b32.xlu2 %v7058_v44, %s7619_s14 }
 0x1a4   :  { %v776_v50 = vpop.permute.xlu1 %775  ;;  %v774_v20 = vpop.permute.xlu0 %773 }
 0x1a5   :  { %917 = vst.msk [vmem:[#allocation2 + $0x198] sm:$0xff] %vm865_vm2, %v776_v50  ;;  %v796_v61 = vpop.permute.xlu2 %795 }
 0x1a6   :  { %916 = vst.msk [vmem:[#allocation2 + $0x190] sm:$0xff] %vm865_vm2, %v774_v20  ;;  %v7105_v20 = vld [vmem:[%s11865_s0 + $0xb1] sm:$0xff] }
 0x1a7   :  { %927 = vst.msk [vmem:[#allocation2 + $0x1e8] sm:$0xff] %vm865_vm2, %v796_v61 }
 0x1aa   :  { %1123 = vrot.lane.b32.xlu1 %v8203_v10, %s7619_s14  ;;  %1121 = vrot.lane.b32.xlu0 %v7059_v58, %s7619_s14  ;;  %v7104_v58 = vld [vmem:[%s11865_s0 + $0xa9] sm:$0xff] }
 0x1ab   :  { %1125 = vrot.lane.b32.xlu2 %v8229_v21, %s7619_s14 }
 0x1ac   :  { %v782_v1 = vpop.permute.xlu1 %781  ;;  %v780_v29 = vpop.permute.xlu0 %779 }
 0x1ad   :  { %920 = vst.msk [vmem:[#allocation2 + $0x1b0] sm:$0xff] %vm865_vm2, %v782_v1  ;;  %v1060_v35 = vpop.permute.xlu2 %1059  ;;  %v7106_v1 = vld [vmem:[%s11865_s0 + $0xc1] sm:$0xff] }
 0x1ae   :  { %919 = vst.msk [vmem:[#allocation2 + $0x1a8] sm:$0xff] %vm865_vm2, %v780_v29 }
 0x1af   :  { %1252 = vst.msk [vmem:[#allocation2] sm:$0xff] %vm1251_vm3, %v1060_v35 }
 0x1b2   :  { %1129 = vrot.lane.b32.xlu1 %v8236_v24, %s7619_s14  ;;  %1127 = vrot.lane.b32.xlu0 %v8245_v28, %s7619_s14 }
 0x1b3   :  { %1131 = vrot.lane.b32.xlu2 %v8265_v37, %s7619_s14 }
 0x1b4   :  { %v788_v10 = vpop.permute.xlu1 %787  ;;  %v786_v49 = vpop.permute.xlu0 %785 }
 0x1b5   :  { %923 = vst.msk [vmem:[#allocation2 + $0x1c8] sm:$0xff] %vm865_vm2, %v788_v10  ;;  %v1066_v21 = vpop.permute.xlu2 %1065  ;;  %v7108_v10 = vld [vmem:[%s11865_s0 + $0xd9] sm:$0xff] }
 0x1b6   :  { %922 = vst.msk [vmem:[#allocation2 + $0x1c0] sm:$0xff] %vm865_vm2, %v786_v49  ;;  %v7107_v49 = vld [vmem:[%s11865_s0 + $0xc9] sm:$0xff] }
 0x1b7   :  { %1255 = vst.msk [vmem:[#allocation2 + $0x18] sm:$0xff] %vm1251_vm3, %v1066_v21 }
 0x1ba   :  { %1135 = vrot.lane.b32.xlu1 %v8272_v40, %s7619_s14  ;;  %1133 = vrot.lane.b32.xlu0 %v8281_v48, %s7619_s14 }
 0x1bb   :  { %1137 = vrot.lane.b32.xlu2 %v8301_v57, %s7619_s14 }
 0x1bc   :  { %v794_v24 = vpop.permute.xlu1 %793  ;;  %v792_v28 = vpop.permute.xlu0 %791 }
 0x1bd   :  { %926 = vst.msk [vmem:[#allocation2 + $0x1e0] sm:$0xff] %vm865_vm2, %v794_v24  ;;  %v1072_v37 = vpop.permute.xlu2 %1071  ;;  %v7109_v24 = vld [vmem:[%s11865_s0 + $0xe1] sm:$0xff] }
 0x1be   :  { %925 = vst.msk [vmem:[#allocation2 + $0x1d8] sm:$0xff] %vm865_vm2, %v792_v28 }
 0x1bf   :  { %1258 = vst.msk [vmem:[#allocation2 + $0x30] sm:$0xff] %vm1251_vm3, %v1072_v37 }
 0x1c2   :  { %1141 = vrot.lane.b32.xlu1 %v8308_v62, %s7619_s14  ;;  %1139 = vrot.lane.b32.xlu0 %v8317_v3, %s7619_s14 }
 0x1c3   :  { %1143 = vrot.lane.b32.xlu2 %v8337_v12, %s7619_s14 }
 0x1c4   :  { %v800_v40 = vpop.permute.xlu1 %799  ;;  %v798_v48 = vpop.permute.xlu0 %797 }
 0x1c5   :  { %929 = vst.msk [vmem:[#allocation2 + $0x1f8] sm:$0xff] %vm865_vm2, %v800_v40  ;;  %v1078_v57 = vpop.permute.xlu2 %1077  ;;  %v7111_v40 = vld [vmem:[%s11865_s0 + $0xf9] sm:$0xff] }
 0x1c6   :  { %928 = vst.msk [vmem:[#allocation2 + $0x1f0] sm:$0xff] %vm865_vm2, %v798_v48  ;;  %v7110_v48 = vld [vmem:[%s11865_s0 + $0xf1] sm:$0xff]  ;;  %vm4198_vm2 = vcmask 458112  }
 0x1c7   :  { %1261 = vst.msk [vmem:[#allocation2 + $0x48] sm:$0xff] %vm1251_vm3, %v1078_v57 }
 0x1ca   :  { %1147 = vrot.lane.b32.xlu1 %v8344_v15, %s7619_s14  ;;  %1145 = vrot.lane.b32.xlu0 %v8353_v19, %s7619_s14 }
 0x1cb   :  { %1149 = vrot.lane.b32.xlu2 %v8373_v30, %s7619_s14 }
 0x1cc   :  { %v1064_v62 = vpop.permute.xlu1 %1063  ;;  %v1062_v3 = vpop.permute.xlu0 %1061 }
 0x1cd   :  { %1254 = vst.msk [vmem:[#allocation2 + $0x10] sm:$0xff] %vm1251_vm3, %v1064_v62  ;;  %v1084_v12 = vpop.permute.xlu2 %1083  ;;  %v7112_v62 = vld [vmem:[%s11865_s0 + $0x109] sm:$0xff] }
 0x1ce   :  { %1253 = vst.msk [vmem:[#allocation2 + $0x8] sm:$0xff] %vm1251_vm3, %v1062_v3 }
 0x1cf   :  { %1264 = vst.msk [vmem:[#allocation2 + $0x60] sm:$0xff] %vm1251_vm3, %v1084_v12 }
 0x1d2   :  { %1153 = vrot.lane.b32.xlu1 %v8380_v34, %s7619_s14  ;;  %1151 = vrot.lane.b32.xlu0 %v8389_v42, %s7619_s14 }
 0x1d3   :  { %1155 = vrot.lane.b32.xlu2 %v8409_v0, %s7619_s14 }
 0x1d4   :  { %v1070_v15 = vpop.permute.xlu1 %1069  ;;  %v1068_v19 = vpop.permute.xlu0 %1067 }
 0x1d5   :  { %1257 = vst.msk [vmem:[#allocation2 + $0x28] sm:$0xff] %vm1251_vm3, %v1070_v15  ;;  %v1090_v30 = vpop.permute.xlu2 %1089  ;;  %v7114_v15 = vld [vmem:[%s11865_s0 + $0x121] sm:$0xff] }
 0x1d6   :  { %1256 = vst.msk [vmem:[#allocation2 + $0x20] sm:$0xff] %vm1251_vm3, %v1068_v19  ;;  %v7113_v19 = vld [vmem:[%s11865_s0 + $0x111] sm:$0xff] }
 0x1d7   :  { %1267 = vst.msk [vmem:[#allocation2 + $0x78] sm:$0xff] %vm1251_vm3, %v1090_v30 }
 0x1da   :  { %1159 = vrot.lane.b32.xlu1 %v8416_v2, %s7619_s14  ;;  %1157 = vrot.lane.b32.xlu0 %v8425_v9, %s7619_s14 }
 0x1db   :  { %1161 = vrot.lane.b32.xlu2 %v8445_v25, %s7619_s14 }
 0x1dc   :  { %v1076_v34 = vpop.permute.xlu1 %1075  ;;  %v1074_v42 = vpop.permute.xlu0 %1073 }
 0x1dd   :  { %1260 = vst.msk [vmem:[#allocation2 + $0x40] sm:$0xff] %vm1251_vm3, %v1076_v34  ;;  %v1096_v0 = vpop.permute.xlu2 %1095  ;;  %v7115_v34 = vld [vmem:[%s11865_s0 + $0x129] sm:$0xff] }
 0x1de   :  { %1259 = vst.msk [vmem:[#allocation2 + $0x38] sm:$0xff] %vm1251_vm3, %v1074_v42 }
 0x1df   :  { %1270 = vst.msk [vmem:[#allocation2 + $0x90] sm:$0xff] %vm1251_vm3, %v1096_v0 }
 0x1e2   :  { %1165 = vrot.lane.b32.xlu1 %v8452_v27, %s7619_s14  ;;  %1163 = vrot.lane.b32.xlu0 %v8461_v41, %s7619_s14 }
 0x1e3   :  { %1167 = vrot.lane.b32.xlu2 %v8481_v6, %s7619_s14 }
 0x1e4   :  { %v1082_v2 = vpop.permute.xlu1 %1081  ;;  %v1080_v9 = vpop.permute.xlu0 %1079 }
 0x1e5   :  { %1263 = vst.msk [vmem:[#allocation2 + $0x58] sm:$0xff] %vm1251_vm3, %v1082_v2  ;;  %v1102_v25 = vpop.permute.xlu2 %1101  ;;  %v7117_v2 = vld [vmem:[%s11865_s0 + $0x141] sm:$0xff] }
 0x1e6   :  { %1262 = vst.msk [vmem:[#allocation2 + $0x50] sm:$0xff] %vm1251_vm3, %v1080_v9  ;;  %v7116_v9 = vld [vmem:[%s11865_s0 + $0x139] sm:$0xff] }
 0x1e7   :  { %1273 = vst.msk [vmem:[#allocation2 + $0xa8] sm:$0xff] %vm1251_vm3, %v1102_v25 }
 0x1ea   :  { %1171 = vrot.lane.b32.xlu1 %v8488_v7, %s7619_s14  ;;  %1169 = vrot.lane.b32.xlu0 %v8497_v18, %s7619_s14  ;;  %v11881_v7 = vld [vmem:[#allocation18_spill] sm:$0xff] }
 0x1eb   :  { %1173 = vrot.lane.b32.xlu2 %v8517_v51, %s7619_s14  ;;  %v7090_v51 = vld [vmem:[%s11865_s0 + $0x330] sm:$0xff] }
 0x1ec   :  { %v1088_v27 = vpop.permute.xlu1 %1087  ;;  %v1086_v41 = vpop.permute.xlu0 %1085 }
 0x1ed   :  { %1266 = vst.msk [vmem:[#allocation2 + $0x70] sm:$0xff] %vm1251_vm3, %v1088_v27  ;;  %v1108_v6 = vpop.permute.xlu2 %1107  ;;  %v7118_v27 = vld [vmem:[%s11865_s0 + $0x151] sm:$0xff] }
 0x1ee   :  { %1265 = vst.msk [vmem:[#allocation2 + $0x68] sm:$0xff] %vm1251_vm3, %v1086_v41 }
 0x1ef   :  { %1276 = vst.msk [vmem:[#allocation2 + $0xc0] sm:$0xff] %vm1251_vm3, %v1108_v6 }
 0x1f2   :  { %1177 = vrot.lane.b32.xlu1 %v8524_v55, %s7619_s14  ;;  %1175 = vrot.lane.b32.xlu0 %v11881_v7, %s7619_s14  ;;  %v11883_v55 = vld [vmem:[#allocation20_spill] sm:$0xff] }
 0x1f3   :  { %1179 = vrot.lane.b32.xlu2 %v11882_v11, %s7619_s14  ;;  %v7120_v7 = vld [vmem:[%s11865_s0 + $0x169] sm:$0xff]  ;;  %v7121_v11 = vld [vmem:[%s11865_s0 + $0x171] sm:$0xff] }
 0x1f4   :  { %v1094_v16 = vpop.permute.xlu1 %1093  ;;  %v1092_v18 = vpop.permute.xlu0 %1091 }
 0x1f5   :  { %1269 = vst.msk [vmem:[#allocation2 + $0x88] sm:$0xff] %vm1251_vm3, %v1094_v16  ;;  %v1114_v56 = vpop.permute.xlu2 %1113  ;;  %v7119_v16 = vld [vmem:[%s11865_s0 + $0x159] sm:$0xff] }
 0x1f6   :  { %1268 = vst.msk [vmem:[#allocation2 + $0x80] sm:$0xff] %vm1251_vm3, %v1092_v18 }
 0x1f7   :  { %1279 = vst.msk [vmem:[#allocation2 + $0xd8] sm:$0xff] %vm1251_vm3, %v1114_v56 }
 0x1fa   :  { %1183 = vrot.lane.b32.xlu1 %v7090_v51, %s7619_s14  ;;  %1181 = vrot.lane.b32.xlu0 %v11883_v55, %s7619_s14  ;;  %v7123_v55 = vld [vmem:[%s11865_s0 + $0x189] sm:$0xff] }
 0x1fb   :  { %1185 = vrot.lane.b32.xlu2 %v7091_v33, %s7619_s14  ;;  %v7122_v33 = vld [vmem:[%s11865_s0 + $0x181] sm:$0xff] }
 0x1fc   :  { %v1100_v38 = vpop.permute.xlu1 %1099  ;;  %v1098_v39 = vpop.permute.xlu0 %1097 }
 0x1fd   :  { %1272 = vst.msk [vmem:[#allocation2 + $0xa0] sm:$0xff] %vm1251_vm3, %v1100_v38  ;;  %v1120_v47 = vpop.permute.xlu2 %1119 }
 0x1fe   :  { %1271 = vst.msk [vmem:[#allocation2 + $0x98] sm:$0xff] %vm1251_vm3, %v1098_v39  ;;  %v7124_v39 = vld [vmem:[%s11865_s0 + $0x1c9] sm:$0xff] }
 0x1ff   :  { %1282 = vst.msk [vmem:[#allocation2 + $0xf0] sm:$0xff] %vm1251_vm3, %v1120_v47  ;;  %v7126_v47 = vld [vmem:[%s11865_s0 + $0x1e1] sm:$0xff] }
 0x202   :  { %1446 = vrot.lane.b32.xlu1 %v7093_v45, %s7620_s28  ;;  %1444 = vrot.lane.b32.xlu0 %v7092_v46, %s7620_s28 }
 0x203   :  { %1448 = vrot.lane.b32.xlu2 %v7094_v52, %s7620_s28  ;;  %v7125_v52 = vld [vmem:[%s11865_s0 + $0x1d1] sm:$0xff] }
 0x204   :  { %v1106_v53 = vpop.permute.xlu1 %1105  ;;  %v1104_v54 = vpop.permute.xlu0 %1103 }
 0x205   :  { %1275 = vst.msk [vmem:[#allocation2 + $0xb8] sm:$0xff] %vm1251_vm3, %v1106_v53  ;;  %v1126_v63 = vpop.permute.xlu2 %1125 }
 0x206   :  { %1274 = vst.msk [vmem:[#allocation2 + $0xb0] sm:$0xff] %vm1251_vm3, %v1104_v54  ;;  %v7127_v54 = vld [vmem:[%s11865_s0 + $0x1e9] sm:$0xff] }
 0x207   :  { %1285 = vst.msk [vmem:[#allocation2 + $0x108] sm:$0xff] %vm1251_vm3, %v1126_v63  ;;  %v7129_v63 = vld [vmem:[%s11865_s0 + $0x201] sm:$0xff] }
 0x20a   :  { %1452 = vrot.lane.b32.xlu1 %v7096_v59, %s7620_s28  ;;  %1450 = vrot.lane.b32.xlu0 %v7095_v60, %s7620_s28 }
 0x20b   :  { %1454 = vrot.lane.b32.xlu2 %v7097_v4, %s7620_s28  ;;  %v7128_v4 = vld [vmem:[%s11865_s0 + $0x1f9] sm:$0xff] }
 0x20c   :  { %v1112_v5 = vpop.permute.xlu1 %1111  ;;  %v1110_v8 = vpop.permute.xlu0 %1109 }
 0x20d   :  { %1278 = vst.msk [vmem:[#allocation2 + $0xd0] sm:$0xff] %vm1251_vm3, %v1112_v5  ;;  %v1132_v17 = vpop.permute.xlu2 %1131 }
 0x20e   :  { %1277 = vst.msk [vmem:[#allocation2 + $0xc8] sm:$0xff] %vm1251_vm3, %v1110_v8  ;;  %v7130_v8 = vld [vmem:[%s11865_s0 + $0x211] sm:$0xff] }
 0x20f   :  { %1288 = vst.msk [vmem:[#allocation2 + $0x120] sm:$0xff] %vm1251_vm3, %v1132_v17  ;;  %v7132_v17 = vld [vmem:[%s11865_s0 + $0x229] sm:$0xff] }
 0x212   :  { %1458 = vrot.lane.b32.xlu1 %v7099_v13, %s7620_s28  ;;  %1456 = vrot.lane.b32.xlu0 %v7098_v14, %s7620_s28 }
 0x213   :  { %1460 = vrot.lane.b32.xlu2 %v7100_v22, %s7620_s28  ;;  %v7131_v22 = vld [vmem:[%s11865_s0 + $0x219] sm:$0xff] }
 0x214   :  { %v1118_v23 = vpop.permute.xlu1 %1117  ;;  %v1116_v26 = vpop.permute.xlu0 %1115 }
 0x215   :  { %1281 = vst.msk [vmem:[#allocation2 + $0xe8] sm:$0xff] %vm1251_vm3, %v1118_v23  ;;  %v1138_v36 = vpop.permute.xlu2 %1137 }
 0x216   :  { %1280 = vst.msk [vmem:[#allocation2 + $0xe0] sm:$0xff] %vm1251_vm3, %v1116_v26  ;;  %v7133_v26 = vld [vmem:[%s11865_s0 + $0x231] sm:$0xff] }
 0x217   :  { %1291 = vst.msk [vmem:[#allocation2 + $0x138] sm:$0xff] %vm1251_vm3, %v1138_v36  ;;  %v7135_v36 = vld [vmem:[%s11865_s0 + $0x249] sm:$0xff] }
 0x21a   :  { %1464 = vrot.lane.b32.xlu1 %v7102_v31, %s7620_s28  ;;  %1462 = vrot.lane.b32.xlu0 %v7101_v32, %s7620_s28 }
 0x21b   :  { %1466 = vrot.lane.b32.xlu2 %v7103_v43, %s7620_s28  ;;  %v7134_v43 = vld [vmem:[%s11865_s0 + $0x241] sm:$0xff] }
 0x21c   :  { %v1124_v44 = vpop.permute.xlu1 %1123  ;;  %v1122_v50 = vpop.permute.xlu0 %1121 }
 0x21d   :  { %1284 = vst.msk [vmem:[#allocation2 + $0x100] sm:$0xff] %vm1251_vm3, %v1124_v44  ;;  %v1144_v61 = vpop.permute.xlu2 %1143 }
 0x21e   :  { %1283 = vst.msk [vmem:[#allocation2 + $0xf8] sm:$0xff] %vm1251_vm3, %v1122_v50  ;;  %v7136_v50 = vld [vmem:[%s11865_s0 + $0x259] sm:$0xff] }
 0x21f   :  { %1294 = vst.msk [vmem:[#allocation2 + $0x150] sm:$0xff] %vm1251_vm3, %v1144_v61  ;;  %v7138_v61 = vld [vmem:[%s11865_s0 + $0x271] sm:$0xff] }
 0x222   :  { %1470 = vrot.lane.b32.xlu1 %v7105_v20, %s7620_s28  ;;  %1468 = vrot.lane.b32.xlu0 %v7104_v58, %s7620_s28 }
 0x223   :  { %1472 = vrot.lane.b32.xlu2 %v7106_v1, %s7620_s28  ;;  %v7137_v1 = vld [vmem:[%s11865_s0 + $0x261] sm:$0xff] }
 0x224   :  { %v1130_v29 = vpop.permute.xlu1 %1129  ;;  %v1128_v35 = vpop.permute.xlu0 %1127 }
 0x225   :  { %1287 = vst.msk [vmem:[#allocation2 + $0x118] sm:$0xff] %vm1251_vm3, %v1130_v29  ;;  %v1150_v21 = vpop.permute.xlu2 %1149 }
 0x226   :  { %1286 = vst.msk [vmem:[#allocation2 + $0x110] sm:$0xff] %vm1251_vm3, %v1128_v35  ;;  %v7139_v35 = vld [vmem:[%s11865_s0 + $0x279] sm:$0xff] }
 0x227   :  { %1297 = vst.msk [vmem:[#allocation2 + $0x168] sm:$0xff] %vm1251_vm3, %v1150_v21  ;;  %v7141_v21 = vld [vmem:[%s11865_s0 + $0x291] sm:$0xff] }
 0x22a   :  { %1476 = vrot.lane.b32.xlu1 %v7108_v10, %s7620_s28  ;;  %1474 = vrot.lane.b32.xlu0 %v7107_v49, %s7620_s28 }
 0x22b   :  { %1478 = vrot.lane.b32.xlu2 %v7109_v24, %s7620_s28  ;;  %v7140_v24 = vld [vmem:[%s11865_s0 + $0x289] sm:$0xff] }
 0x22c   :  { %v1136_v28 = vpop.permute.xlu1 %1135  ;;  %v1134_v37 = vpop.permute.xlu0 %1133 }
 0x22d   :  { %1290 = vst.msk [vmem:[#allocation2 + $0x130] sm:$0xff] %vm1251_vm3, %v1136_v28  ;;  %v1156_v57 = vpop.permute.xlu2 %1155 }
 0x22e   :  { %1289 = vst.msk [vmem:[#allocation2 + $0x128] sm:$0xff] %vm1251_vm3, %v1134_v37  ;;  %v7142_v37 = vld [vmem:[%s11865_s0 + $0x2a1] sm:$0xff] }
 0x22f   :  { %1300 = vst.msk [vmem:[#allocation2 + $0x180] sm:$0xff] %vm1251_vm3, %v1156_v57  ;;  %v7144_v57 = vld [vmem:[%s11865_s0 + $0x2b9] sm:$0xff] }
 0x232   :  { %1482 = vrot.lane.b32.xlu1 %v7111_v40, %s7620_s28  ;;  %1480 = vrot.lane.b32.xlu0 %v7110_v48, %s7620_s28 }
 0x233   :  { %1484 = vrot.lane.b32.xlu2 %v7112_v62, %s7620_s28  ;;  %v7143_v62 = vld [vmem:[%s11865_s0 + $0x2a9] sm:$0xff] }
 0x234   :  { %v1142_v3 = vpop.permute.xlu1 %1141  ;;  %v1140_v12 = vpop.permute.xlu0 %1139 }
 0x235   :  { %1293 = vst.msk [vmem:[#allocation2 + $0x148] sm:$0xff] %vm1251_vm3, %v1142_v3  ;;  %v1162_v30 = vpop.permute.xlu2 %1161 }
 0x236   :  { %1292 = vst.msk [vmem:[#allocation2 + $0x140] sm:$0xff] %vm1251_vm3, %v1140_v12  ;;  %v7145_v12 = vld [vmem:[%s11865_s0 + $0x2c1] sm:$0xff] }
 0x237   :  { %1303 = vst.msk [vmem:[#allocation2 + $0x198] sm:$0xff] %vm1251_vm3, %v1162_v30  ;;  %v7147_v30 = vld [vmem:[%s11865_s0 + $0x2d9] sm:$0xff] }
 0x23a   :  { %1488 = vrot.lane.b32.xlu1 %v7114_v15, %s7620_s28  ;;  %1486 = vrot.lane.b32.xlu0 %v7113_v19, %s7620_s28 }
 0x23b   :  { %1490 = vrot.lane.b32.xlu2 %v7115_v34, %s7620_s28  ;;  %v7146_v34 = vld [vmem:[%s11865_s0 + $0x2d1] sm:$0xff] }
 0x23c   :  { %v1148_v42 = vpop.permute.xlu1 %1147  ;;  %v1146_v0 = vpop.permute.xlu0 %1145 }
 0x23d   :  { %1296 = vst.msk [vmem:[#allocation2 + $0x160] sm:$0xff] %vm1251_vm3, %v1148_v42  ;;  %v1168_v25 = vpop.permute.xlu2 %1167 }
 0x23e   :  { %1295 = vst.msk [vmem:[#allocation2 + $0x158] sm:$0xff] %vm1251_vm3, %v1146_v0  ;;  %v7148_v0 = vld [vmem:[%s11865_s0 + $0x2e9] sm:$0xff] }
 0x23f   :  { %1306 = vst.msk [vmem:[#allocation2 + $0x1b0] sm:$0xff] %vm1251_vm3, %v1168_v25  ;;  %v7150_v25 = vld [vmem:[%s11865_s0 + $0x301] sm:$0xff] }
 0x242   :  { %1494 = vrot.lane.b32.xlu1 %v7117_v2, %s7620_s28  ;;  %1492 = vrot.lane.b32.xlu0 %v7116_v9, %s7620_s28 }
 0x243   :  { %1496 = vrot.lane.b32.xlu2 %v7118_v27, %s7620_s28  ;;  %v7149_v27 = vld [vmem:[%s11865_s0 + $0x2f1] sm:$0xff] }
 0x244   :  { %v1154_v41 = vpop.permute.xlu1 %1153  ;;  %v1152_v6 = vpop.permute.xlu0 %1151 }
 0x245   :  { %1299 = vst.msk [vmem:[#allocation2 + $0x178] sm:$0xff] %vm1251_vm3, %v1154_v41  ;;  %v1174_v18 = vpop.permute.xlu2 %1173 }
 0x246   :  { %1298 = vst.msk [vmem:[#allocation2 + $0x170] sm:$0xff] %vm1251_vm3, %v1152_v6  ;;  %v7151_v6 = vld [vmem:[%s11865_s0 + $0x309] sm:$0xff] }
 0x247   :  { %1309 = vst.msk [vmem:[#allocation2 + $0x1c8] sm:$0xff] %vm1251_vm3, %v1174_v18  ;;  %v7153_v18 = vld [vmem:[%s11865_s0 + $0x321] sm:$0xff] }
 0x24a   :  { %1500 = vrot.lane.b32.xlu1 %v7120_v7, %s7620_s28  ;;  %1498 = vrot.lane.b32.xlu0 %v7119_v16, %s7620_s28 }
 0x24b   :  { %1502 = vrot.lane.b32.xlu2 %v7121_v11, %s7620_s28  ;;  %v7152_v11 = vld [vmem:[%s11865_s0 + $0x319] sm:$0xff] }
 0x24c   :  { %v1160_v51 = vpop.permute.xlu1 %1159  ;;  %v1158_v56 = vpop.permute.xlu0 %1157 }
 0x24d   :  { %1302 = vst.msk [vmem:[#allocation2 + $0x190] sm:$0xff] %vm1251_vm3, %v1160_v51  ;;  %v1180_v38 = vpop.permute.xlu2 %1179 }
 0x24e   :  { %1301 = vst.msk [vmem:[#allocation2 + $0x188] sm:$0xff] %vm1251_vm3, %v1158_v56  ;;  %v7154_v56 = vld [vmem:[%s11865_s0 + $0x331] sm:$0xff] }
 0x24f   :  { %1312 = vst.msk [vmem:[#allocation2 + $0x1e0] sm:$0xff] %vm1251_vm3, %v1180_v38  ;;  %v7156_v38 = vld [vmem:[%s11865_s0 + $0x1a] sm:$0xff] }
 0x252   :  { %1506 = vrot.lane.b32.xlu1 %v7123_v55, %s7620_s28  ;;  %1504 = vrot.lane.b32.xlu0 %v7122_v33, %s7620_s28 }
 0x253   :  { %1508 = vrot.lane.b32.xlu2 %v7124_v39, %s7620_s28  ;;  %v7155_v39 = vld [vmem:[%s11865_s0 + $0x339] sm:$0xff] }
 0x254   :  { %v1166_v45 = vpop.permute.xlu1 %1165  ;;  %v1164_v46 = vpop.permute.xlu0 %1163 }
 0x255   :  { %1305 = vst.msk [vmem:[#allocation2 + $0x1a8] sm:$0xff] %vm1251_vm3, %v1166_v45  ;;  %v1186_v53 = vpop.permute.xlu2 %1185 }
 0x256   :  { %1304 = vst.msk [vmem:[#allocation2 + $0x1a0] sm:$0xff] %vm1251_vm3, %v1164_v46  ;;  %v7157_v46 = vld [vmem:[%s11865_s0 + $0x22] sm:$0xff] }
 0x257   :  { %1315 = vst.msk [vmem:[#allocation2 + $0x1f8] sm:$0xff] %vm1251_vm3, %v1186_v53  ;;  %v7159_v53 = vld [vmem:[%s11865_s0 + $0x3a] sm:$0xff] }
 0x25a   :  { %1512 = vrot.lane.b32.xlu1 %v7126_v47, %s7620_s28  ;;  %1510 = vrot.lane.b32.xlu0 %v7125_v52, %s7620_s28 }
 0x25b   :  { %1514 = vrot.lane.b32.xlu2 %v7127_v54, %s7620_s28  ;;  %v7158_v54 = vld [vmem:[%s11865_s0 + $0x32] sm:$0xff] }
 0x25c   :  { %v1172_v59 = vpop.permute.xlu1 %1171  ;;  %v1170_v60 = vpop.permute.xlu0 %1169 }
 0x25d   :  { %1308 = vst.msk [vmem:[#allocation2 + $0x1c0] sm:$0xff] %vm1251_vm3, %v1172_v59  ;;  %v1449_v5 = vpop.permute.xlu2 %1448 }
 0x25e   :  { %1307 = vst.msk [vmem:[#allocation2 + $0x1b8] sm:$0xff] %vm1251_vm3, %v1170_v60  ;;  %v7160_v60 = vld [vmem:[%s11865_s0 + $0x4a] sm:$0xff] }
 0x25f   :  { %1639 = vst.msk [vmem:[#allocation2 + $0x10] sm:$0xff] %vm1636_vm4, %v1449_v5  ;;  %v7162_v5 = vld [vmem:[%s11865_s0 + $0x62] sm:$0xff] }
 0x262   :  { %1518 = vrot.lane.b32.xlu1 %v7129_v63, %s7620_s28  ;;  %1516 = vrot.lane.b32.xlu0 %v7128_v4, %s7620_s28 }
 0x263   :  { %1520 = vrot.lane.b32.xlu2 %v7130_v8, %s7620_s28  ;;  %v7161_v8 = vld [vmem:[%s11865_s0 + $0x52] sm:$0xff] }
 0x264   :  { %v1178_v13 = vpop.permute.xlu1 %1177  ;;  %v1176_v14 = vpop.permute.xlu0 %1175 }
 0x265   :  { %1311 = vst.msk [vmem:[#allocation2 + $0x1d8] sm:$0xff] %vm1251_vm3, %v1178_v13  ;;  %v1455_v23 = vpop.permute.xlu2 %1454 }
 0x266   :  { %1310 = vst.msk [vmem:[#allocation2 + $0x1d0] sm:$0xff] %vm1251_vm3, %v1176_v14  ;;  %v7163_v14 = vld [vmem:[%s11865_s0 + $0x6a] sm:$0xff] }
 0x267   :  { %1642 = vst.msk [vmem:[#allocation2 + $0x28] sm:$0xff] %vm1636_vm4, %v1455_v23  ;;  %v7165_v23 = vld [vmem:[%s11865_s0 + $0x82] sm:$0xff] }
 0x26a   :  { %1524 = vrot.lane.b32.xlu1 %v7132_v17, %s7620_s28  ;;  %1522 = vrot.lane.b32.xlu0 %v7131_v22, %s7620_s28 }
 0x26b   :  { %1526 = vrot.lane.b32.xlu2 %v7133_v26, %s7620_s28  ;;  %v7164_v26 = vld [vmem:[%s11865_s0 + $0x7a] sm:$0xff] }
 0x26c   :  { %v1184_v31 = vpop.permute.xlu1 %1183  ;;  %v1182_v32 = vpop.permute.xlu0 %1181 }
 0x26d   :  { %1314 = vst.msk [vmem:[#allocation2 + $0x1f0] sm:$0xff] %vm1251_vm3, %v1184_v31  ;;  %v1461_v44 = vpop.permute.xlu2 %1460 }
 0x26e   :  { %1313 = vst.msk [vmem:[#allocation2 + $0x1e8] sm:$0xff] %vm1251_vm3, %v1182_v32  ;;  %v7166_v32 = vld [vmem:[%s11865_s0 + $0x92] sm:$0xff]  ;;  %vm4251_vm3 = vcmask 523712  }
 0x26f   :  { %1645 = vst.msk [vmem:[#allocation2 + $0x40] sm:$0xff] %vm1636_vm4, %v1461_v44  ;;  %v7168_v44 = vld [vmem:[%s11865_s0 + $0xaa] sm:$0xff] }
 0x272   :  { %1530 = vrot.lane.b32.xlu1 %v7135_v36, %s7620_s28  ;;  %1528 = vrot.lane.b32.xlu0 %v7134_v43, %s7620_s28 }
 0x273   :  { %1532 = vrot.lane.b32.xlu2 %v7136_v50, %s7620_s28  ;;  %v7167_v50 = vld [vmem:[%s11865_s0 + $0x9a] sm:$0xff] }
 0x274   :  { %v1447_v20 = vpop.permute.xlu1 %1446  ;;  %v1445_v58 = vpop.permute.xlu0 %1444 }
 0x275   :  { %1638 = vst.msk [vmem:[#allocation2 + $0x8] sm:$0xff] %vm1636_vm4, %v1447_v20  ;;  %v1467_v29 = vpop.permute.xlu2 %1466 }
 0x276   :  { %1637 = vst.msk [vmem:[#allocation2] sm:$0xff] %vm1636_vm4, %v1445_v58  ;;  %v7169_v58 = vld [vmem:[%s11865_s0 + $0xb2] sm:$0xff] }
 0x277   :  { %1648 = vst.msk [vmem:[#allocation2 + $0x58] sm:$0xff] %vm1636_vm4, %v1467_v29  ;;  %v7171_v29 = vld [vmem:[%s11865_s0 + $0xca] sm:$0xff] }
 0x27a   :  { %1536 = vrot.lane.b32.xlu1 %v7138_v61, %s7620_s28  ;;  %1534 = vrot.lane.b32.xlu0 %v7137_v1, %s7620_s28 }
 0x27b   :  { %1538 = vrot.lane.b32.xlu2 %v7139_v35, %s7620_s28  ;;  %v7170_v35 = vld [vmem:[%s11865_s0 + $0xc2] sm:$0xff] }
 0x27c   :  { %v1453_v10 = vpop.permute.xlu1 %1452  ;;  %v1451_v49 = vpop.permute.xlu0 %1450 }
 0x27d   :  { %1641 = vst.msk [vmem:[#allocation2 + $0x20] sm:$0xff] %vm1636_vm4, %v1453_v10  ;;  %v1473_v28 = vpop.permute.xlu2 %1472 }
 0x27e   :  { %1640 = vst.msk [vmem:[#allocation2 + $0x18] sm:$0xff] %vm1636_vm4, %v1451_v49  ;;  %v7172_v49 = vld [vmem:[%s11865_s0 + $0xda] sm:$0xff] }
 0x27f   :  { %1651 = vst.msk [vmem:[#allocation2 + $0x70] sm:$0xff] %vm1636_vm4, %v1473_v28  ;;  %v7174_v28 = vld [vmem:[%s11865_s0 + $0xf2] sm:$0xff] }
 0x282   :  { %1542 = vrot.lane.b32.xlu1 %v7141_v21, %s7620_s28  ;;  %1540 = vrot.lane.b32.xlu0 %v7140_v24, %s7620_s28 }
 0x283   :  { %1544 = vrot.lane.b32.xlu2 %v7142_v37, %s7620_s28  ;;  %v7173_v37 = vld [vmem:[%s11865_s0 + $0xe2] sm:$0xff] }
 0x284   :  { %v1459_v40 = vpop.permute.xlu1 %1458  ;;  %v1457_v48 = vpop.permute.xlu0 %1456 }
 0x285   :  { %1644 = vst.msk [vmem:[#allocation2 + $0x38] sm:$0xff] %vm1636_vm4, %v1459_v40  ;;  %v1479_v3 = vpop.permute.xlu2 %1478 }
 0x286   :  { %1643 = vst.msk [vmem:[#allocation2 + $0x30] sm:$0xff] %vm1636_vm4, %v1457_v48  ;;  %v7175_v48 = vld [vmem:[%s11865_s0 + $0xfa] sm:$0xff] }
 0x287   :  { %1654 = vst.msk [vmem:[#allocation2 + $0x88] sm:$0xff] %vm1636_vm4, %v1479_v3  ;;  %v7177_v3 = vld [vmem:[%s11865_s0 + $0x112] sm:$0xff] }
 0x28a   :  { %1548 = vrot.lane.b32.xlu1 %v7144_v57, %s7620_s28  ;;  %1546 = vrot.lane.b32.xlu0 %v7143_v62, %s7620_s28 }
 0x28b   :  { %1550 = vrot.lane.b32.xlu2 %v7145_v12, %s7620_s28  ;;  %v7176_v12 = vld [vmem:[%s11865_s0 + $0x10a] sm:$0xff] }
 0x28c   :  { %v1465_v15 = vpop.permute.xlu1 %1464  ;;  %v1463_v19 = vpop.permute.xlu0 %1462 }
 0x28d   :  { %1647 = vst.msk [vmem:[#allocation2 + $0x50] sm:$0xff] %vm1636_vm4, %v1465_v15  ;;  %v1485_v42 = vpop.permute.xlu2 %1484 }
 0x28e   :  { %1646 = vst.msk [vmem:[#allocation2 + $0x48] sm:$0xff] %vm1636_vm4, %v1463_v19  ;;  %v7178_v19 = vld [vmem:[%s11865_s0 + $0x122] sm:$0xff] }
 0x28f   :  { %1657 = vst.msk [vmem:[#allocation2 + $0xa0] sm:$0xff] %vm1636_vm4, %v1485_v42  ;;  %v7180_v42 = vld [vmem:[%s11865_s0 + $0x13a] sm:$0xff] }
 0x292   :  { %1554 = vrot.lane.b32.xlu1 %v7147_v30, %s7620_s28  ;;  %1552 = vrot.lane.b32.xlu0 %v7146_v34, %s7620_s28 }
 0x293   :  { %1556 = vrot.lane.b32.xlu2 %v7148_v0, %s7620_s28  ;;  %v7179_v0 = vld [vmem:[%s11865_s0 + $0x12a] sm:$0xff] }
 0x294   :  { %v1471_v2 = vpop.permute.xlu1 %1470  ;;  %v1469_v9 = vpop.permute.xlu0 %1468 }
 0x295   :  { %1650 = vst.msk [vmem:[#allocation2 + $0x68] sm:$0xff] %vm1636_vm4, %v1471_v2  ;;  %v1491_v41 = vpop.permute.xlu2 %1490 }
 0x296   :  { %1649 = vst.msk [vmem:[#allocation2 + $0x60] sm:$0xff] %vm1636_vm4, %v1469_v9  ;;  %v7181_v9 = vld [vmem:[%s11865_s0 + $0x142] sm:$0xff] }
 0x297   :  { %1660 = vst.msk [vmem:[#allocation2 + $0xb8] sm:$0xff] %vm1636_vm4, %v1491_v41  ;;  %v7183_v41 = vld [vmem:[%s11865_s0 + $0x15a] sm:$0xff] }
 0x29a   :  { %1560 = vrot.lane.b32.xlu1 %v7150_v25, %s7620_s28  ;;  %1558 = vrot.lane.b32.xlu0 %v7149_v27, %s7620_s28 }
 0x29b   :  { %1562 = vrot.lane.b32.xlu2 %v7151_v6, %s7620_s28  ;;  %v7182_v6 = vld [vmem:[%s11865_s0 + $0x152] sm:$0xff] }
 0x29c   :  { %v1477_v7 = vpop.permute.xlu1 %1476  ;;  %v1475_v16 = vpop.permute.xlu0 %1474 }
 0x29d   :  { %1653 = vst.msk [vmem:[#allocation2 + $0x80] sm:$0xff] %vm1636_vm4, %v1477_v7  ;;  %v1497_v51 = vpop.permute.xlu2 %1496 }
 0x29e   :  { %1652 = vst.msk [vmem:[#allocation2 + $0x78] sm:$0xff] %vm1636_vm4, %v1475_v16  ;;  %v7184_v16 = vld [vmem:[%s11865_s0 + $0x16a] sm:$0xff] }
 0x29f   :  { %1663 = vst.msk [vmem:[#allocation2 + $0xd0] sm:$0xff] %vm1636_vm4, %v1497_v51  ;;  %v7186_v51 = vld [vmem:[%s11865_s0 + $0x182] sm:$0xff] }
 0x2a2   :  { %1566 = vrot.lane.b32.xlu1 %v7153_v18, %s7620_s28  ;;  %1564 = vrot.lane.b32.xlu0 %v7152_v11, %s7620_s28 }
 0x2a3   :  { %1568 = vrot.lane.b32.xlu2 %v7154_v56, %s7620_s28  ;;  %v7185_v56 = vld [vmem:[%s11865_s0 + $0x172] sm:$0xff] }
 0x2a4   :  { %v1483_v55 = vpop.permute.xlu1 %1482  ;;  %v1481_v33 = vpop.permute.xlu0 %1480 }
 0x2a5   :  { %1656 = vst.msk [vmem:[#allocation2 + $0x98] sm:$0xff] %vm1636_vm4, %v1483_v55  ;;  %v1503_v45 = vpop.permute.xlu2 %1502 }
 0x2a6   :  { %1655 = vst.msk [vmem:[#allocation2 + $0x90] sm:$0xff] %vm1636_vm4, %v1481_v33  ;;  %v7187_v33 = vld [vmem:[%s11865_s0 + $0x18a] sm:$0xff] }
 0x2a7   :  { %1666 = vst.msk [vmem:[#allocation2 + $0xe8] sm:$0xff] %vm1636_vm4, %v1503_v45  ;;  %v7189_v45 = vld [vmem:[%s11865_s0 + $0x1d2] sm:$0xff] }
 0x2aa   :  { %1829 = vrot.lane.b32.xlu1 %v7156_v38, %s7621_s20  ;;  %1570 = vrot.lane.b32.xlu0 %v7155_v39, %s7620_s28 }
 0x2ab   :  { %1831 = vrot.lane.b32.xlu2 %v7157_v46, %s7621_s20  ;;  %v7188_v46 = vld [vmem:[%s11865_s0 + $0x1ca] sm:$0xff] }
 0x2ac   :  { %v1489_v47 = vpop.permute.xlu1 %1488  ;;  %v1487_v52 = vpop.permute.xlu0 %1486 }
 0x2ad   :  { %1659 = vst.msk [vmem:[#allocation2 + $0xb0] sm:$0xff] %vm1636_vm4, %v1489_v47  ;;  %v1509_v59 = vpop.permute.xlu2 %1508 }
 0x2ae   :  { %1658 = vst.msk [vmem:[#allocation2 + $0xa8] sm:$0xff] %vm1636_vm4, %v1487_v52  ;;  %v7190_v52 = vld [vmem:[%s11865_s0 + $0x1e2] sm:$0xff] }
 0x2af   :  { %1669 = vst.msk [vmem:[#allocation2 + $0x100] sm:$0xff] %vm1636_vm4, %v1509_v59  ;;  %v7192_v59 = vld [vmem:[%s11865_s0 + $0x1fa] sm:$0xff] }
 0x2b2   :  { %1835 = vrot.lane.b32.xlu1 %v7159_v53, %s7621_s20  ;;  %1833 = vrot.lane.b32.xlu0 %v7158_v54, %s7621_s20 }
 0x2b3   :  { %1837 = vrot.lane.b32.xlu2 %v7160_v60, %s7621_s20  ;;  %v7191_v60 = vld [vmem:[%s11865_s0 + $0x1ea] sm:$0xff] }
 0x2b4   :  { %v1495_v63 = vpop.permute.xlu1 %1494  ;;  %v1493_v4 = vpop.permute.xlu0 %1492 }
 0x2b5   :  { %1662 = vst.msk [vmem:[#allocation2 + $0xc8] sm:$0xff] %vm1636_vm4, %v1495_v63  ;;  %v1515_v13 = vpop.permute.xlu2 %1514 }
 0x2b6   :  { %1661 = vst.msk [vmem:[#allocation2 + $0xc0] sm:$0xff] %vm1636_vm4, %v1493_v4  ;;  %v7193_v4 = vld [vmem:[%s11865_s0 + $0x202] sm:$0xff] }
 0x2b7   :  { %1672 = vst.msk [vmem:[#allocation2 + $0x118] sm:$0xff] %vm1636_vm4, %v1515_v13  ;;  %v7195_v13 = vld [vmem:[%s11865_s0 + $0x21a] sm:$0xff] }
 0x2ba   :  { %1841 = vrot.lane.b32.xlu1 %v7162_v5, %s7621_s20  ;;  %1839 = vrot.lane.b32.xlu0 %v7161_v8, %s7621_s20 }
 0x2bb   :  { %1843 = vrot.lane.b32.xlu2 %v7163_v14, %s7621_s20  ;;  %v7194_v14 = vld [vmem:[%s11865_s0 + $0x212] sm:$0xff] }
 0x2bc   :  { %v1501_v17 = vpop.permute.xlu1 %1500  ;;  %v1499_v22 = vpop.permute.xlu0 %1498 }
 0x2bd   :  { %1665 = vst.msk [vmem:[#allocation2 + $0xe0] sm:$0xff] %vm1636_vm4, %v1501_v17  ;;  %v1521_v31 = vpop.permute.xlu2 %1520 }
 0x2be   :  { %1664 = vst.msk [vmem:[#allocation2 + $0xd8] sm:$0xff] %vm1636_vm4, %v1499_v22  ;;  %v7196_v22 = vld [vmem:[%s11865_s0 + $0x22a] sm:$0xff] }
 0x2bf   :  { %1675 = vst.msk [vmem:[#allocation2 + $0x130] sm:$0xff] %vm1636_vm4, %v1521_v31  ;;  %v7198_v31 = vld [vmem:[%s11865_s0 + $0x242] sm:$0xff] }
 0x2c2   :  { %1847 = vrot.lane.b32.xlu1 %v7165_v23, %s7621_s20  ;;  %1845 = vrot.lane.b32.xlu0 %v7164_v26, %s7621_s20 }
 0x2c3   :  { %1849 = vrot.lane.b32.xlu2 %v7166_v32, %s7621_s20  ;;  %v7197_v32 = vld [vmem:[%s11865_s0 + $0x232] sm:$0xff] }
 0x2c4   :  { %v1507_v36 = vpop.permute.xlu1 %1506  ;;  %v1505_v43 = vpop.permute.xlu0 %1504 }
 0x2c5   :  { %1668 = vst.msk [vmem:[#allocation2 + $0xf8] sm:$0xff] %vm1636_vm4, %v1507_v36  ;;  %v1527_v20 = vpop.permute.xlu2 %1526 }
 0x2c6   :  { %1667 = vst.msk [vmem:[#allocation2 + $0xf0] sm:$0xff] %vm1636_vm4, %v1505_v43  ;;  %v7199_v43 = vld [vmem:[%s11865_s0 + $0x24a] sm:$0xff] }
 0x2c7   :  { %1678 = vst.msk [vmem:[#allocation2 + $0x148] sm:$0xff] %vm1636_vm4, %v1527_v20  ;;  %v7201_v20 = vld [vmem:[%s11865_s0 + $0x262] sm:$0xff] }
 0x2ca   :  { %1853 = vrot.lane.b32.xlu1 %v7168_v44, %s7621_s20  ;;  %1851 = vrot.lane.b32.xlu0 %v7167_v50, %s7621_s20 }
 0x2cb   :  { %1855 = vrot.lane.b32.xlu2 %v7169_v58, %s7621_s20  ;;  %v7200_v58 = vld [vmem:[%s11865_s0 + $0x25a] sm:$0xff] }
 0x2cc   :  { %v1513_v61 = vpop.permute.xlu1 %1512  ;;  %v1511_v1 = vpop.permute.xlu0 %1510 }
 0x2cd   :  { %1671 = vst.msk [vmem:[#allocation2 + $0x110] sm:$0xff] %vm1636_vm4, %v1513_v61  ;;  %v1533_v10 = vpop.permute.xlu2 %1532 }
 0x2ce   :  { %1670 = vst.msk [vmem:[#allocation2 + $0x108] sm:$0xff] %vm1636_vm4, %v1511_v1  ;;  %v7202_v1 = vld [vmem:[%s11865_s0 + $0x272] sm:$0xff] }
 0x2cf   :  { %1681 = vst.msk [vmem:[#allocation2 + $0x160] sm:$0xff] %vm1636_vm4, %v1533_v10  ;;  %v7204_v10 = vld [vmem:[%s11865_s0 + $0x28a] sm:$0xff] }
 0x2d2   :  { %1859 = vrot.lane.b32.xlu1 %v7171_v29, %s7621_s20  ;;  %1857 = vrot.lane.b32.xlu0 %v7170_v35, %s7621_s20 }
 0x2d3   :  { %1861 = vrot.lane.b32.xlu2 %v7172_v49, %s7621_s20  ;;  %v7203_v49 = vld [vmem:[%s11865_s0 + $0x27a] sm:$0xff] }
 0x2d4   :  { %v1519_v21 = vpop.permute.xlu1 %1518  ;;  %v1517_v24 = vpop.permute.xlu0 %1516 }
 0x2d5   :  { %1674 = vst.msk [vmem:[#allocation2 + $0x128] sm:$0xff] %vm1636_vm4, %v1519_v21  ;;  %v1539_v40 = vpop.permute.xlu2 %1538 }
 0x2d6   :  { %1673 = vst.msk [vmem:[#allocation2 + $0x120] sm:$0xff] %vm1636_vm4, %v1517_v24  ;;  %v7205_v24 = vld [vmem:[%s11865_s0 + $0x292] sm:$0xff] }
 0x2d7   :  { %1684 = vst.msk [vmem:[#allocation2 + $0x178] sm:$0xff] %vm1636_vm4, %v1539_v40  ;;  %v7207_v40 = vld [vmem:[%s11865_s0 + $0x2aa] sm:$0xff] }
 0x2da   :  { %1865 = vrot.lane.b32.xlu1 %v7174_v28, %s7621_s20  ;;  %1863 = vrot.lane.b32.xlu0 %v7173_v37, %s7621_s20 }
 0x2db   :  { %1867 = vrot.lane.b32.xlu2 %v7175_v48, %s7621_s20  ;;  %v7206_v48 = vld [vmem:[%s11865_s0 + $0x2a2] sm:$0xff] }
 0x2dc   :  { %v1525_v57 = vpop.permute.xlu1 %1524  ;;  %v1523_v62 = vpop.permute.xlu0 %1522 }
 0x2dd   :  { %1677 = vst.msk [vmem:[#allocation2 + $0x140] sm:$0xff] %vm1636_vm4, %v1525_v57  ;;  %v1545_v15 = vpop.permute.xlu2 %1544 }
 0x2de   :  { %1676 = vst.msk [vmem:[#allocation2 + $0x138] sm:$0xff] %vm1636_vm4, %v1523_v62  ;;  %v7208_v62 = vld [vmem:[%s11865_s0 + $0x2ba] sm:$0xff] }
 0x2df   :  { %1687 = vst.msk [vmem:[#allocation2 + $0x190] sm:$0xff] %vm1636_vm4, %v1545_v15  ;;  %v7210_v15 = vld [vmem:[%s11865_s0 + $0x2d2] sm:$0xff] }
 0x2e2   :  { %1871 = vrot.lane.b32.xlu1 %v7177_v3, %s7621_s20  ;;  %1869 = vrot.lane.b32.xlu0 %v7176_v12, %s7621_s20 }
 0x2e3   :  { %1873 = vrot.lane.b32.xlu2 %v7178_v19, %s7621_s20  ;;  %v7209_v19 = vld [vmem:[%s11865_s0 + $0x2c2] sm:$0xff] }
 0x2e4   :  { %v1531_v30 = vpop.permute.xlu1 %1530  ;;  %v1529_v34 = vpop.permute.xlu0 %1528 }
 0x2e5   :  { %1680 = vst.msk [vmem:[#allocation2 + $0x158] sm:$0xff] %vm1636_vm4, %v1531_v30  ;;  %v1551_v2 = vpop.permute.xlu2 %1550 }
 0x2e6   :  { %1679 = vst.msk [vmem:[#allocation2 + $0x150] sm:$0xff] %vm1636_vm4, %v1529_v34  ;;  %v7211_v34 = vld [vmem:[%s11865_s0 + $0x2da] sm:$0xff] }
 0x2e7   :  { %1690 = vst.msk [vmem:[#allocation2 + $0x1a8] sm:$0xff] %vm1636_vm4, %v1551_v2  ;;  %v7213_v2 = vld [vmem:[%s11865_s0 + $0x2f2] sm:$0xff] }
 0x2ea   :  { %1877 = vrot.lane.b32.xlu1 %v7180_v42, %s7621_s20  ;;  %1875 = vrot.lane.b32.xlu0 %v7179_v0, %s7621_s20 }
 0x2eb   :  { %1879 = vrot.lane.b32.xlu2 %v7181_v9, %s7621_s20  ;;  %v7212_v9 = vld [vmem:[%s11865_s0 + $0x2ea] sm:$0xff] }
 0x2ec   :  { %v1537_v25 = vpop.permute.xlu1 %1536  ;;  %v1535_v27 = vpop.permute.xlu0 %1534 }
 0x2ed   :  { %1683 = vst.msk [vmem:[#allocation2 + $0x170] sm:$0xff] %vm1636_vm4, %v1537_v25  ;;  %v1557_v7 = vpop.permute.xlu2 %1556 }
 0x2ee   :  { %1682 = vst.msk [vmem:[#allocation2 + $0x168] sm:$0xff] %vm1636_vm4, %v1535_v27  ;;  %v7214_v27 = vld [vmem:[%s11865_s0 + $0x302] sm:$0xff] }
 0x2ef   :  { %1693 = vst.msk [vmem:[#allocation2 + $0x1c0] sm:$0xff] %vm1636_vm4, %v1557_v7  ;;  %v7216_v7 = vld [vmem:[%s11865_s0 + $0x31a] sm:$0xff] }
 0x2f2   :  { %1883 = vrot.lane.b32.xlu1 %v7183_v41, %s7621_s20  ;;  %1881 = vrot.lane.b32.xlu0 %v7182_v6, %s7621_s20 }
 0x2f3   :  { %1885 = vrot.lane.b32.xlu2 %v7184_v16, %s7621_s20  ;;  %v7215_v16 = vld [vmem:[%s11865_s0 + $0x30a] sm:$0xff] }
 0x2f4   :  { %v1543_v18 = vpop.permute.xlu1 %1542  ;;  %v1541_v11 = vpop.permute.xlu0 %1540 }
 0x2f5   :  { %1686 = vst.msk [vmem:[#allocation2 + $0x188] sm:$0xff] %vm1636_vm4, %v1543_v18  ;;  %v1563_v55 = vpop.permute.xlu2 %1562 }
 0x2f6   :  { %1685 = vst.msk [vmem:[#allocation2 + $0x180] sm:$0xff] %vm1636_vm4, %v1541_v11  ;;  %v7217_v11 = vld [vmem:[%s11865_s0 + $0x322] sm:$0xff] }
 0x2f7   :  { %1696 = vst.msk [vmem:[#allocation2 + $0x1d8] sm:$0xff] %vm1636_vm4, %v1563_v55  ;;  %v7219_v55 = vld [vmem:[%s11865_s0 + $0x33a] sm:$0xff] }
 0x2fa   :  { %1889 = vrot.lane.b32.xlu1 %v7186_v51, %s7621_s20  ;;  %1887 = vrot.lane.b32.xlu0 %v7185_v56, %s7621_s20 }
 0x2fb   :  { %1891 = vrot.lane.b32.xlu2 %v7187_v33, %s7621_s20  ;;  %v7218_v33 = vld [vmem:[%s11865_s0 + $0x332] sm:$0xff] }
 0x2fc   :  { %v1549_v38 = vpop.permute.xlu1 %1548  ;;  %v1547_v39 = vpop.permute.xlu0 %1546 }
 0x2fd   :  { %1689 = vst.msk [vmem:[#allocation2 + $0x1a0] sm:$0xff] %vm1636_vm4, %v1549_v38  ;;  %v1569_v47 = vpop.permute.xlu2 %1568 }
 0x2fe   :  { %1688 = vst.msk [vmem:[#allocation2 + $0x198] sm:$0xff] %vm1636_vm4, %v1547_v39  ;;  %v7220_v39 = vld [vmem:[%s11865_s0 + $0x30] sm:$0xff] }
 0x2ff   :  { %1699 = vst.msk [vmem:[#allocation2 + $0x1f0] sm:$0xff] %vm1636_vm4, %v1569_v47  ;;  %v7222_v47 = vld [vmem:[%s11865_s0 + $0x48] sm:$0xff] }
 0x302   :  { %1895 = vrot.lane.b32.xlu1 %v7189_v45, %s7621_s20  ;;  %1893 = vrot.lane.b32.xlu0 %v7188_v46, %s7621_s20 }
 0x303   :  { %1897 = vrot.lane.b32.xlu2 %v7190_v52, %s7621_s20  ;;  %v7221_v52 = vld [vmem:[%s11865_s0 + $0x38] sm:$0xff] }
 0x304   :  { %v1555_v53 = vpop.permute.xlu1 %1554  ;;  %v1553_v54 = vpop.permute.xlu0 %1552 }
 0x305   :  { %1692 = vst.msk [vmem:[#allocation2 + $0x1b8] sm:$0xff] %vm1636_vm4, %v1555_v53  ;;  %v1832_v63 = vpop.permute.xlu2 %1831 }
 0x306   :  { %1691 = vst.msk [vmem:[#allocation2 + $0x1b0] sm:$0xff] %vm1636_vm4, %v1553_v54  ;;  %v7223_v54 = vld [vmem:[%s11865_s0 + $0x50] sm:$0xff] }
 0x307   :  { %2023 = vst.msk [vmem:[#allocation2 + $0x8] sm:$0xff] %vm2021_vm5, %v1832_v63  ;;  %v7225_v63 = vld [vmem:[%s11865_s0 + $0x68] sm:$0xff] }
 0x30a   :  { %1901 = vrot.lane.b32.xlu1 %v7192_v59, %s7621_s20  ;;  %1899 = vrot.lane.b32.xlu0 %v7191_v60, %s7621_s20 }
 0x30b   :  { %1903 = vrot.lane.b32.xlu2 %v7193_v4, %s7621_s20  ;;  %v7224_v4 = vld [vmem:[%s11865_s0 + $0x60] sm:$0xff] }
 0x30c   :  { %v1561_v5 = vpop.permute.xlu1 %1560  ;;  %v1559_v8 = vpop.permute.xlu0 %1558 }
 0x30d   :  { %1695 = vst.msk [vmem:[#allocation2 + $0x1d0] sm:$0xff] %vm1636_vm4, %v1561_v5  ;;  %v1838_v17 = vpop.permute.xlu2 %1837 }
 0x30e   :  { %1694 = vst.msk [vmem:[#allocation2 + $0x1c8] sm:$0xff] %vm1636_vm4, %v1559_v8  ;;  %v7226_v8 = vld [vmem:[%s11865_s0 + $0x78] sm:$0xff] }
 0x30f   :  { %2026 = vst.msk [vmem:[#allocation2 + $0x20] sm:$0xff] %vm2021_vm5, %v1838_v17  ;;  %v7228_v17 = vld [vmem:[%s11865_s0 + $0x90] sm:$0xff] }
 0x312   :  { %1907 = vrot.lane.b32.xlu1 %v7195_v13, %s7621_s20  ;;  %1905 = vrot.lane.b32.xlu0 %v7194_v14, %s7621_s20 }
 0x313   :  { %1909 = vrot.lane.b32.xlu2 %v7196_v22, %s7621_s20  ;;  %v7227_v22 = vld [vmem:[%s11865_s0 + $0x80] sm:$0xff] }
 0x314   :  { %v1567_v23 = vpop.permute.xlu1 %1566  ;;  %v1565_v26 = vpop.permute.xlu0 %1564 }
 0x315   :  { %1698 = vst.msk [vmem:[#allocation2 + $0x1e8] sm:$0xff] %vm1636_vm4, %v1567_v23  ;;  %v1844_v36 = vpop.permute.xlu2 %1843 }
 0x316   :  { %1697 = vst.msk [vmem:[#allocation2 + $0x1e0] sm:$0xff] %vm1636_vm4, %v1565_v26  ;;  %v7229_v26 = vld [vmem:[%s11865_s0 + $0x98] sm:$0xff] }
 0x317   :  { %2029 = vst.msk [vmem:[#allocation2 + $0x38] sm:$0xff] %vm2021_vm5, %v1844_v36  ;;  %v7231_v36 = vld [vmem:[%s11865_s0 + $0xb0] sm:$0xff] }
 0x31a   :  { %1913 = vrot.lane.b32.xlu1 %v7198_v31, %s7621_s20  ;;  %1911 = vrot.lane.b32.xlu0 %v7197_v32, %s7621_s20 }
 0x31b   :  { %1915 = vrot.lane.b32.xlu2 %v7199_v43, %s7621_s20  ;;  %v7230_v43 = vld [vmem:[%s11865_s0 + $0xa8] sm:$0xff] }
 0x31c   :  { %v1830_v44 = vpop.permute.xlu1 %1829  ;;  %v1571_v50 = vpop.permute.xlu0 %1570 }
 0x31d   :  { %2022 = vst.msk [vmem:[#allocation2] sm:$0xff] %vm2021_vm5, %v1830_v44  ;;  %v1850_v61 = vpop.permute.xlu2 %1849 }
 0x31e   :  { %1700 = vst.msk [vmem:[#allocation2 + $0x1f8] sm:$0xff] %vm1636_vm4, %v1571_v50  ;;  %v7232_v50 = vld [vmem:[%s11865_s0 + $0xc0] sm:$0xff]  ;;  %vm4304_vm4 = vcmask 589312  }
 0x31f   :  { %2032 = vst.msk [vmem:[#allocation2 + $0x50] sm:$0xff] %vm2021_vm5, %v1850_v61  ;;  %v7234_v61 = vld [vmem:[%s11865_s0 + $0xd8] sm:$0xff] }
 0x322   :  { %1919 = vrot.lane.b32.xlu1 %v7201_v20, %s7621_s20  ;;  %1917 = vrot.lane.b32.xlu0 %v7200_v58, %s7621_s20 }
 0x323   :  { %1921 = vrot.lane.b32.xlu2 %v7202_v1, %s7621_s20  ;;  %v7233_v1 = vld [vmem:[%s11865_s0 + $0xc8] sm:$0xff] }
 0x324   :  { %v1836_v29 = vpop.permute.xlu1 %1835  ;;  %v1834_v35 = vpop.permute.xlu0 %1833 }
 0x325   :  { %2025 = vst.msk [vmem:[#allocation2 + $0x18] sm:$0xff] %vm2021_vm5, %v1836_v29  ;;  %v1856_v21 = vpop.permute.xlu2 %1855 }
 0x326   :  { %2024 = vst.msk [vmem:[#allocation2 + $0x10] sm:$0xff] %vm2021_vm5, %v1834_v35  ;;  %v7235_v35 = vld [vmem:[%s11865_s0 + $0xe0] sm:$0xff] }
 0x327   :  { %2035 = vst.msk [vmem:[#allocation2 + $0x68] sm:$0xff] %vm2021_vm5, %v1856_v21  ;;  %v7237_v21 = vld [vmem:[%s11865_s0 + $0xf8] sm:$0xff] }
 0x32a   :  { %1925 = vrot.lane.b32.xlu1 %v7204_v10, %s7621_s20  ;;  %1923 = vrot.lane.b32.xlu0 %v7203_v49, %s7621_s20 }
 0x32b   :  { %1927 = vrot.lane.b32.xlu2 %v7205_v24, %s7621_s20  ;;  %v7236_v24 = vld [vmem:[%s11865_s0 + $0xf0] sm:$0xff] }
 0x32c   :  { %v1842_v28 = vpop.permute.xlu1 %1841  ;;  %v1840_v37 = vpop.permute.xlu0 %1839 }
 0x32d   :  { %2028 = vst.msk [vmem:[#allocation2 + $0x30] sm:$0xff] %vm2021_vm5, %v1842_v28  ;;  %v1862_v57 = vpop.permute.xlu2 %1861 }
 0x32e   :  { %2027 = vst.msk [vmem:[#allocation2 + $0x28] sm:$0xff] %vm2021_vm5, %v1840_v37  ;;  %v7238_v37 = vld [vmem:[%s11865_s0 + $0x108] sm:$0xff] }
 0x32f   :  { %2038 = vst.msk [vmem:[#allocation2 + $0x80] sm:$0xff] %vm2021_vm5, %v1862_v57  ;;  %v7240_v57 = vld [vmem:[%s11865_s0 + $0x120] sm:$0xff] }
 0x332   :  { %1931 = vrot.lane.b32.xlu1 %v7207_v40, %s7621_s20  ;;  %1929 = vrot.lane.b32.xlu0 %v7206_v48, %s7621_s20 }
 0x333   :  { %1933 = vrot.lane.b32.xlu2 %v7208_v62, %s7621_s20  ;;  %v7239_v62 = vld [vmem:[%s11865_s0 + $0x110] sm:$0xff] }
 0x334   :  { %v1848_v3 = vpop.permute.xlu1 %1847  ;;  %v1846_v12 = vpop.permute.xlu0 %1845 }
 0x335   :  { %2031 = vst.msk [vmem:[#allocation2 + $0x48] sm:$0xff] %vm2021_vm5, %v1848_v3  ;;  %v1868_v30 = vpop.permute.xlu2 %1867 }
 0x336   :  { %2030 = vst.msk [vmem:[#allocation2 + $0x40] sm:$0xff] %vm2021_vm5, %v1846_v12  ;;  %v7241_v12 = vld [vmem:[%s11865_s0 + $0x128] sm:$0xff] }
 0x337   :  { %2041 = vst.msk [vmem:[#allocation2 + $0x98] sm:$0xff] %vm2021_vm5, %v1868_v30  ;;  %v7243_v30 = vld [vmem:[%s11865_s0 + $0x140] sm:$0xff] }
 0x33a   :  { %1937 = vrot.lane.b32.xlu1 %v7210_v15, %s7621_s20  ;;  %1935 = vrot.lane.b32.xlu0 %v7209_v19, %s7621_s20 }
 0x33b   :  { %1939 = vrot.lane.b32.xlu2 %v7211_v34, %s7621_s20  ;;  %v7242_v34 = vld [vmem:[%s11865_s0 + $0x138] sm:$0xff] }
 0x33c   :  { %v1854_v42 = vpop.permute.xlu1 %1853  ;;  %v1852_v0 = vpop.permute.xlu0 %1851 }
 0x33d   :  { %2034 = vst.msk [vmem:[#allocation2 + $0x60] sm:$0xff] %vm2021_vm5, %v1854_v42  ;;  %v1874_v25 = vpop.permute.xlu2 %1873 }
 0x33e   :  { %2033 = vst.msk [vmem:[#allocation2 + $0x58] sm:$0xff] %vm2021_vm5, %v1852_v0  ;;  %v7244_v0 = vld [vmem:[%s11865_s0 + $0x150] sm:$0xff] }
 0x33f   :  { %2044 = vst.msk [vmem:[#allocation2 + $0xb0] sm:$0xff] %vm2021_vm5, %v1874_v25  ;;  %v7246_v25 = vld [vmem:[%s11865_s0 + $0x168] sm:$0xff] }
 0x342   :  { %1943 = vrot.lane.b32.xlu1 %v7213_v2, %s7621_s20  ;;  %1941 = vrot.lane.b32.xlu0 %v7212_v9, %s7621_s20 }
 0x343   :  { %1945 = vrot.lane.b32.xlu2 %v7214_v27, %s7621_s20  ;;  %v7245_v27 = vld [vmem:[%s11865_s0 + $0x158] sm:$0xff] }
 0x344   :  { %v1860_v41 = vpop.permute.xlu1 %1859  ;;  %v1858_v6 = vpop.permute.xlu0 %1857 }
 0x345   :  { %2037 = vst.msk [vmem:[#allocation2 + $0x78] sm:$0xff] %vm2021_vm5, %v1860_v41  ;;  %v1880_v18 = vpop.permute.xlu2 %1879 }
 0x346   :  { %2036 = vst.msk [vmem:[#allocation2 + $0x70] sm:$0xff] %vm2021_vm5, %v1858_v6  ;;  %v7247_v6 = vld [vmem:[%s11865_s0 + $0x170] sm:$0xff] }
 0x347   :  { %2047 = vst.msk [vmem:[#allocation2 + $0xc8] sm:$0xff] %vm2021_vm5, %v1880_v18  ;;  %v7249_v18 = vld [vmem:[%s11865_s0 + $0x188] sm:$0xff] }
 0x34a   :  { %1949 = vrot.lane.b32.xlu1 %v7216_v7, %s7621_s20  ;;  %1947 = vrot.lane.b32.xlu0 %v7215_v16, %s7621_s20 }
 0x34b   :  { %1951 = vrot.lane.b32.xlu2 %v7217_v11, %s7621_s20  ;;  %v7248_v11 = vld [vmem:[%s11865_s0 + $0x180] sm:$0xff] }
 0x34c   :  { %v1866_v51 = vpop.permute.xlu1 %1865  ;;  %v1864_v56 = vpop.permute.xlu0 %1863 }
 0x34d   :  { %2040 = vst.msk [vmem:[#allocation2 + $0x90] sm:$0xff] %vm2021_vm5, %v1866_v51  ;;  %v1886_v38 = vpop.permute.xlu2 %1885 }
 0x34e   :  { %2039 = vst.msk [vmem:[#allocation2 + $0x88] sm:$0xff] %vm2021_vm5, %v1864_v56  ;;  %v7250_v56 = vld [vmem:[%s11865_s0 + $0x198] sm:$0xff] }
 0x34f   :  { %2050 = vst.msk [vmem:[#allocation2 + $0xe0] sm:$0xff] %vm2021_vm5, %v1886_v38  ;;  %v7252_v38 = vld [vmem:[%s11865_s0 + $0x1e0] sm:$0xff] }
 0x352   :  { %1955 = vrot.lane.b32.xlu1 %v7219_v55, %s7621_s20  ;;  %1953 = vrot.lane.b32.xlu0 %v7218_v33, %s7621_s20  ;;  %s7623_s20 = smov 28  }
 0x353   :  { %2215 = vrot.lane.b32.xlu2 %v7220_v39, %s7622_s23  ;;  %v7251_v39 = vld [vmem:[%s11865_s0 + $0x1a0] sm:$0xff] }
 0x354   :  { %v1872_v45 = vpop.permute.xlu1 %1871  ;;  %v1870_v46 = vpop.permute.xlu0 %1869 }
 0x355   :  { %2043 = vst.msk [vmem:[#allocation2 + $0xa8] sm:$0xff] %vm2021_vm5, %v1872_v45  ;;  %v1892_v53 = vpop.permute.xlu2 %1891 }
 0x356   :  { %2042 = vst.msk [vmem:[#allocation2 + $0xa0] sm:$0xff] %vm2021_vm5, %v1870_v46  ;;  %v7253_v46 = vld [vmem:[%s11865_s0 + $0x1e8] sm:$0xff] }
 0x357   :  { %2053 = vst.msk [vmem:[#allocation2 + $0xf8] sm:$0xff] %vm2021_vm5, %v1892_v53  ;;  %v7255_v53 = vld [vmem:[%s11865_s0 + $0x200] sm:$0xff] }
 0x35a   :  { %2219 = vrot.lane.b32.xlu1 %v7222_v47, %s7622_s23  ;;  %2217 = vrot.lane.b32.xlu0 %v7221_v52, %s7622_s23 }
 0x35b   :  { %2221 = vrot.lane.b32.xlu2 %v7223_v54, %s7622_s23  ;;  %v7254_v54 = vld [vmem:[%s11865_s0 + $0x1f8] sm:$0xff] }
 0x35c   :  { %v1878_v59 = vpop.permute.xlu1 %1877  ;;  %v1876_v60 = vpop.permute.xlu0 %1875 }
 0x35d   :  { %2046 = vst.msk [vmem:[#allocation2 + $0xc0] sm:$0xff] %vm2021_vm5, %v1878_v59  ;;  %v1898_v5 = vpop.permute.xlu2 %1897 }
 0x35e   :  { %2045 = vst.msk [vmem:[#allocation2 + $0xb8] sm:$0xff] %vm2021_vm5, %v1876_v60  ;;  %v7256_v60 = vld [vmem:[%s11865_s0 + $0x210] sm:$0xff] }
 0x35f   :  { %2056 = vst.msk [vmem:[#allocation2 + $0x110] sm:$0xff] %vm2021_vm5, %v1898_v5  ;;  %v7258_v5 = vld [vmem:[%s11865_s0 + $0x228] sm:$0xff] }
 0x362   :  { %2225 = vrot.lane.b32.xlu1 %v7225_v63, %s7622_s23  ;;  %2223 = vrot.lane.b32.xlu0 %v7224_v4, %s7622_s23 }
 0x363   :  { %2227 = vrot.lane.b32.xlu2 %v7226_v8, %s7622_s23  ;;  %v7257_v8 = vld [vmem:[%s11865_s0 + $0x218] sm:$0xff] }
 0x364   :  { %v1884_v13 = vpop.permute.xlu1 %1883  ;;  %v1882_v14 = vpop.permute.xlu0 %1881 }
 0x365   :  { %2049 = vst.msk [vmem:[#allocation2 + $0xd8] sm:$0xff] %vm2021_vm5, %v1884_v13  ;;  %v1904_v23 = vpop.permute.xlu2 %1903 }
 0x366   :  { %2048 = vst.msk [vmem:[#allocation2 + $0xd0] sm:$0xff] %vm2021_vm5, %v1882_v14  ;;  %v7259_v14 = vld [vmem:[%s11865_s0 + $0x230] sm:$0xff] }
 0x367   :  { %2059 = vst.msk [vmem:[#allocation2 + $0x128] sm:$0xff] %vm2021_vm5, %v1904_v23  ;;  %v7261_v23 = vld [vmem:[%s11865_s0 + $0x248] sm:$0xff] }
 0x36a   :  { %2231 = vrot.lane.b32.xlu1 %v7228_v17, %s7622_s23  ;;  %2229 = vrot.lane.b32.xlu0 %v7227_v22, %s7622_s23 }
 0x36b   :  { %2233 = vrot.lane.b32.xlu2 %v7229_v26, %s7622_s23  ;;  %v7260_v26 = vld [vmem:[%s11865_s0 + $0x240] sm:$0xff] }
 0x36c   :  { %v1890_v31 = vpop.permute.xlu1 %1889  ;;  %v1888_v32 = vpop.permute.xlu0 %1887 }
 0x36d   :  { %2052 = vst.msk [vmem:[#allocation2 + $0xf0] sm:$0xff] %vm2021_vm5, %v1890_v31  ;;  %v1910_v44 = vpop.permute.xlu2 %1909 }
 0x36e   :  { %2051 = vst.msk [vmem:[#allocation2 + $0xe8] sm:$0xff] %vm2021_vm5, %v1888_v32  ;;  %v7262_v32 = vld [vmem:[%s11865_s0 + $0x258] sm:$0xff] }
 0x36f   :  { %2062 = vst.msk [vmem:[#allocation2 + $0x140] sm:$0xff] %vm2021_vm5, %v1910_v44  ;;  %v7264_v44 = vld [vmem:[%s11865_s0 + $0x270] sm:$0xff] }
 0x372   :  { %2237 = vrot.lane.b32.xlu1 %v7231_v36, %s7622_s23  ;;  %2235 = vrot.lane.b32.xlu0 %v7230_v43, %s7622_s23 }
 0x373   :  { %2239 = vrot.lane.b32.xlu2 %v7232_v50, %s7622_s23  ;;  %v7263_v50 = vld [vmem:[%s11865_s0 + $0x260] sm:$0xff] }
 0x374   :  { %v1896_v20 = vpop.permute.xlu1 %1895  ;;  %v1894_v58 = vpop.permute.xlu0 %1893 }
 0x375   :  { %2055 = vst.msk [vmem:[#allocation2 + $0x108] sm:$0xff] %vm2021_vm5, %v1896_v20  ;;  %v1916_v29 = vpop.permute.xlu2 %1915 }
 0x376   :  { %2054 = vst.msk [vmem:[#allocation2 + $0x100] sm:$0xff] %vm2021_vm5, %v1894_v58  ;;  %v7265_v58 = vld [vmem:[%s11865_s0 + $0x278] sm:$0xff] }
 0x377   :  { %2065 = vst.msk [vmem:[#allocation2 + $0x158] sm:$0xff] %vm2021_vm5, %v1916_v29  ;;  %v7267_v29 = vld [vmem:[%s11865_s0 + $0x290] sm:$0xff] }
 0x37a   :  { %2243 = vrot.lane.b32.xlu1 %v7234_v61, %s7622_s23  ;;  %2241 = vrot.lane.b32.xlu0 %v7233_v1, %s7622_s23 }
 0x37b   :  { %2245 = vrot.lane.b32.xlu2 %v7235_v35, %s7622_s23  ;;  %v7266_v35 = vld [vmem:[%s11865_s0 + $0x288] sm:$0xff] }
 0x37c   :  { %v1902_v10 = vpop.permute.xlu1 %1901  ;;  %v1900_v49 = vpop.permute.xlu0 %1899 }
 0x37d   :  { %2058 = vst.msk [vmem:[#allocation2 + $0x120] sm:$0xff] %vm2021_vm5, %v1902_v10  ;;  %v1922_v28 = vpop.permute.xlu2 %1921 }
 0x37e   :  { %2057 = vst.msk [vmem:[#allocation2 + $0x118] sm:$0xff] %vm2021_vm5, %v1900_v49  ;;  %v7268_v49 = vld [vmem:[%s11865_s0 + $0x2a0] sm:$0xff] }
 0x37f   :  { %2068 = vst.msk [vmem:[#allocation2 + $0x170] sm:$0xff] %vm2021_vm5, %v1922_v28  ;;  %v7270_v28 = vld [vmem:[%s11865_s0 + $0x2b8] sm:$0xff] }
 0x382   :  { %2249 = vrot.lane.b32.xlu1 %v7237_v21, %s7622_s23  ;;  %2247 = vrot.lane.b32.xlu0 %v7236_v24, %s7622_s23 }
 0x383   :  { %2251 = vrot.lane.b32.xlu2 %v7238_v37, %s7622_s23  ;;  %v7269_v37 = vld [vmem:[%s11865_s0 + $0x2a8] sm:$0xff] }
 0x384   :  { %v1908_v40 = vpop.permute.xlu1 %1907  ;;  %v1906_v48 = vpop.permute.xlu0 %1905 }
 0x385   :  { %2061 = vst.msk [vmem:[#allocation2 + $0x138] sm:$0xff] %vm2021_vm5, %v1908_v40  ;;  %v1928_v3 = vpop.permute.xlu2 %1927 }
 0x386   :  { %2060 = vst.msk [vmem:[#allocation2 + $0x130] sm:$0xff] %vm2021_vm5, %v1906_v48  ;;  %v7271_v48 = vld [vmem:[%s11865_s0 + $0x2c0] sm:$0xff] }
 0x387   :  { %2071 = vst.msk [vmem:[#allocation2 + $0x188] sm:$0xff] %vm2021_vm5, %v1928_v3  ;;  %v7273_v3 = vld [vmem:[%s11865_s0 + $0x2d8] sm:$0xff] }
 0x38a   :  { %2255 = vrot.lane.b32.xlu1 %v7240_v57, %s7622_s23  ;;  %2253 = vrot.lane.b32.xlu0 %v7239_v62, %s7622_s23 }
 0x38b   :  { %2257 = vrot.lane.b32.xlu2 %v7241_v12, %s7622_s23  ;;  %v7272_v12 = vld [vmem:[%s11865_s0 + $0x2d0] sm:$0xff] }
 0x38c   :  { %v1914_v15 = vpop.permute.xlu1 %1913  ;;  %v1912_v19 = vpop.permute.xlu0 %1911 }
 0x38d   :  { %2064 = vst.msk [vmem:[#allocation2 + $0x150] sm:$0xff] %vm2021_vm5, %v1914_v15  ;;  %v1934_v42 = vpop.permute.xlu2 %1933 }
 0x38e   :  { %2063 = vst.msk [vmem:[#allocation2 + $0x148] sm:$0xff] %vm2021_vm5, %v1912_v19  ;;  %v7274_v19 = vld [vmem:[%s11865_s0 + $0x2e8] sm:$0xff] }
 0x38f   :  { %2074 = vst.msk [vmem:[#allocation2 + $0x1a0] sm:$0xff] %vm2021_vm5, %v1934_v42  ;;  %v7276_v42 = vld [vmem:[%s11865_s0 + $0x300] sm:$0xff] }
 0x392   :  { %2261 = vrot.lane.b32.xlu1 %v7243_v30, %s7622_s23  ;;  %2259 = vrot.lane.b32.xlu0 %v7242_v34, %s7622_s23 }
 0x393   :  { %2263 = vrot.lane.b32.xlu2 %v7244_v0, %s7622_s23  ;;  %v7275_v0 = vld [vmem:[%s11865_s0 + $0x2f0] sm:$0xff] }
 0x394   :  { %v1920_v2 = vpop.permute.xlu1 %1919  ;;  %v1918_v9 = vpop.permute.xlu0 %1917 }
 0x395   :  { %2067 = vst.msk [vmem:[#allocation2 + $0x168] sm:$0xff] %vm2021_vm5, %v1920_v2  ;;  %v1940_v41 = vpop.permute.xlu2 %1939 }
 0x396   :  { %2066 = vst.msk [vmem:[#allocation2 + $0x160] sm:$0xff] %vm2021_vm5, %v1918_v9  ;;  %v7277_v9 = vld [vmem:[%s11865_s0 + $0x308] sm:$0xff] }
 0x397   :  { %2077 = vst.msk [vmem:[#allocation2 + $0x1b8] sm:$0xff] %vm2021_vm5, %v1940_v41  ;;  %v7279_v41 = vld [vmem:[%s11865_s0 + $0x320] sm:$0xff] }
 0x39a   :  { %2267 = vrot.lane.b32.xlu1 %v7246_v25, %s7622_s23  ;;  %2265 = vrot.lane.b32.xlu0 %v7245_v27, %s7622_s23 }
 0x39b   :  { %2269 = vrot.lane.b32.xlu2 %v7247_v6, %s7622_s23  ;;  %v7278_v6 = vld [vmem:[%s11865_s0 + $0x318] sm:$0xff] }
 0x39c   :  { %v1926_v7 = vpop.permute.xlu1 %1925  ;;  %v1924_v16 = vpop.permute.xlu0 %1923 }
 0x39d   :  { %2070 = vst.msk [vmem:[#allocation2 + $0x180] sm:$0xff] %vm2021_vm5, %v1926_v7  ;;  %v1946_v51 = vpop.permute.xlu2 %1945 }
 0x39e   :  { %2069 = vst.msk [vmem:[#allocation2 + $0x178] sm:$0xff] %vm2021_vm5, %v1924_v16  ;;  %v7280_v16 = vld [vmem:[%s11865_s0 + $0x330] sm:$0xff] }
 0x39f   :  { %2080 = vst.msk [vmem:[#allocation2 + $0x1d0] sm:$0xff] %vm2021_vm5, %v1946_v51  ;;  %v7282_v51 = vld [vmem:[%s11865_s0 + $0x348] sm:$0xff] }
 0x3a2   :  { %2273 = vrot.lane.b32.xlu1 %v7249_v18, %s7622_s23  ;;  %2271 = vrot.lane.b32.xlu0 %v7248_v11, %s7622_s23 }
 0x3a3   :  { %2275 = vrot.lane.b32.xlu2 %v7250_v56, %s7622_s23  ;;  %v7281_v56 = vld [vmem:[%s11865_s0 + $0x338] sm:$0xff] }
 0x3a4   :  { %v1932_v55 = vpop.permute.xlu1 %1931  ;;  %v1930_v33 = vpop.permute.xlu0 %1929 }
 0x3a5   :  { %2073 = vst.msk [vmem:[#allocation2 + $0x198] sm:$0xff] %vm2021_vm5, %v1932_v55  ;;  %v1952_v45 = vpop.permute.xlu2 %1951 }
 0x3a6   :  { %2072 = vst.msk [vmem:[#allocation2 + $0x190] sm:$0xff] %vm2021_vm5, %v1930_v33  ;;  %v7283_v33 = vld [vmem:[%s11865_s0 + $0x350] sm:$0xff] }
 0x3a7   :  { %2083 = vst.msk [vmem:[#allocation2 + $0x1e8] sm:$0xff] %vm2021_vm5, %v1952_v45  ;;  %v7285_v45 = vld [vmem:[%s11865_s0 + $0x39] sm:$0xff] }
 0x3aa   :  { %2279 = vrot.lane.b32.xlu1 %v7252_v38, %s7622_s23  ;;  %2277 = vrot.lane.b32.xlu0 %v7251_v39, %s7622_s23 }
 0x3ab   :  { %2281 = vrot.lane.b32.xlu2 %v7253_v46, %s7622_s23  ;;  %v7284_v46 = vld [vmem:[%s11865_s0 + $0x31] sm:$0xff] }
 0x3ac   :  { %v1938_v47 = vpop.permute.xlu1 %1937  ;;  %v1936_v52 = vpop.permute.xlu0 %1935 }
 0x3ad   :  { %2076 = vst.msk [vmem:[#allocation2 + $0x1b0] sm:$0xff] %vm2021_vm5, %v1938_v47  ;;  %v2216_v59 = vpop.permute.xlu2 %2215 }
 0x3ae   :  { %2075 = vst.msk [vmem:[#allocation2 + $0x1a8] sm:$0xff] %vm2021_vm5, %v1936_v52  ;;  %v7286_v52 = vld [vmem:[%s11865_s0 + $0x49] sm:$0xff] }
 0x3af   :  { %2408 = vst.msk [vmem:[#allocation2] sm:$0xff] %vm2407_vm6, %v2216_v59  ;;  %v7288_v59 = vld [vmem:[%s11865_s0 + $0x61] sm:$0xff] }
 0x3b2   :  { %2285 = vrot.lane.b32.xlu1 %v7255_v53, %s7622_s23  ;;  %2283 = vrot.lane.b32.xlu0 %v7254_v54, %s7622_s23 }
 0x3b3   :  { %2287 = vrot.lane.b32.xlu2 %v7256_v60, %s7622_s23  ;;  %v7287_v60 = vld [vmem:[%s11865_s0 + $0x51] sm:$0xff] }
 0x3b4   :  { %v1944_v63 = vpop.permute.xlu1 %1943  ;;  %v1942_v4 = vpop.permute.xlu0 %1941 }
 0x3b5   :  { %2079 = vst.msk [vmem:[#allocation2 + $0x1c8] sm:$0xff] %vm2021_vm5, %v1944_v63  ;;  %v2222_v13 = vpop.permute.xlu2 %2221 }
 0x3b6   :  { %2078 = vst.msk [vmem:[#allocation2 + $0x1c0] sm:$0xff] %vm2021_vm5, %v1942_v4  ;;  %v7289_v4 = vld [vmem:[%s11865_s0 + $0x69] sm:$0xff] }
 0x3b7   :  { %2411 = vst.msk [vmem:[#allocation2 + $0x18] sm:$0xff] %vm2407_vm6, %v2222_v13  ;;  %v7291_v13 = vld [vmem:[%s11865_s0 + $0x81] sm:$0xff] }
 0x3ba   :  { %2291 = vrot.lane.b32.xlu1 %v7258_v5, %s7622_s23  ;;  %2289 = vrot.lane.b32.xlu0 %v7257_v8, %s7622_s23 }
 0x3bb   :  { %2293 = vrot.lane.b32.xlu2 %v7259_v14, %s7622_s23  ;;  %v7290_v14 = vld [vmem:[%s11865_s0 + $0x79] sm:$0xff] }
 0x3bc   :  { %v1950_v17 = vpop.permute.xlu1 %1949  ;;  %v1948_v22 = vpop.permute.xlu0 %1947 }
 0x3bd   :  { %2082 = vst.msk [vmem:[#allocation2 + $0x1e0] sm:$0xff] %vm2021_vm5, %v1950_v17  ;;  %v2228_v31 = vpop.permute.xlu2 %2227 }
 0x3be   :  { %2081 = vst.msk [vmem:[#allocation2 + $0x1d8] sm:$0xff] %vm2021_vm5, %v1948_v22  ;;  %v7292_v22 = vld [vmem:[%s11865_s0 + $0x91] sm:$0xff] }
 0x3bf   :  { %2414 = vst.msk [vmem:[#allocation2 + $0x30] sm:$0xff] %vm2407_vm6, %v2228_v31  ;;  %v7294_v31 = vld [vmem:[%s11865_s0 + $0xa9] sm:$0xff] }
 0x3c2   :  { %2297 = vrot.lane.b32.xlu1 %v7261_v23, %s7622_s23  ;;  %2295 = vrot.lane.b32.xlu0 %v7260_v26, %s7622_s23 }
 0x3c3   :  { %2299 = vrot.lane.b32.xlu2 %v7262_v32, %s7622_s23  ;;  %v7293_v32 = vld [vmem:[%s11865_s0 + $0x99] sm:$0xff] }
 0x3c4   :  { %v1956_v36 = vpop.permute.xlu1 %1955  ;;  %v1954_v43 = vpop.permute.xlu0 %1953 }
 0x3c5   :  { %2085 = vst.msk [vmem:[#allocation2 + $0x1f8] sm:$0xff] %vm2021_vm5, %v1956_v36  ;;  %v2234_v20 = vpop.permute.xlu2 %2233 }
 0x3c6   :  { %2084 = vst.msk [vmem:[#allocation2 + $0x1f0] sm:$0xff] %vm2021_vm5, %v1954_v43  ;;  %v7295_v43 = vld [vmem:[%s11865_s0 + $0xb1] sm:$0xff]  ;;  %vm4357_vm5 = vcmask 654912  }
 0x3c7   :  { %2417 = vst.msk [vmem:[#allocation2 + $0x48] sm:$0xff] %vm2407_vm6, %v2234_v20  ;;  %v7297_v20 = vld [vmem:[%s11865_s0 + $0xc9] sm:$0xff] }
 0x3ca   :  { %2303 = vrot.lane.b32.xlu1 %v7264_v44, %s7622_s23  ;;  %2301 = vrot.lane.b32.xlu0 %v7263_v50, %s7622_s23 }
 0x3cb   :  { %2305 = vrot.lane.b32.xlu2 %v7265_v58, %s7622_s23  ;;  %v7296_v58 = vld [vmem:[%s11865_s0 + $0xc1] sm:$0xff] }
 0x3cc   :  { %v2220_v61 = vpop.permute.xlu1 %2219  ;;  %v2218_v1 = vpop.permute.xlu0 %2217 }
 0x3cd   :  { %2410 = vst.msk [vmem:[#allocation2 + $0x10] sm:$0xff] %vm2407_vm6, %v2220_v61  ;;  %v2240_v10 = vpop.permute.xlu2 %2239 }
 0x3ce   :  { %2409 = vst.msk [vmem:[#allocation2 + $0x8] sm:$0xff] %vm2407_vm6, %v2218_v1  ;;  %v7298_v1 = vld [vmem:[%s11865_s0 + $0xd9] sm:$0xff] }
 0x3cf   :  { %2420 = vst.msk [vmem:[#allocation2 + $0x60] sm:$0xff] %vm2407_vm6, %v2240_v10  ;;  %v7300_v10 = vld [vmem:[%s11865_s0 + $0xf1] sm:$0xff] }
 0x3d2   :  { %2309 = vrot.lane.b32.xlu1 %v7267_v29, %s7622_s23  ;;  %2307 = vrot.lane.b32.xlu0 %v7266_v35, %s7622_s23 }
 0x3d3   :  { %2311 = vrot.lane.b32.xlu2 %v7268_v49, %s7622_s23  ;;  %v7299_v49 = vld [vmem:[%s11865_s0 + $0xe1] sm:$0xff] }
 0x3d4   :  { %v2226_v21 = vpop.permute.xlu1 %2225  ;;  %v2224_v24 = vpop.permute.xlu0 %2223 }
 0x3d5   :  { %2413 = vst.msk [vmem:[#allocation2 + $0x28] sm:$0xff] %vm2407_vm6, %v2226_v21  ;;  %v2246_v40 = vpop.permute.xlu2 %2245 }
 0x3d6   :  { %2412 = vst.msk [vmem:[#allocation2 + $0x20] sm:$0xff] %vm2407_vm6, %v2224_v24  ;;  %v7301_v24 = vld [vmem:[%s11865_s0 + $0xf9] sm:$0xff] }
 0x3d7   :  { %2423 = vst.msk [vmem:[#allocation2 + $0x78] sm:$0xff] %vm2407_vm6, %v2246_v40  ;;  %v7303_v40 = vld [vmem:[%s11865_s0 + $0x111] sm:$0xff] }
 0x3da   :  { %2315 = vrot.lane.b32.xlu1 %v7270_v28, %s7622_s23  ;;  %2313 = vrot.lane.b32.xlu0 %v7269_v37, %s7622_s23 }
 0x3db   :  { %2317 = vrot.lane.b32.xlu2 %v7271_v48, %s7622_s23  ;;  %v7302_v48 = vld [vmem:[%s11865_s0 + $0x109] sm:$0xff] }
 0x3dc   :  { %v2232_v57 = vpop.permute.xlu1 %2231  ;;  %v2230_v62 = vpop.permute.xlu0 %2229 }
 0x3dd   :  { %2416 = vst.msk [vmem:[#allocation2 + $0x40] sm:$0xff] %vm2407_vm6, %v2232_v57  ;;  %v2252_v15 = vpop.permute.xlu2 %2251 }
 0x3de   :  { %2415 = vst.msk [vmem:[#allocation2 + $0x38] sm:$0xff] %vm2407_vm6, %v2230_v62  ;;  %v7304_v62 = vld [vmem:[%s11865_s0 + $0x121] sm:$0xff] }
 0x3df   :  { %2426 = vst.msk [vmem:[#allocation2 + $0x90] sm:$0xff] %vm2407_vm6, %v2252_v15  ;;  %v7306_v15 = vld [vmem:[%s11865_s0 + $0x139] sm:$0xff] }
 0x3e2   :  { %2321 = vrot.lane.b32.xlu1 %v7273_v3, %s7622_s23  ;;  %2319 = vrot.lane.b32.xlu0 %v7272_v12, %s7622_s23 }
 0x3e3   :  { %2323 = vrot.lane.b32.xlu2 %v7274_v19, %s7622_s23  ;;  %v7305_v19 = vld [vmem:[%s11865_s0 + $0x129] sm:$0xff] }
 0x3e4   :  { %v2238_v30 = vpop.permute.xlu1 %2237  ;;  %v2236_v34 = vpop.permute.xlu0 %2235 }
 0x3e5   :  { %2419 = vst.msk [vmem:[#allocation2 + $0x58] sm:$0xff] %vm2407_vm6, %v2238_v30  ;;  %v2258_v2 = vpop.permute.xlu2 %2257 }
 0x3e6   :  { %2418 = vst.msk [vmem:[#allocation2 + $0x50] sm:$0xff] %vm2407_vm6, %v2236_v34  ;;  %v7307_v34 = vld [vmem:[%s11865_s0 + $0x141] sm:$0xff] }
 0x3e7   :  { %2429 = vst.msk [vmem:[#allocation2 + $0xa8] sm:$0xff] %vm2407_vm6, %v2258_v2  ;;  %v7309_v2 = vld [vmem:[%s11865_s0 + $0x159] sm:$0xff] }
 0x3ea   :  { %2327 = vrot.lane.b32.xlu1 %v7276_v42, %s7622_s23  ;;  %2325 = vrot.lane.b32.xlu0 %v7275_v0, %s7622_s23 }
 0x3eb   :  { %2329 = vrot.lane.b32.xlu2 %v7277_v9, %s7622_s23  ;;  %v7308_v9 = vld [vmem:[%s11865_s0 + $0x151] sm:$0xff] }
 0x3ec   :  { %v2244_v25 = vpop.permute.xlu1 %2243  ;;  %v2242_v27 = vpop.permute.xlu0 %2241 }
 0x3ed   :  { %2422 = vst.msk [vmem:[#allocation2 + $0x70] sm:$0xff] %vm2407_vm6, %v2244_v25  ;;  %v2264_v7 = vpop.permute.xlu2 %2263 }
 0x3ee   :  { %2421 = vst.msk [vmem:[#allocation2 + $0x68] sm:$0xff] %vm2407_vm6, %v2242_v27  ;;  %v7310_v27 = vld [vmem:[%s11865_s0 + $0x169] sm:$0xff] }
 0x3ef   :  { %2432 = vst.msk [vmem:[#allocation2 + $0xc0] sm:$0xff] %vm2407_vm6, %v2264_v7  ;;  %v7312_v7 = vld [vmem:[%s11865_s0 + $0x181] sm:$0xff] }
 0x3f2   :  { %2333 = vrot.lane.b32.xlu1 %v7279_v41, %s7622_s23  ;;  %2331 = vrot.lane.b32.xlu0 %v7278_v6, %s7622_s23 }
 0x3f3   :  { %2335 = vrot.lane.b32.xlu2 %v7280_v16, %s7622_s23  ;;  %v7311_v16 = vld [vmem:[%s11865_s0 + $0x171] sm:$0xff] }
 0x3f4   :  { %v2250_v18 = vpop.permute.xlu1 %2249  ;;  %v2248_v11 = vpop.permute.xlu0 %2247 }
 0x3f5   :  { %2425 = vst.msk [vmem:[#allocation2 + $0x88] sm:$0xff] %vm2407_vm6, %v2250_v18  ;;  %v2270_v55 = vpop.permute.xlu2 %2269 }
 0x3f6   :  { %2424 = vst.msk [vmem:[#allocation2 + $0x80] sm:$0xff] %vm2407_vm6, %v2248_v11  ;;  %v7313_v11 = vld [vmem:[%s11865_s0 + $0x189] sm:$0xff] }
 0x3f7   :  { %2435 = vst.msk [vmem:[#allocation2 + $0xd8] sm:$0xff] %vm2407_vm6, %v2270_v55  ;;  %v7315_v55 = vld [vmem:[%s11865_s0 + $0x1a1] sm:$0xff] }
 0x3fa   :  { %2339 = vrot.lane.b32.xlu1 %v7282_v51, %s7622_s23  ;;  %2337 = vrot.lane.b32.xlu0 %v7281_v56, %s7622_s23 }
 0x3fb   :  { %2341 = vrot.lane.b32.xlu2 %v7283_v33, %s7622_s23  ;;  %v7314_v33 = vld [vmem:[%s11865_s0 + $0x199] sm:$0xff] }
 0x3fc   :  { %v2256_v38 = vpop.permute.xlu1 %2255  ;;  %v2254_v39 = vpop.permute.xlu0 %2253 }
 0x3fd   :  { %2428 = vst.msk [vmem:[#allocation2 + $0xa0] sm:$0xff] %vm2407_vm6, %v2256_v38  ;;  %v2276_v47 = vpop.permute.xlu2 %2275 }
 0x3fe   :  { %2427 = vst.msk [vmem:[#allocation2 + $0x98] sm:$0xff] %vm2407_vm6, %v2254_v39  ;;  %v7316_v39 = vld [vmem:[%s11865_s0 + $0x1e1] sm:$0xff] }
 0x3ff   :  { %2438 = vst.msk [vmem:[#allocation2 + $0xf0] sm:$0xff] %vm2407_vm6, %v2276_v47  ;;  %v7318_v47 = vld [vmem:[%s11865_s0 + $0x1f9] sm:$0xff] }
 0x402   :  { %2602 = vrot.lane.b32.xlu1 %v7285_v45, %s7623_s20  ;;  %2600 = vrot.lane.b32.xlu0 %v7284_v46, %s7623_s20 }
 0x403   :  { %2604 = vrot.lane.b32.xlu2 %v7286_v52, %s7623_s20  ;;  %v7317_v52 = vld [vmem:[%s11865_s0 + $0x1e9] sm:$0xff] }
 0x404   :  { %v2262_v53 = vpop.permute.xlu1 %2261  ;;  %v2260_v54 = vpop.permute.xlu0 %2259 }
 0x405   :  { %2431 = vst.msk [vmem:[#allocation2 + $0xb8] sm:$0xff] %vm2407_vm6, %v2262_v53  ;;  %v2282_v63 = vpop.permute.xlu2 %2281 }
 0x406   :  { %2430 = vst.msk [vmem:[#allocation2 + $0xb0] sm:$0xff] %vm2407_vm6, %v2260_v54  ;;  %v7319_v54 = vld [vmem:[%s11865_s0 + $0x201] sm:$0xff] }
 0x407   :  { %2441 = vst.msk [vmem:[#allocation2 + $0x108] sm:$0xff] %vm2407_vm6, %v2282_v63  ;;  %v7321_v63 = vld [vmem:[%s11865_s0 + $0x219] sm:$0xff] }
 0x40a   :  { %2608 = vrot.lane.b32.xlu1 %v7288_v59, %s7623_s20  ;;  %2606 = vrot.lane.b32.xlu0 %v7287_v60, %s7623_s20 }
 0x40b   :  { %2610 = vrot.lane.b32.xlu2 %v7289_v4, %s7623_s20  ;;  %v7320_v4 = vld [vmem:[%s11865_s0 + $0x211] sm:$0xff] }
 0x40c   :  { %v2268_v5 = vpop.permute.xlu1 %2267  ;;  %v2266_v8 = vpop.permute.xlu0 %2265 }
 0x40d   :  { %2434 = vst.msk [vmem:[#allocation2 + $0xd0] sm:$0xff] %vm2407_vm6, %v2268_v5  ;;  %v2288_v17 = vpop.permute.xlu2 %2287 }
 0x40e   :  { %2433 = vst.msk [vmem:[#allocation2 + $0xc8] sm:$0xff] %vm2407_vm6, %v2266_v8  ;;  %v7322_v8 = vld [vmem:[%s11865_s0 + $0x229] sm:$0xff] }
 0x40f   :  { %2444 = vst.msk [vmem:[#allocation2 + $0x120] sm:$0xff] %vm2407_vm6, %v2288_v17  ;;  %v7324_v17 = vld [vmem:[%s11865_s0 + $0x241] sm:$0xff] }
 0x412   :  { %2614 = vrot.lane.b32.xlu1 %v7291_v13, %s7623_s20  ;;  %2612 = vrot.lane.b32.xlu0 %v7290_v14, %s7623_s20 }
 0x413   :  { %2616 = vrot.lane.b32.xlu2 %v7292_v22, %s7623_s20  ;;  %v7323_v22 = vld [vmem:[%s11865_s0 + $0x231] sm:$0xff] }
 0x414   :  { %v2274_v23 = vpop.permute.xlu1 %2273  ;;  %v2272_v26 = vpop.permute.xlu0 %2271 }
 0x415   :  { %2437 = vst.msk [vmem:[#allocation2 + $0xe8] sm:$0xff] %vm2407_vm6, %v2274_v23  ;;  %v2294_v36 = vpop.permute.xlu2 %2293 }
 0x416   :  { %2436 = vst.msk [vmem:[#allocation2 + $0xe0] sm:$0xff] %vm2407_vm6, %v2272_v26  ;;  %v7325_v26 = vld [vmem:[%s11865_s0 + $0x249] sm:$0xff] }
 0x417   :  { %2447 = vst.msk [vmem:[#allocation2 + $0x138] sm:$0xff] %vm2407_vm6, %v2294_v36  ;;  %v7327_v36 = vld [vmem:[%s11865_s0 + $0x261] sm:$0xff] }
 0x41a   :  { %2620 = vrot.lane.b32.xlu1 %v7294_v31, %s7623_s20  ;;  %2618 = vrot.lane.b32.xlu0 %v7293_v32, %s7623_s20 }
 0x41b   :  { %2622 = vrot.lane.b32.xlu2 %v7295_v43, %s7623_s20  ;;  %v7326_v43 = vld [vmem:[%s11865_s0 + $0x259] sm:$0xff] }
 0x41c   :  { %v2280_v44 = vpop.permute.xlu1 %2279  ;;  %v2278_v50 = vpop.permute.xlu0 %2277 }
 0x41d   :  { %2440 = vst.msk [vmem:[#allocation2 + $0x100] sm:$0xff] %vm2407_vm6, %v2280_v44  ;;  %v2300_v61 = vpop.permute.xlu2 %2299 }
 0x41e   :  { %2439 = vst.msk [vmem:[#allocation2 + $0xf8] sm:$0xff] %vm2407_vm6, %v2278_v50  ;;  %v7328_v50 = vld [vmem:[%s11865_s0 + $0x271] sm:$0xff] }
 0x41f   :  { %2450 = vst.msk [vmem:[#allocation2 + $0x150] sm:$0xff] %vm2407_vm6, %v2300_v61  ;;  %v7330_v61 = vld [vmem:[%s11865_s0 + $0x289] sm:$0xff] }
 0x422   :  { %2626 = vrot.lane.b32.xlu1 %v7297_v20, %s7623_s20  ;;  %2624 = vrot.lane.b32.xlu0 %v7296_v58, %s7623_s20 }
 0x423   :  { %2628 = vrot.lane.b32.xlu2 %v7298_v1, %s7623_s20  ;;  %v7329_v1 = vld [vmem:[%s11865_s0 + $0x279] sm:$0xff] }
 0x424   :  { %v2286_v29 = vpop.permute.xlu1 %2285  ;;  %v2284_v35 = vpop.permute.xlu0 %2283 }
 0x425   :  { %2443 = vst.msk [vmem:[#allocation2 + $0x118] sm:$0xff] %vm2407_vm6, %v2286_v29  ;;  %v2306_v21 = vpop.permute.xlu2 %2305 }
 0x426   :  { %2442 = vst.msk [vmem:[#allocation2 + $0x110] sm:$0xff] %vm2407_vm6, %v2284_v35  ;;  %v7331_v35 = vld [vmem:[%s11865_s0 + $0x291] sm:$0xff] }
 0x427   :  { %2453 = vst.msk [vmem:[#allocation2 + $0x168] sm:$0xff] %vm2407_vm6, %v2306_v21  ;;  %v7333_v21 = vld [vmem:[%s11865_s0 + $0x2a9] sm:$0xff] }
 0x42a   :  { %2632 = vrot.lane.b32.xlu1 %v7300_v10, %s7623_s20  ;;  %2630 = vrot.lane.b32.xlu0 %v7299_v49, %s7623_s20 }
 0x42b   :  { %2634 = vrot.lane.b32.xlu2 %v7301_v24, %s7623_s20  ;;  %v7332_v24 = vld [vmem:[%s11865_s0 + $0x2a1] sm:$0xff] }
 0x42c   :  { %v2292_v28 = vpop.permute.xlu1 %2291  ;;  %v2290_v37 = vpop.permute.xlu0 %2289 }
 0x42d   :  { %2446 = vst.msk [vmem:[#allocation2 + $0x130] sm:$0xff] %vm2407_vm6, %v2292_v28  ;;  %v2312_v57 = vpop.permute.xlu2 %2311 }
 0x42e   :  { %2445 = vst.msk [vmem:[#allocation2 + $0x128] sm:$0xff] %vm2407_vm6, %v2290_v37  ;;  %v7334_v37 = vld [vmem:[%s11865_s0 + $0x2b9] sm:$0xff] }
 0x42f   :  { %2456 = vst.msk [vmem:[#allocation2 + $0x180] sm:$0xff] %vm2407_vm6, %v2312_v57  ;;  %v7336_v57 = vld [vmem:[%s11865_s0 + $0x2d1] sm:$0xff] }
 0x432   :  { %2638 = vrot.lane.b32.xlu1 %v7303_v40, %s7623_s20  ;;  %2636 = vrot.lane.b32.xlu0 %v7302_v48, %s7623_s20 }
 0x433   :  { %2640 = vrot.lane.b32.xlu2 %v7304_v62, %s7623_s20  ;;  %v7335_v62 = vld [vmem:[%s11865_s0 + $0x2c1] sm:$0xff] }
 0x434   :  { %v2298_v3 = vpop.permute.xlu1 %2297  ;;  %v2296_v12 = vpop.permute.xlu0 %2295 }
 0x435   :  { %2449 = vst.msk [vmem:[#allocation2 + $0x148] sm:$0xff] %vm2407_vm6, %v2298_v3  ;;  %v2318_v30 = vpop.permute.xlu2 %2317 }
 0x436   :  { %2448 = vst.msk [vmem:[#allocation2 + $0x140] sm:$0xff] %vm2407_vm6, %v2296_v12  ;;  %v7337_v12 = vld [vmem:[%s11865_s0 + $0x2d9] sm:$0xff] }
 0x437   :  { %2459 = vst.msk [vmem:[#allocation2 + $0x198] sm:$0xff] %vm2407_vm6, %v2318_v30  ;;  %v7339_v30 = vld [vmem:[%s11865_s0 + $0x2f1] sm:$0xff] }
 0x43a   :  { %2644 = vrot.lane.b32.xlu1 %v7306_v15, %s7623_s20  ;;  %2642 = vrot.lane.b32.xlu0 %v7305_v19, %s7623_s20 }
 0x43b   :  { %2646 = vrot.lane.b32.xlu2 %v7307_v34, %s7623_s20  ;;  %v7338_v34 = vld [vmem:[%s11865_s0 + $0x2e9] sm:$0xff] }
 0x43c   :  { %v2304_v42 = vpop.permute.xlu1 %2303  ;;  %v2302_v0 = vpop.permute.xlu0 %2301 }
 0x43d   :  { %2452 = vst.msk [vmem:[#allocation2 + $0x160] sm:$0xff] %vm2407_vm6, %v2304_v42  ;;  %v2324_v25 = vpop.permute.xlu2 %2323 }
 0x43e   :  { %2451 = vst.msk [vmem:[#allocation2 + $0x158] sm:$0xff] %vm2407_vm6, %v2302_v0  ;;  %v7340_v0 = vld [vmem:[%s11865_s0 + $0x301] sm:$0xff] }
 0x43f   :  { %2462 = vst.msk [vmem:[#allocation2 + $0x1b0] sm:$0xff] %vm2407_vm6, %v2324_v25  ;;  %v7342_v25 = vld [vmem:[%s11865_s0 + $0x319] sm:$0xff] }
 0x442   :  { %2650 = vrot.lane.b32.xlu1 %v7309_v2, %s7623_s20  ;;  %2648 = vrot.lane.b32.xlu0 %v7308_v9, %s7623_s20 }
 0x443   :  { %2652 = vrot.lane.b32.xlu2 %v7310_v27, %s7623_s20  ;;  %v7341_v27 = vld [vmem:[%s11865_s0 + $0x309] sm:$0xff] }
 0x444   :  { %v2310_v41 = vpop.permute.xlu1 %2309  ;;  %v2308_v6 = vpop.permute.xlu0 %2307 }
 0x445   :  { %2455 = vst.msk [vmem:[#allocation2 + $0x178] sm:$0xff] %vm2407_vm6, %v2310_v41  ;;  %v2330_v18 = vpop.permute.xlu2 %2329 }
 0x446   :  { %2454 = vst.msk [vmem:[#allocation2 + $0x170] sm:$0xff] %vm2407_vm6, %v2308_v6  ;;  %v7343_v6 = vld [vmem:[%s11865_s0 + $0x321] sm:$0xff] }
 0x447   :  { %2465 = vst.msk [vmem:[#allocation2 + $0x1c8] sm:$0xff] %vm2407_vm6, %v2330_v18  ;;  %v7345_v18 = vld [vmem:[%s11865_s0 + $0x339] sm:$0xff] }
 0x44a   :  { %2656 = vrot.lane.b32.xlu1 %v7312_v7, %s7623_s20  ;;  %2654 = vrot.lane.b32.xlu0 %v7311_v16, %s7623_s20 }
 0x44b   :  { %2658 = vrot.lane.b32.xlu2 %v7313_v11, %s7623_s20  ;;  %v7344_v11 = vld [vmem:[%s11865_s0 + $0x331] sm:$0xff] }
 0x44c   :  { %v2316_v51 = vpop.permute.xlu1 %2315  ;;  %v2314_v56 = vpop.permute.xlu0 %2313 }
 0x44d   :  { %2458 = vst.msk [vmem:[#allocation2 + $0x190] sm:$0xff] %vm2407_vm6, %v2316_v51  ;;  %v2336_v38 = vpop.permute.xlu2 %2335 }
 0x44e   :  { %2457 = vst.msk [vmem:[#allocation2 + $0x188] sm:$0xff] %vm2407_vm6, %v2314_v56  ;;  %v7346_v56 = vld [vmem:[%s11865_s0 + $0x349] sm:$0xff] }
 0x44f   :  { %2468 = vst.msk [vmem:[#allocation2 + $0x1e0] sm:$0xff] %vm2407_vm6, %v2336_v38  ;;  %v7348_v38 = vld [vmem:[%s11865_s0 + $0x32] sm:$0xff] }
 0x452   :  { %2662 = vrot.lane.b32.xlu1 %v7315_v55, %s7623_s20  ;;  %2660 = vrot.lane.b32.xlu0 %v7314_v33, %s7623_s20 }
 0x453   :  { %2664 = vrot.lane.b32.xlu2 %v7316_v39, %s7623_s20  ;;  %v7347_v39 = vld [vmem:[%s11865_s0 + $0x351] sm:$0xff] }
 0x454   :  { %v2322_v45 = vpop.permute.xlu1 %2321  ;;  %v2320_v46 = vpop.permute.xlu0 %2319 }
 0x455   :  { %2461 = vst.msk [vmem:[#allocation2 + $0x1a8] sm:$0xff] %vm2407_vm6, %v2322_v45  ;;  %v2342_v53 = vpop.permute.xlu2 %2341 }
 0x456   :  { %2460 = vst.msk [vmem:[#allocation2 + $0x1a0] sm:$0xff] %vm2407_vm6, %v2320_v46  ;;  %v7349_v46 = vld [vmem:[%s11865_s0 + $0x3a] sm:$0xff] }
 0x457   :  { %2471 = vst.msk [vmem:[#allocation2 + $0x1f8] sm:$0xff] %vm2407_vm6, %v2342_v53  ;;  %v7351_v53 = vld [vmem:[%s11865_s0 + $0x52] sm:$0xff] }
 0x45a   :  { %2668 = vrot.lane.b32.xlu1 %v7318_v47, %s7623_s20  ;;  %2666 = vrot.lane.b32.xlu0 %v7317_v52, %s7623_s20 }
 0x45b   :  { %2670 = vrot.lane.b32.xlu2 %v7319_v54, %s7623_s20  ;;  %v7350_v54 = vld [vmem:[%s11865_s0 + $0x4a] sm:$0xff] }
 0x45c   :  { %v2328_v59 = vpop.permute.xlu1 %2327  ;;  %v2326_v60 = vpop.permute.xlu0 %2325 }
 0x45d   :  { %2464 = vst.msk [vmem:[#allocation2 + $0x1c0] sm:$0xff] %vm2407_vm6, %v2328_v59  ;;  %v2605_v5 = vpop.permute.xlu2 %2604 }
 0x45e   :  { %2463 = vst.msk [vmem:[#allocation2 + $0x1b8] sm:$0xff] %vm2407_vm6, %v2326_v60  ;;  %v7352_v60 = vld [vmem:[%s11865_s0 + $0x62] sm:$0xff] }
 0x45f   :  { %2795 = vst.msk [vmem:[#allocation2 + $0x10] sm:$0xff] %vm2792_vm7, %v2605_v5  ;;  %v7354_v5 = vld [vmem:[%s11865_s0 + $0x7a] sm:$0xff] }
 0x462   :  { %2674 = vrot.lane.b32.xlu1 %v7321_v63, %s7623_s20  ;;  %2672 = vrot.lane.b32.xlu0 %v7320_v4, %s7623_s20 }
 0x463   :  { %2676 = vrot.lane.b32.xlu2 %v7322_v8, %s7623_s20  ;;  %v7353_v8 = vld [vmem:[%s11865_s0 + $0x6a] sm:$0xff] }
 0x464   :  { %v2334_v13 = vpop.permute.xlu1 %2333  ;;  %v2332_v14 = vpop.permute.xlu0 %2331 }
 0x465   :  { %2467 = vst.msk [vmem:[#allocation2 + $0x1d8] sm:$0xff] %vm2407_vm6, %v2334_v13  ;;  %v2611_v23 = vpop.permute.xlu2 %2610 }
 0x466   :  { %2466 = vst.msk [vmem:[#allocation2 + $0x1d0] sm:$0xff] %vm2407_vm6, %v2332_v14  ;;  %v7355_v14 = vld [vmem:[%s11865_s0 + $0x82] sm:$0xff] }
 0x467   :  { %2798 = vst.msk [vmem:[#allocation2 + $0x28] sm:$0xff] %vm2792_vm7, %v2611_v23  ;;  %v7357_v23 = vld [vmem:[%s11865_s0 + $0x9a] sm:$0xff] }
 0x46a   :  { %2680 = vrot.lane.b32.xlu1 %v7324_v17, %s7623_s20  ;;  %2678 = vrot.lane.b32.xlu0 %v7323_v22, %s7623_s20 }
 0x46b   :  { %2682 = vrot.lane.b32.xlu2 %v7325_v26, %s7623_s20  ;;  %v7356_v26 = vld [vmem:[%s11865_s0 + $0x92] sm:$0xff] }
 0x46c   :  { %v2340_v31 = vpop.permute.xlu1 %2339  ;;  %v2338_v32 = vpop.permute.xlu0 %2337 }
 0x46d   :  { %2470 = vst.msk [vmem:[#allocation2 + $0x1f0] sm:$0xff] %vm2407_vm6, %v2340_v31  ;;  %v2617_v44 = vpop.permute.xlu2 %2616 }
 0x46e   :  { %2469 = vst.msk [vmem:[#allocation2 + $0x1e8] sm:$0xff] %vm2407_vm6, %v2338_v32  ;;  %v7358_v32 = vld [vmem:[%s11865_s0 + $0xaa] sm:$0xff]  ;;  %vm4410_vm6 = vcmask 720512  }
 0x46f   :  { %2801 = vst.msk [vmem:[#allocation2 + $0x40] sm:$0xff] %vm2792_vm7, %v2617_v44  ;;  %v7360_v44 = vld [vmem:[%s11865_s0 + $0xc2] sm:$0xff] }
 0x472   :  { %2686 = vrot.lane.b32.xlu1 %v7327_v36, %s7623_s20  ;;  %2684 = vrot.lane.b32.xlu0 %v7326_v43, %s7623_s20 }
 0x473   :  { %2688 = vrot.lane.b32.xlu2 %v7328_v50, %s7623_s20  ;;  %v7359_v50 = vld [vmem:[%s11865_s0 + $0xb2] sm:$0xff] }
 0x474   :  { %v2603_v20 = vpop.permute.xlu1 %2602  ;;  %v2601_v58 = vpop.permute.xlu0 %2600 }
 0x475   :  { %2794 = vst.msk [vmem:[#allocation2 + $0x8] sm:$0xff] %vm2792_vm7, %v2603_v20  ;;  %v2623_v29 = vpop.permute.xlu2 %2622 }
 0x476   :  { %2793 = vst.msk [vmem:[#allocation2] sm:$0xff] %vm2792_vm7, %v2601_v58  ;;  %v7361_v58 = vld [vmem:[%s11865_s0 + $0xca] sm:$0xff] }
 0x477   :  { %2804 = vst.msk [vmem:[#allocation2 + $0x58] sm:$0xff] %vm2792_vm7, %v2623_v29  ;;  %v7363_v29 = vld [vmem:[%s11865_s0 + $0xe2] sm:$0xff] }
 0x47a   :  { %2692 = vrot.lane.b32.xlu1 %v7330_v61, %s7623_s20  ;;  %2690 = vrot.lane.b32.xlu0 %v7329_v1, %s7623_s20 }
 0x47b   :  { %2694 = vrot.lane.b32.xlu2 %v7331_v35, %s7623_s20  ;;  %v7362_v35 = vld [vmem:[%s11865_s0 + $0xda] sm:$0xff] }
 0x47c   :  { %v2609_v10 = vpop.permute.xlu1 %2608  ;;  %v2607_v49 = vpop.permute.xlu0 %2606 }
 0x47d   :  { %2797 = vst.msk [vmem:[#allocation2 + $0x20] sm:$0xff] %vm2792_vm7, %v2609_v10  ;;  %v2629_v28 = vpop.permute.xlu2 %2628 }
 0x47e   :  { %2796 = vst.msk [vmem:[#allocation2 + $0x18] sm:$0xff] %vm2792_vm7, %v2607_v49  ;;  %v7364_v49 = vld [vmem:[%s11865_s0 + $0xf2] sm:$0xff] }
 0x47f   :  { %2807 = vst.msk [vmem:[#allocation2 + $0x70] sm:$0xff] %vm2792_vm7, %v2629_v28  ;;  %v7366_v28 = vld [vmem:[%s11865_s0 + $0x10a] sm:$0xff] }
 0x482   :  { %2698 = vrot.lane.b32.xlu1 %v7333_v21, %s7623_s20  ;;  %2696 = vrot.lane.b32.xlu0 %v7332_v24, %s7623_s20 }
 0x483   :  { %2700 = vrot.lane.b32.xlu2 %v7334_v37, %s7623_s20  ;;  %v7365_v37 = vld [vmem:[%s11865_s0 + $0xfa] sm:$0xff] }
 0x484   :  { %v2615_v40 = vpop.permute.xlu1 %2614  ;;  %v2613_v48 = vpop.permute.xlu0 %2612 }
 0x485   :  { %2800 = vst.msk [vmem:[#allocation2 + $0x38] sm:$0xff] %vm2792_vm7, %v2615_v40  ;;  %v2635_v3 = vpop.permute.xlu2 %2634 }
 0x486   :  { %2799 = vst.msk [vmem:[#allocation2 + $0x30] sm:$0xff] %vm2792_vm7, %v2613_v48  ;;  %v7367_v48 = vld [vmem:[%s11865_s0 + $0x112] sm:$0xff] }
 0x487   :  { %2810 = vst.msk [vmem:[#allocation2 + $0x88] sm:$0xff] %vm2792_vm7, %v2635_v3  ;;  %v7369_v3 = vld [vmem:[%s11865_s0 + $0x12a] sm:$0xff] }
 0x48a   :  { %2704 = vrot.lane.b32.xlu1 %v7336_v57, %s7623_s20  ;;  %2702 = vrot.lane.b32.xlu0 %v7335_v62, %s7623_s20 }
 0x48b   :  { %2706 = vrot.lane.b32.xlu2 %v7337_v12, %s7623_s20  ;;  %v7368_v12 = vld [vmem:[%s11865_s0 + $0x122] sm:$0xff] }
 0x48c   :  { %v2621_v15 = vpop.permute.xlu1 %2620  ;;  %v2619_v19 = vpop.permute.xlu0 %2618 }
 0x48d   :  { %2803 = vst.msk [vmem:[#allocation2 + $0x50] sm:$0xff] %vm2792_vm7, %v2621_v15  ;;  %v2641_v42 = vpop.permute.xlu2 %2640 }
 0x48e   :  { %2802 = vst.msk [vmem:[#allocation2 + $0x48] sm:$0xff] %vm2792_vm7, %v2619_v19  ;;  %v7370_v19 = vld [vmem:[%s11865_s0 + $0x13a] sm:$0xff] }
 0x48f   :  { %2813 = vst.msk [vmem:[#allocation2 + $0xa0] sm:$0xff] %vm2792_vm7, %v2641_v42  ;;  %v7372_v42 = vld [vmem:[%s11865_s0 + $0x152] sm:$0xff] }
 0x492   :  { %2710 = vrot.lane.b32.xlu1 %v7339_v30, %s7623_s20  ;;  %2708 = vrot.lane.b32.xlu0 %v7338_v34, %s7623_s20 }
 0x493   :  { %2712 = vrot.lane.b32.xlu2 %v7340_v0, %s7623_s20  ;;  %v7371_v0 = vld [vmem:[%s11865_s0 + $0x142] sm:$0xff] }
 0x494   :  { %v2627_v2 = vpop.permute.xlu1 %2626  ;;  %v2625_v9 = vpop.permute.xlu0 %2624 }
 0x495   :  { %2806 = vst.msk [vmem:[#allocation2 + $0x68] sm:$0xff] %vm2792_vm7, %v2627_v2  ;;  %v2647_v41 = vpop.permute.xlu2 %2646 }
 0x496   :  { %2805 = vst.msk [vmem:[#allocation2 + $0x60] sm:$0xff] %vm2792_vm7, %v2625_v9  ;;  %v7373_v9 = vld [vmem:[%s11865_s0 + $0x15a] sm:$0xff] }
 0x497   :  { %2816 = vst.msk [vmem:[#allocation2 + $0xb8] sm:$0xff] %vm2792_vm7, %v2647_v41  ;;  %v7375_v41 = vld [vmem:[%s11865_s0 + $0x172] sm:$0xff] }
 0x49a   :  { %2716 = vrot.lane.b32.xlu1 %v7342_v25, %s7623_s20  ;;  %2714 = vrot.lane.b32.xlu0 %v7341_v27, %s7623_s20 }
 0x49b   :  { %2718 = vrot.lane.b32.xlu2 %v7343_v6, %s7623_s20  ;;  %v7374_v6 = vld [vmem:[%s11865_s0 + $0x16a] sm:$0xff] }
 0x49c   :  { %v2633_v7 = vpop.permute.xlu1 %2632  ;;  %v2631_v16 = vpop.permute.xlu0 %2630 }
 0x49d   :  { %2809 = vst.msk [vmem:[#allocation2 + $0x80] sm:$0xff] %vm2792_vm7, %v2633_v7  ;;  %v2653_v51 = vpop.permute.xlu2 %2652 }
 0x49e   :  { %2808 = vst.msk [vmem:[#allocation2 + $0x78] sm:$0xff] %vm2792_vm7, %v2631_v16  ;;  %v7376_v16 = vld [vmem:[%s11865_s0 + $0x182] sm:$0xff] }
 0x49f   :  { %2819 = vst.msk [vmem:[#allocation2 + $0xd0] sm:$0xff] %vm2792_vm7, %v2653_v51  ;;  %v7378_v51 = vld [vmem:[%s11865_s0 + $0x19a] sm:$0xff] }
 0x4a2   :  { %2722 = vrot.lane.b32.xlu1 %v7345_v18, %s7623_s20  ;;  %2720 = vrot.lane.b32.xlu0 %v7344_v11, %s7623_s20 }
 0x4a3   :  { %2724 = vrot.lane.b32.xlu2 %v7346_v56, %s7623_s20  ;;  %v7377_v56 = vld [vmem:[%s11865_s0 + $0x18a] sm:$0xff] }
 0x4a4   :  { %v2639_v55 = vpop.permute.xlu1 %2638  ;;  %v2637_v33 = vpop.permute.xlu0 %2636 }
 0x4a5   :  { %2812 = vst.msk [vmem:[#allocation2 + $0x98] sm:$0xff] %vm2792_vm7, %v2639_v55  ;;  %v2659_v45 = vpop.permute.xlu2 %2658 }
 0x4a6   :  { %2811 = vst.msk [vmem:[#allocation2 + $0x90] sm:$0xff] %vm2792_vm7, %v2637_v33  ;;  %v7379_v33 = vld [vmem:[%s11865_s0 + $0x1a2] sm:$0xff] }
 0x4a7   :  { %2822 = vst.msk [vmem:[#allocation2 + $0xe8] sm:$0xff] %vm2792_vm7, %v2659_v45 }
 0x4aa   :  { %2985 = vrot.lane.b32.xlu1 %v7348_v38, %s7624_s16  ;;  %2726 = vrot.lane.b32.xlu0 %v7347_v39, %s7623_s20  ;;  %v3310_v38 = vld [vmem:[%s11866_s1 + $0x20] sm:$0xf]  ;;  %s7634_s20 = smov 104  }
 0x4ab   :  { %2987 = vrot.lane.b32.xlu2 %v7349_v46, %s7624_s16  ;;  %7412 = vmatpush.msk.msra.mxu0 %vm3508_vm8, %v3310_v38  ;;  %v3309_v46 = vld [vmem:[%s11866_s1 + $0x18] sm:$0xff] }
 0x4ac   :  { %v2645_v47 = vpop.permute.xlu1 %2644  ;;  %v2643_v52 = vpop.permute.xlu0 %2642  ;;  %7497 = vmatpush.msk.msra.mxu1 %vm3508_vm8, %v3310_v38  ;;  %7498 = vmatpush.msk.msra.mxu2 %vm3508_vm8, %v3310_v38 }
 0x4ad   :  { %2815 = vst.msk [vmem:[#allocation2 + $0xb0] sm:$0xff] %vm2792_vm7, %v2645_v47  ;;  %v2665_v59 = vpop.permute.xlu2 %2664  ;;  %7499 = vmatpush.msk.msra.mxu3 %vm3508_vm8, %v3310_v38  ;;  %3524 = vmatpush.msra.mxu0 %v3309_v46  ;;  %v3308_v47 = vld [vmem:[%s11866_s1 + $0x10] sm:$0xff]  ;;  %vm4516_vm8 = vcmask 851712  }
 0x4ae   :  { %2814 = vst.msk [vmem:[#allocation2 + $0xa8] sm:$0xff] %vm2792_vm7, %v2643_v52  ;;  %7500 = vmatpush.msra.mxu1 %v3309_v46  ;;  %v7381_v52 = vld [vmem:[%s11865_s0 + $0x1ea] sm:$0xff]  ;;  %7501 = vmatpush.msra.mxu2 %v3309_v46 }
 0x4af   :  { %2825 = vst.msk [vmem:[#allocation2 + $0x100] sm:$0xff] %vm2792_vm7, %v2665_v59  ;;  %7502 = vmatpush.msra.mxu3 %v3309_v46  ;;  %3525 = vmatpush.msra.mxu0 %v3308_v47  ;;  %v3307_v59 = vld [vmem:[%s11866_s1 + $0x8] sm:$0xff] }
 0x4b0   :  { %7503 = vmatpush.msra.mxu1 %v3308_v47  ;;  %7504 = vmatpush.msra.mxu2 %v3308_v47 }
 0x4b1   :  { %7505 = vmatpush.msra.mxu3 %v3308_v47  ;;  %3526 = vmatpush.msra.mxu0 %v3307_v59 }
 0x4b2   :  { %2991 = vrot.lane.b32.xlu1 %v7351_v53, %s7624_s16  ;;  %2989 = vrot.lane.b32.xlu0 %v7350_v54, %s7624_s16  ;;  %v7380_v53 = vld [vmem:[%s11865_s0 + $0x1e2] sm:$0xff] }
 0x4b3   :  { %2993 = vrot.lane.b32.xlu2 %v7352_v60, %s7624_s16  ;;  %v7382_v60 = vld [vmem:[%s11865_s0 + $0x1fa] sm:$0xff]  ;;  %7506 = vmatpush.msra.mxu1 %v3307_v59 }
 0x4b4   :  { %v2651_v63 = vpop.permute.xlu1 %2650  ;;  %v2649_v4 = vpop.permute.xlu0 %2648  ;;  %7507 = vmatpush.msra.mxu2 %v3307_v59  ;;  %7508 = vmatpush.msra.mxu3 %v3307_v59 }
 0x4b5   :  { %2818 = vst.msk [vmem:[#allocation2 + $0xc8] sm:$0xff] %vm2792_vm7, %v2651_v63  ;;  %v2671_v13 = vpop.permute.xlu2 %2670  ;;  %v3306_v63 = vld [vmem:[%s11866_s1] sm:$0xff] }
 0x4b6   :  { %2817 = vst.msk [vmem:[#allocation2 + $0xc0] sm:$0xff] %vm2792_vm7, %v2649_v4  ;;  %3527 = vmatpush.msra.mxu0 %v3306_v63  ;;  %7509 = vmatpush.msra.mxu1 %v3306_v63 }
 0x4b7   :  { %2828 = vst.msk [vmem:[#allocation2 + $0x118] sm:$0xff] %vm2792_vm7, %v2671_v13  ;;  %7510 = vmatpush.msra.mxu2 %v3306_v63  ;;  %v7383_v13 = vld [vmem:[%s11865_s0 + $0x202] sm:$0xff]  ;;  %7511 = vmatpush.msra.mxu3 %v3306_v63 }
 0x4ba   :  { %2997 = vrot.lane.b32.xlu1 %v7354_v5, %s7624_s16  ;;  %2995 = vrot.lane.b32.xlu0 %v7353_v8, %s7624_s16  ;;  %v7384_v8 = vld [vmem:[%s11865_s0 + $0x212] sm:$0xff] }
 0x4bb   :  { %2999 = vrot.lane.b32.xlu2 %v7355_v14, %s7624_s16 }
 0x4bc   :  { %v2657_v17 = vpop.permute.xlu1 %2656  ;;  %v2655_v22 = vpop.permute.xlu0 %2654 }
 0x4bd   :  { %2821 = vst.msk [vmem:[#allocation2 + $0xe0] sm:$0xff] %vm2792_vm7, %v2657_v17  ;;  %v2677_v31 = vpop.permute.xlu2 %2676  ;;  %v7385_v17 = vld [vmem:[%s11865_s0 + $0x21a] sm:$0xff] }
 0x4be   :  { %2820 = vst.msk [vmem:[#allocation2 + $0xd8] sm:$0xff] %vm2792_vm7, %v2655_v22 }
 0x4bf   :  { %2831 = vst.msk [vmem:[#allocation2 + $0x130] sm:$0xff] %vm2792_vm7, %v2677_v31  ;;  %v7386_v31 = vld [vmem:[%s11865_s0 + $0x22a] sm:$0xff] }
 0x4c2   :  { %3003 = vrot.lane.b32.xlu1 %v7357_v23, %s7624_s16  ;;  %3001 = vrot.lane.b32.xlu0 %v7356_v26, %s7624_s16  ;;  %v7387_v26 = vld [vmem:[%s11865_s0 + $0x232] sm:$0xff] }
 0x4c3   :  { %3005 = vrot.lane.b32.xlu2 %v7358_v32, %s7624_s16 }
 0x4c4   :  { %v2663_v36 = vpop.permute.xlu1 %2662  ;;  %v2661_v43 = vpop.permute.xlu0 %2660 }
 0x4c5   :  { %2824 = vst.msk [vmem:[#allocation2 + $0xf8] sm:$0xff] %vm2792_vm7, %v2663_v36  ;;  %v2683_v20 = vpop.permute.xlu2 %2682  ;;  %v7388_v36 = vld [vmem:[%s11865_s0 + $0x242] sm:$0xff] }
 0x4c6   :  { %2823 = vst.msk [vmem:[#allocation2 + $0xf0] sm:$0xff] %vm2792_vm7, %v2661_v43 }
 0x4c7   :  { %2834 = vst.msk [vmem:[#allocation2 + $0x148] sm:$0xff] %vm2792_vm7, %v2683_v20  ;;  %v7389_v20 = vld [vmem:[%s11865_s0 + $0x24a] sm:$0xff] }
 0x4ca   :  { %3009 = vrot.lane.b32.xlu1 %v7360_v44, %s7624_s16  ;;  %3007 = vrot.lane.b32.xlu0 %v7359_v50, %s7624_s16  ;;  %v7390_v50 = vld [vmem:[%s11865_s0 + $0x25a] sm:$0xff] }
 0x4cb   :  { %3011 = vrot.lane.b32.xlu2 %v7361_v58, %s7624_s16 }
 0x4cc   :  { %v2669_v61 = vpop.permute.xlu1 %2668  ;;  %v2667_v1 = vpop.permute.xlu0 %2666 }
 0x4cd   :  { %2827 = vst.msk [vmem:[#allocation2 + $0x110] sm:$0xff] %vm2792_vm7, %v2669_v61  ;;  %v2689_v10 = vpop.permute.xlu2 %2688  ;;  %v7391_v61 = vld [vmem:[%s11865_s0 + $0x262] sm:$0xff] }
 0x4ce   :  { %2826 = vst.msk [vmem:[#allocation2 + $0x108] sm:$0xff] %vm2792_vm7, %v2667_v1 }
 0x4cf   :  { %2837 = vst.msk [vmem:[#allocation2 + $0x160] sm:$0xff] %vm2792_vm7, %v2689_v10  ;;  %v7392_v10 = vld [vmem:[%s11865_s0 + $0x272] sm:$0xff] }
 0x4d2   :  { %3015 = vrot.lane.b32.xlu1 %v7363_v29, %s7624_s16  ;;  %3013 = vrot.lane.b32.xlu0 %v7362_v35, %s7624_s16  ;;  %v7393_v35 = vld [vmem:[%s11865_s0 + $0x27a] sm:$0xff] }
 0x4d3   :  { %3017 = vrot.lane.b32.xlu2 %v7364_v49, %s7624_s16 }
 0x4d4   :  { %v2675_v21 = vpop.permute.xlu1 %2674  ;;  %v2673_v24 = vpop.permute.xlu0 %2672 }
 0x4d5   :  { %2830 = vst.msk [vmem:[#allocation2 + $0x128] sm:$0xff] %vm2792_vm7, %v2675_v21  ;;  %v2695_v40 = vpop.permute.xlu2 %2694  ;;  %v7394_v21 = vld [vmem:[%s11865_s0 + $0x28a] sm:$0xff] }
 0x4d6   :  { %2829 = vst.msk [vmem:[#allocation2 + $0x120] sm:$0xff] %vm2792_vm7, %v2673_v24 }
 0x4d7   :  { %2840 = vst.msk [vmem:[#allocation2 + $0x178] sm:$0xff] %vm2792_vm7, %v2695_v40  ;;  %v7395_v40 = vld [vmem:[%s11865_s0 + $0x292] sm:$0xff] }
 0x4da   :  { %3021 = vrot.lane.b32.xlu1 %v7366_v28, %s7624_s16  ;;  %3019 = vrot.lane.b32.xlu0 %v7365_v37, %s7624_s16 }
 0x4db   :  { %3023 = vrot.lane.b32.xlu2 %v7367_v48, %s7624_s16  ;;  %v7396_v48 = vld [vmem:[%s11865_s0 + $0x2a2] sm:$0xff] }
 0x4dc   :  { %v2681_v57 = vpop.permute.xlu1 %2680  ;;  %v2679_v62 = vpop.permute.xlu0 %2678 }
 0x4dd   :  { %2833 = vst.msk [vmem:[#allocation2 + $0x140] sm:$0xff] %vm2792_vm7, %v2681_v57  ;;  %v2701_v15 = vpop.permute.xlu2 %2700 }
 0x4de   :  { %2832 = vst.msk [vmem:[#allocation2 + $0x138] sm:$0xff] %vm2792_vm7, %v2679_v62 }
 0x4df   :  { %2843 = vst.msk [vmem:[#allocation2 + $0x190] sm:$0xff] %vm2792_vm7, %v2701_v15  ;;  %v7398_v15 = vld [vmem:[%s11865_s0 + $0x2ba] sm:$0xff] }
 0x4e2   :  { %3027 = vrot.lane.b32.xlu1 %v7369_v3, %s7624_s16  ;;  %3025 = vrot.lane.b32.xlu0 %v7368_v12, %s7624_s16 }
 0x4e3   :  { %3029 = vrot.lane.b32.xlu2 %v7370_v19, %s7624_s16 }
 0x4e4   :  { %v2687_v30 = vpop.permute.xlu1 %2686  ;;  %v2685_v34 = vpop.permute.xlu0 %2684 }
 0x4e5   :  { %2836 = vst.msk [vmem:[#allocation2 + $0x158] sm:$0xff] %vm2792_vm7, %v2687_v30  ;;  %v2707_v2 = vpop.permute.xlu2 %2706  ;;  %v7399_v30 = vld [vmem:[%s11865_s0 + $0x2c2] sm:$0xff] }
 0x4e6   :  { %2835 = vst.msk [vmem:[#allocation2 + $0x150] sm:$0xff] %vm2792_vm7, %v2685_v34 }
 0x4e7   :  { %2846 = vst.msk [vmem:[#allocation2 + $0x1a8] sm:$0xff] %vm2792_vm7, %v2707_v2  ;;  %v7397_v2 = vld [vmem:[%s11865_s0 + $0x2aa] sm:$0xff] }
 0x4ea   :  { %3033 = vrot.lane.b32.xlu1 %v7372_v42, %s7624_s16  ;;  %3031 = vrot.lane.b32.xlu0 %v7371_v0, %s7624_s16 }
 0x4eb   :  { %3035 = vrot.lane.b32.xlu2 %v7373_v9, %s7624_s16 }
 0x4ec   :  { %v2693_v25 = vpop.permute.xlu1 %2692  ;;  %v2691_v27 = vpop.permute.xlu0 %2690 }
 0x4ed   :  { %2839 = vst.msk [vmem:[#allocation2 + $0x170] sm:$0xff] %vm2792_vm7, %v2693_v25  ;;  %v2713_v7 = vpop.permute.xlu2 %2712 }
 0x4ee   :  { %2838 = vst.msk [vmem:[#allocation2 + $0x168] sm:$0xff] %vm2792_vm7, %v2691_v27 }
 0x4ef   :  { %2849 = vst.msk [vmem:[#allocation2 + $0x1c0] sm:$0xff] %vm2792_vm7, %v2713_v7 }
 0x4f2   :  { %3039 = vrot.lane.b32.xlu1 %v7375_v41, %s7624_s16  ;;  %3037 = vrot.lane.b32.xlu0 %v7374_v6, %s7624_s16  ;;  %v7401_v6 = vld [vmem:[%s11865_s0 + $0x2da] sm:$0xff] }
 0x4f3   :  { %3041 = vrot.lane.b32.xlu2 %v7376_v16, %s7624_s16 }
 0x4f4   :  { %v2699_v18 = vpop.permute.xlu1 %2698  ;;  %v2697_v11 = vpop.permute.xlu0 %2696 }
 0x4f5   :  { %2842 = vst.msk [vmem:[#allocation2 + $0x188] sm:$0xff] %vm2792_vm7, %v2699_v18  ;;  %v2719_v55 = vpop.permute.xlu2 %2718 }
 0x4f6   :  { %2841 = vst.msk [vmem:[#allocation2 + $0x180] sm:$0xff] %vm2792_vm7, %v2697_v11 }
 0x4f7   :  { %2852 = vst.msk [vmem:[#allocation2 + $0x1d8] sm:$0xff] %vm2792_vm7, %v2719_v55 }
 0x4fa   :  { %3045 = vrot.lane.b32.xlu1 %v7378_v51, %s7624_s16  ;;  %3043 = vrot.lane.b32.xlu0 %v7377_v56, %s7624_s16  ;;  %v7402_v51 = vld [vmem:[%s11865_s0 + $0x2ea] sm:$0xff] }
 0x4fb   :  { %3047 = vrot.lane.b32.xlu2 %v7379_v33, %s7624_s16 }
 0x4fc   :  { %v2705_v39 = vpop.permute.xlu1 %2704  ;;  %v2703_v45 = vpop.permute.xlu0 %2702 }
 0x4fd   :  { %2845 = vst.msk [vmem:[#allocation2 + $0x1a0] sm:$0xff] %vm2792_vm7, %v2705_v39  ;;  %v2725_v54 = vpop.permute.xlu2 %2724  ;;  %v7400_v39 = vld [vmem:[%s11865_s0 + $0x2d2] sm:$0xff] }
 0x4fe   :  { %2844 = vst.msk [vmem:[#allocation2 + $0x198] sm:$0xff] %vm2792_vm7, %v2703_v45 }
 0x4ff   :  { %2855 = vst.msk [vmem:[#allocation2 + $0x1f0] sm:$0xff] %vm2792_vm7, %v2725_v54 }
 0x502   :  { %3051 = vrot.lane.b32.xlu1 %v7381_v52, %s7624_s16  ;;  %3049 = vrot.lane.b32.xlu0 %v7380_v53, %s7624_s16  ;;  %v7404_v53 = vld [vmem:[%s11865_s0 + $0x302] sm:$0xff] }
 0x503   :  { %3053 = vrot.lane.b32.xlu2 %v7382_v60, %s7624_s16 }
 0x504   :  { %v2711_v4 = vpop.permute.xlu1 %2710  ;;  %v2709_v5 = vpop.permute.xlu0 %2708 }
 0x505   :  { %2848 = vst.msk [vmem:[#allocation2 + $0x1b8] sm:$0xff] %vm2792_vm7, %v2711_v4  ;;  %v2988_v14 = vpop.permute.xlu2 %2987  ;;  %v7405_v4 = vld [vmem:[%s11865_s0 + $0x30a] sm:$0xff] }
 0x506   :  { %2847 = vst.msk [vmem:[#allocation2 + $0x1b0] sm:$0xff] %vm2792_vm7, %v2709_v5 }
 0x507   :  { %3179 = vst.msk [vmem:[#allocation2 + $0x8] sm:$0xff] %vm3177_vm9, %v2988_v14 }
 0x50a   :  { %3057 = vrot.lane.b32.xlu1 %v7384_v8, %s7624_s16  ;;  %3055 = vrot.lane.b32.xlu0 %v7383_v13, %s7624_s16 }
 0x50b   :  { %3059 = vrot.lane.b32.xlu2 %v7385_v17, %s7624_s16 }
 0x50c   :  { %v2717_v22 = vpop.permute.xlu1 %2716  ;;  %v2715_v23 = vpop.permute.xlu0 %2714 }
 0x50d   :  { %2851 = vst.msk [vmem:[#allocation2 + $0x1d0] sm:$0xff] %vm2792_vm7, %v2717_v22  ;;  %v2994_v32 = vpop.permute.xlu2 %2993  ;;  %v7403_v22 = vld [vmem:[%s11865_s0 + $0x2f2] sm:$0xff] }
 0x50e   :  { %2850 = vst.msk [vmem:[#allocation2 + $0x1c8] sm:$0xff] %vm2792_vm7, %v2715_v23  ;;  %v3243_v62 = vld [vmem:[#allocation2 + $0x8] sm:$0xff] }
 0x50f   :  { %3182 = vst.msk [vmem:[#allocation2 + $0x20] sm:$0xff] %vm3177_vm9, %v2994_v32 }
 0x512   :  { %3063 = vrot.lane.b32.xlu1 %v7387_v26, %s7624_s16  ;;  %3061 = vrot.lane.b32.xlu0 %v7386_v31, %s7624_s16 }
 0x513   :  { %3065 = vrot.lane.b32.xlu2 %v7388_v36, %s7624_s16 }
 0x514   :  { %v2723_v43 = vpop.permute.xlu1 %2722  ;;  %v2721_v44 = vpop.permute.xlu0 %2720 }
 0x515   :  { %2854 = vst.msk [vmem:[#allocation2 + $0x1e8] sm:$0xff] %vm2792_vm7, %v2723_v43  ;;  %v3000_v58 = vpop.permute.xlu2 %2999 }
 0x516   :  { %2853 = vst.msk [vmem:[#allocation2 + $0x1e0] sm:$0xff] %vm2792_vm7, %v2721_v44  ;;  %v3246_v11 = vld [vmem:[#allocation2 + $0x20] sm:$0xff] }
 0x517   :  { %3185 = vst.msk [vmem:[#allocation2 + $0x38] sm:$0xff] %vm3177_vm9, %v3000_v58  ;;  %v7407_v44 = vld [vmem:[%s11865_s0 + $0x322] sm:$0xff] }
 0x51a   :  { %3069 = vrot.lane.b32.xlu1 %v7390_v50, %s7624_s16  ;;  %3067 = vrot.lane.b32.xlu0 %v7389_v20, %s7624_s16 }
 0x51b   :  { %3071 = vrot.lane.b32.xlu2 %v7391_v61, %s7624_s16 }
 0x51c   :  { %v2986_v1 = vpop.permute.xlu1 %2985  ;;  %v2727_v29 = vpop.permute.xlu0 %2726 }
 0x51d   :  { %3178 = vst.msk [vmem:[#allocation2] sm:$0xff] %vm3177_vm9, %v2986_v1  ;;  %v3006_v49 = vpop.permute.xlu2 %3005 }
 0x51e   :  { %2856 = vst.msk [vmem:[#allocation2 + $0x1f8] sm:$0xff] %vm2792_vm7, %v2727_v29  ;;  %v3249_v63 = vld [vmem:[#allocation2 + $0x38] sm:$0xff]  ;;  %vm4463_vm7 = vcmask 786112  }
 0x51f   :  { %3188 = vst.msk [vmem:[#allocation2 + $0x50] sm:$0xff] %vm3177_vm9, %v3006_v49 }
 0x522   :  { %3075 = vrot.lane.b32.xlu1 %v7393_v35, %s7624_s16  ;;  %3073 = vrot.lane.b32.xlu0 %v7392_v10, %s7624_s16  ;;  %v7408_v35 = vld [vmem:[%s11865_s0 + $0x332] sm:$0xff] }
 0x523   :  { %3077 = vrot.lane.b32.xlu2 %v7394_v21, %s7624_s16 }
 0x524   :  { %v2992_v24 = vpop.permute.xlu1 %2991  ;;  %v2990_v28 = vpop.permute.xlu0 %2989  ;;  %v3242_v37 = vld [vmem:[#allocation2] sm:$0xff] }
 0x525   :  { %3181 = vst.msk [vmem:[#allocation2 + $0x18] sm:$0xff] %vm3177_vm9, %v2992_v24  ;;  %7413 = vmatmul.msk.f32.vlgmr.msra.gmra.mxu0 %vm3315_vm10, %v3242_v37  ;;  %v3012_v57 = vpop.permute.xlu2 %3011 }
 0x526   :  { %3180 = vst.msk [vmem:[#allocation2 + $0x10] sm:$0xff] %vm3177_vm9, %v2990_v28  ;;  %v3252_v61 = vld [vmem:[#allocation2 + $0x50] sm:$0xff] }
 0x527   :  { %3191 = vst.msk [vmem:[#allocation2 + $0x68] sm:$0xff] %vm3177_vm9, %v3012_v57 }
 0x52a   :  { %3079 = vrot.lane.b32.xlu0 %v7395_v40, %s7624_s16  ;;  %3081 = vrot.lane.b32.xlu1 %v7396_v48, %s7624_s16  ;;  %v7406_v40 = vld [vmem:[%s11865_s0 + $0x31a] sm:$0xff] }
 0x52b   :  { %3083 = vrot.lane.b32.xlu2 %v7397_v2, %s7624_s16 }
 0x52c   :  { %v2998_v3 = vpop.permute.xlu1 %2997  ;;  %v2996_v12 = vpop.permute.xlu0 %2995  ;;  %v3245_v41 = vld [vmem:[#allocation2 + $0x18] sm:$0xff] }
 0x52d   :  { %3184 = vst.msk [vmem:[#allocation2 + $0x30] sm:$0xff] %vm3177_vm9, %v2998_v3  ;;  %7414 = vmatmul.msk.f32.gmra.mxu0 %vm3315_vm10, %v3243_v62  ;;  %v3018_v19 = vpop.permute.xlu2 %3017  ;;  %v3244_v34 = vld [vmem:[#allocation2 + $0x10] sm:$0xff] }
 0x52e   :  { %3183 = vst.msk [vmem:[#allocation2 + $0x28] sm:$0xff] %vm3177_vm9, %v2996_v12 }
 0x52f   :  { %3194 = vst.msk [vmem:[#allocation2 + $0x80] sm:$0xff] %vm3177_vm9, %v3018_v19 }
 0x532   :  { %3085 = vrot.lane.b32.xlu0 %v7398_v15, %s7624_s16  ;;  %3087 = vrot.lane.b32.xlu1 %v7399_v30, %s7624_s16  ;;  %v7625_v15 = vmov 0.0   ;;  %v3255_v30 = vld [vmem:[#allocation2 + $0x68] sm:$0xff] }
 0x533   :  { %3089 = vrot.lane.b32.xlu2 %v7400_v39, %s7624_s16  ;;  %4684 = vst.msk [vmem:[#allocation4 + $0x18] sm:$0xff] %vm3785_vm11, %v7625_v15  ;;  %v7410_v39 = vld [vmem:[%s11865_s0 + $0x34a] sm:$0xff] }
 0x534   :  { %v3004_v42 = vpop.permute.xlu1 %3003  ;;  %v3002_v0 = vpop.permute.xlu0 %3001  ;;  %v3248_v52 = vld [vmem:[#allocation2 + $0x30] sm:$0xff]  ;;  %4685 = vst.msk [vmem:[#allocation4 + $0x20] sm:$0xff] %vm3785_vm11, %v7625_v15 }
 0x535   :  { %3187 = vst.msk [vmem:[#allocation2 + $0x48] sm:$0xff] %vm3177_vm9, %v3004_v42  ;;  %7415 = vmatmul.msk.f32.gmra.mxu0 %vm3315_vm10, %v3244_v34  ;;  %v3024_v9 = vpop.permute.xlu2 %3023  ;;  %v3247_v38 = vld [vmem:[#allocation2 + $0x28] sm:$0xff] }
 0x536   :  { %3186 = vst.msk [vmem:[#allocation2 + $0x40] sm:$0xff] %vm3177_vm9, %v3002_v0 }
 0x537   :  { %3197 = vst.msk [vmem:[#allocation2 + $0x98] sm:$0xff] %vm3177_vm9, %v3024_v9 }
 0x538   :  { %4680 = vst.msk [vmem:[#allocation4] sm:$0xff] %vm3785_vm11, %v7625_v15 }
 0x539   :  { %4681 = vst.msk [vmem:[#allocation4 + $0x8] sm:$0xff] %vm3785_vm11, %v7625_v15 }
 0x53a   :  { %3091 = vrot.lane.b32.xlu0 %v7401_v6, %s7624_s16  ;;  %3093 = vrot.lane.b32.xlu1 %v7402_v51, %s7624_s16  ;;  %4687 = vst.msk [vmem:[#allocation4 + $0x30] sm:$0xff] %vm3785_vm11, %v7625_v15 }
 0x53b   :  { %3095 = vrot.lane.b32.xlu2 %v7403_v22, %s7624_s16  ;;  %4688 = vst.msk [vmem:[#allocation4 + $0x38] sm:$0xff] %vm3785_vm11, %v7625_v15 }
 0x53c   :  { %v3010_v25 = vpop.permute.xlu1 %3009  ;;  %v3008_v27 = vpop.permute.xlu0 %3007  ;;  %v3251_v31 = vld [vmem:[#allocation2 + $0x48] sm:$0xff]  ;;  %4690 = vst.msk [vmem:[#allocation4 + $0x48] sm:$0xff] %vm3785_vm11, %v7625_v15 }
 0x53d   :  { %3190 = vst.msk [vmem:[#allocation2 + $0x60] sm:$0xff] %vm3177_vm9, %v3010_v25  ;;  %7416 = vmatmul.msk.f32.gmra.mxu0 %vm3315_vm10, %v3245_v41  ;;  %v3030_v7 = vpop.permute.xlu2 %3029  ;;  %v3250_v13 = vld [vmem:[#allocation2 + $0x40] sm:$0xff] }
 0x53e   :  { %3189 = vst.msk [vmem:[#allocation2 + $0x58] sm:$0xff] %vm3177_vm9, %v3008_v27 }
 0x53f   :  { %3200 = vst.msk [vmem:[#allocation2 + $0xb0] sm:$0xff] %vm3177_vm9, %v3030_v7  ;;  %v10624_v7 = vld [vmem:[%s11867_s2] ss:$0 sm:$0xff] }
 0x540   :  { %4691 = vst.msk [vmem:[#allocation4 + $0x50] sm:$0xff] %vm3785_vm11, %v7625_v15 }
 0x541   :  { %4693 = vst.msk [vmem:[#allocation4 + $0x60] sm:$0xff] %vm3785_vm11, %v7625_v15 }
 0x542   :  { %3097 = vrot.lane.b32.xlu0 %v7404_v53, %s7624_s16  ;;  %3099 = vrot.lane.b32.xlu1 %v7405_v4, %s7624_s16  ;;  %4694 = vst.msk [vmem:[#allocation4 + $0x68] sm:$0xff] %vm3785_vm11, %v7625_v15 }
 0x543   :  { %3101 = vrot.lane.b32.xlu2 %v7406_v40, %s7624_s16  ;;  %4696 = vst.msk [vmem:[#allocation4 + $0x78] sm:$0xff] %vm3785_vm11, %v7625_v15 }
 0x544   :  { %v3016_v16 = vpop.permute.xlu1 %3015  ;;  %v3014_v18 = vpop.permute.xlu0 %3013  ;;  %v3254_v62 = vld [vmem:[#allocation2 + $0x60] sm:$0xff]  ;;  %4697 = vst.msk [vmem:[#allocation4 + $0x80] sm:$0xff] %vm3785_vm11, %v7625_v15 }
 0x545   :  { %3193 = vst.msk [vmem:[#allocation2 + $0x78] sm:$0xff] %vm3177_vm9, %v3016_v16  ;;  %7417 = vmatmul.msk.f32.gmra.mxu0 %vm3315_vm10, %v3246_v11  ;;  %v3036_v56 = vpop.permute.xlu2 %3035  ;;  %v3253_v24 = vld [vmem:[#allocation2 + $0x58] sm:$0xff]  ;;  %v3258_v11 = vld [vmem:[#allocation2 + $0x80] sm:$0xff] }
 0x546   :  { %3192 = vst.msk [vmem:[#allocation2 + $0x70] sm:$0xff] %vm3177_vm9, %v3014_v18 }
 0x547   :  { %3203 = vst.msk [vmem:[#allocation2 + $0xc8] sm:$0xff] %vm3177_vm9, %v3036_v56 }
 0x548   :  { %4699 = vst.msk [vmem:[#allocation4 + $0x90] sm:$0xff] %vm3785_vm11, %v7625_v15 }
 0x549   :  { %4700 = vst.msk [vmem:[#allocation4 + $0x98] sm:$0xff] %vm3785_vm11, %v7625_v15 }
 0x54a   :  { %3103 = vrot.lane.b32.xlu0 %v7407_v44, %s7624_s16  ;;  %3105 = vrot.lane.b32.xlu1 %v7408_v35, %s7624_s16  ;;  %4702 = vst.msk [vmem:[#allocation4 + $0xa8] sm:$0xff] %vm3785_vm11, %v7625_v15 }
 0x54b   :  { %4703 = vst.msk [vmem:[#allocation4 + $0xb0] sm:$0xff] %vm3785_vm11, %v7625_v15 }
 0x54c   :  { %v3022_v55 = vpop.permute.xlu1 %3021  ;;  %v3020_v33 = vpop.permute.xlu0 %3019  ;;  %4705 = vst.msk [vmem:[#allocation4 + $0xc0] sm:$0xff] %vm3785_vm11, %v7625_v15  ;;  %v3257_v27 = vld [vmem:[#allocation2 + $0x78] sm:$0xff] }
 0x54d   :  { %3196 = vst.msk [vmem:[#allocation2 + $0x90] sm:$0xff] %vm3177_vm9, %v3022_v55  ;;  %7418 = vmatmul.msk.f32.gmra.mxu0 %vm3315_vm10, %v3247_v38  ;;  %v3042_v45 = vpop.permute.xlu2 %3041  ;;  %v3256_v2 = vld [vmem:[#allocation2 + $0x70] sm:$0xff] }
 0x54e   :  { %3195 = vst.msk [vmem:[#allocation2 + $0x88] sm:$0xff] %vm3177_vm9, %v3020_v33  ;;  %v3267_v29 = vld [vmem:[#allocation2 + $0xc8] sm:$0xff] }
 0x54f   :  { %3206 = vst.msk [vmem:[#allocation2 + $0xe0] sm:$0xff] %vm3177_vm9, %v3042_v45 }
 0x550   :  { %4706 = vst.msk [vmem:[#allocation4 + $0xc8] sm:$0xff] %vm3785_vm11, %v7625_v15 }
 0x551   :  { %4708 = vst.msk [vmem:[#allocation4 + $0xd8] sm:$0xff] %vm3785_vm11, %v7625_v15 }
 0x552   :  { %4709 = vst.msk [vmem:[#allocation4 + $0xe0] sm:$0xff] %vm3785_vm11, %v7625_v15  ;;  %3109 = vrot.lane.b32.xlu0 %v7410_v39, %s7624_s16 }
 0x553   :  { %4711 = vst.msk [vmem:[#allocation4 + $0xf0] sm:$0xff] %vm3785_vm11, %v7625_v15 }
 0x554   :  { %v3028_v46 = vpop.permute.xlu1 %3027  ;;  %v3026_v47 = vpop.permute.xlu0 %3025  ;;  %4712 = vst.msk [vmem:[#allocation4 + $0xf8] sm:$0xff] %vm3785_vm11, %v7625_v15  ;;  %v3260_v38 = vld [vmem:[#allocation2 + $0x90] sm:$0xff] }
 0x555   :  { %3199 = vst.msk [vmem:[#allocation2 + $0xa8] sm:$0xff] %vm3177_vm9, %v3028_v46  ;;  %7419 = vmatmul.msk.f32.gmra.mxu0 %vm3315_vm10, %v3248_v52  ;;  %v3048_v54 = vpop.permute.xlu2 %3047  ;;  %v3259_v55 = vld [vmem:[#allocation2 + $0x88] sm:$0xff]  ;;  %v3261_v46 = vld [vmem:[#allocation2 + $0x98] sm:$0xff] }
 0x556   :  { %3198 = vst.msk [vmem:[#allocation2 + $0xa0] sm:$0xff] %vm3177_vm9, %v3026_v47  ;;  %v3270_v20 = vld [vmem:[#allocation2 + $0xe0] sm:$0xff] }
 0x557   :  { %3209 = vst.msk [vmem:[#allocation2 + $0xf8] sm:$0xff] %vm3177_vm9, %v3048_v54 }
 0x558   :  { %4714 = vst.msk [vmem:[#allocation4 + $0x108] sm:$0xff] %vm3785_vm11, %v7625_v15 }
 0x559   :  { %4715 = vst.msk [vmem:[#allocation4 + $0x110] sm:$0xff] %vm3785_vm11, %v7625_v15 }
 0x55a   :  { %4717 = vst.msk [vmem:[#allocation4 + $0x120] sm:$0xff] %vm3785_vm11, %v7625_v15 }
 0x55b   :  { %4718 = vst.msk [vmem:[#allocation4 + $0x128] sm:$0xff] %vm3785_vm11, %v7625_v15 }
 0x55c   :  { %v3034_v59 = vpop.permute.xlu1 %3033  ;;  %v3032_v60 = vpop.permute.xlu0 %3031  ;;  %4720 = vst.msk [vmem:[#allocation4 + $0x138] sm:$0xff] %vm3785_vm11, %v7625_v15 }
 0x55d   :  { %3202 = vst.msk [vmem:[#allocation2 + $0xc0] sm:$0xff] %vm3177_vm9, %v3034_v59  ;;  %7420 = vmatmul.msk.f32.gmra.mxu0 %vm3315_vm10, %v3249_v63  ;;  %v3054_v5 = vpop.permute.xlu2 %3053  ;;  %v3262_v52 = vld [vmem:[#allocation2 + $0xa0] sm:$0xff]  ;;  %v3263_v59 = vld [vmem:[#allocation2 + $0xa8] sm:$0xff] }
 0x55e   :  { %3201 = vst.msk [vmem:[#allocation2 + $0xb8] sm:$0xff] %vm3177_vm9, %v3032_v60  ;;  %v3273_v34 = vld [vmem:[#allocation2 + $0xf8] sm:$0xff] }
 0x55f   :  { %3212 = vst.msk [vmem:[#allocation2 + $0x110] sm:$0xff] %vm3177_vm9, %v3054_v5 }
 0x560   :  { %4721 = vst.msk [vmem:[#allocation4 + $0x140] sm:$0xff] %vm3785_vm11, %v7625_v15 }
 0x561   :  { %4723 = vst.msk [vmem:[#allocation4 + $0x150] sm:$0xff] %vm3785_vm11, %v7625_v15 }
 0x562   :  { %4724 = vst.msk [vmem:[#allocation4 + $0x158] sm:$0xff] %vm3785_vm11, %v7625_v15 }
 0x563   :  { %4726 = vst.msk [vmem:[#allocation4 + $0x168] sm:$0xff] %vm3785_vm11, %v7625_v15 }
 0x564   :  { %v3040_v8 = vpop.permute.xlu1 %3039  ;;  %v3038_v14 = vpop.permute.xlu0 %3037  ;;  %v3266_v43 = vld [vmem:[#allocation2 + $0xc0] sm:$0xff]  ;;  %4727 = vst.msk [vmem:[#allocation4 + $0x170] sm:$0xff] %vm3785_vm11, %v7625_v15 }
 0x565   :  { %3205 = vst.msk [vmem:[#allocation2 + $0xd8] sm:$0xff] %vm3177_vm9, %v3040_v8  ;;  %7421 = vmatmul.msk.f32.gmra.mxu0 %vm3315_vm10, %v3250_v13  ;;  %v3265_v17 = vld [vmem:[#allocation2 + $0xb8] sm:$0xff]  ;;  %v3060_v23 = vpop.permute.xlu2 %3059  ;;  %v3264_v8 = vld [vmem:[#allocation2 + $0xb0] sm:$0xff] }
 0x566   :  { %7436 = vmatmul.msk.f32.vlgmr.msra.gmra.mxu1 %vm3315_vm10, %v3265_v17  ;;  %3204 = vst.msk [vmem:[#allocation2 + $0xd0] sm:$0xff] %vm3177_vm9, %v3038_v14  ;;  %v3276_v51 = vld [vmem:[#allocation2 + $0x110] sm:$0xff] }
 0x567   :  { %3215 = vst.msk [vmem:[#allocation2 + $0x128] sm:$0xff] %vm3177_vm9, %v3060_v23  ;;  %v7411_v17 = vld [vmem:[%s11865_s0 + $0x352] sm:$0xff] }
 0x568   :  { %4729 = vst.msk [vmem:[#allocation4 + $0x180] sm:$0xff] %vm3785_vm11, %v7625_v15  ;;  %3111 = vrot.lane.b32.xlu1 %v7411_v17, %s7624_s16 }
 0x569   :  { %4730 = vst.msk [vmem:[#allocation4 + $0x188] sm:$0xff] %vm3785_vm11, %v7625_v15 }
 0x56a   :  { %4735 = vst.msk [vmem:[#allocation4 + $0x1b0] sm:$0xff] %vm3785_vm11, %v7625_v15 }
 0x56b   :  { %4736 = vst.msk [vmem:[#allocation4 + $0x1b8] sm:$0xff] %vm3785_vm11, %v7625_v15 }
 0x56c   :  { %v3046_v26 = vpop.permute.xlu1 %3045  ;;  %v3269_v32 = vld [vmem:[#allocation2 + $0xd8] sm:$0xff]  ;;  %v3044_v36 = vpop.permute.xlu0 %3043  ;;  %4738 = vst.msk [vmem:[#allocation4 + $0x1c8] sm:$0xff] %vm3785_vm11, %v7625_v15 }
 0x56d   :  { %3208 = vst.msk [vmem:[#allocation2 + $0xf0] sm:$0xff] %vm3177_vm9, %v3046_v26  ;;  %7422 = vmatmul.msk.f32.gmra.mxu0 %vm3315_vm10, %v3251_v31  ;;  %7440 = vmatmul.msk.f32.vlgmr.msra.gmra.mxu2 %vm3315_vm10, %v3269_v32  ;;  %v3066_v50 = vpop.permute.xlu2 %3065  ;;  %v3268_v37 = vld [vmem:[#allocation2 + $0xd0] sm:$0xff] }
 0x56e   :  { %7437 = vmatmul.msk.f32.gmra.mxu1 %vm3315_vm10, %v3266_v43  ;;  %3207 = vst.msk [vmem:[#allocation2 + $0xe8] sm:$0xff] %vm3177_vm9, %v3044_v36  ;;  %v3279_v54 = vld [vmem:[#allocation2 + $0x128] sm:$0xff]  ;;  %v7409_v26 = vld [vmem:[%s11865_s0 + $0x33a] sm:$0xff]  ;;  %s7638_s0 = smov 128  }
 0x56f   :  { %3218 = vst.msk [vmem:[#allocation2 + $0x140] sm:$0xff] %vm3177_vm9, %v3066_v50  ;;  %3107 = vrot.lane.b32.xlu2 %v7409_v26, %s7624_s16 }
 0x570   :  { %4739 = vst.msk [vmem:[#allocation4 + $0x1d0] sm:$0xff] %vm3785_vm11, %v7625_v15 }
 0x571   :  { %4741 = vst.msk [vmem:[#allocation4 + $0x1e0] sm:$0xff] %vm3785_vm11, %v7625_v15 }
 0x572   :  { %4742 = vst.msk [vmem:[#allocation4 + $0x1e8] sm:$0xff] %vm3785_vm11, %v7625_v15 }
 0x573   :  { %4744 = vst.msk [vmem:[#allocation4 + $0x1f8] sm:$0xff] %vm3785_vm11, %v7625_v15 }
 0x574   :  { %v3052_v58 = vpop.permute.xlu1 %3051  ;;  %v3050_v1 = vpop.permute.xlu0 %3049  ;;  %v3272_v3 = vld [vmem:[#allocation2 + $0xf0] sm:$0xff]  ;;  %4745 = vst.msk [vmem:[#allocation4 + $0x200] sm:$0xff] %vm3785_vm11, %v7625_v15 }
 0x575   :  { %3211 = vst.msk [vmem:[#allocation2 + $0x108] sm:$0xff] %vm3177_vm9, %v3052_v58  ;;  %7423 = vmatmul.msk.f32.gmra.mxu0 %vm3315_vm10, %v3252_v61  ;;  %7441 = vmatmul.msk.f32.gmra.mxu2 %vm3315_vm10, %v3270_v20  ;;  %v3072_v10 = vpop.permute.xlu2 %3071  ;;  %v3271_v49 = vld [vmem:[#allocation2 + $0xe8] sm:$0xff] }
 0x576   :  { %7438 = vmatmul.msk.f32.gmra.mxu1 %vm3315_vm10, %v3267_v29  ;;  %3210 = vst.msk [vmem:[#allocation2 + $0x100] sm:$0xff] %vm3177_vm9, %v3050_v1  ;;  %v3282_v23 = vld [vmem:[#allocation2 + $0x140] sm:$0xff] }
 0x577   :  { %3221 = vst.msk [vmem:[#allocation2 + $0x158] sm:$0xff] %vm3177_vm9, %v3072_v10 }
 0x578   :  { %4747 = vst.msk [vmem:[#allocation4 + $0x210] sm:$0xff] %vm3785_vm11, %v7625_v15 }
 0x579   :  { %4748 = vst.msk [vmem:[#allocation4 + $0x218] sm:$0xff] %vm3785_vm11, %v7625_v15 }
 0x57a   :  { %4750 = vst.msk [vmem:[#allocation4 + $0x228] sm:$0xff] %vm3785_vm11, %v7625_v15 }
 0x57b   :  { %4751 = vst.msk [vmem:[#allocation4 + $0x230] sm:$0xff] %vm3785_vm11, %v7625_v15 }
 0x57c   :  { %v3058_v21 = vpop.permute.xlu1 %3057  ;;  %v3056_v28 = vpop.permute.xlu0 %3055  ;;  %v3275_v41 = vld [vmem:[#allocation2 + $0x108] sm:$0xff]  ;;  %4753 = vst.msk [vmem:[#allocation4 + $0x240] sm:$0xff] %vm3785_vm11, %v7625_v15 }
 0x57d   :  { %3214 = vst.msk [vmem:[#allocation2 + $0x120] sm:$0xff] %vm3177_vm9, %v3058_v21  ;;  %7424 = vmatmul.msk.f32.gmra.mxu0 %vm3315_vm10, %v3253_v24  ;;  %7442 = vmatmul.msk.f32.gmra.mxu2 %vm3315_vm10, %v3271_v49  ;;  %v3078_v48 = vpop.permute.xlu2 %3077  ;;  %v3274_v9 = vld [vmem:[#allocation2 + $0x100] sm:$0xff] }
 0x57e   :  { %7439 = vmatmul.msk.f32.gmra.mxu1 %vm3315_vm10, %v3268_v37  ;;  %3213 = vst.msk [vmem:[#allocation2 + $0x118] sm:$0xff] %vm3177_vm9, %v3056_v28  ;;  %v3285_v29 = vld [vmem:[#allocation2 + $0x158] sm:$0xff] }
 0x57f   :  { %3224 = vst.msk [vmem:[#allocation2 + $0x170] sm:$0xff] %vm3177_vm9, %v3078_v48 }
 0x580   :  { %4754 = vst.msk [vmem:[#allocation4 + $0x248] sm:$0xff] %vm3785_vm11, %v7625_v15 }
 0x581   :  { %4756 = vst.msk [vmem:[#allocation4 + $0x258] sm:$0xff] %vm3785_vm11, %v7625_v15 }
 0x582   :  { %4757 = vst.msk [vmem:[#allocation4 + $0x260] sm:$0xff] %vm3785_vm11, %v7625_v15 }
 0x583   :  { %4759 = vst.msk [vmem:[#allocation4 + $0x270] sm:$0xff] %vm3785_vm11, %v7625_v15 }
 0x584   :  { %v3064_v57 = vpop.permute.xlu1 %3063  ;;  %v3062_v12 = vpop.permute.xlu0 %3061  ;;  %4760 = vst.msk [vmem:[#allocation4 + $0x278] sm:$0xff] %vm3785_vm11, %v7625_v15  ;;  %v3278_v47 = vld [vmem:[#allocation2 + $0x120] sm:$0xff] }
 0x585   :  { %3217 = vst.msk [vmem:[#allocation2 + $0x138] sm:$0xff] %vm3177_vm9, %v3064_v57  ;;  %7425 = vmatmul.msk.f32.gmra.mxu0 %vm3315_vm10, %v3254_v62  ;;  %7443 = vmatmul.msk.f32.gmra.mxu2 %vm3315_vm10, %v3272_v3  ;;  %v3277_v45 = vld [vmem:[#allocation2 + $0x118] sm:$0xff]  ;;  %v3084_v35 = vpop.permute.xlu2 %3083 }
 0x586   :  { %3216 = vst.msk [vmem:[#allocation2 + $0x130] sm:$0xff] %vm3177_vm9, %v3062_v12  ;;  %v3288_v33 = vld [vmem:[#allocation2 + $0x170] sm:$0xff] }
 0x587   :  { %4762 = vst.msk [vmem:[#allocation4 + $0x288] sm:$0xff] %vm3785_vm11, %v7625_v15 }
 0x588   :  { %4763 = vst.msk [vmem:[#allocation4 + $0x290] sm:$0xff] %vm3785_vm11, %v7625_v15 }
 0x589   :  { %4765 = vst.msk [vmem:[#allocation4 + $0x2a0] sm:$0xff] %vm3785_vm11, %v7625_v15 }
 0x58a   :  { %4766 = vst.msk [vmem:[#allocation4 + $0x2a8] sm:$0xff] %vm3785_vm11, %v7625_v15 }
 0x58b   :  { %4768 = vst.msk [vmem:[#allocation4 + $0x2b8] sm:$0xff] %vm3785_vm11, %v7625_v15 }
 0x58c   :  { %v3070_v19 = vpop.permute.xlu1 %3069  ;;  %v3068_v42 = vpop.permute.xlu0 %3067  ;;  %4769 = vst.msk [vmem:[#allocation4 + $0x2c0] sm:$0xff] %vm3785_vm11, %v7625_v15  ;;  %v3281_v13 = vld [vmem:[#allocation2 + $0x138] sm:$0xff] }
 0x58d   :  { %3220 = vst.msk [vmem:[#allocation2 + $0x150] sm:$0xff] %vm3177_vm9, %v3070_v19  ;;  %7426 = vmatmul.msk.f32.gmra.mxu0 %vm3315_vm10, %v3255_v30  ;;  %7444 = vmatmul.msk.f32.gmra.mxu2 %vm3315_vm10, %v3273_v34  ;;  %v3280_v5 = vld [vmem:[#allocation2 + $0x130] sm:$0xff]  ;;  %v3090_v12 = vpop.permute.xlu2 %3089 }
 0x58e   :  { %3219 = vst.msk [vmem:[#allocation2 + $0x148] sm:$0xff] %vm3177_vm9, %v3068_v42 }
 0x58f   :  { %4771 = vst.msk [vmem:[#allocation4 + $0x2d0] sm:$0xff] %vm3785_vm11, %v7625_v15 }
 0x590   :  { %4772 = vst.msk [vmem:[#allocation4 + $0x2d8] sm:$0xff] %vm3785_vm11, %v7625_v15 }
 0x591   :  { %4774 = vst.msk [vmem:[#allocation4 + $0x2e8] sm:$0xff] %vm3785_vm11, %v7625_v15 }
 0x592   :  { %4775 = vst.msk [vmem:[#allocation4 + $0x2f0] sm:$0xff] %vm3785_vm11, %v7625_v15 }
 0x593   :  { %4777 = vst.msk [vmem:[#allocation4 + $0x300] sm:$0xff] %vm3785_vm11, %v7625_v15 }
 0x594   :  { %v3076_v0 = vpop.permute.xlu1 %3075  ;;  %v3074_v25 = vpop.permute.xlu0 %3073  ;;  %4778 = vst.msk [vmem:[#allocation4 + $0x308] sm:$0xff] %vm3785_vm11, %v7625_v15  ;;  %v3284_v43 = vld [vmem:[#allocation2 + $0x150] sm:$0xff] }
 0x595   :  { %3223 = vst.msk [vmem:[#allocation2 + $0x168] sm:$0xff] %vm3177_vm9, %v3076_v0  ;;  %7427 = vmatmul.msk.f32.gmra.mxu0 %vm3315_vm10, %v3256_v2  ;;  %7445 = vmatmul.msk.f32.gmra.mxu2 %vm3315_vm10, %v3274_v9  ;;  %v3283_v32 = vld [vmem:[#allocation2 + $0x148] sm:$0xff] }
 0x596   :  { %3222 = vst.msk [vmem:[#allocation2 + $0x160] sm:$0xff] %vm3177_vm9, %v3074_v25 }
 0x597   :  { %4780 = vst.msk [vmem:[#allocation4 + $0x318] sm:$0xff] %vm3785_vm11, %v7625_v15 }
 0x598   :  { %4781 = vst.msk [vmem:[#allocation4 + $0x320] sm:$0xff] %vm3785_vm11, %v7625_v15 }
 0x599   :  { %4783 = vst.msk [vmem:[#allocation4 + $0x330] sm:$0xff] %vm3785_vm11, %v7625_v15 }
 0x59a   :  { %4784 = vst.msk [vmem:[#allocation4 + $0x338] sm:$0xff] %vm3785_vm11, %v7625_v15 }
 0x59b   :  { %4686 = vst.msk [vmem:[#allocation4 + $0x28] sm:$0x3] %vm4682_vm12, %v7625_v15 }
 0x59c   :  { %v3287_v6 = vld [vmem:[#allocation2 + $0x168] sm:$0xff]  ;;  %v3080_v63 = vpop.permute.xlu0 %3079  ;;  %4683 = vst.msk [vmem:[#allocation4 + $0x10] sm:$0x3] %vm4682_vm12, %v7625_v15  ;;  %v3082_v58 = vpop.permute.xlu1 %3081 }
 0x59d   :  { %7428 = vmatmul.msk.f32.gmra.mxu0 %vm3315_vm10, %v3257_v27  ;;  %7446 = vmatmul.msk.f32.gmra.mxu2 %vm3315_vm10, %v3275_v41  ;;  %3225 = vst.msk [vmem:[#allocation2 + $0x178] sm:$0xff] %vm3177_vm9, %v3080_v63  ;;  %v3286_v62 = vld [vmem:[#allocation2 + $0x160] sm:$0xff] }
 0x59e   :  { %7458 = vmatmul.msk.f32.vlgmr.msra.gmra.mxu3 %vm3315_vm10, %v3287_v6  ;;  %4689 = vst.msk [vmem:[#allocation4 + $0x40] sm:$0x3] %vm4682_vm12, %v7625_v15  ;;  %v3096_v6 = vpop.permute.xlu2 %3095 }
 0x59f   :  { %4692 = vst.msk [vmem:[#allocation4 + $0x58] sm:$0x3] %vm4682_vm12, %v7625_v15 }
 0x5a0   :  { %4695 = vst.msk [vmem:[#allocation4 + $0x70] sm:$0x3] %vm4682_vm12, %v7625_v15 }
 0x5a1   :  { %4698 = vst.msk [vmem:[#allocation4 + $0x88] sm:$0x3] %vm4682_vm12, %v7625_v15 }
 0x5a2   :  { %v3529_v16 = vpop.f32.mrf.mxu0  ;;  %4701 = vst.msk [vmem:[#allocation4 + $0xa0] sm:$0x3] %vm4682_vm12, %v7625_v15 }
 0x5a3   :  { %v3530_v18 = vadd.f32 %v10624_v7, %v3529_v16  ;;  %4704 = vst.msk [vmem:[#allocation4 + $0xb8] sm:$0x3] %vm4682_vm12, %v7625_v15 }
 0x5a4   :  { %v3289_v14 = vld [vmem:[#allocation2 + $0x178] sm:$0xff]  ;;  %4707 = vst.msk [vmem:[#allocation4 + $0xd0] sm:$0x3] %vm4682_vm12, %v7625_v15  ;;  %v3086_v24 = vpop.permute.xlu0 %3085  ;;  %v3088_v40 = vpop.permute.xlu1 %3087 }
 0x5a5   :  { %v3721_v56 = vmax.f32 %v3530_v18, 0.0  ;;  %7429 = vmatmul.msk.f32.gmra.mxu0 %vm3315_vm10, %v3258_v11  ;;  %7447 = vmatmul.msk.f32.gmra.mxu2 %vm3315_vm10, %v3276_v51  ;;  %4710 = vst.msk [vmem:[#allocation4 + $0xe8] sm:$0x3] %vm4682_vm12, %v7625_v15 }
 0x5a6   :  { %7459 = vmatmul.msk.f32.gmra.mxu3 %vm3315_vm10, %v3288_v33  ;;  %4713 = vst.msk [vmem:[#allocation4 + $0x100] sm:$0x3] %vm4682_vm12, %v7625_v15 }
 0x5a7   :  { %3786 = vst.msk [vmem:[#allocation3] sm:$0xff] %vm3785_vm11, %v3721_v56 }
 0x5a8   :  { %4790 = vst.msk [vmem:[#allocation4 + $0x19] sm:$0xff] %vm3785_vm11, %v3721_v56 }
 0x5a9   :  { %4716 = vst.msk [vmem:[#allocation4 + $0x118] sm:$0x3] %vm4682_vm12, %v7625_v15 }
 0x5aa   :  { %v3532_v53 = vpop.f32.mrf.mxu0  ;;  %4719 = vst.msk [vmem:[#allocation4 + $0x130] sm:$0x3] %vm4682_vm12, %v7625_v15 }
 0x5ab   :  { %v3533_v60 = vadd.f32 %v10624_v7, %v3532_v53  ;;  %4722 = vst.msk [vmem:[#allocation4 + $0x148] sm:$0x3] %vm4682_vm12, %v7625_v15 }
 0x5ac   :  { %4725 = vst.msk [vmem:[#allocation4 + $0x160] sm:$0x3] %vm4682_vm12, %v7625_v15  ;;  %v3092_v34 = vpop.permute.xlu0 %3091  ;;  %v3094_v2 = vpop.permute.xlu1 %3093 }
 0x5ad   :  { %7430 = vmatmul.msk.f32.gmra.mxu0 %vm3315_vm10, %v3259_v55  ;;  %7448 = vmatmul.msk.f32.gmra.mxu2 %vm3315_vm10, %v3277_v45  ;;  %v3722_v4 = vmax.f32 %v3533_v60, 0.0  ;;  %4728 = vst.msk [vmem:[#allocation4 + $0x178] sm:$0x3] %vm4682_vm12, %v7625_v15 }
 0x5ae   :  { %7460 = vmatmul.msk.f32.gmra.mxu3 %vm3315_vm10, %v3289_v14  ;;  %4731 = vst.msk [vmem:[#allocation4 + $0x190] sm:$0x3] %vm4682_vm12, %v7625_v15 }
 0x5af   :  { %3787 = vst.msk [vmem:[#allocation3 + $0x8] sm:$0xff] %vm3785_vm11, %v3722_v4 }
 0x5b0   :  { %4791 = vst.msk [vmem:[#allocation4 + $0x21] sm:$0xff] %vm3785_vm11, %v3722_v4 }
 0x5b1   :  { %4737 = vst.msk [vmem:[#allocation4 + $0x1c0] sm:$0x3] %vm4682_vm12, %v7625_v15 }
 0x5b2   :  { %v3535_v22 = vpop.f32.mrf.mxu0  ;;  %4740 = vst.msk [vmem:[#allocation4 + $0x1d8] sm:$0x3] %vm4682_vm12, %v7625_v15 }
 0x5b3   :  { %4743 = vst.msk [vmem:[#allocation4 + $0x1f0] sm:$0x3] %vm4682_vm12, %v7625_v15  ;;  %v3536_v50 = vadd.f32 %v10624_v7, %v3535_v22 }
 0x5b4   :  { %4746 = vst.msk [vmem:[#allocation4 + $0x208] sm:$0x3] %vm4682_vm12, %v7625_v15  ;;  %v3100_v63 = vpop.permute.xlu1 %3099 }
 0x5b5   :  { %7431 = vmatmul.msk.f32.gmra.mxu0 %vm3315_vm10, %v3260_v38  ;;  %7449 = vmatmul.msk.f32.gmra.mxu2 %vm3315_vm10, %v3278_v47  ;;  %4749 = vst.msk [vmem:[#allocation4 + $0x220] sm:$0x3] %vm4682_vm12, %v7625_v15  ;;  %v3723_v61 = vmax.f32 %v3536_v50, 0.0  ;;  %v3098_v38 = vpop.permute.xlu0 %3097 }
 0x5b6   :  { %4752 = vst.msk [vmem:[#allocation4 + $0x238] sm:$0x3] %vm4682_vm12, %v7625_v15 }
 0x5b7   :  { %4755 = vst.msk [vmem:[#allocation4 + $0x250] sm:$0x3] %vm4682_vm12, %v7625_v15 }
 0x5b8   :  { %4758 = vst.msk [vmem:[#allocation4 + $0x268] sm:$0x3] %vm4682_vm12, %v7625_v15 }
 0x5b9   :  { %4761 = vst.msk [vmem:[#allocation4 + $0x280] sm:$0x3] %vm4682_vm12, %v7625_v15 }
 0x5ba   :  { %v3538_v31 = vpop.f32.mrf.mxu0  ;;  %4764 = vst.msk [vmem:[#allocation4 + $0x298] sm:$0x3] %vm4682_vm12, %v7625_v15 }
 0x5bb   :  { %4767 = vst.msk [vmem:[#allocation4 + $0x2b0] sm:$0x3] %vm4682_vm12, %v7625_v15  ;;  %v3539_v20 = vadd.f32 %v10624_v7, %v3538_v31 }
 0x5bc   :  { %4770 = vst.msk [vmem:[#allocation4 + $0x2c8] sm:$0x3] %vm4682_vm12, %v7625_v15 }
 0x5bd   :  { %7432 = vmatmul.msk.f32.gmra.mxu0 %vm3315_vm10, %v3261_v46  ;;  %7450 = vmatmul.msk.f32.gmra.mxu2 %vm3315_vm10, %v3279_v54  ;;  %4773 = vst.msk [vmem:[#allocation4 + $0x2e0] sm:$0x3] %vm4682_vm12, %v7625_v15  ;;  %v3724_v10 = vmax.f32 %v3539_v20, 0.0 }
 0x5be   :  { %4776 = vst.msk [vmem:[#allocation4 + $0x2f8] sm:$0x3] %vm4682_vm12, %v7625_v15 }
 0x5bf   :  { %4779 = vst.msk [vmem:[#allocation4 + $0x310] sm:$0x3] %vm4682_vm12, %v7625_v15 }
 0x5c0   :  { %4782 = vst.msk [vmem:[#allocation4 + $0x328] sm:$0x3] %vm4682_vm12, %v7625_v15 }
 0x5c1   :  { %4785 = vst.msk [vmem:[#allocation4 + $0x340] sm:$0x3] %vm4682_vm12, %v7625_v15  ;;  %vm4675_vm12 = vcmask 1048512  }
 0x5c2   :  { %v3541_v36 = vpop.f32.mrf.mxu0  ;;  %3226 = vst.msk [vmem:[#allocation2 + $0x180] sm:$0xff] %vm3177_vm9, %v3082_v58 }
 0x5c3   :  { %v3542_v1 = vadd.f32 %v10624_v7, %v3541_v36  ;;  %3788 = vst.msk [vmem:[#allocation3 + $0x10] sm:$0xff] %vm3785_vm11, %v3723_v61 }
 0x5c4   :  { %4792 = vst.msk [vmem:[#allocation4 + $0x31] sm:$0xff] %vm3785_vm11, %v3723_v61 }
 0x5c5   :  { %7433 = vmatmul.msk.f32.gmra.mxu0 %vm3315_vm10, %v3262_v52  ;;  %7451 = vmatmul.msk.f32.gmra.mxu2 %vm3315_vm10, %v3280_v5  ;;  %3227 = vst.msk [vmem:[#allocation2 + $0x188] sm:$0xff] %vm3177_vm9, %v3084_v35  ;;  %v3725_v28 = vmax.f32 %v3542_v1, 0.0  ;;  %v3104_v35 = vpop.permute.xlu0 %3103 }
 0x5c6   :  { %3789 = vst.msk [vmem:[#allocation3 + $0x18] sm:$0xff] %vm3785_vm11, %v3724_v10 }
 0x5c7   :  { %4793 = vst.msk [vmem:[#allocation4 + $0x39] sm:$0xff] %vm3785_vm11, %v3724_v10 }
 0x5c8   :  { %3228 = vst.msk [vmem:[#allocation2 + $0x190] sm:$0xff] %vm3177_vm9, %v3086_v24 }
 0x5c9   :  { %v3290_v57 = vld [vmem:[#allocation2 + $0x180] sm:$0xff]  ;;  %3790 = vst.msk [vmem:[#allocation3 + $0x20] sm:$0xff] %vm3785_vm11, %v3725_v28 }
 0x5ca   :  { %v3544_v44 = vpop.f32.mrf.mxu0  ;;  %7461 = vmatmul.msk.f32.gmra.mxu3 %vm3315_vm10, %v3290_v57  ;;  %4794 = vst.msk [vmem:[#allocation4 + $0x49] sm:$0xff] %vm3785_vm11, %v3725_v28 }
 0x5cb   :  { %v3545_v21 = vadd.f32 %v10624_v7, %v3544_v44  ;;  %3229 = vst.msk [vmem:[#allocation2 + $0x198] sm:$0xff] %vm3177_vm9, %v3088_v40 }
 0x5cc   :  { %3230 = vst.msk [vmem:[#allocation2 + $0x1a0] sm:$0xff] %vm3177_vm9, %v3090_v12  ;;  %v3291_v0 = vld [vmem:[#allocation2 + $0x188] sm:$0xff] }
 0x5cd   :  { %7434 = vmatmul.msk.f32.gmra.mxu0 %vm3315_vm10, %v3263_v59  ;;  %7452 = vmatmul.msk.f32.gmra.mxu2 %vm3315_vm10, %v3281_v13  ;;  %v3726_v48 = vmax.f32 %v3545_v21, 0.0  ;;  %3231 = vst.msk [vmem:[#allocation2 + $0x1a8] sm:$0xff] %vm3177_vm9, %v3092_v34 }
 0x5ce   :  { %3232 = vst.msk [vmem:[#allocation2 + $0x1b0] sm:$0xff] %vm3177_vm9, %v3094_v2  ;;  %v4856_v47 = vld [vmem:[#allocation4 + $0x30] ss:$2 sm:$0xff] }
 0x5cf   :  { %3791 = vst.msk [vmem:[#allocation3 + $0x28] sm:$0xff] %vm3785_vm11, %v3726_v48  ;;  %v3292_v11 = vld [vmem:[#allocation2 + $0x190] sm:$0xff] }
 0x5d0   :  { %4795 = vst.msk [vmem:[#allocation4 + $0x51] sm:$0xff] %vm3785_vm11, %v3726_v48  ;;  %v3106_v48 = vpop.permute.xlu1 %3105 }
 0x5d1   :  { %3233 = vst.msk [vmem:[#allocation2 + $0x1b8] sm:$0xff] %vm3177_vm9, %v3096_v6 }
 0x5d2   :  { %v3547_v49 = vpop.f32.mrf.mxu0  ;;  %7462 = vmatmul.msk.f32.gmra.mxu3 %vm3315_vm10, %v3291_v0  ;;  %3234 = vst.msk [vmem:[#allocation2 + $0x1c0] sm:$0xff] %vm3177_vm9, %v3098_v38  ;;  %v3293_v46 = vld [vmem:[#allocation2 + $0x198] sm:$0xff] }
 0x5d3   :  { %v3548_v37 = vadd.f32 %v10624_v7, %v3547_v49  ;;  %4886 = vst.msk [vmem:[#allocation5 + $0x8] sm:$0xff] %vm3785_vm11, %v4856_v47  ;;  %v3294_v13 = vld [vmem:[#allocation2 + $0x1a0] sm:$0xff] }
 0x5d4   :  { %3235 = vst.msk [vmem:[#allocation2 + $0x1c8] sm:$0xff] %vm3177_vm9, %v3100_v63  ;;  %v3295_v50 = vld [vmem:[#allocation2 + $0x1a8] sm:$0xff] }
 0x5d5   :  { %7435 = vmatmul.msk.f32.gmra.mxu0 %vm3315_vm10, %v3264_v8  ;;  %7453 = vmatmul.msk.f32.gmra.mxu2 %vm3315_vm10, %v3282_v23  ;;  %v3727_v19 = vmax.f32 %v3548_v37, 0.0  ;;  %3237 = vst.msk [vmem:[#allocation2 + $0x1d8] sm:$0xff] %vm3177_vm9, %v3104_v35  ;;  %v3296_v21 = vld [vmem:[#allocation2 + $0x1b0] sm:$0xff] }
 0x5d6   :  { %3238 = vst.msk [vmem:[#allocation2 + $0x1e0] sm:$0xff] %vm3177_vm9, %v3106_v48 }
 0x5d7   :  { %3792 = vst.msk [vmem:[#allocation3 + $0x30] sm:$0xff] %vm3785_vm11, %v3727_v19 }
 0x5d8   :  { %4796 = vst.msk [vmem:[#allocation4 + $0x61] sm:$0xff] %vm3785_vm11, %v3727_v19 }
 0x5da   :  { %v3550_v3 = vpop.f32.mrf.mxu0  ;;  %7463 = vmatmul.msk.f32.gmra.mxu3 %vm3315_vm10, %v3292_v11 }
 0x5db   :  { %v3551_v30 = vadd.f32 %v10624_v7, %v3550_v3  ;;  %v3297_v3 = vld [vmem:[#allocation2 + $0x1b8] sm:$0xff]  ;;  %v3299_v38 = vld [vmem:[#allocation2 + $0x1c8] sm:$0xff] }
 0x5dc   :  { %v3301_v35 = vld [vmem:[#allocation2 + $0x1d8] sm:$0xff] }
 0x5dd   :  { %7454 = vmatmul.msk.f32.gmra.mxu2 %vm3315_vm10, %v3283_v32  ;;  %v3728_v42 = vmax.f32 %v3551_v30, 0.0  ;;  %v3102_v32 = vpop.permute.xlu2 %3101 }
 0x5de   :  { %3236 = vst.msk [vmem:[#allocation2 + $0x1d0] sm:$0xff] %vm3177_vm9, %v3102_v32  ;;  %v3887_v11 = vld [vmem:[#allocation3 + $0x1] ss:$16 sm:$0xc] }
 0x5df   :  { %3793 = vst.msk [vmem:[#allocation3 + $0x38] sm:$0xff] %vm3785_vm11, %v3728_v42 }
 0x5e0   :  { %4797 = vst.msk [vmem:[#allocation4 + $0x69] sm:$0xff] %vm3785_vm11, %v3728_v42 }
 0x5e2   :  { %v3553_v9 = vpop.f32.mrf.mxu0  ;;  %7464 = vmatmul.msk.f32.gmra.mxu3 %vm3315_vm10, %v3293_v46  ;;  %v3851_v46 = vld [vmem:[#allocation3] ss:$16 sm:$0xc] }
 0x5e3   :  { %v3598_v25 = vpop.f32.mrf.mxu1  ;;  %v3554_v27 = vadd.f32 %v10624_v7, %v3553_v9 }
 0x5e4   :  { %v3599_v41 = vadd.f32 %v10624_v7, %v3598_v25  ;;  %v3298_v25 = vld [vmem:[#allocation2 + $0x1c0] sm:$0xff] }
 0x5e5   :  { %7455 = vmatmul.msk.f32.gmra.mxu2 %vm3315_vm10, %v3284_v43  ;;  %v3729_v16 = vmax.f32 %v3554_v27, 0.0  ;;  %v3108_v9 = vpop.permute.xlu2 %3107 }
 0x5e6   :  { %v3744_v18 = vmax.f32 %v3599_v41, 0.0  ;;  %3239 = vst.msk [vmem:[#allocation2 + $0x1e8] sm:$0xff] %vm3177_vm9, %v3108_v9 }
 0x5e7   :  { %3794 = vst.msk [vmem:[#allocation3 + $0x40] sm:$0xff] %vm3785_vm11, %v3729_v16  ;;  %v4858_v12 = vld [vmem:[#allocation4 + $0x60] ss:$2 sm:$0xff] }
 0x5e8   :  { %4798 = vst.msk [vmem:[#allocation4 + $0x79] sm:$0xff] %vm3785_vm11, %v3729_v16 }
 0x5e9   :  { %3809 = vst.msk [vmem:[#allocation3 + $0xb8] sm:$0xff] %vm3785_vm11, %v3744_v18 }
 0x5ea   :  { %4813 = vst.msk [vmem:[#allocation4 + $0x129] sm:$0xff] %vm3785_vm11, %v3744_v18  ;;  %v3556_v51 = vpop.f32.mrf.mxu0  ;;  %7465 = vmatmul.msk.f32.gmra.mxu3 %vm3315_vm10, %v3294_v13  ;;  %v3110_v18 = vpop.permute.xlu0 %3109 }
 0x5eb   :  { %v3601_v56 = vpop.f32.mrf.mxu1  ;;  %v3557_v55 = vadd.f32 %v10624_v7, %v3556_v51  ;;  %4887 = vst.msk [vmem:[#allocation5 + $0x10] sm:$0xff] %vm3785_vm11, %v4858_v12 }
 0x5ec   :  { %v3602_v33 = vadd.f32 %v10624_v7, %v3601_v56  ;;  %3240 = vst.msk [vmem:[#allocation2 + $0x1f0] sm:$0xff] %vm3177_vm9, %v3110_v18 }
 0x5ed   :  { %7456 = vmatmul.msk.f32.gmra.mxu2 %vm3315_vm10, %v3285_v29  ;;  %v3730_v39 = vmax.f32 %v3557_v55, 0.0  ;;  %v3886_v55 = vld [vmem:[#allocation3 + $0x1] ss:$16 sm:$0x3] }
 0x5ee   :  { %v3745_v45 = vmax.f32 %v3602_v33, 0.0 }
 0x5ef   :  { %3795 = vst.msk [vmem:[#allocation3 + $0x48] sm:$0xff] %vm3785_vm11, %v3730_v39 }
 0x5f0   :  { %4799 = vst.msk [vmem:[#allocation4 + $0x81] sm:$0xff] %vm3785_vm11, %v3730_v39  ;;  %v3610_v52 = vpop.f32.mrf.mxu2  ;;  %v3888_v39 = vor.u32 %v3887_v11, %v3886_v55 }
 0x5f1   :  { %3810 = vst.msk [vmem:[#allocation3 + $0xc0] sm:$0xff] %vm3785_vm11, %v3745_v45  ;;  %v3611_v54 = vadd.f32 %v10624_v7, %v3610_v52 }
 0x5f2   :  { %4814 = vst.msk [vmem:[#allocation4 + $0x139] sm:$0xff] %vm3785_vm11, %v3745_v45  ;;  %v3559_v53 = vpop.f32.mrf.mxu0  ;;  %7466 = vmatmul.msk.f32.gmra.mxu3 %vm3315_vm10, %v3295_v50 }
 0x5f3   :  { %v3560_v59 = vadd.f32 %v10624_v7, %v3559_v53  ;;  %v3604_v60 = vpop.f32.mrf.mxu1  ;;  %v3748_v5 = vmax.f32 %v3611_v54, 0.0 }
 0x5f4   :  { %v3605_v4 = vadd.f32 %v10624_v7, %v3604_v60 }
 0x5f5   :  { %7457 = vmatmul.msk.f32.gmra.mxu2 %vm3315_vm10, %v3286_v62  ;;  %v3731_v8 = vmax.f32 %v3560_v59, 0.0  ;;  %3813 = vst.msk [vmem:[#allocation3 + $0xd8] sm:$0xff] %vm3785_vm11, %v3748_v5 }
 0x5f6   :  { %v3746_v14 = vmax.f32 %v3605_v4, 0.0  ;;  %4817 = vst.msk [vmem:[#allocation4 + $0x159] sm:$0xff] %vm3785_vm11, %v3748_v5 }
 0x5f7   :  { %3796 = vst.msk [vmem:[#allocation3 + $0x50] sm:$0xff] %vm3785_vm11, %v3731_v8 }
 0x5f8   :  { %4800 = vst.msk [vmem:[#allocation4 + $0x91] sm:$0xff] %vm3785_vm11, %v3731_v8  ;;  %v3613_v17 = vpop.f32.mrf.mxu2  ;;  %v3850_v8 = vld [vmem:[#allocation3] ss:$16 sm:$0x3] }
 0x5f9   :  { %3811 = vst.msk [vmem:[#allocation3 + $0xc8] sm:$0xff] %vm3785_vm11, %v3746_v14  ;;  %v3614_v23 = vadd.f32 %v10624_v7, %v3613_v17  ;;  %v3112_v17 = vpop.permute.xlu1 %3111 }
 0x5fa   :  { %v3562_v22 = vpop.f32.mrf.mxu0  ;;  %4815 = vst.msk [vmem:[#allocation4 + $0x141] sm:$0xff] %vm3785_vm11, %v3746_v14  ;;  %7467 = vmatmul.msk.f32.gmra.mxu3 %vm3315_vm10, %v3296_v21 }
 0x5fb   :  { %v3563_v26 = vadd.f32 %v10624_v7, %v3562_v22  ;;  %v3607_v31 = vpop.f32.mrf.mxu1  ;;  %v3749_v43 = vmax.f32 %v3614_v23, 0.0  ;;  %v3852_v22 = vor.u32 %v3851_v46, %v3850_v8  ;;  %3241 = vst.msk [vmem:[#allocation2 + $0x1f8] sm:$0xff] %vm3177_vm9, %v3112_v17  ;;  %vm4569_vm9 = vcmask 917312  }
 0x5fc   :  { %v3608_v36 = vadd.f32 %v10624_v7, %v3607_v31 }
 0x5fd   :  { %v3732_v44 = vmax.f32 %v3563_v26, 0.0  ;;  %3814 = vst.msk [vmem:[#allocation3 + $0xe0] sm:$0xff] %vm3785_vm11, %v3749_v43  ;;  %v3300_v26 = vld [vmem:[#allocation2 + $0x1d0] sm:$0xff] }
 0x5fe   :  { %v3747_v20 = vmax.f32 %v3608_v36, 0.0  ;;  %4818 = vst.msk [vmem:[#allocation4 + $0x169] sm:$0xff] %vm3785_vm11, %v3749_v43  ;;  %v3889_v33 = vld [vmem:[#allocation3 + $0x1] ss:$16 sm:$0x30] }
 0x5ff   :  { %3797 = vst.msk [vmem:[#allocation3 + $0x58] sm:$0xff] %vm3785_vm11, %v3732_v44  ;;  %v3890_v45 = vor.u32 %v3889_v33, %v3888_v39  ;;  %v3853_v5 = vld [vmem:[#allocation3] ss:$16 sm:$0x30] }
 0x600   :  { %4801 = vst.msk [vmem:[#allocation4 + $0x99] sm:$0xff] %vm3785_vm11, %v3732_v44  ;;  %v3616_v58 = vpop.f32.mrf.mxu2  ;;  %v3854_v32 = vor.u32 %v3853_v5, %v3852_v22 }
 0x601   :  { %3812 = vst.msk [vmem:[#allocation3 + $0xd0] sm:$0xff] %vm3785_vm11, %v3747_v20  ;;  %v3617_v1 = vadd.f32 %v10624_v7, %v3616_v58 }
 0x602   :  { %v3565_v61 = vpop.f32.mrf.mxu0  ;;  %4816 = vst.msk [vmem:[#allocation4 + $0x151] sm:$0xff] %vm3785_vm11, %v3747_v20  ;;  %7468 = vmatmul.msk.f32.gmra.mxu3 %vm3315_vm10, %v3297_v3  ;;  %v3302_v3 = vld [vmem:[#allocation2 + $0x1e0] sm:$0xff] }
 0x603   :  { %v3566_v29 = vadd.f32 %v10624_v7, %v3565_v61  ;;  %v3750_v10 = vmax.f32 %v3617_v1, 0.0 }
 0x605   :  { %v3733_v49 = vmax.f32 %v3566_v29, 0.0  ;;  %3815 = vst.msk [vmem:[#allocation3 + $0xe8] sm:$0xff] %vm3785_vm11, %v3750_v10 }
 0x606   :  { %4819 = vst.msk [vmem:[#allocation4 + $0x171] sm:$0xff] %vm3785_vm11, %v3750_v10 }
 0x607   :  { %3798 = vst.msk [vmem:[#allocation3 + $0x60] sm:$0xff] %vm3785_vm11, %v3733_v49  ;;  %v4860_v21 = vld [vmem:[#allocation4 + $0x90] ss:$2 sm:$0xff] }
 0x608   :  { %4802 = vst.msk [vmem:[#allocation4 + $0xa9] sm:$0xff] %vm3785_vm11, %v3733_v49  ;;  %v3619_v24 = vpop.f32.mrf.mxu2 }
 0x609   :  { %v3620_v37 = vadd.f32 %v10624_v7, %v3619_v24  ;;  %4888 = vst.msk [vmem:[#allocation5 + $0x18] sm:$0xff] %vm3785_vm11, %v4860_v21 }
 0x60a   :  { %v3568_v28 = vpop.f32.mrf.mxu0  ;;  %7469 = vmatmul.msk.f32.gmra.mxu3 %vm3315_vm10, %v3298_v25 }
 0x60b   :  { %v3569_v40 = vadd.f32 %v10624_v7, %v3568_v28  ;;  %v3751_v57 = vmax.f32 %v3620_v37, 0.0  ;;  %v4868_v37 = vld [vmem:[#allocation4 + $0x150] ss:$2 sm:$0xff] }
 0x60c   :  { %4892 = vst.msk [vmem:[#allocation5 + $0x38] sm:$0xff] %vm3785_vm11, %v4868_v37  ;;  %v3939_v37 = vld [vmem:[#allocation3 + $0x2] ss:$16 sm:$0x3] }
 0x60d   :  { %v3734_v62 = vmax.f32 %v3569_v40, 0.0  ;;  %3816 = vst.msk [vmem:[#allocation3 + $0xf0] sm:$0xff] %vm3785_vm11, %v3751_v57 }
 0x60e   :  { %4820 = vst.msk [vmem:[#allocation4 + $0x181] sm:$0xff] %vm3785_vm11, %v3751_v57 }
 0x60f   :  { %3799 = vst.msk [vmem:[#allocation3 + $0x68] sm:$0xff] %vm3785_vm11, %v3734_v62 }
 0x610   :  { %4803 = vst.msk [vmem:[#allocation4 + $0xb1] sm:$0xff] %vm3785_vm11, %v3734_v62  ;;  %v3622_v19 = vpop.f32.mrf.mxu2 }
 0x611   :  { %v3623_v34 = vadd.f32 %v10624_v7, %v3622_v19 }
 0x612   :  { %v3571_v30 = vpop.f32.mrf.mxu0  ;;  %7470 = vmatmul.msk.f32.gmra.mxu3 %vm3315_vm10, %v3299_v38  ;;  %v3305_v38 = vld [vmem:[#allocation2 + $0x1f8] sm:$0xff] }
 0x613   :  { %v3572_v42 = vadd.f32 %v10624_v7, %v3571_v30  ;;  %v3752_v0 = vmax.f32 %v3623_v34, 0.0 }
 0x615   :  { %v3735_v2 = vmax.f32 %v3572_v42, 0.0  ;;  %3817 = vst.msk [vmem:[#allocation3 + $0xf8] sm:$0xff] %vm3785_vm11, %v3752_v0 }
 0x616   :  { %4821 = vst.msk [vmem:[#allocation4 + $0x189] sm:$0xff] %vm3785_vm11, %v3752_v0  ;;  %v3303_v0 = vld [vmem:[#allocation2 + $0x1e8] sm:$0xff] }
 0x617   :  { %3800 = vst.msk [vmem:[#allocation3 + $0x70] sm:$0xff] %vm3785_vm11, %v3735_v2 }
 0x618   :  { %4804 = vst.msk [vmem:[#allocation4 + $0xc1] sm:$0xff] %vm3785_vm11, %v3735_v2  ;;  %v3625_v27 = vpop.f32.mrf.mxu2 }
 0x619   :  { %v3626_v6 = vadd.f32 %v10624_v7, %v3625_v27 }
 0x61a   :  { %v3574_v41 = vpop.f32.mrf.mxu0  ;;  %7471 = vmatmul.msk.f32.gmra.mxu3 %vm3315_vm10, %v3300_v26 }
 0x61b   :  { %v3575_v16 = vadd.f32 %v10624_v7, %v3574_v41  ;;  %v3753_v51 = vmax.f32 %v3626_v6, 0.0 }
 0x61d   :  { %v3736_v56 = vmax.f32 %v3575_v16, 0.0  ;;  %3818 = vst.msk [vmem:[#allocation3 + $0x100] sm:$0xff] %vm3785_vm11, %v3753_v51  ;;  %v3304_v16 = vld [vmem:[#allocation2 + $0x1f0] sm:$0xff] }
 0x61e   :  { %4822 = vst.msk [vmem:[#allocation4 + $0x1c9] sm:$0xff] %vm3785_vm11, %v3753_v51  ;;  %v3891_v53 = vld [vmem:[#allocation3 + $0x1] ss:$16 sm:$0xc0] }
 0x61f   :  { %3801 = vst.msk [vmem:[#allocation3 + $0x78] sm:$0xff] %vm3785_vm11, %v3736_v56  ;;  %v3892_v60 = vor.u32 %v3891_v53, %v3890_v45  ;;  %v3855_v23 = vld [vmem:[#allocation3] ss:$16 sm:$0xc0] }
 0x620   :  { %4805 = vst.msk [vmem:[#allocation4 + $0xc9] sm:$0xff] %vm3785_vm11, %v3736_v56  ;;  %v3628_v47 = vpop.f32.mrf.mxu2  ;;  %v3856_v36 = vor.u32 %v3855_v23, %v3854_v32 }
 0x621   :  { %v3664_v52 = vpop.f32.mrf.mxu3  ;;  %v3629_v54 = vadd.f32 %v10624_v7, %v3628_v47  ;;  %3921 = vrot.lane.b32.xlu2 %v3892_v60, %s7618_s24 }
 0x622   :  { %v3665_v59 = vadd.f32 %v10624_v7, %v3664_v52  ;;  %v3577_v63 = vpop.f32.mrf.mxu0  ;;  %3881 = vst.msk [vmem:[#allocation11] sm:$0xff] %vm3785_vm11, %v3856_v36  ;;  %7472 = vmatmul.msk.f32.gmra.mxu3 %vm3315_vm10, %v3301_v35 }
 0x623   :  { %v3578_v4 = vadd.f32 %v10624_v7, %v3577_v63  ;;  %v3754_v13 = vmax.f32 %v3629_v54, 0.0 }
 0x624   :  { %v3766_v14 = vmax.f32 %v3665_v59, 0.0 }
 0x625   :  { %3819 = vst.msk [vmem:[#allocation3 + $0x108] sm:$0xff] %vm3785_vm11, %v3754_v13  ;;  %v3737_v31 = vmax.f32 %v3578_v4, 0.0 }
 0x626   :  { %4823 = vst.msk [vmem:[#allocation4 + $0x1d1] sm:$0xff] %vm3785_vm11, %v3754_v13 }
 0x627   :  { %3831 = vst.msk [vmem:[#allocation3 + $0x168] sm:$0xff] %vm3785_vm11, %v3766_v14  ;;  %v4862_v45 = vld [vmem:[#allocation4 + $0xc0] ss:$2 sm:$0xff] }
 0x628   :  { %4835 = vst.msk [vmem:[#allocation4 + $0x261] sm:$0xff] %vm3785_vm11, %v3766_v14  ;;  %v3631_v43 = vpop.f32.mrf.mxu2 }
 0x629   :  { %v3667_v44 = vpop.f32.mrf.mxu3  ;;  %3802 = vst.msk [vmem:[#allocation3 + $0x80] sm:$0xff] %vm3785_vm11, %v3737_v31  ;;  %v3632_v50 = vadd.f32 %v10624_v7, %v3631_v43 }
 0x62a   :  { %v3668_v20 = vadd.f32 %v10624_v7, %v3667_v44  ;;  %v3580_v58 = vpop.f32.mrf.mxu0  ;;  %4806 = vst.msk [vmem:[#allocation4 + $0xd9] sm:$0xff] %vm3785_vm11, %v3737_v31  ;;  %7473 = vmatmul.msk.f32.gmra.mxu3 %vm3315_vm10, %v3302_v3  ;;  %v3863_v3 = vld [vmem:[#allocation3 + $0x80] ss:$16 sm:$0xc0] }
 0x62b   :  { %v3581_v61 = vadd.f32 %v10624_v7, %v3580_v58  ;;  %v3755_v1 = vmax.f32 %v3632_v50, 0.0  ;;  %4889 = vst.msk [vmem:[#allocation5 + $0x20] sm:$0xff] %vm3785_vm11, %v4862_v45 }
 0x62c   :  { %v3767_v29 = vmax.f32 %v3668_v20, 0.0  ;;  %v3897_v20 = vld [vmem:[#allocation3 + $0x81] ss:$16 sm:$0x30] }
 0x62d   :  { %3820 = vst.msk [vmem:[#allocation3 + $0x110] sm:$0xff] %vm3785_vm11, %v3755_v1  ;;  %v3738_v10 = vmax.f32 %v3581_v61, 0.0  ;;  %v3899_v61 = vld [vmem:[#allocation3 + $0x81] ss:$16 sm:$0xc0] }
 0x62e   :  { %4824 = vst.msk [vmem:[#allocation4 + $0x1e1] sm:$0xff] %vm3785_vm11, %v3755_v1 }
 0x62f   :  { %3832 = vst.msk [vmem:[#allocation3 + $0x170] sm:$0xff] %vm3785_vm11, %v3767_v29 }
 0x630   :  { %4836 = vst.msk [vmem:[#allocation4 + $0x271] sm:$0xff] %vm3785_vm11, %v3767_v29  ;;  %v3634_v49 = vpop.f32.mrf.mxu2 }
 0x631   :  { %3803 = vst.msk [vmem:[#allocation3 + $0x88] sm:$0xff] %vm3785_vm11, %v3738_v10  ;;  %v3635_v24 = vadd.f32 %v10624_v7, %v3634_v49  ;;  %v3670_v57 = vpop.f32.mrf.mxu3  ;;  %v3940_v49 = vld [vmem:[#allocation3 + $0x2] ss:$16 sm:$0xc] }
 0x632   :  { %v3583_v28 = vpop.f32.mrf.mxu0  ;;  %4807 = vst.msk [vmem:[#allocation4 + $0xe1] sm:$0xff] %vm3785_vm11, %v3738_v10  ;;  %v3671_v12 = vadd.f32 %v10624_v7, %v3670_v57  ;;  %7474 = vmatmul.msk.f32.gmra.mxu3 %vm3315_vm10, %v3303_v0  ;;  %v3944_v0 = vld [vmem:[#allocation3 + $0x2] ss:$16 sm:$0xc0] }
 0x633   :  { %v3584_v40 = vadd.f32 %v10624_v7, %v3583_v28  ;;  %v3756_v48 = vmax.f32 %v3635_v24, 0.0  ;;  %v3861_v24 = vld [vmem:[#allocation3 + $0x80] ss:$16 sm:$0x30] }
 0x634   :  { %v3768_v19 = vmax.f32 %v3671_v12, 0.0 }
 0x635   :  { %v3739_v62 = vmax.f32 %v3584_v40, 0.0  ;;  %3821 = vst.msk [vmem:[#allocation3 + $0x118] sm:$0xff] %vm3785_vm11, %v3756_v48 }
 0x636   :  { %4825 = vst.msk [vmem:[#allocation4 + $0x1e9] sm:$0xff] %vm3785_vm11, %v3756_v48 }
 0x637   :  { %3804 = vst.msk [vmem:[#allocation3 + $0x90] sm:$0xff] %vm3785_vm11, %v3739_v62 }
 0x638   :  { %4808 = vst.msk [vmem:[#allocation4 + $0xf1] sm:$0xff] %vm3785_vm11, %v3739_v62  ;;  %v3637_v30 = vpop.f32.mrf.mxu2  ;;  %v3942_v62 = vld [vmem:[#allocation3 + $0x2] ss:$16 sm:$0x30] }
 0x639   :  { %3833 = vst.msk [vmem:[#allocation3 + $0x178] sm:$0xff] %vm3785_vm11, %v3768_v19  ;;  %v3638_v34 = vadd.f32 %v10624_v7, %v3637_v30 }
 0x63a   :  { %4837 = vst.msk [vmem:[#allocation4 + $0x279] sm:$0xff] %vm3785_vm11, %v3768_v19  ;;  %v3586_v2 = vpop.f32.mrf.mxu0  ;;  %7475 = vmatmul.msk.f32.gmra.mxu3 %vm3315_vm10, %v3304_v16  ;;  %v3941_v19 = vor.u32 %v3940_v49, %v3939_v37  ;;  %v3995_v37 = vld [vmem:[#allocation3 + $0x3] ss:$16 sm:$0x30] }
 0x63b   :  { %v3757_v42 = vmax.f32 %v3638_v34, 0.0  ;;  %v3587_v9 = vadd.f32 %v10624_v7, %v3586_v2 }
 0x63c   :  { %v3943_v2 = vor.u32 %v3942_v62, %v3941_v19  ;;  %v3997_v62 = vld [vmem:[#allocation3 + $0x3] ss:$16 sm:$0xc0] }
 0x63d   :  { %3822 = vst.msk [vmem:[#allocation3 + $0x120] sm:$0xff] %vm3785_vm11, %v3757_v42  ;;  %v3740_v25 = vmax.f32 %v3587_v9, 0.0  ;;  %v4872_v43 = vld [vmem:[#allocation4 + $0x1e0] ss:$2 sm:$0xff] }
 0x63e   :  { %4826 = vst.msk [vmem:[#allocation4 + $0x1f9] sm:$0xff] %vm3785_vm11, %v3757_v42  ;;  %v3894_v26 = vld [vmem:[#allocation3 + $0x81] ss:$16 sm:$0x3] }
 0x63f   :  { %3805 = vst.msk [vmem:[#allocation3 + $0x98] sm:$0xff] %vm3785_vm11, %v3740_v25  ;;  %v3858_v1 = vld [vmem:[#allocation3 + $0x80] ss:$16 sm:$0x3] }
 0x640   :  { %v3640_v27 = vpop.f32.mrf.mxu2  ;;  %4809 = vst.msk [vmem:[#allocation4 + $0xf9] sm:$0xff] %vm3785_vm11, %v3740_v25  ;;  %v3945_v25 = vor.u32 %v3944_v0, %v3943_v2 }
 0x641   :  { %v3641_v41 = vadd.f32 %v10624_v7, %v3640_v27  ;;  %4894 = vst.msk [vmem:[#allocation5 + $0x48] sm:$0xff] %vm3785_vm11, %v4872_v43 }
 0x642   :  { %v3589_v18 = vpop.f32.mrf.mxu0  ;;  %7476 = vmatmul.msk.f32.gmra.mxu3 %vm3315_vm10, %v3305_v38  ;;  %vm4622_vm10 = vcmask 982912  }
 0x643   :  { %v3758_v6 = vmax.f32 %v3641_v41, 0.0  ;;  %v3590_v11 = vadd.f32 %v10624_v7, %v3589_v18  ;;  %v4878_v41 = vld [vmem:[#allocation4 + $0x270] ss:$2 sm:$0xff] }
 0x644   :  { %4897 = vst.msk [vmem:[#allocation5 + $0x60] sm:$0xff] %vm3785_vm11, %v4878_v41 }
 0x645   :  { %3823 = vst.msk [vmem:[#allocation3 + $0x128] sm:$0xff] %vm3785_vm11, %v3758_v6  ;;  %v3741_v51 = vmax.f32 %v3590_v11, 0.0 }
 0x646   :  { %4827 = vst.msk [vmem:[#allocation4 + $0x201] sm:$0xff] %vm3785_vm11, %v3758_v6 }
 0x647   :  { %3806 = vst.msk [vmem:[#allocation3 + $0xa0] sm:$0xff] %vm3785_vm11, %v3741_v51  ;;  %v4864_v48 = vld [vmem:[#allocation4 + $0xf0] ss:$2 sm:$0xff] }
 0x648   :  { %v3643_v56 = vpop.f32.mrf.mxu2  ;;  %4810 = vst.msk [vmem:[#allocation4 + $0x109] sm:$0xff] %vm3785_vm11, %v3741_v51 }
 0x649   :  { %v3644_v55 = vadd.f32 %v10624_v7, %v3643_v56  ;;  %4890 = vst.msk [vmem:[#allocation5 + $0x28] sm:$0xff] %vm3785_vm11, %v4864_v48 }
 0x64a   :  { %v3592_v39 = vpop.f32.mrf.mxu0 }
 0x64b   :  { %v3759_v33 = vmax.f32 %v3644_v55, 0.0  ;;  %v3593_v46 = vadd.f32 %v10624_v7, %v3592_v39  ;;  %v11024_v55 = vld [vmem:[%s11867_s2] ss:$0 sm:$0xff]  ;;  %s7626_s2 = smov 40  }
 0x64d   :  { %3824 = vst.msk [vmem:[#allocation3 + $0x130] sm:$0xff] %vm3785_vm11, %v3759_v33  ;;  %v3742_v47 = vmax.f32 %v3593_v46, 0.0  ;;  %v3673_v8 = vpop.f32.mrf.mxu3 }
 0x64e   :  { %4828 = vst.msk [vmem:[#allocation4 + $0x211] sm:$0xff] %vm3785_vm11, %v3759_v33  ;;  %v3674_v13 = vadd.f32 %v10624_v7, %v3673_v8 }
 0x64f   :  { %3807 = vst.msk [vmem:[#allocation3 + $0xa8] sm:$0xff] %vm3785_vm11, %v3742_v47 }
 0x650   :  { %v3646_v52 = vpop.f32.mrf.mxu2  ;;  %4811 = vst.msk [vmem:[#allocation4 + $0x111] sm:$0xff] %vm3785_vm11, %v3742_v47  ;;  %v3769_v17 = vmax.f32 %v3674_v13, 0.0  ;;  %v3947_v13 = vld [vmem:[#allocation3 + $0x82] ss:$16 sm:$0x3] }
 0x651   :  { %v3647_v53 = vadd.f32 %v10624_v7, %v3646_v52 }
 0x652   :  { %v3595_v59 = vpop.f32.mrf.mxu0  ;;  %3834 = vst.msk [vmem:[#allocation3 + $0x180] sm:$0xff] %vm3785_vm11, %v3769_v17 }
 0x653   :  { %v3760_v54 = vmax.f32 %v3647_v53, 0.0  ;;  %v3596_v60 = vadd.f32 %v10624_v7, %v3595_v59  ;;  %4838 = vst.msk [vmem:[#allocation4 + $0x289] sm:$0xff] %vm3785_vm11, %v3769_v17  ;;  %v3902_v59 = vld [vmem:[#allocation3 + $0x101] ss:$16 sm:$0x3] }
 0x654   :  { %v3903_v47 = vld [vmem:[#allocation3 + $0x101] ss:$16 sm:$0xc]  ;;  %v3867_v43 = vld [vmem:[#allocation3 + $0x100] ss:$16 sm:$0xc] }
 0x655   :  { %3825 = vst.msk [vmem:[#allocation3 + $0x138] sm:$0xff] %vm3785_vm11, %v3760_v54  ;;  %v3743_v63 = vmax.f32 %v3596_v60, 0.0  ;;  %v3676_v32 = vpop.f32.mrf.mxu3 }
 0x656   :  { %4829 = vst.msk [vmem:[#allocation4 + $0x219] sm:$0xff] %vm3785_vm11, %v3760_v54  ;;  %v3677_v44 = vadd.f32 %v10624_v7, %v3676_v32  ;;  %v3950_v32 = vld [vmem:[#allocation3 + $0x82] ss:$16 sm:$0x30] }
 0x657   :  { %3808 = vst.msk [vmem:[#allocation3 + $0xb0] sm:$0xff] %vm3785_vm11, %v3743_v63 }
 0x658   :  { %v3649_v4 = vpop.f32.mrf.mxu2  ;;  %4812 = vst.msk [vmem:[#allocation4 + $0x121] sm:$0xff] %vm3785_vm11, %v3743_v63  ;;  %v3770_v29 = vmax.f32 %v3677_v44, 0.0  ;;  %v3904_v63 = vor.u32 %v3903_v47, %v3902_v59 }
 0x659   :  { %v3650_v5 = vadd.f32 %v10624_v7, %v3649_v4 }
 0x65a   :  { %3835 = vst.msk [vmem:[#allocation3 + $0x188] sm:$0xff] %vm3785_vm11, %v3770_v29 }
 0x65b   :  { %v3761_v14 = vmax.f32 %v3650_v5, 0.0  ;;  %4839 = vst.msk [vmem:[#allocation4 + $0x291] sm:$0xff] %vm3785_vm11, %v3770_v29  ;;  %v3992_v29 = vld [vmem:[#allocation3 + $0x3] ss:$16 sm:$0x3] }
 0x65d   :  { %3826 = vst.msk [vmem:[#allocation3 + $0x140] sm:$0xff] %vm3785_vm11, %v3761_v14  ;;  %v3679_v12 = vpop.f32.mrf.mxu3 }
 0x65e   :  { %4830 = vst.msk [vmem:[#allocation4 + $0x229] sm:$0xff] %vm3785_vm11, %v3761_v14  ;;  %v3895_v31 = vld [vmem:[#allocation3 + $0x81] ss:$16 sm:$0xc]  ;;  %v3680_v34 = vadd.f32 %v10624_v7, %v3679_v12 }
 0x65f   :  { %v3896_v36 = vor.u32 %v3895_v31, %v3894_v26  ;;  %v3859_v35 = vld [vmem:[#allocation3 + $0x80] ss:$16 sm:$0xc]  ;;  %v3948_v5 = vld [vmem:[#allocation3 + $0x82] ss:$16 sm:$0xc] }
 0x660   :  { %v3652_v22 = vpop.f32.mrf.mxu2  ;;  %v3860_v21 = vor.u32 %v3859_v35, %v3858_v1  ;;  %v3771_v9 = vmax.f32 %v3680_v34, 0.0  ;;  %v4866_v53 = vld [vmem:[#allocation4 + $0x120] ss:$2 sm:$0xff]  ;;  %v4874_v26 = vld [vmem:[#allocation4 + $0x210] ss:$2 sm:$0xff] }
 0x661   :  { %v3653_v23 = vadd.f32 %v10624_v7, %v3652_v22  ;;  %v3898_v58 = vor.u32 %v3897_v20, %v3896_v36  ;;  %4891 = vst.msk [vmem:[#allocation5 + $0x30] sm:$0xff] %vm3785_vm11, %v4866_v53  ;;  %v3949_v22 = vor.u32 %v3948_v5, %v3947_v13  ;;  %v3866_v20 = vld [vmem:[#allocation3 + $0x100] ss:$16 sm:$0x3] }
 0x662   :  { %v3862_v40 = vor.u32 %v3861_v24, %v3860_v21  ;;  %3836 = vst.msk [vmem:[#allocation3 + $0x190] sm:$0xff] %vm3785_vm11, %v3771_v9  ;;  %v3993_v35 = vld [vmem:[#allocation3 + $0x3] ss:$16 sm:$0xc] }
 0x663   :  { %v3762_v50 = vmax.f32 %v3653_v23, 0.0  ;;  %v3900_v10 = vor.u32 %v3899_v61, %v3898_v58  ;;  %4840 = vst.msk [vmem:[#allocation4 + $0x2a1] sm:$0xff] %vm3785_vm11, %v3771_v9  ;;  %v3951_v36 = vor.u32 %v3950_v32, %v3949_v22  ;;  %v3952_v58 = vld [vmem:[#allocation3 + $0x82] ss:$16 sm:$0xc0]  ;;  %v3868_v61 = vor.u32 %v3867_v43, %v3866_v20 }
 0x664   :  { %v3864_v30 = vor.u32 %v3863_v3, %v3862_v40  ;;  %4895 = vst.msk [vmem:[#allocation5 + $0x50] sm:$0xff] %vm3785_vm11, %v4874_v26  ;;  %v3994_v48 = vor.u32 %v3993_v35, %v3992_v29 }
 0x665   :  { %3827 = vst.msk [vmem:[#allocation3 + $0x148] sm:$0xff] %vm3785_vm11, %v3762_v50  ;;  %3923 = vrot.lane.b32.xlu0 %v3900_v10, %s7618_s24  ;;  %v3682_v16 = vpop.f32.mrf.mxu3  ;;  %v3953_v1 = vor.u32 %v3952_v58, %v3951_v36 }
 0x666   :  { %4831 = vst.msk [vmem:[#allocation4 + $0x231] sm:$0xff] %vm3785_vm11, %v3762_v50  ;;  %v3683_v18 = vadd.f32 %v10624_v7, %v3682_v16  ;;  %v3996_v3 = vor.u32 %v3995_v37, %v3994_v48  ;;  %v3955_v37 = vld [vmem:[#allocation3 + $0x102] ss:$16 sm:$0x3] }
 0x667   :  { %3882 = vst.msk [vmem:[#allocation11 + $0x8] sm:$0xff] %vm3785_vm11, %v3864_v30 }
 0x668   :  { %v3655_v28 = vpop.f32.mrf.mxu2  ;;  %v3772_v51 = vmax.f32 %v3683_v18, 0.0  ;;  %v3998_v12 = vor.u32 %v3997_v62, %v3996_v3  ;;  %v4107_v62 = vld [vmem:[#allocation3 + $0x85] ss:$16 sm:$0xc] }
 0x669   :  { %v3656_v57 = vadd.f32 %v10624_v7, %v3655_v28  ;;  %v4016_v53 = vld [vmem:[#allocation3 + $0x183] ss:$16 sm:$0x3]  ;;  %v3963_v59 = vld [vmem:[#allocation3 + $0x182] ss:$16 sm:$0x3] }
 0x66a   :  { %3837 = vst.msk [vmem:[#allocation3 + $0x198] sm:$0xff] %vm3785_vm11, %v3772_v51  ;;  %v3874_v26 = vld [vmem:[#allocation3 + $0x180] ss:$16 sm:$0x3] }
 0x66b   :  { %v3763_v42 = vmax.f32 %v3656_v57, 0.0  ;;  %4841 = vst.msk [vmem:[#allocation4 + $0x2a9] sm:$0xff] %vm3785_vm11, %v3772_v51  ;;  %v4054_v3 = vld [vmem:[#allocation3 + $0x84] ss:$16 sm:$0xc] }
 0x66d   :  { %3828 = vst.msk [vmem:[#allocation3 + $0x150] sm:$0xff] %vm3785_vm11, %v3763_v42  ;;  %3974 = vrot.lane.b32.xlu0 %v3945_v25, %s7620_s28  ;;  %v3685_v33 = vpop.f32.mrf.mxu3 }
 0x66e   :  { %4832 = vst.msk [vmem:[#allocation4 + $0x241] sm:$0xff] %vm3785_vm11, %v3763_v42  ;;  %v3686_v38 = vadd.f32 %v11024_v55, %v3685_v33 }
 0x670   :  { %v3658_v27 = vpop.f32.mrf.mxu2  ;;  %v3773_v45 = vmax.f32 %v3686_v38, 0.0 }
 0x671   :  { %v3659_v6 = vadd.f32 %v10624_v7, %v3658_v27 }
 0x672   :  { %3838 = vst.msk [vmem:[#allocation3 + $0x1a0] sm:$0xff] %vm3785_vm11, %v3773_v45  ;;  %v4880_v24 = vld [vmem:[#allocation4 + $0x2a0] ss:$2 sm:$0xff] }
 0x673   :  { %v3764_v11 = vmax.f32 %v3659_v6, 0.0  ;;  %4842 = vst.msk [vmem:[#allocation4 + $0x2b9] sm:$0xff] %vm3785_vm11, %v3773_v45 }
 0x674   :  { %v3905_v60 = vld [vmem:[#allocation3 + $0x101] ss:$16 sm:$0x30]  ;;  %v3869_v50 = vld [vmem:[#allocation3 + $0x100] ss:$16 sm:$0x30] }
 0x675   :  { %3829 = vst.msk [vmem:[#allocation3 + $0x158] sm:$0xff] %vm3785_vm11, %v3764_v11  ;;  %v3688_v52 = vpop.f32.mrf.mxu3  ;;  %v3906_v8 = vor.u32 %v3905_v60, %v3904_v63  ;;  %v3870_v10 = vor.u32 %v3869_v50, %v3868_v61  ;;  %v4062_v61 = vld [vmem:[#allocation3 + $0x104] ss:$16 sm:$0xc] }
 0x676   :  { %4833 = vst.msk [vmem:[#allocation4 + $0x249] sm:$0xff] %vm3785_vm11, %v3764_v11  ;;  %v3689_v54 = vadd.f32 %v11024_v55, %v3688_v52 }
 0x677   :  { %4898 = vst.msk [vmem:[#allocation5 + $0x68] sm:$0xff] %vm3785_vm11, %v4880_v24  ;;  %v4009_v24 = vld [vmem:[#allocation3 + $0x103] ss:$16 sm:$0xc] }
 0x678   :  { %v3661_v56 = vpop.f32.mrf.mxu2  ;;  %v3774_v4 = vmax.f32 %v3689_v54, 0.0 }
 0x679   :  { %v3662_v7 = vadd.f32 %v11024_v55, %v3661_v56 }
 0x67a   :  { %3839 = vst.msk [vmem:[#allocation3 + $0x1a8] sm:$0xff] %vm3785_vm11, %v3774_v4 }
 0x67b   :  { %v3765_v39 = vmax.f32 %v3662_v7, 0.0  ;;  %v3922_v46 = vpop.permute.xlu2 %3921  ;;  %4843 = vst.msk [vmem:[#allocation4 + $0x2c1] sm:$0xff] %vm3785_vm11, %v3774_v4 }
 0x67c   :  { %3934 = vst.msk [vmem:[#allocation11] sm:$0xff] %vm3933_vm13, %v3922_v46 }
 0x67d   :  { %3830 = vst.msk [vmem:[#allocation3 + $0x160] sm:$0xff] %vm3785_vm11, %v3765_v39  ;;  %v3691_v23 = vpop.f32.mrf.mxu3  ;;  %v4876_v42 = vld [vmem:[#allocation4 + $0x240] ss:$2 sm:$0xff] }
 0x67e   :  { %4834 = vst.msk [vmem:[#allocation4 + $0x259] sm:$0xff] %vm3785_vm11, %v3765_v39  ;;  %v3692_v31 = vadd.f32 %v11024_v55, %v3691_v23 }
 0x67f   :  { %4896 = vst.msk [vmem:[#allocation5 + $0x58] sm:$0xff] %vm3785_vm11, %v4876_v42  ;;  %v3958_v42 = vld [vmem:[#allocation3 + $0x102] ss:$16 sm:$0x30] }
 0x680   :  { %v3775_v44 = vmax.f32 %v3692_v31, 0.0 }
 0x682   :  { %3840 = vst.msk [vmem:[#allocation3 + $0x1b0] sm:$0xff] %vm3785_vm11, %v3775_v44 }
 0x683   :  { %4844 = vst.msk [vmem:[#allocation4 + $0x2d1] sm:$0xff] %vm3785_vm11, %v3775_v44 }
 0x684   :  { %v3907_v14 = vld [vmem:[#allocation3 + $0x101] ss:$16 sm:$0xc0]  ;;  %v3871_v21 = vld [vmem:[#allocation3 + $0x100] ss:$16 sm:$0xc0] }
 0x685   :  { %v3908_v17 = vor.u32 %v3907_v14, %v3906_v8  ;;  %v3694_v49 = vpop.f32.mrf.mxu3  ;;  %v3872_v40 = vor.u32 %v3871_v21, %v3870_v10  ;;  %v4008_v21 = vld [vmem:[#allocation3 + $0x103] ss:$16 sm:$0x3] }
 0x686   :  { %v3695_v28 = vadd.f32 %v11024_v55, %v3694_v49  ;;  %v4061_v49 = vld [vmem:[#allocation3 + $0x104] ss:$16 sm:$0x3] }
 0x687   :  { %3925 = vrot.lane.b32.xlu1 %v3908_v17, %s7618_s24  ;;  %3883 = vst.msk [vmem:[#allocation11 + $0x10] sm:$0xff] %vm3785_vm11, %v3872_v40  ;;  %v3910_v17 = vld [vmem:[#allocation3 + $0x181] ss:$16 sm:$0x3] }
 0x688   :  { %v3776_v57 = vmax.f32 %v3695_v28, 0.0  ;;  %v4064_v28 = vld [vmem:[#allocation3 + $0x104] ss:$16 sm:$0x30] }
 0x689   :  { %v4017_v52 = vld [vmem:[#allocation3 + $0x183] ss:$16 sm:$0xc]  ;;  %v3964_v54 = vld [vmem:[#allocation3 + $0x182] ss:$16 sm:$0xc] }
 0x68a   :  { %3841 = vst.msk [vmem:[#allocation3 + $0x1b8] sm:$0xff] %vm3785_vm11, %v3776_v57  ;;  %v3911_v60 = vld [vmem:[#allocation3 + $0x181] ss:$16 sm:$0xc]  ;;  %v4018_v13 = vor.u32 %v4017_v52, %v4016_v53  ;;  %v3965_v14 = vor.u32 %v3964_v54, %v3963_v59 }
 0x68b   :  { %4845 = vst.msk [vmem:[#allocation4 + $0x2d9] sm:$0xff] %vm3785_vm11, %v3776_v57  ;;  %v3912_v23 = vor.u32 %v3911_v60, %v3910_v17  ;;  %v3875_v31 = vld [vmem:[#allocation3 + $0x180] ss:$16 sm:$0xc] }
 0x68c   :  { %v3876_v35 = vor.u32 %v3875_v31, %v3874_v26  ;;  %v3956_v40 = vld [vmem:[#allocation3 + $0x102] ss:$16 sm:$0xc]  ;;  %v4011_v57 = vld [vmem:[#allocation3 + $0x103] ss:$16 sm:$0x30] }
 0x68d   :  { %v3697_v19 = vpop.f32.mrf.mxu3  ;;  %v4056_v52 = vld [vmem:[#allocation3 + $0x84] ss:$16 sm:$0x30]  ;;  %v4003_v60 = vld [vmem:[#allocation3 + $0x83] ss:$16 sm:$0x30] }
 0x68e   :  { %v3698_v30 = vadd.f32 %v11024_v55, %v3697_v19  ;;  %v4005_v17 = vld [vmem:[#allocation3 + $0x83] ss:$16 sm:$0xc0]  ;;  %v4152_v26 = vld [vmem:[#allocation3 + $0x6] ss:$16 sm:$0xc] }
 0x68f   :  { %3976 = vrot.lane.b32.xlu1 %v3953_v1, %s7620_s28  ;;  %v4099_v31 = vld [vmem:[#allocation3 + $0x5] ss:$16 sm:$0xc] }
 0x690   :  { %v3777_v34 = vmax.f32 %v3698_v30, 0.0  ;;  %v4063_v30 = vor.u32 %v4062_v61, %v4061_v49  ;;  %v4048_v61 = vld [vmem:[#allocation3 + $0x4] ss:$16 sm:$0x30] }
 0x691   :  { %v4050_v49 = vld [vmem:[#allocation3 + $0x4] ss:$16 sm:$0xc0] }
 0x692   :  { %3842 = vst.msk [vmem:[#allocation3 + $0x1c0] sm:$0xff] %vm3785_vm11, %v3777_v34  ;;  %v4882_v38 = vld [vmem:[#allocation4 + $0x2d0] ss:$2 sm:$0xff] }
 0x693   :  { %4846 = vst.msk [vmem:[#allocation4 + $0x2e9] sm:$0xff] %vm3785_vm11, %v3777_v34  ;;  %v4010_v34 = vor.u32 %v4009_v24, %v4008_v21 }
 0x694   :  { %4899 = vst.msk [vmem:[#allocation5 + $0x70] sm:$0xff] %vm3785_vm11, %v4882_v38 }
 0x695   :  { %v3700_v0 = vpop.f32.mrf.mxu3 }
 0x696   :  { %v3701_v2 = vadd.f32 %v11024_v55, %v3700_v0  ;;  %v4001_v0 = vld [vmem:[#allocation3 + $0x83] ss:$16 sm:$0xc] }
 0x697   :  { %4027 = vrot.lane.b32.xlu1 %v3998_v12, %s7622_s23 }
 0x698   :  { %v3778_v9 = vmax.f32 %v3701_v2, 0.0 }
 0x69a   :  { %3843 = vst.msk [vmem:[#allocation3 + $0x1c8] sm:$0xff] %vm3785_vm11, %v3778_v9 }
 0x69b   :  { %4847 = vst.msk [vmem:[#allocation4 + $0x2f1] sm:$0xff] %vm3785_vm11, %v3778_v9  ;;  %v4066_v9 = vld [vmem:[#allocation3 + $0x104] ss:$16 sm:$0xc0] }
 0x69d   :  { %v3703_v25 = vpop.f32.mrf.mxu3 }
 0x69e   :  { %v3704_v27 = vadd.f32 %v11024_v55, %v3703_v25  ;;  %v4013_v25 = vld [vmem:[#allocation3 + $0x103] ss:$16 sm:$0xc0] }
 0x6a0   :  { %v3779_v41 = vmax.f32 %v3704_v27, 0.0  ;;  %v3957_v27 = vor.u32 %v3956_v40, %v3955_v37  ;;  %v4175_v40 = vld [vmem:[#allocation3 + $0x186] ss:$16 sm:$0x3] }
 0x6a2   :  { %3844 = vst.msk [vmem:[#allocation3 + $0x1d0] sm:$0xff] %vm3785_vm11, %v3779_v41 }
 0x6a3   :  { %4848 = vst.msk [vmem:[#allocation4 + $0x301] sm:$0xff] %vm3785_vm11, %v3779_v41  ;;  %v4065_v41 = vor.u32 %v4064_v28, %v4063_v30 }
 0x6a5   :  { %v3706_v6 = vpop.f32.mrf.mxu3 }
 0x6a6   :  { %v3707_v16 = vadd.f32 %v11024_v55, %v3706_v6  ;;  %v4012_v6 = vor.u32 %v4011_v57, %v4010_v34  ;;  %v4123_v57 = vld [vmem:[#allocation3 + $0x185] ss:$16 sm:$0xc] }
 0x6a8   :  { %v3780_v18 = vmax.f32 %v3707_v16, 0.0  ;;  %v3960_v16 = vld [vmem:[#allocation3 + $0x102] ss:$16 sm:$0xc0] }
 0x6a9   :  { %v4019_v4 = vld [vmem:[#allocation3 + $0x183] ss:$16 sm:$0x30]  ;;  %v3966_v5 = vld [vmem:[#allocation3 + $0x182] ss:$16 sm:$0x30] }
 0x6aa   :  { %3845 = vst.msk [vmem:[#allocation3 + $0x1d8] sm:$0xff] %vm3785_vm11, %v3780_v18  ;;  %v3913_v22 = vld [vmem:[#allocation3 + $0x181] ss:$16 sm:$0x30]  ;;  %v4020_v36 = vor.u32 %v4019_v4, %v4018_v13  ;;  %v3967_v43 = vor.u32 %v3966_v5, %v3965_v14 }
 0x6ab   :  { %4849 = vst.msk [vmem:[#allocation4 + $0x309] sm:$0xff] %vm3785_vm11, %v3780_v18  ;;  %v3877_v44 = vld [vmem:[#allocation3 + $0x180] ss:$16 sm:$0x30]  ;;  %v3914_v58 = vor.u32 %v3913_v22, %v3912_v23  ;;  %v3959_v18 = vor.u32 %v3958_v42, %v3957_v27 }
 0x6ac   :  { %v3878_v48 = vor.u32 %v3877_v44, %v3876_v35  ;;  %v4111_v5 = vld [vmem:[#allocation3 + $0x85] ss:$16 sm:$0xc0]  ;;  %v4151_v23 = vld [vmem:[#allocation3 + $0x6] ss:$16 sm:$0x3] }
 0x6ad   :  { %v3709_v11 = vpop.f32.mrf.mxu3  ;;  %v4101_v44 = vld [vmem:[#allocation3 + $0x5] ss:$16 sm:$0x30]  ;;  %v4069_v42 = vld [vmem:[#allocation3 + $0x184] ss:$16 sm:$0x3] }
 0x6ae   :  { %v3710_v51 = vadd.f32 %v11024_v55, %v3709_v11  ;;  %v4106_v11 = vld [vmem:[#allocation3 + $0x85] ss:$16 sm:$0x3] }
 0x6b0   :  { %v3781_v56 = vmax.f32 %v3710_v51, 0.0  ;;  %v4053_v51 = vld [vmem:[#allocation3 + $0x84] ss:$16 sm:$0x3] }
 0x6b1   :  { %v4055_v38 = vor.u32 %v4054_v3, %v4053_v51  ;;  %v4070_v3 = vld [vmem:[#allocation3 + $0x184] ss:$16 sm:$0xc] }
 0x6b2   :  { %3846 = vst.msk [vmem:[#allocation3 + $0x1e0] sm:$0xff] %vm3785_vm11, %v3781_v56  ;;  %v4884_v4 = vld [vmem:[#allocation4 + $0x300] ss:$2 sm:$0xff] }
 0x6b3   :  { %4850 = vst.msk [vmem:[#allocation4 + $0x319] sm:$0xff] %vm3785_vm11, %v3781_v56  ;;  %v4067_v56 = vor.u32 %v4066_v9, %v4065_v41  ;;  %v4057_v59 = vor.u32 %v4056_v52, %v4055_v38  ;;  %v4168_v38 = vld [vmem:[#allocation3 + $0x106] ss:$16 sm:$0xc] }
 0x6b4   :  { %4900 = vst.msk [vmem:[#allocation5 + $0x78] sm:$0xff] %vm3785_vm11, %v4884_v4  ;;  %v4266_v52 = vld [vmem:[#allocation3 + $0x88] ss:$16 sm:$0xc] }
 0x6b5   :  { %v3712_v7 = vpop.f32.mrf.mxu3  ;;  %v4225_v4 = vld [vmem:[#allocation3 + $0x107] ss:$16 sm:$0xc0] }
 0x6b6   :  { %v3713_v33 = vadd.f32 %v11024_v55, %v3712_v7  ;;  %v4014_v7 = vor.u32 %v4013_v25, %v4012_v6  ;;  %v4071_v25 = vor.u32 %v4070_v3, %v4069_v42  ;;  %v4257_v3 = vld [vmem:[#allocation3 + $0x8] ss:$16 sm:$0x3] }
 0x6b8   :  { %v3782_v39 = vmax.f32 %v3713_v33, 0.0  ;;  %v4108_v33 = vor.u32 %v4107_v62, %v4106_v11  ;;  %v4122_v62 = vld [vmem:[#allocation3 + $0x185] ss:$16 sm:$0x3] }
 0x6b9   :  { %v4124_v34 = vor.u32 %v4123_v57, %v4122_v62  ;;  %v4310_v57 = vld [vmem:[#allocation3 + $0x9] ss:$16 sm:$0x3] }
 0x6ba   :  { %3847 = vst.msk [vmem:[#allocation3 + $0x1e8] sm:$0xff] %vm3785_vm11, %v3782_v39  ;;  %v4311_v62 = vld [vmem:[#allocation3 + $0x9] ss:$16 sm:$0xc] }
 0x6bb   :  { %4851 = vst.msk [vmem:[#allocation4 + $0x321] sm:$0xff] %vm3785_vm11, %v3782_v39  ;;  %v4000_v39 = vld [vmem:[#allocation3 + $0x83] ss:$16 sm:$0x3]  ;;  %v4312_v42 = vor.u32 %v4311_v62, %v4310_v57 }
 0x6bc   :  { %v4319_v57 = vld [vmem:[#allocation3 + $0x89] ss:$16 sm:$0xc]  ;;  %v4371_v62 = vld [vmem:[#allocation3 + $0x8a] ss:$16 sm:$0x3] }
 0x6bd   :  { %v3715_v45 = vpop.f32.mrf.mxu3 }
 0x6be   :  { %v3716_v46 = vadd.f32 %v11024_v55, %v3715_v45  ;;  %v3961_v45 = vor.u32 %v3960_v16, %v3959_v18 }
 0x6c0   :  { %v3783_v47 = vmax.f32 %v3716_v46, 0.0  ;;  %v4002_v46 = vor.u32 %v4001_v0, %v4000_v39  ;;  %v4072_v0 = vld [vmem:[#allocation3 + $0x184] ss:$16 sm:$0x30] }
 0x6c1   :  { %v4073_v16 = vor.u32 %v4072_v0, %v4071_v25  ;;  %v4114_v39 = vld [vmem:[#allocation3 + $0x105] ss:$16 sm:$0x3]  ;;  %v4315_v25 = vld [vmem:[#allocation3 + $0x9] ss:$16 sm:$0xc0] }
 0x6c2   :  { %3848 = vst.msk [vmem:[#allocation3 + $0x1f0] sm:$0xff] %vm3785_vm11, %v3783_v47 }
 0x6c3   :  { %4852 = vst.msk [vmem:[#allocation4 + $0x331] sm:$0xff] %vm3785_vm11, %v3783_v47  ;;  %v4109_v47 = vld [vmem:[#allocation3 + $0x85] ss:$16 sm:$0x30] }
 0x6c4   :  { %v4110_v54 = vor.u32 %v4109_v47, %v4108_v33  ;;  %v4167_v33 = vld [vmem:[#allocation3 + $0x106] ss:$16 sm:$0x3] }
 0x6c5   :  { %v3718_v63 = vpop.f32.mrf.mxu3  ;;  %v4170_v47 = vld [vmem:[#allocation3 + $0x106] ss:$16 sm:$0x30] }
 0x6c6   :  { %v3719_v8 = vadd.f32 %v11024_v55, %v3718_v63  ;;  %v4004_v63 = vor.u32 %v4003_v60, %v4002_v46  ;;  %v4112_v13 = vor.u32 %v4111_v5, %v4110_v54  ;;  %v4223_v46 = vld [vmem:[#allocation3 + $0x107] ss:$16 sm:$0x30]  ;;  %v4117_v60 = vld [vmem:[#allocation3 + $0x105] ss:$16 sm:$0x30] }
 0x6c7   :  { %v4172_v5 = vld [vmem:[#allocation3 + $0x106] ss:$16 sm:$0xc0] }
 0x6c8   :  { %v3784_v32 = vmax.f32 %v3719_v8, 0.0  ;;  %v4058_v8 = vld [vmem:[#allocation3 + $0x84] ss:$16 sm:$0xc0]  ;;  %v4006_v22 = vor.u32 %v4005_v17, %v4004_v63 }
 0x6c9   :  { %v4021_v50 = vld [vmem:[#allocation3 + $0x183] ss:$16 sm:$0xc0]  ;;  %v3968_v20 = vld [vmem:[#allocation3 + $0x182] ss:$16 sm:$0xc0]  ;;  %v4059_v14 = vor.u32 %v4058_v8, %v4057_v59  ;;  %v4169_v59 = vor.u32 %v4168_v38, %v4167_v33 }
 0x6ca   :  { %3849 = vst.msk [vmem:[#allocation3 + $0x1f8] sm:$0xff] %vm3785_vm11, %v3784_v32  ;;  %v4022_v1 = vor.u32 %v4021_v50, %v4020_v36  ;;  %v3969_v29 = vor.u32 %v3968_v20, %v3967_v43  ;;  %v3915_v55 = vld [vmem:[#allocation3 + $0x181] ss:$16 sm:$0xc0]  ;;  %v4153_v50 = vor.u32 %v4152_v26, %v4151_v23 }
 0x6cb   :  { %4853 = vst.msk [vmem:[#allocation4 + $0x339] sm:$0xff] %vm3785_vm11, %v3784_v32  ;;  %v3916_v10 = vor.u32 %v3915_v55, %v3914_v58  ;;  %v3879_v19 = vld [vmem:[#allocation3 + $0x180] ss:$16 sm:$0xc0] }
 0x6cc   :  { %4033 = vrot.lane.b32.xlu1 %v4022_v1, %s7622_s23  ;;  %3980 = vrot.lane.b32.xlu0 %v3969_v29, %s7620_s28  ;;  %v3880_v2 = vor.u32 %v3879_v19, %v3878_v48  ;;  %v4098_v32 = vld [vmem:[#allocation3 + $0x5] ss:$16 sm:$0x3]  ;;  %v4046_v36 = vld [vmem:[#allocation3 + $0x4] ss:$16 sm:$0xc] }
 0x6cd   :  { %3927 = vrot.lane.b32.xlu2 %v3916_v10, %s7618_s24  ;;  %v4154_v43 = vld [vmem:[#allocation3 + $0x6] ss:$16 sm:$0x30]  ;;  %v4100_v20 = vor.u32 %v4099_v31, %v4098_v32  ;;  %v4045_v58 = vld [vmem:[#allocation3 + $0x4] ss:$16 sm:$0x3] }
 0x6ce   :  { %3884 = vst.msk [vmem:[#allocation11 + $0x18] sm:$0xff] %vm3785_vm11, %v3880_v2  ;;  %v4156_v1 = vld [vmem:[#allocation3 + $0x6] ss:$16 sm:$0xc0]  ;;  %v4047_v55 = vor.u32 %v4046_v36, %v4045_v58  ;;  %v4155_v35 = vor.u32 %v4154_v43, %v4153_v50 }
 0x6cf   :  { %v4103_v29 = vld [vmem:[#allocation3 + $0x5] ss:$16 sm:$0xc0]  ;;  %v4102_v10 = vor.u32 %v4101_v44, %v4100_v20  ;;  %v4176_v48 = vld [vmem:[#allocation3 + $0x186] ss:$16 sm:$0xc] }
 0x6d0   :  { %v4049_v21 = vor.u32 %v4048_v61, %v4047_v55  ;;  %v4157_v24 = vor.u32 %v4156_v1, %v4155_v35  ;;  %v4125_v19 = vld [vmem:[#allocation3 + $0x185] ss:$16 sm:$0x30]  ;;  %v4177_v30 = vor.u32 %v4176_v48, %v4175_v40  ;;  %v4180_v2 = vld [vmem:[#allocation3 + $0x186] ss:$16 sm:$0xc0] }
 0x6d1   :  { %v4104_v28 = vor.u32 %v4103_v29, %v4102_v10  ;;  %v4127_v9 = vld [vmem:[#allocation3 + $0x185] ss:$16 sm:$0xc0]  ;;  %v4126_v41 = vor.u32 %v4125_v19, %v4124_v34  ;;  %v4074_v6 = vld [vmem:[#allocation3 + $0x184] ss:$16 sm:$0xc0] }
 0x6d2   :  { %v4051_v37 = vor.u32 %v4050_v49, %v4049_v21  ;;  %v4075_v51 = vor.u32 %v4074_v6, %v4073_v16  ;;  %v4160_v63 = vld [vmem:[#allocation3 + $0x86] ss:$16 sm:$0xc]  ;;  %v4119_v23 = vld [vmem:[#allocation3 + $0x105] ss:$16 sm:$0xc0] }
 0x6d3   :  { %v4128_v11 = vor.u32 %v4127_v9, %v4126_v41  ;;  %v4265_v31 = vld [vmem:[#allocation3 + $0x88] ss:$16 sm:$0x3]  ;;  %v4159_v50 = vld [vmem:[#allocation3 + $0x86] ss:$16 sm:$0x3] }
 0x6d4   :  { %4084 = vrot.lane.b32.xlu1 %v4067_v56, %s7624_s16  ;;  %4031 = vrot.lane.b32.xlu0 %v4014_v7, %s7622_s23  ;;  %v4220_v56 = vld [vmem:[#allocation3 + $0x107] ss:$16 sm:$0x3]  ;;  %v4267_v43 = vor.u32 %v4266_v52, %v4265_v31  ;;  %v4161_v58 = vor.u32 %v4160_v63, %v4159_v50  ;;  %v4268_v61 = vld [vmem:[#allocation3 + $0x88] ss:$16 sm:$0x30] }
 0x6d5   :  { %3978 = vrot.lane.b32.xlu2 %v3961_v45, %s7620_s28  ;;  %v4221_v7 = vld [vmem:[#allocation3 + $0x107] ss:$16 sm:$0xc]  ;;  %v4115_v45 = vld [vmem:[#allocation3 + $0x105] ss:$16 sm:$0xc] }
 0x6d6   :  { %v4222_v54 = vor.u32 %v4221_v7, %v4220_v56  ;;  %v4116_v8 = vor.u32 %v4115_v45, %v4114_v39  ;;  %v4215_v1 = vld [vmem:[#allocation3 + $0x87] ss:$16 sm:$0x30]  ;;  %v4269_v29 = vor.u32 %v4268_v61, %v4267_v43  ;;  %v4162_v35 = vld [vmem:[#allocation3 + $0x86] ss:$16 sm:$0x30] }
 0x6d7   :  { %v3924_v12 = vpop.permute.xlu0 %3923  ;;  %v4163_v10 = vor.u32 %v4162_v35, %v4161_v58  ;;  %v4217_v21 = vld [vmem:[#allocation3 + $0x87] ss:$16 sm:$0xc0]  ;;  %v4164_v40 = vld [vmem:[#allocation3 + $0x86] ss:$16 sm:$0xc0] }
 0x6d8   :  { %3935 = vst.msk [vmem:[#allocation11 + $0x8] sm:$0xff] %vm3933_vm13, %v3924_v12  ;;  %v4178_v12 = vld [vmem:[#allocation3 + $0x186] ss:$16 sm:$0x30]  ;;  %v4224_v17 = vor.u32 %v4223_v46, %v4222_v54  ;;  %v4118_v26 = vor.u32 %v4117_v60, %v4116_v8 }
 0x6d9   :  { %v4179_v27 = vor.u32 %v4178_v12, %v4177_v30  ;;  %v4165_v48 = vor.u32 %v4164_v40, %v4163_v10  ;;  %v4258_v12 = vld [vmem:[#allocation3 + $0x8] ss:$16 sm:$0xc]  ;;  %v4313_v19 = vld [vmem:[#allocation3 + $0x9] ss:$16 sm:$0x30] }
 0x6da   :  { %v4226_v32 = vor.u32 %v4225_v4, %v4224_v17  ;;  %v4120_v20 = vor.u32 %v4119_v23, %v4118_v26  ;;  %v4205_v30 = vld [vmem:[#allocation3 + $0x7] ss:$16 sm:$0xc]  ;;  %v4260_v34 = vld [vmem:[#allocation3 + $0x8] ss:$16 sm:$0x30]  ;;  %v4259_v0 = vor.u32 %v4258_v12, %v4257_v3  ;;  %v4314_v16 = vor.u32 %v4313_v19, %v4312_v42 }
 0x6db   :  { %v4181_v18 = vor.u32 %v4180_v2, %v4179_v27  ;;  %v4204_v2 = vld [vmem:[#allocation3 + $0x7] ss:$16 sm:$0x3]  ;;  %v4262_v27 = vld [vmem:[#allocation3 + $0x8] ss:$16 sm:$0xc0] }
 0x6dc   :  { %4135 = vrot.lane.b32.xlu1 %v4112_v13, %s7626_s2  ;;  %4082 = vrot.lane.b32.xlu0 %v4059_v14, %s7624_s16  ;;  %v4212_v13 = vld [vmem:[#allocation3 + $0x87] ss:$16 sm:$0x3]  ;;  %v4206_v41 = vor.u32 %v4205_v30, %v4204_v2  ;;  %v4316_v56 = vor.u32 %v4315_v25, %v4314_v16  ;;  %v4334_v38 = vld [vmem:[#allocation3 + $0x189] ss:$16 sm:$0x3] }
 0x6dd   :  { %4029 = vrot.lane.b32.xlu2 %v4006_v22, %s7622_s23  ;;  %v4171_v22 = vor.u32 %v4170_v47, %v4169_v59  ;;  %v4207_v9 = vld [vmem:[#allocation3 + $0x7] ss:$16 sm:$0x30]  ;;  %v4335_v39 = vld [vmem:[#allocation3 + $0x189] ss:$16 sm:$0xc] }
 0x6de   :  { %v4282_v45 = vld [vmem:[#allocation3 + $0x188] ss:$16 sm:$0xc]  ;;  %v4229_v47 = vld [vmem:[#allocation3 + $0x187] ss:$16 sm:$0xc]  ;;  %v4336_v54 = vor.u32 %v4335_v39, %v4334_v38 }
 0x6df   :  { %v3975_v53 = vpop.permute.xlu0 %3974  ;;  %v4173_v36 = vor.u32 %v4172_v5, %v4171_v22  ;;  %v4281_v46 = vld [vmem:[#allocation3 + $0x188] ss:$16 sm:$0x3]  ;;  %v4337_v52 = vld [vmem:[#allocation3 + $0x189] ss:$16 sm:$0x30] }
 0x6e0   :  { %3987 = vst.msk [vmem:[#allocation11] sm:$0xff] %vm3986_vm14, %v3975_v53  ;;  %v4213_v53 = vld [vmem:[#allocation3 + $0x87] ss:$16 sm:$0xc]  ;;  %v4283_v59 = vor.u32 %v4282_v45, %v4281_v46 }
 0x6e1   :  { %v4214_v44 = vor.u32 %v4213_v53, %v4212_v13  ;;  %v4284_v53 = vld [vmem:[#allocation3 + $0x188] ss:$16 sm:$0x30]  ;;  %v4228_v60 = vld [vmem:[#allocation3 + $0x187] ss:$16 sm:$0x3]  ;;  %v4338_v13 = vor.u32 %v4337_v52, %v4336_v54 }
 0x6e2   :  { %v4231_v63 = vld [vmem:[#allocation3 + $0x187] ss:$16 sm:$0x30]  ;;  %v4339_v4 = vld [vmem:[#allocation3 + $0x189] ss:$16 sm:$0xc0]  ;;  %v4230_v8 = vor.u32 %v4229_v47, %v4228_v60 }
 0x6e3   :  { %v4216_v55 = vor.u32 %v4215_v1, %v4214_v44  ;;  %v4286_v5 = vld [vmem:[#allocation3 + $0x188] ss:$16 sm:$0xc0]  ;;  %v4233_v17 = vld [vmem:[#allocation3 + $0x187] ss:$16 sm:$0xc0] }
 0x6e4   :  { %4186 = vrot.lane.b32.xlu1 %v4157_v24, %s7627_s15  ;;  %4133 = vrot.lane.b32.xlu0 %v4104_v28, %s7626_s2  ;;  %v4270_v24 = vld [vmem:[#allocation3 + $0x88] ss:$16 sm:$0xc0]  ;;  %v4232_v22 = vor.u32 %v4231_v63, %v4230_v8  ;;  %v4379_v23 = vld [vmem:[#allocation3 + $0x10a] ss:$16 sm:$0x3] }
 0x6e5   :  { %4080 = vrot.lane.b32.xlu2 %v4051_v37, %s7624_s16  ;;  %v4271_v28 = vor.u32 %v4270_v24, %v4269_v29  ;;  %v4218_v37 = vor.u32 %v4217_v21, %v4216_v55  ;;  %v4380_v26 = vld [vmem:[#allocation3 + $0x10a] ss:$16 sm:$0xc]  ;;  %v4327_v31 = vld [vmem:[#allocation3 + $0x109] ss:$16 sm:$0xc] }
 0x6e6   :  { %v4326_v43 = vld [vmem:[#allocation3 + $0x109] ss:$16 sm:$0x3]  ;;  %v4274_v44 = vld [vmem:[#allocation3 + $0x108] ss:$16 sm:$0xc]  ;;  %v4234_v50 = vor.u32 %v4233_v17, %v4232_v22  ;;  %v4381_v61 = vor.u32 %v4380_v26, %v4379_v23 }
 0x6e7   :  { %v4329_v58 = vld [vmem:[#allocation3 + $0x109] ss:$16 sm:$0x30]  ;;  %v4328_v1 = vor.u32 %v4327_v31, %v4326_v43  ;;  %v4273_v29 = vld [vmem:[#allocation3 + $0x108] ss:$16 sm:$0x3] }
 0x6e8   :  { %v4276_v55 = vld [vmem:[#allocation3 + $0x108] ss:$16 sm:$0x30]  ;;  %v4275_v35 = vor.u32 %v4274_v44, %v4273_v29  ;;  %v4384_v21 = vld [vmem:[#allocation3 + $0x10a] ss:$16 sm:$0xc0] }
 0x6e9   :  { %v4331_v24 = vld [vmem:[#allocation3 + $0x109] ss:$16 sm:$0xc0]  ;;  %v4372_v40 = vld [vmem:[#allocation3 + $0x8a] ss:$16 sm:$0xc] }
 0x6ea   :  { %v4278_v19 = vld [vmem:[#allocation3 + $0x108] ss:$16 sm:$0xc0]  ;;  %v4318_v42 = vld [vmem:[#allocation3 + $0x89] ss:$16 sm:$0x3] }
 0x6eb   :  { %v4320_v2 = vor.u32 %v4319_v57, %v4318_v42  ;;  %v4374_v25 = vld [vmem:[#allocation3 + $0x8a] ss:$16 sm:$0x30]  ;;  %v4469_v38 = vld [vmem:[#allocation3 + $0xc] ss:$16 sm:$0x3] }
 0x6ec   :  { %4192 = vrot.lane.b32.xlu1 %v4181_v18, %s7627_s15  ;;  %4139 = vrot.lane.b32.xlu0 %v4128_v11, %s7626_s2  ;;  %v4261_v18 = vor.u32 %v4260_v34, %v4259_v0  ;;  %v4209_v11 = vld [vmem:[#allocation3 + $0x7] ss:$16 sm:$0xc0]  ;;  %v4373_v34 = vor.u32 %v4372_v40, %v4371_v62  ;;  %v4470_v39 = vld [vmem:[#allocation3 + $0xc] ss:$16 sm:$0xc] }
 0x6ed   :  { %4086 = vrot.lane.b32.xlu2 %v4075_v51, %s7624_s16  ;;  %v4208_v51 = vor.u32 %v4207_v9, %v4206_v41  ;;  %v4427_v9 = vld [vmem:[#allocation3 + $0x8b] ss:$16 sm:$0x30]  ;;  %v4364_v47 = vld [vmem:[#allocation3 + $0xa] ss:$16 sm:$0xc]  ;;  %v4471_v54 = vor.u32 %v4470_v39, %v4469_v38 }
 0x6ee   :  { %v4263_v7 = vor.u32 %v4262_v27, %v4261_v18  ;;  %v4375_v41 = vor.u32 %v4374_v25, %v4373_v34  ;;  %v4429_v18 = vld [vmem:[#allocation3 + $0x8b] ss:$16 sm:$0xc0]  ;;  %v4472_v52 = vld [vmem:[#allocation3 + $0xc] ss:$16 sm:$0x30] }
 0x6ef   :  { %v4210_v33 = vor.u32 %v4209_v11, %v4208_v51  ;;  %v4376_v11 = vld [vmem:[#allocation3 + $0x8a] ss:$16 sm:$0xc0]  ;;  %v4417_v45 = vld [vmem:[#allocation3 + $0xb] ss:$16 sm:$0xc] }
 0x6f0   :  { %v4416_v46 = vld [vmem:[#allocation3 + $0xb] ss:$16 sm:$0x3]  ;;  %v4363_v60 = vld [vmem:[#allocation3 + $0xa] ss:$16 sm:$0x3] }
 0x6f1   :  { %v4366_v63 = vld [vmem:[#allocation3 + $0xa] ss:$16 sm:$0x30]  ;;  %v4365_v8 = vor.u32 %v4364_v47, %v4363_v60  ;;  %v4441_v43 = vld [vmem:[#allocation3 + $0x18b] ss:$16 sm:$0xc] }
 0x6f2   :  { %v4368_v17 = vld [vmem:[#allocation3 + $0xa] ss:$16 sm:$0xc0]  ;;  %v4440_v44 = vld [vmem:[#allocation3 + $0x18b] ss:$16 sm:$0x3] }
 0x6f3   :  { %v4367_v22 = vor.u32 %v4366_v63, %v4365_v8  ;;  %v4387_v29 = vld [vmem:[#allocation3 + $0x18a] ss:$16 sm:$0x3]  ;;  %v4539_v57 = vld [vmem:[#allocation3 + $0x10d] ss:$16 sm:$0xc] }
 0x6f4   :  { %4243 = vrot.lane.b32.xlu1 %v4226_v32, %s7628_s17  ;;  %4190 = vrot.lane.b32.xlu0 %v4173_v36, %s7627_s15  ;;  %v4340_v32 = vor.u32 %v4339_v4, %v4338_v13  ;;  %v4474_v4 = vld [vmem:[#allocation3 + $0xc] ss:$16 sm:$0xc0]  ;;  %v4473_v13 = vor.u32 %v4472_v52, %v4471_v54  ;;  %v4541_v42 = vld [vmem:[#allocation3 + $0x10d] ss:$16 sm:$0x30] }
 0x6f5   :  { %4137 = vrot.lane.b32.xlu2 %v4120_v20, %s7626_s2  ;;  %v4382_v20 = vld [vmem:[#allocation3 + $0x10a] ss:$16 sm:$0x30]  ;;  %v4369_v31 = vor.u32 %v4368_v17, %v4367_v22  ;;  %v4486_v62 = vld [vmem:[#allocation3 + $0x10c] ss:$16 sm:$0xc] }
 0x6f6   :  { %v4383_v10 = vor.u32 %v4382_v20, %v4381_v61  ;;  %v4475_v23 = vor.u32 %v4474_v4, %v4473_v13  ;;  %v4496_v20 = vld [vmem:[#allocation3 + $0x18c] ss:$16 sm:$0x30]  ;;  %v4432_v25 = vld [vmem:[#allocation3 + $0x10b] ss:$16 sm:$0x3] }
 0x6f7   :  { %v4531_v38 = vld [vmem:[#allocation3 + $0x8d] ss:$16 sm:$0xc]  ;;  %v4478_v39 = vld [vmem:[#allocation3 + $0x8c] ss:$16 sm:$0xc] }
 0x6f8   :  { %v4385_v3 = vor.u32 %v4384_v21, %v4383_v10  ;;  %v4498_v10 = vld [vmem:[#allocation3 + $0x18c] ss:$16 sm:$0xc0]  ;;  %v4437_v52 = vld [vmem:[#allocation3 + $0x10b] ss:$16 sm:$0xc0] }
 0x6f9   :  { %v3926_v14 = vpop.permute.xlu1 %3925  ;;  %v4586_v4 = vld [vmem:[#allocation3 + $0x8e] ss:$16 sm:$0x30] }
 0x6fa   :  { %3936 = vst.msk [vmem:[#allocation11 + $0x10] sm:$0xff] %vm3933_vm13, %v3926_v14  ;;  %v4285_v14 = vor.u32 %v4284_v53, %v4283_v59  ;;  %v4419_v53 = vld [vmem:[#allocation3 + $0xb] ss:$16 sm:$0x30]  ;;  %v4418_v59 = vor.u32 %v4417_v45, %v4416_v46 }
 0x6fb   :  { %v4530_v45 = vld [vmem:[#allocation3 + $0x8d] ss:$16 sm:$0x3] }
 0x6fc   :  { %4294 = vrot.lane.b32.xlu1 %v4271_v28, %s7629_s18  ;;  %4241 = vrot.lane.b32.xlu0 %v4218_v37, %s7628_s17  ;;  %v4287_v36 = vor.u32 %v4286_v5, %v4285_v14  ;;  %v4277_v28 = vor.u32 %v4276_v55, %v4275_v35  ;;  %v4425_v37 = vld [vmem:[#allocation3 + $0x8b] ss:$16 sm:$0xc]  ;;  %v4420_v14 = vor.u32 %v4419_v53, %v4418_v59  ;;  %v4390_v55 = vld [vmem:[#allocation3 + $0x18a] ss:$16 sm:$0x30] }
 0x6fd   :  { %4188 = vrot.lane.b32.xlu2 %v4165_v48, %s7627_s15  ;;  %v4424_v48 = vld [vmem:[#allocation3 + $0x8b] ss:$16 sm:$0x3]  ;;  %v4532_v54 = vor.u32 %v4531_v38, %v4530_v45  ;;  %v4477_v59 = vld [vmem:[#allocation3 + $0x8c] ss:$16 sm:$0x3] }
 0x6fe   :  { %v4426_v30 = vor.u32 %v4425_v37, %v4424_v48  ;;  %v4279_v0 = vor.u32 %v4278_v19, %v4277_v28  ;;  %v4421_v5 = vld [vmem:[#allocation3 + $0xb] ss:$16 sm:$0xc0]  ;;  %v4392_v37 = vld [vmem:[#allocation3 + $0x18a] ss:$16 sm:$0xc0]  ;;  %v4479_v63 = vor.u32 %v4478_v39, %v4477_v59 }
 0x6ff   :  { %v4422_v26 = vor.u32 %v4421_v5, %v4420_v14  ;;  %v4538_v48 = vld [vmem:[#allocation3 + $0x10d] ss:$16 sm:$0x3]  ;;  %v4485_v19 = vld [vmem:[#allocation3 + $0x10c] ss:$16 sm:$0x3] }
 0x700   :  { %v4428_v27 = vor.u32 %v4427_v9, %v4426_v30  ;;  %v4433_v30 = vld [vmem:[#allocation3 + $0x10b] ss:$16 sm:$0xc]  ;;  %v4487_v9 = vor.u32 %v4486_v62, %v4485_v19  ;;  %v4533_v5 = vld [vmem:[#allocation3 + $0x8d] ss:$16 sm:$0x30] }
 0x701   :  { %v3977_v49 = vpop.permute.xlu1 %3976  ;;  %v4534_v13 = vor.u32 %v4533_v5, %v4532_v54  ;;  %v4480_v14 = vld [vmem:[#allocation3 + $0x8c] ss:$16 sm:$0x30]  ;;  %v4604_v38 = vld [vmem:[#allocation3 + $0x18e] ss:$16 sm:$0xc0] }
 0x702   :  { %3988 = vst.msk [vmem:[#allocation11 + $0x8] sm:$0xff] %vm3986_vm14, %v3977_v49  ;;  %v4330_v49 = vor.u32 %v4329_v58, %v4328_v1  ;;  %v4430_v51 = vor.u32 %v4429_v18, %v4428_v27  ;;  %v4443_v58 = vld [vmem:[#allocation3 + $0x18b] ss:$16 sm:$0x30]  ;;  %v4442_v1 = vor.u32 %v4441_v43, %v4440_v44  ;;  %v4481_v22 = vor.u32 %v4480_v14, %v4479_v63 }
 0x703   :  { %v4435_v27 = vld [vmem:[#allocation3 + $0x10b] ss:$16 sm:$0x30]  ;;  %v4628_v44 = vld [vmem:[#allocation3 + $0xf] ss:$16 sm:$0x3] }
 0x704   :  { %4345 = vrot.lane.b32.xlu1 %v4316_v56, %s7630_s19  ;;  %4292 = vrot.lane.b32.xlu0 %v4263_v7, %s7629_s18  ;;  %v4332_v12 = vor.u32 %v4331_v24, %v4330_v49  ;;  %v4377_v56 = vor.u32 %v4376_v11, %v4375_v41  ;;  %v4323_v7 = vld [vmem:[#allocation3 + $0x89] ss:$16 sm:$0xc0]  ;;  %v4445_v49 = vld [vmem:[#allocation3 + $0x18b] ss:$16 sm:$0xc0]  ;;  %v4444_v28 = vor.u32 %v4443_v58, %v4442_v1 }
 0x705   :  { %4239 = vrot.lane.b32.xlu2 %v4210_v33, %s7628_s17  ;;  %v4434_v41 = vor.u32 %v4433_v30, %v4432_v25  ;;  %v4543_v11 = vld [vmem:[#allocation3 + $0x10d] ss:$16 sm:$0xc0]  ;;  %v4576_v58 = vld [vmem:[#allocation3 + $0xe] ss:$16 sm:$0xc] }
 0x706   :  { %v4522_v1 = vld [vmem:[#allocation3 + $0xd] ss:$16 sm:$0x3]  ;;  %v4647_v5 = vld [vmem:[#allocation3 + $0x10f] ss:$16 sm:$0x30] }
 0x707   :  { %v4546_v25 = vld [vmem:[#allocation3 + $0x18d] ss:$16 sm:$0x3]  ;;  %v4594_v14 = vld [vmem:[#allocation3 + $0x10e] ss:$16 sm:$0x30] }
 0x709   :  { %v4028_v6 = vpop.permute.xlu1 %4027 }
 0x70a   :  { %4040 = vst.msk [vmem:[#allocation11] sm:$0xff] %vm4039_vm15, %v4028_v6  ;;  %v4321_v6 = vld [vmem:[#allocation3 + $0x89] ss:$16 sm:$0x30] }
 0x70b   :  { %v4322_v16 = vor.u32 %v4321_v6, %v4320_v2  ;;  %v4540_v2 = vor.u32 %v4539_v57, %v4538_v48 }
 0x70c   :  { %4351 = vrot.lane.b32.xlu1 %v4340_v32, %s7630_s19  ;;  %4298 = vrot.lane.b32.xlu0 %v4287_v36, %s7629_s18  ;;  %v4493_v32 = vld [vmem:[#allocation3 + $0x18c] ss:$16 sm:$0x3] }
 0x70d   :  { %4245 = vrot.lane.b32.xlu2 %v4234_v50, %s7628_s17  ;;  %v4324_v33 = vor.u32 %v4323_v7, %v4322_v16  ;;  %v4494_v36 = vld [vmem:[#allocation3 + $0x18c] ss:$16 sm:$0xc]  ;;  %v4388_v50 = vld [vmem:[#allocation3 + $0x18a] ss:$16 sm:$0xc]  ;;  %v4542_v6 = vor.u32 %v4541_v42, %v4540_v2 }
 0x70e   :  { %v4495_v61 = vor.u32 %v4494_v36, %v4493_v32  ;;  %v4389_v21 = vor.u32 %v4388_v50, %v4387_v29  ;;  %v4583_v7 = vld [vmem:[#allocation3 + $0x8e] ss:$16 sm:$0x3]  ;;  %v4482_v36 = vld [vmem:[#allocation3 + $0x8c] ss:$16 sm:$0xc0] }
 0x70f   :  { %v4544_v46 = vor.u32 %v4543_v11, %v4542_v6  ;;  %v4483_v43 = vor.u32 %v4482_v36, %v4481_v22  ;;  %v4629_v50 = vld [vmem:[#allocation3 + $0xf] ss:$16 sm:$0xc]  ;;  %v4523_v29 = vld [vmem:[#allocation3 + $0xd] ss:$16 sm:$0xc] }
 0x710   :  { %v4497_v24 = vor.u32 %v4496_v20, %v4495_v61  ;;  %v4391_v40 = vor.u32 %v4390_v55, %v4389_v21  ;;  %v4575_v20 = vld [vmem:[#allocation3 + $0xe] ss:$16 sm:$0x3]  ;;  %v4631_v61 = vld [vmem:[#allocation3 + $0xf] ss:$16 sm:$0x30]  ;;  %v4630_v21 = vor.u32 %v4629_v50, %v4628_v44  ;;  %v4524_v48 = vor.u32 %v4523_v29, %v4522_v1 }
 0x711   :  { %v4578_v55 = vld [vmem:[#allocation3 + $0xe] ss:$16 sm:$0x30]  ;;  %v4652_v42 = vld [vmem:[#allocation3 + $0x18f] ss:$16 sm:$0x3] }
 0x712   :  { %v4393_v34 = vor.u32 %v4392_v37, %v4391_v40  ;;  %v4580_v40 = vld [vmem:[#allocation3 + $0xe] ss:$16 sm:$0xc0]  ;;  %v4632_v57 = vor.u32 %v4631_v61, %v4630_v21  ;;  %v4637_v36 = vld [vmem:[#allocation3 + $0x8f] ss:$16 sm:$0xc] }
 0x713   :  { %v4599_v2 = vld [vmem:[#allocation3 + $0x18e] ss:$16 sm:$0x3]  ;;  %v4641_v21 = vld [vmem:[#allocation3 + $0x8f] ss:$16 sm:$0xc0] }
 0x714   :  { %4402 = vrot.lane.b32.xlu1 %v4385_v3, %s7631_s21  ;;  %4349 = vrot.lane.b32.xlu0 %v4332_v12, %s7630_s19  ;;  %v4499_v3 = vor.u32 %v4498_v10, %v4497_v24  ;;  %v4446_v12 = vor.u32 %v4445_v49, %v4444_v28  ;;  %v4633_v24 = vld [vmem:[#allocation3 + $0xf] ss:$16 sm:$0xc0]  ;;  %v4577_v28 = vor.u32 %v4576_v58, %v4575_v20  ;;  %v4602_v6 = vld [vmem:[#allocation3 + $0x18e] ss:$16 sm:$0x30] }
 0x715   :  { %4296 = vrot.lane.b32.xlu2 %v4279_v0, %s7629_s18  ;;  %v4488_v0 = vld [vmem:[#allocation3 + $0x10c] ss:$16 sm:$0x30]  ;;  %v4634_v19 = vor.u32 %v4633_v24, %v4632_v57  ;;  %v4596_v50 = vld [vmem:[#allocation3 + $0x10e] ss:$16 sm:$0xc0] }
 0x716   :  { %v4489_v16 = vor.u32 %v4488_v0, %v4487_v9  ;;  %v4579_v62 = vor.u32 %v4578_v55, %v4577_v28  ;;  %v4653_v0 = vld [vmem:[#allocation3 + $0x18f] ss:$16 sm:$0xc]  ;;  %v4600_v9 = vld [vmem:[#allocation3 + $0x18e] ss:$16 sm:$0xc] }
 0x717   :  { %v4654_v11 = vor.u32 %v4653_v0, %v4652_v42  ;;  %v4636_v20 = vld [vmem:[#allocation3 + $0x8f] ss:$16 sm:$0x3] }
 0x718   :  { %v4581_v30 = vor.u32 %v4580_v40, %v4579_v62  ;;  %v4906_v58 = vld [vmem:[#allocation4 + $0x61] ss:$2 sm:$0xff]  ;;  %v4638_v1 = vor.u32 %v4637_v36, %v4636_v20  ;;  %v4912_v24 = vld [vmem:[#allocation4 + $0xf1] ss:$2 sm:$0xff]  ;;  %v5463_v36 = vld [vmem:[#allocation4 + $0x60] ss:$2 sm:$0xff] }
 0x719   :  { %v4904_v28 = vld [vmem:[#allocation4 + $0x31] ss:$2 sm:$0xff]  ;;  %v4924_v42 = vld [vmem:[#allocation4 + $0x241] ss:$2 sm:$0xff] }
 0x71a   :  { %v4918_v62 = vld [vmem:[#allocation4 + $0x1b1] ss:$2 sm:$0xff] }
 0x71b   :  { %v4916_v0 = vld [vmem:[#allocation4 + $0x151] ss:$2 sm:$0xff] }
 0x71c   :  { %4453 = vrot.lane.b32.xlu1 %v4430_v51, %s7632_s22  ;;  %4400 = vrot.lane.b32.xlu0 %v4377_v56, %s7631_s21  ;;  %v4490_v51 = vld [vmem:[#allocation3 + $0x10c] ss:$16 sm:$0xc0]  ;;  %v4436_v56 = vor.u32 %v4435_v27, %v4434_v41  ;;  %v4547_v27 = vld [vmem:[#allocation3 + $0x18d] ss:$16 sm:$0xc] }
 0x71d   :  { %4347 = vrot.lane.b32.xlu2 %v4324_v33, %s7630_s19  ;;  %v4584_v33 = vld [vmem:[#allocation3 + $0x8e] ss:$16 sm:$0xc]  ;;  %v4491_v47 = vor.u32 %v4490_v51, %v4489_v16  ;;  %v4655_v41 = vld [vmem:[#allocation3 + $0x18f] ss:$16 sm:$0x30]  ;;  %v4548_v39 = vor.u32 %v4547_v27, %v4546_v25 }
 0x71e   :  { %v4585_v53 = vor.u32 %v4584_v33, %v4583_v7  ;;  %v4438_v60 = vor.u32 %v4437_v52, %v4436_v56  ;;  %v4657_v51 = vld [vmem:[#allocation3 + $0x18f] ss:$16 sm:$0xc0]  ;;  %v4601_v56 = vor.u32 %v4600_v9, %v4599_v2  ;;  %v4549_v7 = vld [vmem:[#allocation3 + $0x18d] ss:$16 sm:$0x30]  ;;  %v4656_v45 = vor.u32 %v4655_v41, %v4654_v11 }
 0x71f   :  { %v4550_v52 = vor.u32 %v4549_v7, %v4548_v39  ;;  %v4908_v2 = vld [vmem:[#allocation4 + $0x91] ss:$2 sm:$0xff]  ;;  %v5014_v41 = vld [vmem:[#allocation4 + $0x2] ss:$2 sm:$0xff]  ;;  %v4928_v7 = vld [vmem:[#allocation4 + $0x2a1] ss:$2 sm:$0xff] }
 0x720   :  { %v4587_v8 = vor.u32 %v4586_v4, %v4585_v53  ;;  %v4645_v53 = vld [vmem:[#allocation3 + $0x10f] ss:$16 sm:$0xc]  ;;  %v4658_v54 = vor.u32 %v4657_v51, %v4656_v45 }
 0x721   :  { %v4644_v4 = vld [vmem:[#allocation3 + $0x10f] ss:$16 sm:$0x3] }
 0x724   :  { %4504 = vrot.lane.b32.xlu1 %v4475_v23, %s7633_s25  ;;  %4451 = vrot.lane.b32.xlu0 %v4422_v26, %s7632_s22  ;;  %v4588_v23 = vld [vmem:[#allocation3 + $0x8e] ss:$16 sm:$0xc0]  ;;  %v4535_v26 = vld [vmem:[#allocation3 + $0x8d] ss:$16 sm:$0xc0] }
 0x725   :  { %4398 = vrot.lane.b32.xlu2 %v4369_v31, %s7631_s21  ;;  %v4589_v31 = vor.u32 %v4588_v23, %v4587_v8  ;;  %v4536_v32 = vor.u32 %v4535_v26, %v4534_v13  ;;  %v4646_v8 = vor.u32 %v4645_v53, %v4644_v4  ;;  %v4591_v13 = vld [vmem:[#allocation3 + $0x10e] ss:$16 sm:$0x3] }
 0x726   :  { %v5125_v4 = vld [vmem:[#allocation4 + $0x18] ss:$2 sm:$0xff] }
 0x727   :  { %v3928_v35 = vpop.permute.xlu2 %3927  ;;  %v4648_v26 = vor.u32 %v4647_v5, %v4646_v8 }
 0x728   :  { %3937 = vst.msk [vmem:[#allocation11 + $0x18] sm:$0xff] %vm3933_vm13, %v3928_v35  ;;  %v4525_v35 = vld [vmem:[#allocation3 + $0xd] ss:$16 sm:$0x30] }
 0x72c   :  { %4510 = vrot.lane.b32.xlu1 %v4499_v3, %s7633_s25  ;;  %4457 = vrot.lane.b32.xlu0 %v4446_v12, %s7632_s22  ;;  %v4527_v3 = vld [vmem:[#allocation3 + $0xd] ss:$16 sm:$0xc0]  ;;  %v4526_v12 = vor.u32 %v4525_v35, %v4524_v48  ;;  %v4639_v35 = vld [vmem:[#allocation3 + $0x8f] ss:$16 sm:$0x30] }
 0x72d   :  { %4404 = vrot.lane.b32.xlu2 %v4393_v34, %s7631_s21 }
 0x72e   :  { %v4528_v34 = vor.u32 %v4527_v3, %v4526_v12  ;;  %v4902_v3 = vld [vmem:[#allocation4 + $0x1] ss:$2 sm:$0xff] }
 0x72f   :  { %v3979_v18 = vpop.permute.xlu2 %3978  ;;  %v4910_v12 = vld [vmem:[#allocation4 + $0xc1] ss:$2 sm:$0xff] }
 0x730   :  { %3989 = vst.msk [vmem:[#allocation11 + $0x10] sm:$0xff] %vm3986_vm14, %v3979_v18 }
 0x734   :  { %4561 = vrot.lane.b32.xlu1 %v4544_v46, %s7634_s20  ;;  %4508 = vrot.lane.b32.xlu0 %v4491_v47, %s7633_s25  ;;  %v4603_v46 = vor.u32 %v4602_v6, %v4601_v56  ;;  %v4551_v47 = vld [vmem:[#allocation3 + $0x18d] ss:$16 sm:$0xc0]  ;;  %v5349_v56 = vld [vmem:[#allocation4 + $0x1a] ss:$2 sm:$0xff] }
 0x735   :  { %4455 = vrot.lane.b32.xlu2 %v4438_v60, %s7632_s22  ;;  %v4592_v60 = vld [vmem:[#allocation3 + $0x10e] ss:$16 sm:$0xc]  ;;  %v4552_v63 = vor.u32 %v4551_v47, %v4550_v52  ;;  %v4922_v6 = vld [vmem:[#allocation4 + $0x211] ss:$2 sm:$0xff]  ;;  %s6843_s22 = sshll.u32 %s11872_s7, 4  ;;  %s6844_s22 = int_to_ptr.hbm [resolvable:$true] %s6843_s22 }
 0x736   :  { %v4605_v59 = vor.u32 %v4604_v38, %v4603_v46  ;;  %v5685_v46 = vld [vmem:[#allocation4 + $0x32] ss:$2 sm:$0xff]  ;;  %v5237_v47 = vld [vmem:[#allocation4 + $0x19] ss:$2 sm:$0xff]  ;;  %s6870_s7 = sshll.u32 %s11874_s9, 4  ;;  %s6871_s7 = int_to_ptr.hbm [resolvable:$true] %s6870_s7 }
 0x737   :  { %v4030_v17 = vpop.permute.xlu2 %4029  ;;  %v4926_v52 = vld [vmem:[#allocation4 + $0x271] ss:$2 sm:$0xff] }
 0x738   :  { %4041 = vst.msk [vmem:[#allocation11 + $0x8] sm:$0xff] %vm4039_vm15, %v4030_v17  ;;  %v4593_v17 = vor.u32 %v4592_v60, %v4591_v13  ;;  %v5239_v60 = vld [vmem:[#allocation4 + $0x49] ss:$2 sm:$0xff] }
 0x73c   :  { %4612 = vrot.lane.b32.xlu1 %v4589_v31, %s7635_s26  ;;  %4559 = vrot.lane.b32.xlu0 %v4536_v32, %s7634_s20  ;;  %v4595_v32 = vor.u32 %v4594_v14, %v4593_v17  ;;  %v5575_v14 = vld [vmem:[#allocation4 + $0x61] ss:$2 sm:$0xff]  ;;  %v5127_v17 = vld [vmem:[#allocation4 + $0x48] ss:$2 sm:$0xff] }
 0x73d   :  { %4506 = vrot.lane.b32.xlu2 %v4483_v43, %s7633_s25  ;;  %v4649_v43 = vld [vmem:[#allocation3 + $0x10f] ss:$16 sm:$0xc0] }
 0x73e   :  { %v4034_v10 = vpop.permute.xlu1 %4033  ;;  %v3981_v49 = vpop.permute.xlu0 %3980  ;;  %v4650_v44 = vor.u32 %v4649_v43, %v4648_v26  ;;  %v4597_v61 = vor.u32 %v4596_v50, %v4595_v32  ;;  %v5129_v32 = vld [vmem:[#allocation4 + $0x78] ss:$2 sm:$0xff] }
 0x73f   :  { %3990 = vst.msk [vmem:[#allocation11 + $0x18] sm:$0xff] %vm3986_vm14, %v3981_v49  ;;  %v4081_v37 = vpop.permute.xlu2 %4080  ;;  %v4640_v49 = vor.u32 %v4639_v35, %v4638_v1  ;;  %v5016_v43 = vld [vmem:[#allocation4 + $0x32] ss:$2 sm:$0xff]  ;;  %v5018_v1 = vld [vmem:[#allocation4 + $0x62] ss:$2 sm:$0xff] }
 0x740   :  { %4043 = vst.msk [vmem:[#allocation11 + $0x18] sm:$0xff] %vm4039_vm15, %v4034_v10 }
 0x741   :  { %4093 = vst.msk [vmem:[#allocation11] sm:$0xff] %vm4092_vm0, %v4081_v37  ;;  %v4642_v37 = vor.u32 %v4641_v21, %v4640_v49  ;;  %v5020_v49 = vld [vmem:[#allocation4 + $0x92] ss:$2 sm:$0xff] }
 0x742   :  { %v5353_v21 = vld [vmem:[#allocation4 + $0x7a] ss:$2 sm:$0xff] }
 0x744   :  { %4663 = vrot.lane.b32.xlu1 %v4634_v19, %s7636_s27  ;;  %4610 = vrot.lane.b32.xlu0 %v4581_v30, %s7635_s26 }
 0x745   :  { %4557 = vrot.lane.b32.xlu2 %v4528_v34, %s7634_s20 }
 0x746   :  { %v4085_v16 = vpop.permute.xlu1 %4084  ;;  %v4032_v18 = vpop.permute.xlu0 %4031 }
 0x747   :  { %4042 = vst.msk [vmem:[#allocation11 + $0x10] sm:$0xff] %vm4039_vm15, %v4032_v18  ;;  %v4087_v33 = vpop.permute.xlu2 %4086 }
 0x748   :  { %4095 = vst.msk [vmem:[#allocation11 + $0x10] sm:$0xff] %vm4092_vm0, %v4085_v16  ;;  %v4914_v16 = vld [vmem:[#allocation4 + $0x121] ss:$2 sm:$0xff] }
 0x749   :  { %4096 = vst.msk [vmem:[#allocation11 + $0x18] sm:$0xff] %vm4092_vm0, %v4087_v33  ;;  %v4920_v33 = vld [vmem:[#allocation4 + $0x1e1] ss:$2 sm:$0xff] }
 0x74c   :  { %4669 = vrot.lane.b32.xlu1 %v4658_v54, %s7636_s27  ;;  %4616 = vrot.lane.b32.xlu0 %v4605_v59, %s7635_s26 }
 0x74d   :  { %4563 = vrot.lane.b32.xlu2 %v4552_v63, %s7634_s20  ;;  %v5573_v63 = vld [vmem:[#allocation4 + $0x31] ss:$2 sm:$0xff]  ;;  %s7639_s20 = smov [#allocation11]  }
 0x74e   :  { %v4136_v22 = vpop.permute.xlu1 %4135  ;;  %v4083_v23 = vpop.permute.xlu0 %4082 }
 0x74f   :  { %4094 = vst.msk [vmem:[#allocation11 + $0x8] sm:$0xff] %vm4092_vm0, %v4083_v23  ;;  %v4138_v31 = vpop.permute.xlu2 %4137 }
 0x750   :  { %4148 = vst.msk [vmem:[#allocation11 + $0x10] sm:$0xff] %vm4145_vm1, %v4138_v31 }
 0x751   :  { %4147 = vst.msk [vmem:[#allocation11 + $0x8] sm:$0xff] %vm4145_vm1, %v4136_v22  ;;  %v5461_v22 = vld [vmem:[#allocation4 + $0x30] ss:$2 sm:$0xff] }
 0x754   :  { %4953 = vrot.lane.b32.xlu1 %v4906_v58, %s7618_s24  ;;  %4667 = vrot.lane.b32.xlu0 %v4650_v44, %s7636_s27  ;;  %v4854_v58 = vld [vmem:[#allocation4] ss:$2 sm:$0xff] }
 0x755   :  { %4614 = vrot.lane.b32.xlu2 %v4597_v61, %s7635_s26  ;;  %4885 = vst.msk [vmem:[#allocation5] sm:$0xff] %vm3785_vm11, %v4854_v58  ;;  %v5465_v61 = vld [vmem:[#allocation4 + $0x90] ss:$2 sm:$0xff] }
 0x756   :  { %v4187_v29 = vpop.permute.xlu1 %4186  ;;  %v4134_v55 = vpop.permute.xlu0 %4133 }
 0x757   :  { %4146 = vst.msk [vmem:[#allocation11] sm:$0xff] %vm4145_vm1, %v4134_v55  ;;  %v4189_v10 = vpop.permute.xlu2 %4188 }
 0x758   :  { %4200 = vst.msk [vmem:[#allocation11 + $0x8] sm:$0xff] %vm4198_vm2, %v4189_v10 }
 0x759   :  { %4199 = vst.msk [vmem:[#allocation11] sm:$0xff] %vm4198_vm2, %v4187_v29  ;;  %v5351_v29 = vld [vmem:[#allocation4 + $0x4a] ss:$2 sm:$0xff] }
 0x75c   :  { %4959 = vrot.lane.b32.xlu1 %v4912_v24, %s7618_s24  ;;  %4951 = vrot.lane.b32.xlu0 %v4904_v28, %s7618_s24  ;;  %v5687_v24 = vld [vmem:[#allocation4 + $0x62] ss:$2 sm:$0xff] }
 0x75d   :  { %4665 = vrot.lane.b32.xlu2 %v4642_v37, %s7636_s27  ;;  %s6841_s27 = sshll.u32 %s7639_s20, 4  ;;  %s6842_s27 = int_to_ptr.vmem [resolvable:$true] %s6841_s27 }
 0x75e   :  { %v4193_v40 = vpop.permute.xlu1 %4192  ;;  %v4140_v48 = vpop.permute.xlu0 %4139 }
 0x75f   :  { %4149 = vst.msk [vmem:[#allocation11 + $0x18] sm:$0xff] %vm4145_vm1, %v4140_v48  ;;  %v4240_v57 = vpop.permute.xlu2 %4239  ;;  %v5355_v48 = vld [vmem:[#allocation4 + $0xaa] ss:$2 sm:$0xff] }
 0x760   :  { %4202 = vst.msk [vmem:[#allocation11 + $0x18] sm:$0xff] %vm4198_vm2, %v4193_v40 }
 0x761   :  { %4252 = vst.msk [vmem:[#allocation11] sm:$0xff] %vm4251_vm3, %v4240_v57  ;;  %v5689_v57 = vld [vmem:[#allocation4 + $0x92] ss:$2 sm:$0xff] }
 0x764   :  { %4965 = vrot.lane.b32.xlu1 %v4918_v62, %s7618_s24  ;;  %4957 = vrot.lane.b32.xlu0 %v4910_v12, %s7618_s24  ;;  %v5241_v62 = vld [vmem:[#allocation4 + $0x79] ss:$2 sm:$0xff] }
 0x765   :  { %4949 = vrot.lane.b32.xlu2 %v4902_v3, %s7618_s24  ;;  %v4870_v3 = vld [vmem:[#allocation4 + $0x1b0] ss:$2 sm:$0xff] }
 0x766   :  { %v4244_v19 = vpop.permute.xlu1 %4243  ;;  %v4191_v30 = vpop.permute.xlu0 %4190  ;;  %4893 = vst.msk [vmem:[#allocation5 + $0x40] sm:$0xff] %vm3785_vm11, %v4870_v3  ;;  %v5137_v3 = vld [vmem:[#allocation4 + $0x138] ss:$2 sm:$0xff]  ;;  %vm5825_vm11 = vcmask 588800  }
 0x767   :  { %4201 = vst.msk [vmem:[#allocation11 + $0x10] sm:$0xff] %vm4198_vm2, %v4191_v30  ;;  %v4246_v34 = vpop.permute.xlu2 %4245 }
 0x768   :  { %4254 = vst.msk [vmem:[#allocation11 + $0x10] sm:$0xff] %vm4251_vm3, %v4244_v19 }
 0x769   :  { %4255 = vst.msk [vmem:[#allocation11 + $0x18] sm:$0xff] %vm4251_vm3, %v4246_v34  ;;  %v5691_v34 = vld [vmem:[#allocation4 + $0xc2] ss:$2 sm:$0xff] }
 0x76c   :  { %4971 = vrot.lane.b32.xlu1 %v4924_v42, %s7618_s24  ;;  %4963 = vrot.lane.b32.xlu0 %v4916_v0, %s7618_s24  ;;  %v5243_v42 = vld [vmem:[#allocation4 + $0xa9] ss:$2 sm:$0xff] }
 0x76d   :  { %4955 = vrot.lane.b32.xlu2 %v4908_v2, %s7618_s24  ;;  %v5577_v0 = vld [vmem:[#allocation4 + $0x91] ss:$2 sm:$0xff] }
 0x76e   :  { %v4295_v9 = vpop.permute.xlu1 %4294  ;;  %v4242_v25 = vpop.permute.xlu0 %4241 }
 0x76f   :  { %4253 = vst.msk [vmem:[#allocation11 + $0x8] sm:$0xff] %vm4251_vm3, %v4242_v25  ;;  %v4297_v27 = vpop.permute.xlu2 %4296 }
 0x770   :  { %4307 = vst.msk [vmem:[#allocation11 + $0x10] sm:$0xff] %vm4304_vm4, %v4297_v27  ;;  %v5245_v27 = vld [vmem:[#allocation4 + $0xd9] ss:$2 sm:$0xff] }
 0x771   :  { %4306 = vst.msk [vmem:[#allocation11 + $0x8] sm:$0xff] %vm4304_vm4, %v4295_v9 }
 0x774   :  { %5061 = vrot.lane.b32.xlu1 %v5014_v41, %s7620_s28  ;;  %4969 = vrot.lane.b32.xlu0 %v4922_v6, %s7618_s24  ;;  %v5579_v41 = vld [vmem:[#allocation4 + $0xc1] ss:$2 sm:$0xff]  ;;  %v5131_v6 = vld [vmem:[#allocation4 + $0xa8] ss:$2 sm:$0xff] }
 0x775   :  { %4961 = vrot.lane.b32.xlu2 %v4914_v16, %s7618_s24 }
 0x776   :  { %v4346_v18 = vpop.permute.xlu1 %4345  ;;  %v4293_v11 = vpop.permute.xlu0 %4292 }
 0x777   :  { %4305 = vst.msk [vmem:[#allocation11] sm:$0xff] %vm4304_vm4, %v4293_v11  ;;  %v4348_v51 = vpop.permute.xlu2 %4347 }
 0x778   :  { %4359 = vst.msk [vmem:[#allocation11 + $0x8] sm:$0xff] %vm4357_vm5, %v4348_v51  ;;  %v5581_v51 = vld [vmem:[#allocation4 + $0xf1] ss:$2 sm:$0xff] }
 0x779   :  { %4358 = vst.msk [vmem:[#allocation11] sm:$0xff] %vm4357_vm5, %v4346_v18 }
 0x77c   :  { %5396 = vrot.lane.b32.xlu1 %v5349_v56, %s7626_s2  ;;  %4975 = vrot.lane.b32.xlu0 %v4928_v7, %s7618_s24  ;;  %v5133_v56 = vld [vmem:[#allocation4 + $0xd8] ss:$2 sm:$0xff] }
 0x77d   :  { %4967 = vrot.lane.b32.xlu2 %v4920_v33, %s7618_s24  ;;  %v5467_v7 = vld [vmem:[#allocation4 + $0xc0] ss:$2 sm:$0xff] }
 0x77e   :  { %v4352_v38 = vpop.permute.xlu1 %4351  ;;  %v4299_v39 = vpop.permute.xlu0 %4298 }
 0x77f   :  { %4308 = vst.msk [vmem:[#allocation11 + $0x18] sm:$0xff] %vm4304_vm4, %v4299_v39  ;;  %v4399_v45 = vpop.permute.xlu2 %4398 }
 0x780   :  { %4361 = vst.msk [vmem:[#allocation11 + $0x18] sm:$0xff] %vm4357_vm5, %v4352_v38 }
 0x781   :  { %4411 = vst.msk [vmem:[#allocation11] sm:$0xff] %vm4410_vm6, %v4399_v45  ;;  %v5135_v45 = vld [vmem:[#allocation4 + $0x108] ss:$2 sm:$0xff] }
 0x784   :  { %5732 = vrot.lane.b32.xlu1 %v5685_v46, %s7629_s18  ;;  %5284 = vrot.lane.b32.xlu0 %v5237_v47, %s7624_s16  ;;  %v5469_v46 = vld [vmem:[#allocation4 + $0xf0] ss:$2 sm:$0xff] }
 0x785   :  { %4973 = vrot.lane.b32.xlu2 %v4926_v52, %s7618_s24  ;;  %v5022_v47 = vld [vmem:[#allocation4 + $0xc2] ss:$2 sm:$0xff] }
 0x786   :  { %v4403_v53 = vpop.permute.xlu1 %4402  ;;  %v4350_v54 = vpop.permute.xlu0 %4349 }
 0x787   :  { %4360 = vst.msk [vmem:[#allocation11 + $0x10] sm:$0xff] %vm4357_vm5, %v4350_v54  ;;  %v4405_v59 = vpop.permute.xlu2 %4404  ;;  %vm5955_vm5 = vcmask 130048  }
 0x788   :  { %4413 = vst.msk [vmem:[#allocation11 + $0x10] sm:$0xff] %vm4410_vm6, %v4403_v53 }
 0x789   :  { %4414 = vst.msk [vmem:[#allocation11 + $0x18] sm:$0xff] %vm4410_vm6, %v4405_v59  ;;  %v5820_v59 = vld [vmem:[%s11868_s3 + $0x40] sm:$0xff] }
 0x78a   :  { %5881 = vmatpush.msrb.mxu1 %v5820_v59  ;;  %6117 = vst.msk [vmem:[#allocation7 + $0x10] sm:$0xff] %vm5955_vm5, %v7625_v15 }
 0x78b   :  { %6114 = vst.msk [vmem:[#allocation7] sm:$0xff] %vm5955_vm5, %v7625_v15 }
 0x78c   :  { %5286 = vrot.lane.b32.xlu1 %v5239_v60, %s7624_s16  ;;  %5620 = vrot.lane.b32.xlu0 %v5573_v63, %s7628_s17  ;;  %v5819_v60 = vld [vmem:[%s11868_s3 + $0x38] sm:$0xff]  ;;  %v5471_v63 = vld [vmem:[#allocation4 + $0x120] ss:$2 sm:$0xff]  ;;  %6119 = vst.msk [vmem:[#allocation7 + $0x20] sm:$0xff] %vm5955_vm5, %v7625_v15 }
 0x78d   :  { %5172 = vrot.lane.b32.xlu2 %v5125_v4, %s7622_s23  ;;  %v5024_v4 = vld [vmem:[#allocation4 + $0xf2] ss:$2 sm:$0xff]  ;;  %5882 = vmatpush.msrb.mxu1 %v5819_v60  ;;  %6121 = vst.msk [vmem:[#allocation7 + $0x30] sm:$0xff] %vm5955_vm5, %v7625_v15 }
 0x78e   :  { %v4454_v5 = vpop.permute.xlu1 %4453  ;;  %v4401_v8 = vpop.permute.xlu0 %4400  ;;  %6123 = vst.msk [vmem:[#allocation7 + $0x40] sm:$0xff] %vm5955_vm5, %v7625_v15 }
 0x78f   :  { %4412 = vst.msk [vmem:[#allocation11 + $0x8] sm:$0xff] %vm4410_vm6, %v4401_v8  ;;  %v4456_v13 = vpop.permute.xlu2 %4455  ;;  %v5818_v8 = vld [vmem:[%s11868_s3 + $0x30] sm:$0xff]  ;;  %vm6115_vm6 = vcmask 123904  }
 0x790   :  { %4466 = vst.msk [vmem:[#allocation11 + $0x10] sm:$0xff] %vm4463_vm7, %v4456_v13  ;;  %5883 = vmatpush.msrb.mxu1 %v5818_v8 }
 0x791   :  { %4465 = vst.msk [vmem:[#allocation11 + $0x8] sm:$0xff] %vm4463_vm7, %v4454_v5  ;;  %v5357_v5 = vld [vmem:[#allocation4 + $0xda] ss:$2 sm:$0xff] }
 0x792   :  { %6118 = vst.msk [vmem:[#allocation7 + $0x18] sm:$0x3] %vm6115_vm6, %v7625_v15 }
 0x793   :  { %6116 = vst.msk [vmem:[#allocation7 + $0x8] sm:$0x3] %vm6115_vm6, %v7625_v15 }
 0x794   :  { %5622 = vrot.lane.b32.xlu1 %v5575_v14, %s7628_s17  ;;  %5174 = vrot.lane.b32.xlu0 %v5127_v17, %s7622_s23  ;;  %v5817_v17 = vld [vmem:[%s11868_s3 + $0x28] sm:$0xff]  ;;  %6120 = vst.msk [vmem:[#allocation7 + $0x28] sm:$0x3] %vm6115_vm6, %v7625_v15 }
 0x795   :  { %5508 = vrot.lane.b32.xlu2 %v5461_v22, %s7627_s15  ;;  %5884 = vmatpush.msrb.mxu1 %v5817_v17  ;;  %v5703_v17 = vld [vmem:[#allocation4 + $0x212] ss:$2 sm:$0xff]  ;;  %6122 = vst.msk [vmem:[#allocation7 + $0x38] sm:$0x3] %vm6115_vm6, %v7625_v15 }
 0x796   :  { %v4505_v23 = vpop.permute.xlu1 %4504  ;;  %v4452_v26 = vpop.permute.xlu0 %4451  ;;  %6124 = vst.msk [vmem:[#allocation7 + $0x48] sm:$0x3] %vm6115_vm6, %v7625_v15 }
 0x797   :  { %4464 = vst.msk [vmem:[#allocation11] sm:$0xff] %vm4463_vm7, %v4452_v26  ;;  %v4507_v31 = vpop.permute.xlu2 %4506  ;;  %v5815_v26 = vld [vmem:[%s11868_s3 + $0x18] sm:$0xff] }
 0x798   :  { %4518 = vst.msk [vmem:[#allocation11 + $0x8] sm:$0xff] %vm4516_vm8, %v4507_v31  ;;  %v5026_v31 = vld [vmem:[#allocation4 + $0x122] ss:$2 sm:$0xff] }
 0x799   :  { %4517 = vst.msk [vmem:[#allocation11] sm:$0xff] %vm4516_vm8, %v4505_v23  ;;  %v5816_v23 = vld [vmem:[%s11868_s3 + $0x20] sm:$0xff] }
 0x79a   :  { %5885 = vmatpush.msrb.mxu1 %v5816_v23  ;;  %v5589_v23 = vld [vmem:[#allocation4 + $0x1e1] ss:$2 sm:$0xff]  ;;  %6125 = vst.msk [vmem:[#allocation7 + $0x50] sm:$0xff] %vm5955_vm5, %v7625_v15 }
 0x79b   :  { %6126 = vst.msk [vmem:[#allocation7 + $0x58] sm:$0x3] %vm6115_vm6, %v7625_v15 }
 0x79c   :  { %5176 = vrot.lane.b32.xlu1 %v5129_v32, %s7622_s23  ;;  %5510 = vrot.lane.b32.xlu0 %v5463_v36, %s7627_s15  ;;  %v5359_v32 = vld [vmem:[#allocation4 + $0x10a] ss:$2 sm:$0xff]  ;;  %6127 = vst.msk [vmem:[#allocation7 + $0x60] sm:$0xff] %vm5955_vm5, %v7625_v15 }
 0x79d   :  { %5063 = vrot.lane.b32.xlu2 %v5016_v43, %s7620_s28  ;;  %v5693_v36 = vld [vmem:[#allocation4 + $0xf2] ss:$2 sm:$0xff]  ;;  %v5814_v43 = vld [vmem:[%s11868_s3 + $0x10] sm:$0xff]  ;;  %5886 = vmatpush.msrb.mxu1 %v5815_v26  ;;  %6128 = vst.msk [vmem:[#allocation7 + $0x68] sm:$0x3] %vm6115_vm6, %v7625_v15 }
 0x79e   :  { %v4511_v44 = vpop.permute.xlu1 %4510  ;;  %v4458_v50 = vpop.permute.xlu0 %4457  ;;  %6129 = vst.msk [vmem:[#allocation7 + $0x70] sm:$0xff] %vm5955_vm5, %v7625_v15 }
 0x79f   :  { %4467 = vst.msk [vmem:[#allocation11 + $0x18] sm:$0xff] %vm4463_vm7, %v4458_v50  ;;  %v4558_v20 = vpop.permute.xlu2 %4557  ;;  %5887 = vmatpush.msrb.mxu1 %v5814_v43  ;;  %v5257_v43 = vld [vmem:[#allocation4 + $0x229] ss:$2 sm:$0xff]  ;;  %vm6187_vm7 = vcmask 125952  }
 0x7a0   :  { %4520 = vst.msk [vmem:[#allocation11 + $0x18] sm:$0xff] %vm4516_vm8, %v4511_v44 }
 0x7a1   :  { %4570 = vst.msk [vmem:[#allocation11] sm:$0xff] %vm4569_vm9, %v4558_v20  ;;  %v5813_v20 = vld [vmem:[%s11868_s3 + $0x8] sm:$0xff] }
 0x7a2   :  { %5888 = vmatpush.msrb.mxu1 %v5813_v20  ;;  %6130 = vst.msk [vmem:[#allocation7 + $0x78] sm:$0x3] %vm6115_vm6, %v7625_v15 }
 0x7a3   :  { %6131 = vst.msk [vmem:[#allocation7 + $0x80] sm:$0xff] %vm5955_vm5, %v7625_v15 }
 0x7a4   :  { %5512 = vrot.lane.b32.xlu1 %v5465_v61, %s7627_s15  ;;  %5065 = vrot.lane.b32.xlu0 %v5018_v1, %s7620_s28  ;;  %v5812_v61 = vld [vmem:[%s11868_s3] sm:$0xff]  ;;  %6132 = vst.msk [vmem:[#allocation7 + $0x88] sm:$0x3] %vm6115_vm6, %v7625_v15 }
 0x7a5   :  { %5398 = vrot.lane.b32.xlu2 %v5351_v29, %s7626_s2  ;;  %v5361_v1 = vld [vmem:[#allocation4 + $0x13a] ss:$2 sm:$0xff]  ;;  %5889 = vmatpush.msrb.mxu1 %v5812_v61  ;;  %6135 = vst.msk [vmem:[#allocation7 + $0xa0] sm:$0xff] %vm5955_vm5, %v7625_v15 }
 0x7a6   :  { %v4562_v55 = vpop.permute.xlu1 %4561  ;;  %v4509_v35 = vpop.permute.xlu0 %4508  ;;  %v5695_v29 = vld [vmem:[#allocation4 + $0x122] ss:$2 sm:$0xff]  ;;  %6136 = vst.msk [vmem:[#allocation7 + $0xa8] sm:$0x3] %vm6115_vm6, %v7625_v15 }
 0x7a7   :  { %4519 = vst.msk [vmem:[#allocation11 + $0x10] sm:$0xff] %vm4516_vm8, %v4509_v35  ;;  %v4564_v10 = vpop.permute.xlu2 %4563  ;;  %vm6806_vm8 = vcmask 261120  }
 0x7a8   :  { %4572 = vst.msk [vmem:[#allocation11 + $0x10] sm:$0xff] %vm4569_vm9, %v4562_v55  ;;  %v5247_v55 = vld [vmem:[#allocation4 + $0x109] ss:$2 sm:$0xff] }
 0x7a9   :  { %4573 = vst.msk [vmem:[#allocation11 + $0x18] sm:$0xff] %vm4569_vm9, %v4564_v10 }
 0x7aa   :  { %6137 = vst.msk [vmem:[#allocation7 + $0xb0] sm:$0xff] %vm5955_vm5, %v7625_v15 }
 0x7ab   :  { %6138 = vst.msk [vmem:[#allocation7 + $0xb8] sm:$0x3] %vm6115_vm6, %v7625_v15 }
 0x7ac   :  { %5067 = vrot.lane.b32.xlu1 %v5020_v49, %s7620_s28  ;;  %5400 = vrot.lane.b32.xlu0 %v5353_v21, %s7626_s2  ;;  %v5697_v21 = vld [vmem:[#allocation4 + $0x152] ss:$2 sm:$0xff]  ;;  %6139 = vst.msk [vmem:[#allocation7 + $0xc0] sm:$0xff] %vm5955_vm5, %v7625_v15 }
 0x7ad   :  { %5734 = vrot.lane.b32.xlu2 %v5687_v24, %s7629_s18  ;;  %v5249_v24 = vld [vmem:[#allocation4 + $0x139] ss:$2 sm:$0xff]  ;;  %6140 = vst.msk [vmem:[#allocation7 + $0xc8] sm:$0x3] %vm6115_vm6, %v7625_v15 }
 0x7ae   :  { %v4613_v28 = vpop.permute.xlu1 %4612  ;;  %v4560_v37 = vpop.permute.xlu0 %4559  ;;  %6141 = vst.msk [vmem:[#allocation7 + $0xd0] sm:$0xff] %vm5955_vm5, %v7625_v15 }
 0x7af   :  { %4571 = vst.msk [vmem:[#allocation11 + $0x8] sm:$0xff] %vm4569_vm9, %v4560_v37  ;;  %v4615_v40 = vpop.permute.xlu2 %4614  ;;  %vm5997_vm9 = vcmask 261248  }
 0x7b0   :  { %4625 = vst.msk [vmem:[#allocation11 + $0x10] sm:$0xff] %vm4622_vm10, %v4615_v40 }
 0x7b1   :  { %4624 = vst.msk [vmem:[#allocation11 + $0x8] sm:$0xff] %vm4622_vm10, %v4613_v28  ;;  %v5583_v28 = vld [vmem:[#allocation4 + $0x121] ss:$2 sm:$0xff] }
 0x7b2   :  { %6142 = vst.msk [vmem:[#allocation7 + $0xd8] sm:$0x3] %vm6115_vm6, %v7625_v15 }
 0x7b3   :  { %6143 = vst.msk [vmem:[#allocation7 + $0xe0] sm:$0xff] %vm5955_vm5, %v7625_v15 }
 0x7b4   :  { %5402 = vrot.lane.b32.xlu1 %v5355_v48, %s7626_s2  ;;  %5736 = vrot.lane.b32.xlu0 %v5689_v57, %s7629_s18  ;;  %v5251_v57 = vld [vmem:[#allocation4 + $0x169] ss:$2 sm:$0xff]  ;;  %6144 = vst.msk [vmem:[#allocation7 + $0xe8] sm:$0x3] %vm6115_vm6, %v7625_v15 }
 0x7b5   :  { %5288 = vrot.lane.b32.xlu2 %v5241_v62, %s7624_s16  ;;  %v5585_v62 = vld [vmem:[#allocation4 + $0x151] ss:$2 sm:$0xff]  ;;  %6145 = vst.msk [vmem:[#allocation7 + $0xf0] sm:$0xff] %vm5955_vm5, %v7625_v15 }
 0x7b6   :  { %v4664_v12 = vpop.permute.xlu1 %4663  ;;  %v4611_v19 = vpop.permute.xlu0 %4610  ;;  %6146 = vst.msk [vmem:[#allocation7 + $0xf8] sm:$0x3] %vm6115_vm6, %v7625_v15 }
 0x7b7   :  { %4623 = vst.msk [vmem:[#allocation11] sm:$0xff] %vm4622_vm10, %v4611_v19  ;;  %v4666_v30 = vpop.permute.xlu2 %4665 }
 0x7b8   :  { %4676 = vst.msk [vmem:[#allocation11] sm:$0xff] %vm4675_vm12, %v4664_v12 }
 0x7b9   :  { %4677 = vst.msk [vmem:[#allocation11 + $0x8] sm:$0xff] %vm4675_vm12, %v4666_v30 }
 0x7ba   :  { %6147 = vst.msk [vmem:[#allocation7 + $0x100] sm:$0xff] %vm5955_vm5, %v7625_v15 }
 0x7bb   :  { %6148 = vst.msk [vmem:[#allocation7 + $0x108] sm:$0x3] %vm6115_vm6, %v7625_v15 }
 0x7bc   :  { %5738 = vrot.lane.b32.xlu1 %v5691_v34, %s7629_s18  ;;  %5290 = vrot.lane.b32.xlu0 %v5243_v42, %s7624_s16  ;;  %v5587_v34 = vld [vmem:[#allocation4 + $0x181] ss:$2 sm:$0xff]  ;;  %v5139_v42 = vld [vmem:[#allocation4 + $0x168] ss:$2 sm:$0xff]  ;;  %6149 = vst.msk [vmem:[#allocation7 + $0x110] sm:$0xff] %vm5955_vm5, %v7625_v15 }
 0x7bd   :  { %5624 = vrot.lane.b32.xlu2 %v5577_v0, %s7628_s17  ;;  %v5473_v0 = vld [vmem:[#allocation4 + $0x150] ss:$2 sm:$0xff]  ;;  %6150 = vst.msk [vmem:[#allocation7 + $0x118] sm:$0x3] %vm6115_vm6, %v7625_v15 }
 0x7be   :  { %v4670_v2 = vpop.permute.xlu1 %4669  ;;  %v4617_v9 = vpop.permute.xlu0 %4616  ;;  %6151 = vst.msk [vmem:[#allocation7 + $0x120] sm:$0xff] %vm5955_vm5, %v7625_v15 }
 0x7bf   :  { %4626 = vst.msk [vmem:[#allocation11 + $0x18] sm:$0xff] %vm4622_vm10, %v4617_v9  ;;  %v4950_v25 = vpop.permute.xlu2 %4949  ;;  %vm6016_vm10 = vcmask 392448  }
 0x7c0   :  { %4679 = vst.msk [vmem:[#allocation11 + $0x18] sm:$0xff] %vm4675_vm12, %v4670_v2 }
 0x7c1   :  { %4997 = vst.msk [vmem:[#allocation5] sm:$0xff] %vm3933_vm13, %v4950_v25 }
 0x7c2   :  { %6152 = vst.msk [vmem:[#allocation7 + $0x128] sm:$0x3] %vm6115_vm6, %v7625_v15  ;;  %vm6073_vm6 = vcmask 786048  }
 0x7c4   :  { %5292 = vrot.lane.b32.xlu1 %v5245_v27, %s7624_s16  ;;  %5626 = vrot.lane.b32.xlu0 %v5579_v41, %s7628_s17  ;;  %v5141_v41 = vld [vmem:[#allocation4 + $0x1c8] ss:$2 sm:$0xff] }
 0x7c5   :  { %5178 = vrot.lane.b32.xlu2 %v5131_v6, %s7622_s23  ;;  %v5475_v6 = vld [vmem:[#allocation4 + $0x180] ss:$2 sm:$0xff] }
 0x7c6   :  { %v4954_v16 = vpop.permute.xlu1 %4953  ;;  %v4668_v18 = vpop.permute.xlu0 %4667 }
 0x7c7   :  { %4999 = vst.msk [vmem:[#allocation5 + $0x10] sm:$0xff] %vm3933_vm13, %v4954_v16  ;;  %v4956_v11 = vpop.permute.xlu2 %4955  ;;  %v5028_v16 = vld [vmem:[#allocation4 + $0x152] ss:$2 sm:$0xff] }
 0x7c8   :  { %4678 = vst.msk [vmem:[#allocation11 + $0x10] sm:$0xff] %vm4675_vm12, %v4668_v18  ;;  %vm6035_vm12 = vcmask 523648  }
 0x7c9   :  { %5000 = vst.msk [vmem:[#allocation5 + $0x18] sm:$0xff] %vm3933_vm13, %v4956_v11  ;;  %6849 = dma.vmem_to_hbm [thread:$0]  %s6842_s27, 512, %s6844_s22, [#allocation12], %s7638_s0, %s7638_s0, %s7618_s24  }
 0x7cc   :  { %5628 = vrot.lane.b32.xlu1 %v5581_v51, %s7628_s17  ;;  %5180 = vrot.lane.b32.xlu0 %v5133_v56, %s7622_s23  ;;  %v5030_v56 = vld [vmem:[#allocation4 + $0x1b2] ss:$2 sm:$0xff] }
 0x7cd   :  { %5514 = vrot.lane.b32.xlu2 %v5467_v7, %s7627_s15  ;;  %v5477_v7 = vld [vmem:[#allocation4 + $0x1e0] ss:$2 sm:$0xff] }
 0x7ce   :  { %v4960_v33 = vpop.permute.xlu1 %4959  ;;  %v4952_v38 = vpop.permute.xlu0 %4951 }
 0x7cf   :  { %5002 = vst.msk [vmem:[#allocation5 + $0x28] sm:$0xff] %vm3933_vm13, %v4960_v33  ;;  %v4962_v39 = vpop.permute.xlu2 %4961  ;;  %v5363_v33 = vld [vmem:[#allocation4 + $0x16a] ss:$2 sm:$0xff] }
 0x7d0   :  { %4998 = vst.msk [vmem:[#allocation5 + $0x8] sm:$0xff] %vm3933_vm13, %v4952_v38 }
 0x7d1   :  { %5003 = vst.msk [vmem:[#allocation5 + $0x30] sm:$0xff] %vm3933_vm13, %v4962_v39 }
 0x7d4   :  { %5182 = vrot.lane.b32.xlu1 %v5135_v45, %s7622_s23  ;;  %5516 = vrot.lane.b32.xlu0 %v5469_v46, %s7627_s15 }
 0x7d5   :  { %5069 = vrot.lane.b32.xlu2 %v5022_v47, %s7620_s28  ;;  %v5032_v47 = vld [vmem:[#allocation4 + $0x1e2] ss:$2 sm:$0xff] }
 0x7d6   :  { %v4966_v52 = vpop.permute.xlu1 %4965  ;;  %v4958_v53 = vpop.permute.xlu0 %4957 }
 0x7d7   :  { %5005 = vst.msk [vmem:[#allocation5 + $0x40] sm:$0xff] %vm3933_vm13, %v4966_v52  ;;  %v4968_v54 = vpop.permute.xlu2 %4967  ;;  %v5365_v52 = vld [vmem:[#allocation4 + $0x1ca] ss:$2 sm:$0xff] }
 0x7d8   :  { %5001 = vst.msk [vmem:[#allocation5 + $0x20] sm:$0xff] %vm3933_vm13, %v4958_v53  ;;  %v5699_v53 = vld [vmem:[#allocation4 + $0x182] ss:$2 sm:$0xff] }
 0x7d9   :  { %5006 = vst.msk [vmem:[#allocation5 + $0x48] sm:$0xff] %vm3933_vm13, %v4968_v54 }
 0x7dc   :  { %5518 = vrot.lane.b32.xlu1 %v5471_v63, %s7627_s15  ;;  %5071 = vrot.lane.b32.xlu0 %v5024_v4, %s7620_s28  ;;  %v5367_v63 = vld [vmem:[#allocation4 + $0x1fa] ss:$2 sm:$0xff] }
 0x7dd   :  { %5404 = vrot.lane.b32.xlu2 %v5357_v5, %s7626_s2  ;;  %v5701_v4 = vld [vmem:[#allocation4 + $0x1e2] ss:$2 sm:$0xff]  ;;  %v5253_v5 = vld [vmem:[#allocation4 + $0x1c9] ss:$2 sm:$0xff] }
 0x7de   :  { %v4972_v13 = vpop.permute.xlu1 %4971  ;;  %v4964_v14 = vpop.permute.xlu0 %4963 }
 0x7df   :  { %5008 = vst.msk [vmem:[#allocation5 + $0x58] sm:$0xff] %vm3933_vm13, %v4972_v13  ;;  %v4974_v22 = vpop.permute.xlu2 %4973 }
 0x7e0   :  { %5004 = vst.msk [vmem:[#allocation5 + $0x38] sm:$0xff] %vm3933_vm13, %v4964_v14 }
 0x7e1   :  { %5009 = vst.msk [vmem:[#allocation5 + $0x60] sm:$0xff] %vm3933_vm13, %v4974_v22  ;;  %v5255_v22 = vld [vmem:[#allocation4 + $0x1f9] ss:$2 sm:$0xff] }
 0x7e4   :  { %5073 = vrot.lane.b32.xlu1 %v5026_v31, %s7620_s28  ;;  %5406 = vrot.lane.b32.xlu0 %v5359_v32, %s7626_s2 }
 0x7e5   :  { %5740 = vrot.lane.b32.xlu2 %v5693_v36, %s7629_s18 }
 0x7e6   :  { %v5062_v44 = vpop.permute.xlu1 %5061  ;;  %v4970_v50 = vpop.permute.xlu0 %4969 }
 0x7e7   :  { %5109 = vst.msk [vmem:[#allocation5] sm:$0xff] %vm3986_vm14, %v5062_v44  ;;  %v5173_v58 = vpop.permute.xlu2 %5172  ;;  %v5591_v44 = vld [vmem:[#allocation4 + $0x211] ss:$2 sm:$0xff] }
 0x7e8   :  { %5007 = vst.msk [vmem:[#allocation5 + $0x50] sm:$0xff] %vm3933_vm13, %v4970_v50  ;;  %v5143_v50 = vld [vmem:[#allocation4 + $0x1f8] ss:$2 sm:$0xff] }
 0x7e9   :  { %5220 = vst.msk [vmem:[#allocation5] sm:$0xff] %vm4039_vm15, %v5173_v58 }
 0x7ec   :  { %5408 = vrot.lane.b32.xlu1 %v5361_v1, %s7626_s2  ;;  %5742 = vrot.lane.b32.xlu0 %v5695_v29, %s7629_s18  ;;  %v5593_v1 = vld [vmem:[#allocation4 + $0x241] ss:$2 sm:$0xff]  ;;  %v5145_v29 = vld [vmem:[#allocation4 + $0x228] ss:$2 sm:$0xff] }
 0x7ed   :  { %5294 = vrot.lane.b32.xlu2 %v5247_v55, %s7624_s16  ;;  %v5479_v55 = vld [vmem:[#allocation4 + $0x210] ss:$2 sm:$0xff] }
 0x7ee   :  { %v5397_v35 = vpop.permute.xlu1 %5396  ;;  %v4976_v10 = vpop.permute.xlu0 %4975 }
 0x7ef   :  { %5010 = vst.msk [vmem:[#allocation5 + $0x68] sm:$0xff] %vm3933_vm13, %v4976_v10  ;;  %v5509_v49 = vpop.permute.xlu2 %5508 }
 0x7f4   :  { %5744 = vrot.lane.b32.xlu1 %v5697_v21, %s7629_s18  ;;  %5296 = vrot.lane.b32.xlu0 %v5249_v24, %s7624_s16  ;;  %v5147_v24 = vld [vmem:[#allocation4 + $0x258] ss:$2 sm:$0xff] }
 0x7f5   :  { %5630 = vrot.lane.b32.xlu2 %v5583_v28, %s7628_s17  ;;  %v5481_v28 = vld [vmem:[#allocation4 + $0x240] ss:$2 sm:$0xff] }
 0x7f6   :  { %v5733_v37 = vpop.permute.xlu1 %5732  ;;  %v5285_v40 = vpop.permute.xlu0 %5284 }
 0x7f7   :  { %5332 = vst.msk [vmem:[#allocation5] sm:$0xff] %vm4092_vm0, %v5285_v40  ;;  %v5064_v48 = vpop.permute.xlu2 %5063 }
 0x7f8   :  { %5444 = vst.msk [vmem:[#allocation5] sm:$0xff] %vm4145_vm1, %v5397_v35 }
 0x7f9   :  { %5556 = vst.msk [vmem:[#allocation5] sm:$0xff] %vm4198_vm2, %v5509_v49 }
 0x7fa   :  { %5110 = vst.msk [vmem:[#allocation5 + $0x8] sm:$0xff] %vm3986_vm14, %v5064_v48 }
 0x7fc   :  { %5298 = vrot.lane.b32.xlu1 %v5251_v57, %s7624_s16  ;;  %5632 = vrot.lane.b32.xlu0 %v5585_v62, %s7628_s17  ;;  %v5483_v62 = vld [vmem:[#allocation4 + $0x270] ss:$2 sm:$0xff] }
 0x7fd   :  { %5184 = vrot.lane.b32.xlu2 %v5137_v3, %s7622_s23  ;;  %v5036_v3 = vld [vmem:[#allocation4 + $0x242] ss:$2 sm:$0xff] }
 0x7fe   :  { %v5287_v12 = vpop.permute.xlu1 %5286  ;;  %v5621_v19 = vpop.permute.xlu0 %5620 }
 0x7ff   :  { %5668 = vst.msk [vmem:[#allocation5] sm:$0xff] %vm4251_vm3, %v5621_v19  ;;  %v5399_v30 = vpop.permute.xlu2 %5398 }
 0x800   :  { %5780 = vst.msk [vmem:[#allocation5] sm:$0xff] %vm4304_vm4, %v5733_v37  ;;  %v5034_v37 = vld [vmem:[#allocation4 + $0x212] ss:$2 sm:$0xff] }
 0x804   :  { %5634 = vrot.lane.b32.xlu1 %v5587_v34, %s7628_s17  ;;  %5186 = vrot.lane.b32.xlu0 %v5139_v42, %s7622_s23 }
 0x805   :  { %5520 = vrot.lane.b32.xlu2 %v5473_v0, %s7627_s15  ;;  %v5038_v0 = vld [vmem:[#allocation4 + $0x272] ss:$2 sm:$0xff] }
 0x806   :  { %v5623_v2 = vpop.permute.xlu1 %5622  ;;  %v5175_v9 = vpop.permute.xlu0 %5174 }
 0x807   :  { %5221 = vst.msk [vmem:[#allocation5 + $0x8] sm:$0xff] %vm4039_vm15, %v5175_v9  ;;  %v5735_v25 = vpop.permute.xlu2 %5734  ;;  %v5796_v27 = vld [vmem:[#allocation5] sm:$0xff] }
 0x808   :  { %5333 = vst.msk [vmem:[#allocation5 + $0x8] sm:$0xff] %vm4092_vm0, %v5287_v12  ;;  %7477 = vmatmul.msk.f32.vlgmr.msrb.gmra.mxu1 %vm5825_vm11, %v5796_v27  ;;  %v5369_v12 = vld [vmem:[#allocation4 + $0x22a] ss:$2 sm:$0xff] }
 0x809   :  { %5445 = vst.msk [vmem:[#allocation5 + $0x8] sm:$0xff] %vm4145_vm1, %v5399_v30  ;;  %v5705_v9 = vld [vmem:[#allocation4 + $0x242] ss:$2 sm:$0xff] }
 0x80c   :  { %5188 = vrot.lane.b32.xlu1 %v5141_v41, %s7622_s23  ;;  %5522 = vrot.lane.b32.xlu0 %v5475_v6, %s7627_s15  ;;  %v5373_v6 = vld [vmem:[#allocation4 + $0x28a] ss:$2 sm:$0xff] }
 0x80d   :  { %5075 = vrot.lane.b32.xlu2 %v5028_v16, %s7620_s28  ;;  %v5707_v16 = vld [vmem:[#allocation4 + $0x272] ss:$2 sm:$0xff] }
 0x80e   :  { %v5177_v18 = vpop.permute.xlu1 %5176  ;;  %v5511_v11 = vpop.permute.xlu0 %5510 }
 0x80f   :  { %5557 = vst.msk [vmem:[#allocation5 + $0x8] sm:$0xff] %vm4198_vm2, %v5511_v11  ;;  %v5289_v51 = vpop.permute.xlu2 %5288 }
 0x810   :  { %5669 = vst.msk [vmem:[#allocation5 + $0x8] sm:$0xff] %vm4251_vm3, %v5623_v2  ;;  %v5371_v2 = vld [vmem:[#allocation4 + $0x25a] ss:$2 sm:$0xff] }
 0x811   :  { %5781 = vst.msk [vmem:[#allocation5 + $0x8] sm:$0xff] %vm4304_vm4, %v5735_v25 }
 0x814   :  { %5524 = vrot.lane.b32.xlu1 %v5477_v7, %s7627_s15  ;;  %5077 = vrot.lane.b32.xlu0 %v5030_v56, %s7620_s28  ;;  %v5709_v7 = vld [vmem:[#allocation4 + $0x2a2] ss:$2 sm:$0xff] }
 0x815   :  { %5410 = vrot.lane.b32.xlu2 %v5363_v33, %s7626_s2  ;;  %v5261_v33 = vld [vmem:[#allocation4 + $0x289] ss:$2 sm:$0xff] }
 0x816   :  { %v5513_v38 = vpop.permute.xlu1 %5512  ;;  %v5066_v39 = vpop.permute.xlu0 %5065 }
 0x817   :  { %5111 = vst.msk [vmem:[#allocation5 + $0x10] sm:$0xff] %vm3986_vm14, %v5066_v39  ;;  %v5625_v45 = vpop.permute.xlu2 %5624 }
 0x818   :  { %5222 = vst.msk [vmem:[#allocation5 + $0x10] sm:$0xff] %vm4039_vm15, %v5177_v18  ;;  %v5797_v46 = vld [vmem:[#allocation5 + $0x8] sm:$0xff]  ;;  %v5259_v18 = vld [vmem:[#allocation4 + $0x259] ss:$2 sm:$0xff] }
 0x819   :  { %5334 = vst.msk [vmem:[#allocation5 + $0x10] sm:$0xff] %vm4092_vm0, %v5289_v51  ;;  %7478 = vmatmul.msk.f32.gmra.mxu1 %vm5825_vm11, %v5797_v46 }
 0x81c   :  { %5079 = vrot.lane.b32.xlu1 %v5032_v47, %s7620_s28  ;;  %5412 = vrot.lane.b32.xlu0 %v5365_v52, %s7626_s2  ;;  %v5263_v52 = vld [vmem:[#allocation4 + $0x2b9] ss:$2 sm:$0xff] }
 0x81d   :  { %5746 = vrot.lane.b32.xlu2 %v5699_v53, %s7629_s18  ;;  %v5597_v53 = vld [vmem:[#allocation4 + $0x2a1] ss:$2 sm:$0xff] }
 0x81e   :  { %v5068_v54 = vpop.permute.xlu1 %5067  ;;  %v5401_v59 = vpop.permute.xlu0 %5400 }
 0x81f   :  { %5112 = vst.msk [vmem:[#allocation5 + $0x18] sm:$0xff] %vm3986_vm14, %v5068_v54  ;;  %v5179_v60 = vpop.permute.xlu2 %5178  ;;  %v5149_v54 = vld [vmem:[#allocation4 + $0x288] ss:$2 sm:$0xff] }
 0x820   :  { %5446 = vst.msk [vmem:[#allocation5 + $0x10] sm:$0xff] %vm4145_vm1, %v5401_v59 }
 0x821   :  { %5558 = vst.msk [vmem:[#allocation5 + $0x10] sm:$0xff] %vm4198_vm2, %v5513_v38  ;;  %v5595_v38 = vld [vmem:[#allocation4 + $0x271] ss:$2 sm:$0xff] }
 0x822   :  { %5670 = vst.msk [vmem:[#allocation5 + $0x10] sm:$0xff] %vm4251_vm3, %v5625_v45 }
 0x823   :  { %5223 = vst.msk [vmem:[#allocation5 + $0x18] sm:$0xff] %vm4039_vm15, %v5179_v60 }
 0x824   :  { %5414 = vrot.lane.b32.xlu1 %v5367_v63, %s7626_s2  ;;  %5748 = vrot.lane.b32.xlu0 %v5701_v4, %s7629_s18  ;;  %v5599_v4 = vld [vmem:[#allocation4 + $0x2d1] ss:$2 sm:$0xff] }
 0x825   :  { %5300 = vrot.lane.b32.xlu2 %v5253_v5, %s7624_s16  ;;  %v5151_v5 = vld [vmem:[#allocation4 + $0x2b8] ss:$2 sm:$0xff] }
 0x826   :  { %v5403_v8 = vpop.permute.xlu1 %5402  ;;  %v5737_v13 = vpop.permute.xlu0 %5736 }
 0x827   :  { %5782 = vst.msk [vmem:[#allocation5 + $0x10] sm:$0xff] %vm4304_vm4, %v5737_v13  ;;  %v5515_v14 = vpop.permute.xlu2 %5514 }
 0x82c   :  { %5750 = vrot.lane.b32.xlu1 %v5703_v17, %s7629_s18  ;;  %5302 = vrot.lane.b32.xlu0 %v5255_v22, %s7624_s16 }
 0x82d   :  { %5636 = vrot.lane.b32.xlu2 %v5589_v23, %s7628_s17  ;;  %v5042_v23 = vld [vmem:[#allocation4 + $0x2d2] ss:$2 sm:$0xff] }
 0x82e   :  { %v5739_v26 = vpop.permute.xlu1 %5738  ;;  %v5291_v31 = vpop.permute.xlu0 %5290  ;;  %v5798_v32 = vld [vmem:[#allocation5 + $0x10] sm:$0xff] }
 0x82f   :  { %5335 = vst.msk [vmem:[#allocation5 + $0x18] sm:$0xff] %vm4092_vm0, %v5291_v31  ;;  %v5070_v36 = vpop.permute.xlu2 %5069  ;;  %7479 = vmatmul.msk.f32.gmra.mxu1 %vm5825_vm11, %v5798_v32  ;;  %v5040_v31 = vld [vmem:[#allocation4 + $0x2a2] ss:$2 sm:$0xff] }
 0x830   :  { %5447 = vst.msk [vmem:[#allocation5 + $0x18] sm:$0xff] %vm4145_vm1, %v5403_v8  ;;  %v5485_v8 = vld [vmem:[#allocation4 + $0x2a0] ss:$2 sm:$0xff] }
 0x831   :  { %5559 = vst.msk [vmem:[#allocation5 + $0x18] sm:$0xff] %vm4198_vm2, %v5515_v14 }
 0x832   :  { %5113 = vst.msk [vmem:[#allocation5 + $0x20] sm:$0xff] %vm3986_vm14, %v5070_v36 }
 0x834   :  { %5304 = vrot.lane.b32.xlu1 %v5257_v43, %s7624_s16  ;;  %5638 = vrot.lane.b32.xlu0 %v5591_v44, %s7628_s17  ;;  %v11444_v44 = vld [vmem:[%s11869_s4] ss:$0 sm:$0xff] }
 0x835   :  { %5190 = vrot.lane.b32.xlu2 %v5143_v50, %s7622_s23  ;;  %v5377_v50 = vld [vmem:[#allocation4 + $0x2ea] ss:$2 sm:$0xff] }
 0x836   :  { %v5293_v20 = vpop.permute.xlu1 %5292  ;;  %v5627_v58 = vpop.permute.xlu0 %5626 }
 0x837   :  { %5671 = vst.msk [vmem:[#allocation5 + $0x18] sm:$0xff] %vm4251_vm3, %v5627_v58  ;;  %v5405_v61 = vpop.permute.xlu2 %5404  ;;  %v5375_v58 = vld [vmem:[#allocation4 + $0x2ba] ss:$2 sm:$0xff] }
 0x838   :  { %5783 = vst.msk [vmem:[#allocation5 + $0x18] sm:$0xff] %vm4304_vm4, %v5739_v26  ;;  %v5487_v26 = vld [vmem:[#allocation4 + $0x2d0] ss:$2 sm:$0xff] }
 0x83c   :  { %5640 = vrot.lane.b32.xlu1 %v5593_v1, %s7628_s17  ;;  %5192 = vrot.lane.b32.xlu0 %v5145_v29, %s7622_s23 }
 0x83d   :  { %5526 = vrot.lane.b32.xlu2 %v5479_v55, %s7627_s15 }
 0x83e   :  { %v5629_v35 = vpop.permute.xlu1 %5628  ;;  %v5181_v10 = vpop.permute.xlu0 %5180 }
 0x83f   :  { %5224 = vst.msk [vmem:[#allocation5 + $0x20] sm:$0xff] %vm4039_vm15, %v5181_v10  ;;  %v5741_v49 = vpop.permute.xlu2 %5740  ;;  %v5799_v21 = vld [vmem:[#allocation5 + $0x18] sm:$0xff] }
 0x840   :  { %5336 = vst.msk [vmem:[#allocation5 + $0x20] sm:$0xff] %vm4092_vm0, %v5293_v20  ;;  %7480 = vmatmul.msk.f32.gmra.mxu1 %vm5825_vm11, %v5799_v21  ;;  %v4930_v20 = vld [vmem:[#allocation4 + $0x2d1] ss:$2 sm:$0xff]  ;;  %v5713_v21 = vld [vmem:[#allocation4 + $0x302] ss:$2 sm:$0xff] }
 0x841   :  { %5448 = vst.msk [vmem:[#allocation5 + $0x20] sm:$0xff] %vm4145_vm1, %v5405_v61 }
 0x844   :  { %5194 = vrot.lane.b32.xlu1 %v5147_v24, %s7622_s23  ;;  %5528 = vrot.lane.b32.xlu0 %v5481_v28, %s7627_s15  ;;  %v5265_v24 = vld [vmem:[#allocation4 + $0x2e9] ss:$2 sm:$0xff]  ;;  %v5711_v28 = vld [vmem:[#allocation4 + $0x2d2] ss:$2 sm:$0xff] }
 0x845   :  { %5081 = vrot.lane.b32.xlu2 %v5034_v37, %s7620_s28 }
 0x846   :  { %v5183_v40 = vpop.permute.xlu1 %5182  ;;  %v5517_v48 = vpop.permute.xlu0 %5516 }
 0x847   :  { %5560 = vst.msk [vmem:[#allocation5 + $0x20] sm:$0xff] %vm4198_vm2, %v5517_v48  ;;  %v5295_v57 = vpop.permute.xlu2 %5294 }
 0x848   :  { %5672 = vst.msk [vmem:[#allocation5 + $0x20] sm:$0xff] %vm4251_vm3, %v5629_v35 }
 0x849   :  { %5784 = vst.msk [vmem:[#allocation5 + $0x20] sm:$0xff] %vm4304_vm4, %v5741_v49 }
 0x84c   :  { %5530 = vrot.lane.b32.xlu1 %v5483_v62, %s7627_s15  ;;  %5083 = vrot.lane.b32.xlu0 %v5036_v3, %s7620_s28  ;;  %v5601_v62 = vld [vmem:[#allocation4 + $0x301] ss:$2 sm:$0xff]  ;;  %v5153_v3 = vld [vmem:[#allocation4 + $0x2e8] ss:$2 sm:$0xff] }
 0x84d   :  { %5416 = vrot.lane.b32.xlu2 %v5369_v12, %s7626_s2 }
 0x84e   :  { %v5519_v19 = vpop.permute.xlu1 %5518  ;;  %v5072_v30 = vpop.permute.xlu0 %5071 }
 0x84f   :  { %5114 = vst.msk [vmem:[#allocation5 + $0x28] sm:$0xff] %vm3986_vm14, %v5072_v30  ;;  %v5631_v34 = vpop.permute.xlu2 %5630 }
 0x850   :  { %5225 = vst.msk [vmem:[#allocation5 + $0x28] sm:$0xff] %vm4039_vm15, %v5183_v40  ;;  %v5800_v42 = vld [vmem:[#allocation5 + $0x20] sm:$0xff] }
 0x851   :  { %5337 = vst.msk [vmem:[#allocation5 + $0x28] sm:$0xff] %vm4092_vm0, %v5295_v57  ;;  %7481 = vmatmul.msk.f32.gmra.mxu1 %vm5825_vm11, %v5800_v42  ;;  %v5155_v57 = vld [vmem:[#allocation4 + $0x318] ss:$2 sm:$0xff] }
 0x852   :  { %v5491_v42 = vld [vmem:[#allocation4 + $0x330] ss:$2 sm:$0xff] }
 0x854   :  { %5085 = vrot.lane.b32.xlu1 %v5038_v0, %s7620_s28  ;;  %5418 = vrot.lane.b32.xlu0 %v5371_v2, %s7626_s2  ;;  %v5044_v0 = vld [vmem:[#allocation4 + $0x302] ss:$2 sm:$0xff] }
 0x855   :  { %5752 = vrot.lane.b32.xlu2 %v5705_v9, %s7629_s18  ;;  %v5489_v2 = vld [vmem:[#allocation4 + $0x300] ss:$2 sm:$0xff] }
 0x856   :  { %v5074_v25 = vpop.permute.xlu1 %5073  ;;  %v5407_v27 = vpop.permute.xlu0 %5406 }
 0x857   :  { %5115 = vst.msk [vmem:[#allocation5 + $0x30] sm:$0xff] %vm3986_vm14, %v5074_v25  ;;  %v5185_v41 = vpop.permute.xlu2 %5184 }
 0x858   :  { %5449 = vst.msk [vmem:[#allocation5 + $0x28] sm:$0xff] %vm4145_vm1, %v5407_v27 }
 0x859   :  { %5561 = vst.msk [vmem:[#allocation5 + $0x28] sm:$0xff] %vm4198_vm2, %v5519_v19 }
 0x85a   :  { %5673 = vst.msk [vmem:[#allocation5 + $0x28] sm:$0xff] %vm4251_vm3, %v5631_v34 }
 0x85b   :  { %5226 = vst.msk [vmem:[#allocation5 + $0x30] sm:$0xff] %vm4039_vm15, %v5185_v41  ;;  %v6197_v41 = vld [vmem:[#allocation7 + $0x1] ss:$2 sm:$0xf] }
 0x85c   :  { %5420 = vrot.lane.b32.xlu1 %v5373_v6, %s7626_s2  ;;  %5754 = vrot.lane.b32.xlu0 %v5707_v16, %s7629_s18  ;;  %v5379_v16 = vld [vmem:[#allocation4 + $0x31a] ss:$2 sm:$0xff] }
 0x85d   :  { %5306 = vrot.lane.b32.xlu2 %v5259_v18, %s7624_s16  ;;  %v4932_v18 = vld [vmem:[#allocation4 + $0x301] ss:$2 sm:$0xff] }
 0x85e   :  { %v5409_v11 = vpop.permute.xlu1 %5408  ;;  %v5743_v51 = vpop.permute.xlu0 %5742 }
 0x85f   :  { %5785 = vst.msk [vmem:[#allocation5 + $0x28] sm:$0xff] %vm4304_vm4, %v5743_v51  ;;  %v5521_v56 = vpop.permute.xlu2 %5520 }
 0x864   :  { %5756 = vrot.lane.b32.xlu1 %v5709_v7, %s7629_s18  ;;  %5308 = vrot.lane.b32.xlu0 %v5261_v33, %s7624_s16  ;;  %v5715_v7 = vld [vmem:[#allocation4 + $0x332] ss:$2 sm:$0xff] }
 0x865   :  { %5642 = vrot.lane.b32.xlu2 %v5595_v38, %s7628_s17 }
 0x866   :  { %v5745_v39 = vpop.permute.xlu1 %5744  ;;  %v5297_v45 = vpop.permute.xlu0 %5296  ;;  %v5801_v46 = vld [vmem:[#allocation5 + $0x28] sm:$0xff] }
 0x867   :  { %5338 = vst.msk [vmem:[#allocation5 + $0x30] sm:$0xff] %vm4092_vm0, %v5297_v45  ;;  %v5076_v47 = vpop.permute.xlu2 %5075  ;;  %7482 = vmatmul.msk.f32.gmra.mxu1 %vm5825_vm11, %v5801_v46 }
 0x868   :  { %5450 = vst.msk [vmem:[#allocation5 + $0x30] sm:$0xff] %vm4145_vm1, %v5409_v11 }
 0x869   :  { %5562 = vst.msk [vmem:[#allocation5 + $0x30] sm:$0xff] %vm4198_vm2, %v5521_v56 }
 0x86a   :  { %5116 = vst.msk [vmem:[#allocation5 + $0x38] sm:$0xff] %vm3986_vm14, %v5076_v47 }
 0x86c   :  { %5310 = vrot.lane.b32.xlu1 %v5263_v52, %s7624_s16  ;;  %5644 = vrot.lane.b32.xlu0 %v5597_v53, %s7628_s17 }
 0x86d   :  { %5196 = vrot.lane.b32.xlu2 %v5149_v54, %s7622_s23 }
 0x86e   :  { %v5299_v59 = vpop.permute.xlu1 %5298  ;;  %v5633_v60 = vpop.permute.xlu0 %5632 }
 0x86f   :  { %5674 = vst.msk [vmem:[#allocation5 + $0x30] sm:$0xff] %vm4251_vm3, %v5633_v60  ;;  %v5411_v63 = vpop.permute.xlu2 %5410 }
 0x870   :  { %5786 = vst.msk [vmem:[#allocation5 + $0x30] sm:$0xff] %vm4304_vm4, %v5745_v39  ;;  %v5267_v39 = vld [vmem:[#allocation4 + $0x319] ss:$2 sm:$0xff] }
 0x874   :  { %5646 = vrot.lane.b32.xlu1 %v5599_v4, %s7628_s17  ;;  %5198 = vrot.lane.b32.xlu0 %v5151_v5, %s7622_s23  ;;  %v5603_v5 = vld [vmem:[#allocation4 + $0x331] ss:$2 sm:$0xff] }
 0x875   :  { %5532 = vrot.lane.b32.xlu2 %v5485_v8, %s7627_s15 }
 0x876   :  { %v5635_v13 = vpop.permute.xlu1 %5634  ;;  %v5187_v14 = vpop.permute.xlu0 %5186 }
 0x877   :  { %5227 = vst.msk [vmem:[#allocation5 + $0x38] sm:$0xff] %vm4039_vm15, %v5187_v14  ;;  %v5747_v17 = vpop.permute.xlu2 %5746  ;;  %v5802_v22 = vld [vmem:[#allocation5 + $0x30] sm:$0xff] }
 0x878   :  { %5339 = vst.msk [vmem:[#allocation5 + $0x38] sm:$0xff] %vm4092_vm0, %v5299_v59  ;;  %7483 = vmatmul.msk.f32.gmra.mxu1 %vm5825_vm11, %v5802_v22 }
 0x879   :  { %5451 = vst.msk [vmem:[#allocation5 + $0x38] sm:$0xff] %vm4145_vm1, %v5411_v63 }
 0x87c   :  { %5089 = vrot.lane.b32.xlu1 %v5042_v23, %s7620_s28  ;;  %5534 = vrot.lane.b32.xlu0 %v5487_v26, %s7627_s15 }
 0x87d   :  { %5087 = vrot.lane.b32.xlu2 %v5040_v31, %s7620_s28 }
 0x87e   :  { %v11432_v32 = vpop.permute.xlu1 %5188  ;;  %v5523_v36 = vpop.permute.xlu0 %5522 }
 0x87f   :  { %5563 = vst.msk [vmem:[#allocation5 + $0x38] sm:$0xff] %vm4198_vm2, %v5523_v36  ;;  %v11437_v43 = vpop.permute.xlu2 %5300 }
 0x880   :  { %5675 = vst.msk [vmem:[#allocation5 + $0x38] sm:$0xff] %vm4251_vm3, %v5635_v13 }
 0x881   :  { %5787 = vst.msk [vmem:[#allocation5 + $0x38] sm:$0xff] %vm4304_vm4, %v5747_v17  ;;  %v6254_v17 = vld [vmem:[#allocation7 + $0x2] ss:$2 sm:$0xf] }
 0x884   :  { %5424 = vrot.lane.b32.xlu1 %v5377_v50, %s7626_s2  ;;  %4977 = vrot.lane.b32.xlu0 %v4930_v20, %s7618_s24 }
 0x885   :  { %5422 = vrot.lane.b32.xlu2 %v5375_v58, %s7626_s2  ;;  %v5891_v61 = vpop.f32.mrf.mxu1 }
 0x886   :  { %v5892_v1 = vadd.f32 %v11444_v44, %v5891_v61  ;;  %v5525_v29 = vpop.permute.xlu1 %5524  ;;  %v5078_v55 = vpop.permute.xlu0 %5077 }
 0x887   :  { %v5637_v35 = vpop.permute.xlu2 %5636  ;;  %5117 = vst.msk [vmem:[#allocation5 + $0x40] sm:$0xff] %vm3986_vm14, %v5078_v55 }
 0x888   :  { %v5939_v10 = vmax.f32 %v5892_v1, 0.0  ;;  %v5803_v49 = vld [vmem:[#allocation5 + $0x38] sm:$0xff]  ;;  %5228 = vst.msk [vmem:[#allocation5 + $0x40] sm:$0xff] %vm4039_vm15, %v11432_v32 }
 0x889   :  { %7484 = vmatmul.msk.f32.gmra.mxu1 %vm5825_vm11, %v5803_v49  ;;  %5340 = vst.msk [vmem:[#allocation5 + $0x40] sm:$0xff] %vm4092_vm0, %v11437_v43 }
 0x88a   :  { %5956 = vst.msk [vmem:[#allocation6] sm:$0xff] %vm5955_vm5, %v5939_v10 }
 0x88b   :  { %6156 = vst.msk [vmem:[#allocation7 + $0x11] sm:$0xff] %vm5955_vm5, %v5939_v10 }
 0x88c   :  { %5760 = vrot.lane.b32.xlu1 %v5713_v21, %s7629_s18  ;;  %5312 = vrot.lane.b32.xlu0 %v5265_v24, %s7624_s16 }
 0x88d   :  { %5758 = vrot.lane.b32.xlu2 %v5711_v28, %s7629_s18 }
 0x88e   :  { %v5080_v37 = vpop.permute.xlu1 %5079  ;;  %v5413_v40 = vpop.permute.xlu0 %5412 }
 0x88f   :  { %v5191_v48 = vpop.permute.xlu2 %5190  ;;  %5118 = vst.msk [vmem:[#allocation5 + $0x48] sm:$0xff] %vm3986_vm14, %v5080_v37 }
 0x890   :  { %5452 = vst.msk [vmem:[#allocation5 + $0x40] sm:$0xff] %vm4145_vm1, %v5413_v40 }
 0x891   :  { %5564 = vst.msk [vmem:[#allocation5 + $0x40] sm:$0xff] %vm4198_vm2, %v5525_v29 }
 0x892   :  { %5676 = vst.msk [vmem:[#allocation5 + $0x40] sm:$0xff] %vm4251_vm3, %v5637_v35  ;;  %v6367_v33 = vld [vmem:[#allocation7 + $0x11] ss:$2 sm:$0xf] }
 0x893   :  { %5229 = vst.msk [vmem:[#allocation5 + $0x48] sm:$0xff] %vm4039_vm15, %v5191_v48  ;;  %v6310_v60 = vld [vmem:[#allocation7 + $0x10] ss:$2 sm:$0xf] }
 0x894   :  { %5202 = vrot.lane.b32.xlu1 %v5155_v57, %s7622_s23  ;;  %5648 = vrot.lane.b32.xlu0 %v5601_v62, %s7628_s17  ;;  %v6424_v1 = vld [vmem:[#allocation7 + $0x12] ss:$2 sm:$0xf] }
 0x895   :  { %5200 = vrot.lane.b32.xlu2 %v5153_v3, %s7622_s23 }
 0x896   :  { %v5415_v12 = vpop.permute.xlu1 %5414  ;;  %v5749_v19 = vpop.permute.xlu0 %5748 }
 0x897   :  { %v5527_v30 = vpop.permute.xlu2 %5526  ;;  %v5894_v34 = vpop.f32.mrf.mxu1  ;;  %5788 = vst.msk [vmem:[#allocation5 + $0x40] sm:$0xff] %vm4304_vm4, %v5749_v19 }
 0x898   :  { %v5895_v9 = vadd.f32 %v11444_v44, %v5894_v34 }
 0x89a   :  { %v5940_v6 = vmax.f32 %v5895_v9, 0.0 }
 0x89c   :  { %5538 = vrot.lane.b32.xlu1 %v5491_v42, %s7627_s15  ;;  %5091 = vrot.lane.b32.xlu0 %v5044_v0, %s7620_s28  ;;  %5957 = vst.msk [vmem:[#allocation6 + $0x8] sm:$0xff] %vm5955_vm5, %v5940_v6 }
 0x89d   :  { %5536 = vrot.lane.b32.xlu2 %v5489_v2, %s7627_s15  ;;  %6157 = vst.msk [vmem:[#allocation7 + $0x21] sm:$0xff] %vm5955_vm5, %v5940_v6 }
 0x89e   :  { %v5751_v25 = vpop.permute.xlu1 %5750  ;;  %v5303_v27 = vpop.permute.xlu0 %5302  ;;  %v5804_v38 = vld [vmem:[#allocation5 + $0x40] sm:$0xff] }
 0x89f   :  { %v5082_v15 = vpop.permute.xlu2 %5081  ;;  %5341 = vst.msk [vmem:[#allocation5 + $0x48] sm:$0xff] %vm4092_vm0, %v5303_v27  ;;  %7485 = vmatmul.msk.f32.gmra.mxu1 %vm5825_vm11, %v5804_v38 }
 0x8a0   :  { %5453 = vst.msk [vmem:[#allocation5 + $0x48] sm:$0xff] %vm4145_vm1, %v5415_v12 }
 0x8a1   :  { %5565 = vst.msk [vmem:[#allocation5 + $0x48] sm:$0xff] %vm4198_vm2, %v5527_v30 }
 0x8a2   :  { %5119 = vst.msk [vmem:[#allocation5 + $0x50] sm:$0xff] %vm3986_vm14, %v5082_v15 }
 0x8a4   :  { %6220 = vrot.lane.b32.xlu1 %v6197_v41, %s7620_s28  ;;  %5426 = vrot.lane.b32.xlu0 %v5379_v16, %s7626_s2  ;;  %v6595_v47 = vld [vmem:[#allocation7 + $0x22] ss:$2 sm:$0xf]  ;;  %v6538_v63 = vld [vmem:[#allocation7 + $0x21] ss:$2 sm:$0xf] }
 0x8a5   :  { %4979 = vrot.lane.b32.xlu2 %v4932_v18, %s7618_s24  ;;  %6610 = vst.msk [vmem:[#allocation8 + $0x4] sm:$0xf] %vm6187_vm7, %v6595_v47  ;;  %v6481_v22 = vld [vmem:[#allocation7 + $0x20] ss:$2 sm:$0xf] }
 0x8a6   :  { %v5305_v11 = vpop.permute.xlu1 %5304  ;;  %v5639_v51 = vpop.permute.xlu0 %5638  ;;  %v6256_v58 = vld [vmem:[#allocation7 + $0x22] ss:$2 sm:$0xf]  ;;  %v6199_v24 = vld [vmem:[#allocation7 + $0x21] ss:$2 sm:$0xf] }
 0x8a7   :  { %v5417_v56 = vpop.permute.xlu2 %5416  ;;  %5677 = vst.msk [vmem:[#allocation5 + $0x48] sm:$0xff] %vm4251_vm3, %v5639_v51  ;;  %v6174_v61 = vld [vmem:[#allocation7 + $0x20] ss:$2 sm:$0xf] }
 0x8a8   :  { %5789 = vst.msk [vmem:[#allocation5 + $0x48] sm:$0xff] %vm4304_vm4, %v5751_v25 }
 0x8a9   :  { %6189 = vst.msk [vmem:[#allocation8 + $0x8] sm:$0xf] %vm6187_vm7, %v6174_v61 }
 0x8ac   :  { %5762 = vrot.lane.b32.xlu0 %v5715_v7, %s7629_s18  ;;  %6390 = vrot.lane.b32.xlu1 %v6367_v33, %s7629_s18  ;;  %v5897_v45 = vpop.f32.mrf.mxu1 }
 0x8ad   :  { %5314 = vrot.lane.b32.xlu2 %v5267_v39, %s7624_s16  ;;  %v5898_v46 = vadd.f32 %v11444_v44, %v5897_v45 }
 0x8ae   :  { %v5641_v52 = vpop.permute.xlu1 %5640  ;;  %v5193_v53 = vpop.permute.xlu0 %5192 }
 0x8af   :  { %v5941_v54 = vmax.f32 %v5898_v46, 0.0  ;;  %v5753_v59 = vpop.permute.xlu2 %5752  ;;  %5230 = vst.msk [vmem:[#allocation5 + $0x50] sm:$0xff] %vm4039_vm15, %v5193_v53  ;;  %v5805_v4 = vld [vmem:[#allocation5 + $0x48] sm:$0xff] }
 0x8b0   :  { %5342 = vst.msk [vmem:[#allocation5 + $0x50] sm:$0xff] %vm4092_vm0, %v5305_v11  ;;  %7486 = vmatmul.msk.f32.gmra.mxu1 %vm5825_vm11, %v5805_v4 }
 0x8b1   :  { %5958 = vst.msk [vmem:[#allocation6 + $0x10] sm:$0xff] %vm5955_vm5, %v5941_v54 }
 0x8b2   :  { %6158 = vst.msk [vmem:[#allocation7 + $0x31] sm:$0xff] %vm5955_vm5, %v5941_v54 }
 0x8b3   :  { %5454 = vst.msk [vmem:[#allocation5 + $0x50] sm:$0xff] %vm4145_vm1, %v5417_v56 }
 0x8b4   :  { %6333 = vrot.lane.b32.xlu0 %v6310_v60, %s7627_s15  ;;  %6561 = vrot.lane.b32.xlu1 %v6538_v63, %s7635_s26 }
 0x8b5   :  { %5650 = vrot.lane.b32.xlu2 %v5603_v5, %s7628_s17 }
 0x8b6   :  { %v5195_v8 = vpop.permute.xlu1 %5194  ;;  %v5529_v13 = vpop.permute.xlu0 %5528 }
 0x8b7   :  { %5566 = vst.msk [vmem:[#allocation5 + $0x50] sm:$0xff] %vm4198_vm2, %v5529_v13  ;;  %v5307_v14 = vpop.permute.xlu2 %5306 }
 0x8b8   :  { %5678 = vst.msk [vmem:[#allocation5 + $0x50] sm:$0xff] %vm4251_vm3, %v5641_v52 }
 0x8b9   :  { %5790 = vst.msk [vmem:[#allocation5 + $0x50] sm:$0xff] %vm4304_vm4, %v5753_v59  ;;  %v6312_v23 = vld [vmem:[#allocation7 + $0x30] ss:$2 sm:$0xf] }
 0x8ba   :  { %v6426_v10 = vld [vmem:[#allocation7 + $0x32] ss:$2 sm:$0xf]  ;;  %v6369_v19 = vld [vmem:[#allocation7 + $0x31] ss:$2 sm:$0xf] }
 0x8bc   :  { %6504 = vrot.lane.b32.xlu0 %v6481_v22, %s7633_s25  ;;  %6335 = vrot.lane.b32.xlu1 %v6312_v23, %s7627_s15 }
 0x8bd   :  { %6277 = vrot.lane.b32.xlu2 %v6254_v17, %s7624_s16  ;;  %v5900_v26 = vpop.f32.mrf.mxu1 }
 0x8be   :  { %v5901_v31 = vadd.f32 %v11444_v44, %v5900_v26  ;;  %v5531_v32 = vpop.permute.xlu1 %5530  ;;  %v5084_v36 = vpop.permute.xlu0 %5083 }
 0x8bf   :  { %5120 = vst.msk [vmem:[#allocation5 + $0x58] sm:$0xff] %vm3986_vm14, %v5084_v36  ;;  %v5643_v43 = vpop.permute.xlu2 %5642 }
 0x8c0   :  { %v5942_v50 = vmax.f32 %v5901_v31, 0.0  ;;  %5231 = vst.msk [vmem:[#allocation5 + $0x58] sm:$0xff] %vm4039_vm15, %v5195_v8  ;;  %v5806_v20 = vld [vmem:[#allocation5 + $0x50] sm:$0xff] }
 0x8c1   :  { %5343 = vst.msk [vmem:[#allocation5 + $0x58] sm:$0xff] %vm4092_vm0, %v5307_v14  ;;  %7487 = vmatmul.msk.f32.gmra.mxu1 %vm5825_vm11, %v5806_v20  ;;  %v6172_v14 = vld [vmem:[#allocation7] ss:$2 sm:$0xf] }
 0x8c2   :  { %5959 = vst.msk [vmem:[#allocation6 + $0x18] sm:$0xff] %vm5955_vm5, %v5942_v50 }
 0x8c3   :  { %6159 = vst.msk [vmem:[#allocation7 + $0x41] sm:$0xff] %vm5955_vm5, %v5942_v50 }
 0x8c4   :  { %6279 = vrot.lane.b32.xlu0 %v6256_v58, %s7624_s16  ;;  %6188 = vst.msk [vmem:[#allocation8] sm:$0xf] %vm6187_vm7, %v6172_v14  ;;  %v6713_v14 = vld [vmem:[%s11870_s5 + $0x18] sm:$0xff] }
 0x8c5   :  { %6447 = vrot.lane.b32.xlu2 %v6424_v1, %s7631_s21 }
 0x8c6   :  { %v5086_v29 = vpop.permute.xlu1 %5085  ;;  %v5419_v55 = vpop.permute.xlu0 %5418 }
 0x8c7   :  { %5121 = vst.msk [vmem:[#allocation5 + $0x60] sm:$0xff] %vm3986_vm14, %v5086_v29  ;;  %v5197_v35 = vpop.permute.xlu2 %5196 }
 0x8c8   :  { %5455 = vst.msk [vmem:[#allocation5 + $0x58] sm:$0xff] %vm4145_vm1, %v5419_v55 }
 0x8c9   :  { %5567 = vst.msk [vmem:[#allocation5 + $0x58] sm:$0xff] %vm4198_vm2, %v5531_v32 }
 0x8ca   :  { %v6597_v49 = vld [vmem:[#allocation7 + $0x42] ss:$2 sm:$0xf]  ;;  %5679 = vst.msk [vmem:[#allocation5 + $0x58] sm:$0xff] %vm4251_vm3, %v5643_v43 }
 0x8cb   :  { %6611 = vst.msk [vmem:[#allocation8 + $0xc] sm:$0xf] %vm6187_vm7, %v6597_v49  ;;  %v6483_v21 = vld [vmem:[#allocation7 + $0x40] ss:$2 sm:$0xf] }
 0x8cc   :  { %5232 = vst.msk [vmem:[#allocation5 + $0x60] sm:$0xff] %vm4039_vm15, %v5197_v35  ;;  %6506 = vrot.lane.b32.xlu1 %v6483_v21, %s7633_s25  ;;  %6449 = vrot.lane.b32.xlu0 %v6426_v10, %s7631_s21  ;;  %v6258_v3 = vld [vmem:[#allocation7 + $0x42] ss:$2 sm:$0xf] }
 0x8cd   :  { %6222 = vrot.lane.b32.xlu2 %v6199_v24, %s7620_s28  ;;  %v6201_v12 = vld [vmem:[#allocation7 + $0x41] ss:$2 sm:$0xf]  ;;  %v6176_v38 = vld [vmem:[#allocation7 + $0x40] ss:$2 sm:$0xf] }
 0x8ce   :  { %v5421_v28 = vpop.permute.xlu1 %5420  ;;  %v5755_v37 = vpop.permute.xlu0 %5754  ;;  %v6540_v2 = vld [vmem:[#allocation7 + $0x41] ss:$2 sm:$0xf]  ;;  %6190 = vst.msk [vmem:[#allocation8 + $0x10] sm:$0xf] %vm6187_vm7, %v6176_v38 }
 0x8cf   :  { %5791 = vst.msk [vmem:[#allocation5 + $0x58] sm:$0xff] %vm4304_vm4, %v5755_v37  ;;  %v5903_v40 = vpop.f32.mrf.mxu1  ;;  %v5533_v48 = vpop.permute.xlu2 %5532  ;;  %v6205_v49 = vld [vmem:[#allocation7 + $0xa1] ss:$2 sm:$0xf] }
 0x8d0   :  { %v5904_v57 = vadd.f32 %v11444_v44, %v5903_v40 }
 0x8d2   :  { %v5943_v62 = vmax.f32 %v5904_v57, 0.0 }
 0x8d4   :  { %5960 = vst.msk [vmem:[#allocation6 + $0x20] sm:$0xff] %vm5955_vm5, %v5943_v62  ;;  %6281 = vrot.lane.b32.xlu1 %v6258_v3, %s7624_s16  ;;  %6224 = vrot.lane.b32.xlu0 %v6201_v12, %s7620_s28 }
 0x8d5   :  { %6160 = vst.msk [vmem:[#allocation7 + $0x51] sm:$0xff] %vm5955_vm5, %v5943_v62  ;;  %6392 = vrot.lane.b32.xlu2 %v6369_v19, %s7629_s18  ;;  %v6262_v62 = vld [vmem:[#allocation7 + $0xa2] ss:$2 sm:$0xf]  ;;  %v6725_v19 = vld [vmem:[%s11870_s5 + $0x78] sm:$0xff] }
 0x8d6   :  { %v5757_v30 = vpop.permute.xlu1 %5756  ;;  %v5309_v34 = vpop.permute.xlu0 %5308  ;;  %v5807_v42 = vld [vmem:[#allocation5 + $0x58] sm:$0xff]  ;;  %6744 = vmatpush.msrb.mxu2 %v6725_v19 }
 0x8d7   :  { %5344 = vst.msk [vmem:[#allocation5 + $0x60] sm:$0xff] %vm4092_vm0, %v5309_v34  ;;  %v5088_v0 = vpop.permute.xlu2 %5087  ;;  %7488 = vmatmul.msk.f32.gmra.mxu1 %vm5825_vm11, %v5807_v42  ;;  %v6724_v34 = vld [vmem:[%s11870_s5 + $0x70] sm:$0xff]  ;;  %v6723_v42 = vld [vmem:[%s11870_s5 + $0x68] sm:$0xff] }
 0x8d8   :  { %5456 = vst.msk [vmem:[#allocation5 + $0x60] sm:$0xff] %vm4145_vm1, %v5421_v28  ;;  %6745 = vmatpush.msrb.mxu2 %v6724_v34 }
 0x8d9   :  { %5568 = vst.msk [vmem:[#allocation5 + $0x60] sm:$0xff] %vm4198_vm2, %v5533_v48 }
 0x8da   :  { %5122 = vst.msk [vmem:[#allocation5 + $0x68] sm:$0xff] %vm3986_vm14, %v5088_v0  ;;  %6746 = vmatpush.msrb.mxu2 %v6723_v42 }
 0x8dc   :  { %v6428_v9 = vld [vmem:[#allocation7 + $0x52] ss:$2 sm:$0xf]  ;;  %v6371_v25 = vld [vmem:[#allocation7 + $0x51] ss:$2 sm:$0xf] }
 0x8dd   :  { %6451 = vrot.lane.b32.xlu1 %v6428_v9, %s7631_s21  ;;  %6563 = vrot.lane.b32.xlu2 %v6540_v2, %s7635_s26  ;;  %v6314_v6 = vld [vmem:[#allocation7 + $0x50] ss:$2 sm:$0xf] }
 0x8de   :  { %6394 = vrot.lane.b32.xlu0 %v6371_v25, %s7629_s18  ;;  %v5311_v27 = vpop.permute.xlu1 %5310  ;;  %v5645_v15 = vpop.permute.xlu0 %5644 }
 0x8df   :  { %5680 = vst.msk [vmem:[#allocation5 + $0x60] sm:$0xff] %vm4251_vm3, %v5645_v15  ;;  %v5423_v41 = vpop.permute.xlu2 %5422  ;;  %v6722_v15 = vld [vmem:[%s11870_s5 + $0x60] sm:$0xff] }
 0x8e0   :  { %5792 = vst.msk [vmem:[#allocation5 + $0x60] sm:$0xff] %vm4304_vm4, %v5757_v30  ;;  %6747 = vmatpush.msrb.mxu2 %v6722_v15 }
 0x8e4   :  { %v5906_v16 = vpop.f32.mrf.mxu1 }
 0x8e5   :  { %6337 = vrot.lane.b32.xlu2 %v6314_v6, %s7627_s15  ;;  %v5907_v18 = vadd.f32 %v11444_v44, %v5906_v16 }
 0x8e6   :  { %v5647_v11 = vpop.permute.xlu1 %5646  ;;  %v5199_v51 = vpop.permute.xlu0 %5198 }
 0x8e7   :  { %v5944_v56 = vmax.f32 %v5907_v18, 0.0  ;;  %5233 = vst.msk [vmem:[#allocation5 + $0x68] sm:$0xff] %vm4039_vm15, %v5199_v51  ;;  %v5759_v7 = vpop.permute.xlu2 %5758  ;;  %v5808_v33 = vld [vmem:[#allocation5 + $0x60] sm:$0xff]  ;;  %v6720_v18 = vld [vmem:[%s11870_s5 + $0x50] sm:$0xff] }
 0x8e8   :  { %5345 = vst.msk [vmem:[#allocation5 + $0x68] sm:$0xff] %vm4092_vm0, %v5311_v27  ;;  %7489 = vmatmul.msk.f32.gmra.mxu1 %vm5825_vm11, %v5808_v33  ;;  %v6719_v51 = vld [vmem:[%s11870_s5 + $0x48] sm:$0xff] }
 0x8e9   :  { %5961 = vst.msk [vmem:[#allocation6 + $0x28] sm:$0xff] %vm5955_vm5, %v5944_v56 }
 0x8ea   :  { %6161 = vst.msk [vmem:[#allocation7 + $0x61] sm:$0xff] %vm5955_vm5, %v5944_v56  ;;  %v6718_v56 = vld [vmem:[%s11870_s5 + $0x40] sm:$0xff] }
 0x8eb   :  { %5457 = vst.msk [vmem:[#allocation5 + $0x68] sm:$0xff] %vm4145_vm1, %v5423_v41  ;;  %v6721_v41 = vld [vmem:[%s11870_s5 + $0x58] sm:$0xff] }
 0x8ec   :  { %6748 = vmatpush.msrb.mxu2 %v6721_v41 }
 0x8ee   :  { %v5090_v39 = vpop.permute.xlu1 %5089  ;;  %v5535_v45 = vpop.permute.xlu0 %5534  ;;  %6749 = vmatpush.msrb.mxu2 %v6720_v18 }
 0x8ef   :  { %5569 = vst.msk [vmem:[#allocation5 + $0x68] sm:$0xff] %vm4198_vm2, %v5535_v45  ;;  %v5201_v46 = vpop.permute.xlu2 %5200 }
 0x8f0   :  { %5681 = vst.msk [vmem:[#allocation5 + $0x68] sm:$0xff] %vm4251_vm3, %v5647_v11  ;;  %6750 = vmatpush.msrb.mxu2 %v6719_v51 }
 0x8f1   :  { %v6599_v47 = vld [vmem:[#allocation7 + $0x62] ss:$2 sm:$0xf]  ;;  %5793 = vst.msk [vmem:[#allocation5 + $0x68] sm:$0xff] %vm4304_vm4, %v5759_v7 }
 0x8f2   :  { %6612 = vst.msk [vmem:[#allocation8 + $0x14] sm:$0xf] %vm6187_vm7, %v6599_v47  ;;  %v6542_v52 = vld [vmem:[#allocation7 + $0x61] ss:$2 sm:$0xf]  ;;  %6751 = vmatpush.msrb.mxu2 %v6718_v56 }
 0x8f3   :  { %6565 = vrot.lane.b32.xlu0 %v6542_v52, %s7635_s26  ;;  %v6485_v53 = vld [vmem:[#allocation7 + $0x60] ss:$2 sm:$0xf]  ;;  %v6203_v54 = vld [vmem:[#allocation7 + $0x61] ss:$2 sm:$0xf] }
 0x8f4   :  { %6508 = vrot.lane.b32.xlu2 %v6485_v53, %s7633_s25  ;;  %6226 = vrot.lane.b32.xlu1 %v6203_v54, %s7620_s28  ;;  %v6260_v17 = vld [vmem:[#allocation7 + $0x62] ss:$2 sm:$0xf] }
 0x8f5   :  { %v5909_v59 = vpop.f32.mrf.mxu1  ;;  %v6178_v21 = vld [vmem:[#allocation7 + $0x60] ss:$2 sm:$0xf]  ;;  %v6716_v52 = vld [vmem:[%s11870_s5 + $0x30] sm:$0xff] }
 0x8f6   :  { %v5910_v60 = vadd.f32 %v11444_v44, %v5909_v59  ;;  %v5425_v63 = vpop.permute.xlu1 %5424  ;;  %v4978_v4 = vpop.permute.xlu0 %4977  ;;  %6191 = vst.msk [vmem:[#allocation8 + $0x18] sm:$0xf] %vm6187_vm7, %v6178_v21 }
 0x8f7   :  { %5011 = vst.msk [vmem:[#allocation5 + $0x70] sm:$0xff] %vm3933_vm13, %v4978_v4  ;;  %v5537_v5 = vpop.permute.xlu2 %5536  ;;  %v5972_v4 = vld [vmem:[#allocation6] ss:$8 sm:$0xf] }
 0x8f8   :  { %v5945_v8 = vmax.f32 %v5910_v60, 0.0  ;;  %5123 = vst.msk [vmem:[#allocation5 + $0x70] sm:$0xff] %vm3986_vm14, %v5090_v39  ;;  %v5809_v13 = vld [vmem:[#allocation5 + $0x68] sm:$0xff]  ;;  %v6717_v39 = vld [vmem:[%s11870_s5 + $0x38] sm:$0xff]  ;;  %v6715_v60 = vld [vmem:[%s11870_s5 + $0x28] sm:$0xff] }
 0x8f9   :  { %5234 = vst.msk [vmem:[#allocation5 + $0x70] sm:$0xff] %vm4039_vm15, %v5201_v46  ;;  %7490 = vmatmul.msk.f32.gmra.mxu1 %vm5825_vm11, %v5809_v13  ;;  %6752 = vmatpush.msrb.mxu2 %v6717_v39 }
 0x8fa   :  { %5962 = vst.msk [vmem:[#allocation6 + $0x30] sm:$0xff] %vm5955_vm5, %v5945_v8 }
 0x8fb   :  { %6162 = vst.msk [vmem:[#allocation7 + $0x71] sm:$0xff] %vm5955_vm5, %v5945_v8  ;;  %6753 = vmatpush.msrb.mxu2 %v6716_v52 }
 0x8fc   :  { %6283 = vrot.lane.b32.xlu2 %v6260_v17, %s7624_s16 }
 0x8fd   :  { %6754 = vmatpush.msrb.mxu2 %v6715_v60 }
 0x8fe   :  { %v5761_v22 = vpop.permute.xlu1 %5760  ;;  %v5313_v23 = vpop.permute.xlu0 %5312 }
 0x8ff   :  { %5346 = vst.msk [vmem:[#allocation5 + $0x70] sm:$0xff] %vm4092_vm0, %v5313_v23  ;;  %v4980_v26 = vpop.permute.xlu2 %4979 }
 0x900   :  { %5458 = vst.msk [vmem:[#allocation5 + $0x70] sm:$0xff] %vm4145_vm1, %v5425_v63 }
 0x901   :  { %5570 = vst.msk [vmem:[#allocation5 + $0x70] sm:$0xff] %vm4198_vm2, %v5537_v5  ;;  %v6714_v5 = vld [vmem:[%s11870_s5 + $0x20] sm:$0xff] }
 0x902   :  { %5012 = vst.msk [vmem:[#allocation5 + $0x78] sm:$0xff] %vm3933_vm13, %v4980_v26  ;;  %v6430_v31 = vld [vmem:[#allocation7 + $0x72] ss:$2 sm:$0xf]  ;;  %vm6244_vm13 = vcmask 257152   ;;  %6755 = vmatpush.msrb.mxu2 %v6714_v5 }
 0x903   :  { %v6373_v32 = vld [vmem:[#allocation7 + $0x71] ss:$2 sm:$0xf]  ;;  %v6316_v36 = vld [vmem:[#allocation7 + $0x70] ss:$2 sm:$0xf] }
 0x904   :  { %6453 = vrot.lane.b32.xlu2 %v6430_v31, %s7631_s21  ;;  %6396 = vrot.lane.b32.xlu1 %v6373_v32, %s7629_s18 }
 0x905   :  { %6339 = vrot.lane.b32.xlu0 %v6316_v36, %s7627_s15  ;;  %6756 = vmatpush.msrb.mxu2 %v6713_v14 }
 0x906   :  { %v5203_v43 = vpop.permute.xlu1 %5202  ;;  %v5649_v50 = vpop.permute.xlu0 %5648 }
 0x907   :  { %5682 = vst.msk [vmem:[#allocation5 + $0x70] sm:$0xff] %vm4251_vm3, %v5649_v50  ;;  %v5912_v20 = vpop.f32.mrf.mxu1  ;;  %v5315_v58 = vpop.permute.xlu2 %5314 }
 0x908   :  { %5794 = vst.msk [vmem:[#allocation5 + $0x70] sm:$0xff] %vm4304_vm4, %v5761_v22  ;;  %v5913_v61 = vadd.f32 %v11444_v44, %v5912_v20 }
 0x90a   :  { %v5946_v1 = vmax.f32 %v5913_v61, 0.0  ;;  %v6712_v61 = vld [vmem:[%s11870_s5 + $0x10] sm:$0xff] }
 0x90b   :  { %6757 = vmatpush.msrb.mxu2 %v6712_v61 }
 0x90c   :  { %5963 = vst.msk [vmem:[#allocation6 + $0x38] sm:$0xff] %vm5955_vm5, %v5946_v1  ;;  %6228 = vrot.lane.b32.xlu2 %v6205_v49, %s7620_s28  ;;  %v6726_v49 = vld [vmem:[%s11870_s5 + $0x80] sm:$0xff] }
 0x90d   :  { %6163 = vst.msk [vmem:[#allocation7 + $0x81] sm:$0xff] %vm5955_vm5, %v5946_v1 }
 0x90e   :  { %v5539_v29 = vpop.permute.xlu1 %5538  ;;  %v5092_v55 = vpop.permute.xlu0 %5091 }
 0x90f   :  { %5124 = vst.msk [vmem:[#allocation5 + $0x78] sm:$0xff] %vm3986_vm14, %v5092_v55  ;;  %v5651_v35 = vpop.permute.xlu2 %5650  ;;  %v5810_v10 = vld [vmem:[#allocation5 + $0x70] sm:$0xff]  ;;  %vm6301_vm14 = vcmask 388352   ;;  %v6727_v55 = vld [vmem:[%s11870_s5 + $0x88] sm:$0xff] }
 0x910   :  { %5235 = vst.msk [vmem:[#allocation5 + $0x78] sm:$0xff] %vm4039_vm15, %v5203_v43  ;;  %7491 = vmatmul.msk.f32.gmra.mxu1 %vm5825_vm11, %v5810_v10  ;;  %vm6357_vm15 = vcmask 519552   ;;  %6787 = vmatpush.msrb.mxu3 %v6727_v55  ;;  %v6710_v10 = vld [vmem:[%s11870_s5] sm:$0xff] }
 0x911   :  { %5347 = vst.msk [vmem:[#allocation5 + $0x78] sm:$0xff] %vm4092_vm0, %v5315_v58  ;;  %vm6414_vm0 = vcmask 650752  }
 0x912   :  { %6788 = vmatpush.msrb.mxu3 %v6726_v49  ;;  %v5982_v49 = vld [vmem:[#allocation6 + $0x1] ss:$8 sm:$0xf] }
 0x913   :  { %v5973_v8 = vld [vmem:[#allocation6] ss:$8 sm:$0xf0] }
 0x914   :  { %v6601_v24 = vld [vmem:[#allocation7 + $0x82] ss:$2 sm:$0xf]  ;;  %v6544_v28 = vld [vmem:[#allocation7 + $0x81] ss:$2 sm:$0xf]  ;;  %v5974_v13 = vor.u32 %v5973_v8, %v5972_v4 }
 0x915   :  { %6613 = vst.msk [vmem:[#allocation8 + $0x1c] sm:$0xf] %vm6187_vm7, %v6601_v24  ;;  %6567 = vrot.lane.b32.xlu1 %v6544_v28, %s7635_s26  ;;  %v6487_v37 = vld [vmem:[#allocation7 + $0x80] ss:$2 sm:$0xf] }
 0x916   :  { %6510 = vrot.lane.b32.xlu0 %v6487_v37, %s7633_s25  ;;  %v6221_v40 = vpop.permute.xlu1 %6220  ;;  %v5427_v48 = vpop.permute.xlu0 %5426  ;;  %5979 = vst.msk [vmem:[#allocation13] sm:$0xff] %vm5955_vm5, %v5974_v13 }
 0x917   :  { %6245 = vst.msk [vmem:[#allocation8] sm:$0xf] %vm6244_vm13, %v6221_v40  ;;  %v6278_v57 = vpop.permute.xlu2 %6277 }
 0x918   :  { %5459 = vst.msk [vmem:[#allocation5 + $0x78] sm:$0xff] %vm4145_vm1, %v5427_v48  ;;  %vm6471_vm1 = vcmask 781952  }
 0x919   :  { %5571 = vst.msk [vmem:[#allocation5 + $0x78] sm:$0xff] %vm4198_vm2, %v5539_v29  ;;  %vm6528_vm2 = vcmask 913152   ;;  %v6711_v29 = vld [vmem:[%s11870_s5 + $0x8] sm:$0xff] }
 0x91a   :  { %5683 = vst.msk [vmem:[#allocation5 + $0x78] sm:$0xff] %vm4251_vm3, %v5651_v35  ;;  %vm6585_vm3 = vcmask 1044352   ;;  %6758 = vmatpush.msrb.mxu2 %v6711_v29 }
 0x91b   :  { %6302 = vst.msk [vmem:[#allocation8] sm:$0xf] %vm6301_vm14, %v6278_v57 }
 0x91c   :  { %v5915_v25 = vpop.f32.mrf.mxu1  ;;  %6759 = vmatpush.msrb.mxu2 %v6710_v10  ;;  %v5983_v10 = vld [vmem:[#allocation6 + $0x1] ss:$8 sm:$0xf0] }
 0x91d   :  { %v5916_v27 = vadd.f32 %v11444_v44, %v5915_v25 }
 0x91e   :  { %v5763_v3 = vpop.permute.xlu0 %5762  ;;  %6285 = vrot.lane.b32.xlu0 %v6262_v62, %s7624_s16  ;;  %v6391_v30 = vpop.permute.xlu1 %6390 }
 0x91f   :  { %5795 = vst.msk [vmem:[#allocation5 + $0x78] sm:$0xff] %vm4304_vm4, %v5763_v3  ;;  %v6448_v12 = vpop.permute.xlu2 %6447  ;;  %v5947_v16 = vmax.f32 %v5916_v27, 0.0  ;;  %vm6637_vm4 = vcmask 130052  }
 0x921   :  { %5964 = vst.msk [vmem:[#allocation6 + $0x40] sm:$0xff] %vm5955_vm5, %v5947_v16 }
 0x922   :  { %6164 = vst.msk [vmem:[#allocation7 + $0xb1] sm:$0xff] %vm5955_vm5, %v5947_v16 }
 0x926   :  { %v6334_v0 = vpop.permute.xlu0 %6333  ;;  %v5811_v2 = vld [vmem:[#allocation5 + $0x78] sm:$0xff]  ;;  %v6562_v6 = vpop.permute.xlu1 %6561 }
 0x927   :  { %6358 = vst.msk [vmem:[#allocation8] sm:$0xf] %vm6357_vm15, %v6334_v0  ;;  %v6223_v9 = vpop.permute.xlu2 %6222  ;;  %7492 = vmatmul.msk.f32.gmra.mxu1 %vm5825_vm11, %v5811_v2  ;;  %vm6054_vm11 = vcmask 654848  }
 0x928   :  { %6415 = vst.msk [vmem:[#allocation8] sm:$0xf] %vm6414_vm0, %v6391_v30 }
 0x929   :  { %6246 = vst.msk [vmem:[#allocation8 + $0x8] sm:$0xf] %vm6244_vm13, %v6223_v9  ;;  %v6432_v53 = vld [vmem:[#allocation7 + $0xb2] ss:$2 sm:$0xf] }
 0x92a   :  { %6472 = vst.msk [vmem:[#allocation8] sm:$0xf] %vm6471_vm1, %v6448_v12  ;;  %v6375_v54 = vld [vmem:[#allocation7 + $0xb1] ss:$2 sm:$0xf]  ;;  %6455 = vrot.lane.b32.xlu0 %v6432_v53, %s7631_s21 }
 0x92b   :  { %6398 = vrot.lane.b32.xlu2 %v6375_v54, %s7629_s18  ;;  %v6318_v59 = vld [vmem:[#allocation7 + $0xb0] ss:$2 sm:$0xf] }
 0x92c   :  { %6341 = vrot.lane.b32.xlu1 %v6318_v59, %s7627_s15 }
 0x92d   :  { %v5918_v7 = vpop.f32.mrf.mxu1 }
 0x92e   :  { %v6505_v11 = vpop.permute.xlu0 %6504  ;;  %v5919_v33 = vadd.f32 %v11444_v44, %v5918_v7  ;;  %v6336_v46 = vpop.permute.xlu1 %6335 }
 0x92f   :  { %6529 = vst.msk [vmem:[#allocation8] sm:$0xf] %vm6528_vm2, %v6505_v11  ;;  %v6393_v38 = vpop.permute.xlu2 %6392  ;;  %v6180_v11 = vld [vmem:[#allocation7 + $0xa0] ss:$2 sm:$0xf] }
 0x930   :  { %6586 = vst.msk [vmem:[#allocation8] sm:$0xf] %vm6585_vm3, %v6562_v6  ;;  %v5948_v45 = vmax.f32 %v5919_v33, 0.0 }
 0x931   :  { %6192 = vst.msk [vmem:[#allocation8 + $0x20] sm:$0xf] %vm6187_vm7, %v6180_v11 }
 0x932   :  { %5965 = vst.msk [vmem:[#allocation6 + $0x48] sm:$0xff] %vm5955_vm5, %v5948_v45 }
 0x933   :  { %6165 = vst.msk [vmem:[#allocation7 + $0xc1] sm:$0xff] %vm5955_vm5, %v5948_v45 }
 0x936   :  { %v6280_v47 = vpop.permute.xlu0 %6279 }
 0x937   :  { %v6618_v63 = vld [vmem:[#allocation8] sm:$0xff]  ;;  %6303 = vst.msk [vmem:[#allocation8 + $0x8] sm:$0xf] %vm6301_vm14, %v6280_v47  ;;  %v6564_v17 = vpop.permute.xlu2 %6563 }
 0x938   :  { %6620 = vst [vmem:[#allocation1] ss:$2 sm:$0xff] %v6618_v63 }
 0x939   :  { %6359 = vst.msk [vmem:[#allocation8 + $0x8] sm:$0xf] %vm6357_vm15, %v6336_v46 }
 0x93a   :  { %6416 = vst.msk [vmem:[#allocation8 + $0x8] sm:$0xf] %vm6414_vm0, %v6393_v38  ;;  %v6603_v31 = vld [vmem:[#allocation7 + $0xc2] ss:$2 sm:$0xf] }
 0x93b   :  { %v6546_v32 = vld [vmem:[#allocation7 + $0xc1] ss:$2 sm:$0xf]  ;;  %6614 = vst.msk [vmem:[#allocation8 + $0x24] sm:$0xf] %vm6187_vm7, %v6603_v31 }
 0x93c   :  { %6569 = vrot.lane.b32.xlu2 %v6546_v32, %s7635_s26  ;;  %v6489_v43 = vld [vmem:[#allocation7 + $0xc0] ss:$2 sm:$0xf]  ;;  %v6207_v50 = vld [vmem:[#allocation7 + $0xc1] ss:$2 sm:$0xf] }
 0x93d   :  { %6512 = vrot.lane.b32.xlu1 %v6489_v43, %s7633_s25  ;;  %6230 = vrot.lane.b32.xlu0 %v6207_v50, %s7620_s28  ;;  %v6264_v28 = vld [vmem:[#allocation7 + $0xc2] ss:$2 sm:$0xf]  ;;  %v7540_v31 = vld [vmem:[%s11869_s4] ss:$0 sm:$0xff] }
 0x93e   :  { %v6507_v22 = vpop.permute.xlu1 %6506  ;;  %v6450_v23 = vpop.permute.xlu0 %6449  ;;  %v6182_v9 = vld [vmem:[#allocation7 + $0xc0] ss:$2 sm:$0xf] }
 0x93f   :  { %6473 = vst.msk [vmem:[#allocation8 + $0x8] sm:$0xf] %vm6471_vm1, %v6450_v23  ;;  %v5921_v26 = vpop.f32.mrf.mxu1  ;;  %v6621_v58 = vld.sshfl [vmem:[#allocation1] sm:$0xff pattern:$0x75316420]  ;;  %v6338_v21 = vpop.permute.xlu2 %6337 }
 0x940   :  { %v5922_v36 = vadd.f32 %v11444_v44, %v5921_v26  ;;  %6530 = vst.msk [vmem:[#allocation8 + $0x8] sm:$0xf] %vm6528_vm2, %v6507_v22  ;;  %v6622_v1 = vld.sshfl [vmem:[#allocation1 + $0x8] sm:$0xff pattern:$0x75316420] }
 0x941   :  { %6587 = vst.msk [vmem:[#allocation8 + $0x8] sm:$0xf] %vm6585_vm3, %v6564_v17 }
 0x942   :  { %v5949_v20 = vmax.f32 %v5922_v36, 0.0  ;;  %6625 = vst [vmem:[#allocation9] sm:$0xf] %v6621_v58 }
 0x943   :  { %6626 = vst.msk [vmem:[#allocation9 + $0x8] sm:$0xf] %vm6187_vm7, %v6622_v1 }
 0x944   :  { %5966 = vst.msk [vmem:[#allocation6 + $0x50] sm:$0xff] %vm5955_vm5, %v5949_v20 }
 0x945   :  { %6166 = vst.msk [vmem:[#allocation7 + $0xd1] sm:$0xff] %vm5955_vm5, %v5949_v20  ;;  %6287 = vrot.lane.b32.xlu1 %v6264_v28, %s7624_s16 }
 0x946   :  { %v6225_v35 = vpop.permute.xlu0 %6224  ;;  %v6282_v24 = vpop.permute.xlu1 %6281  ;;  %6193 = vst.msk [vmem:[#allocation8 + $0x28] sm:$0xf] %vm6187_vm7, %v6182_v9 }
 0x947   :  { %6247 = vst.msk [vmem:[#allocation8 + $0x10] sm:$0xf] %vm6244_vm13, %v6225_v35 }
 0x948   :  { %6304 = vst.msk [vmem:[#allocation8 + $0x10] sm:$0xf] %vm6301_vm14, %v6282_v24  ;;  %v6628_v37 = vld [vmem:[#allocation8 + $0x8] sm:$0xff] }
 0x949   :  { %6360 = vst.msk [vmem:[#allocation8 + $0x10] sm:$0xf] %vm6357_vm15, %v6338_v21  ;;  %v5984_v21 = vor.u32 %v5983_v10, %v5982_v49 }
 0x94a   :  { %6631 = vst [vmem:[#allocation1 + $0x1] ss:$2 sm:$0xff] %v6628_v37 }
 0x94c   :  { %v6377_v40 = vld [vmem:[#allocation7 + $0xd1] ss:$2 sm:$0xf]  ;;  %v6434_v48 = vld [vmem:[#allocation7 + $0xd2] ss:$2 sm:$0xf] }
 0x94d   :  { %6400 = vrot.lane.b32.xlu0 %v6377_v40, %s7629_s18  ;;  %v6320_v57 = vld [vmem:[#allocation7 + $0xd0] ss:$2 sm:$0xf]  ;;  %6457 = vrot.lane.b32.xlu1 %v6434_v48, %s7631_s21 }
 0x94e   :  { %v6509_v62 = vpop.permute.xlu2 %6508  ;;  %6343 = vrot.lane.b32.xlu2 %v6320_v57, %s7627_s15 }
 0x94f   :  { %v6452_v12 = vpop.permute.xlu1 %6451 }
 0x950   :  { %v6395_v3 = vpop.permute.xlu0 %6394 }
 0x951   :  { %6417 = vst.msk [vmem:[#allocation8 + $0x10] sm:$0xf] %vm6414_vm0, %v6395_v3  ;;  %v6632_v19 = vld.sshfl [vmem:[#allocation1] sm:$0xff pattern:$0x75316420] }
 0x952   :  { %6474 = vst.msk [vmem:[#allocation8 + $0x10] sm:$0xf] %vm6471_vm1, %v6452_v12  ;;  %v6633_v30 = vld.sshfl [vmem:[#allocation1 + $0x8] sm:$0xff pattern:$0x75316420] }
 0x953   :  { %6531 = vst.msk [vmem:[#allocation8 + $0x10] sm:$0xf] %vm6528_vm2, %v6509_v62 }
 0x954   :  { %v5924_v34 = vpop.f32.mrf.mxu1  ;;  %6636 = vst [vmem:[#allocation9] sm:$0xf0] %v6632_v19 }
 0x955   :  { %v5925_v42 = vadd.f32 %v11444_v44, %v5924_v34  ;;  %6638 = vst.msk [vmem:[#allocation9 + $0x8] sm:$0xf0] %vm6637_vm4, %v6633_v30 }
 0x956   :  { %v6284_v2 = vpop.permute.xlu2 %6283 }
 0x957   :  { %v5950_v0 = vmax.f32 %v5925_v42, 0.0 }
 0x959   :  { %5967 = vst.msk [vmem:[#allocation6 + $0x58] sm:$0xff] %vm5955_vm5, %v5950_v0 }
 0x95a   :  { %6167 = vst.msk [vmem:[#allocation7 + $0xe1] sm:$0xff] %vm5955_vm5, %v5950_v0 }
 0x95b   :  { %v6702_v25 = vld [vmem:[#allocation9] sm:$0xff] }
 0x95c   :  { %6760 = vmatmul.f32.vlgmr.msrb.gmra.mxu2 %v6702_v25  ;;  %v6703_v27 = vld [vmem:[#allocation9 + $0x8] sm:$0xff] }
 0x95d   :  { %7493 = vmatmul.msk.f32.vlgmr.msrb.gmra.mxu3 %vm5955_vm5, %v6703_v27  ;;  %v6002_v27 = vld [vmem:[#allocation6 + $0x2] ss:$8 sm:$0xf0] }
 0x95e   :  { %v6454_v16 = vpop.permute.xlu2 %6453 }
 0x960   :  { %v6005_v19 = vld [vmem:[#allocation6 + $0x42] ss:$8 sm:$0xf]  ;;  %v5986_v11 = vld [vmem:[#allocation6 + $0x41] ss:$8 sm:$0xf] }
 0x961   :  { %v6605_v15 = vld [vmem:[#allocation7 + $0xe2] ss:$2 sm:$0xf]  ;;  %v6548_v41 = vld [vmem:[#allocation7 + $0xe1] ss:$2 sm:$0xf] }
 0x962   :  { %6615 = vst.msk [vmem:[#allocation8 + $0x2c] sm:$0xf] %vm6187_vm7, %v6605_v15  ;;  %6571 = vrot.lane.b32.xlu0 %v6548_v41, %s7635_s26  ;;  %v6491_v6 = vld [vmem:[#allocation7 + $0xe0] ss:$2 sm:$0xf] }
 0x963   :  { %6514 = vrot.lane.b32.xlu2 %v6491_v6, %s7633_s25  ;;  %v6209_v18 = vld [vmem:[#allocation7 + $0xe1] ss:$2 sm:$0xf]  ;;  %v6266_v39 = vld [vmem:[#allocation7 + $0xe2] ss:$2 sm:$0xf] }
 0x964   :  { %6232 = vrot.lane.b32.xlu1 %v6209_v18, %s7620_s28  ;;  %v6184_v17 = vld [vmem:[#allocation7 + $0xe0] ss:$2 sm:$0xf] }
 0x965   :  { %v6566_v51 = vpop.permute.xlu0 %6565  ;;  %v5927_v56 = vpop.f32.mrf.mxu1  ;;  %6194 = vst.msk [vmem:[#allocation8 + $0x30] sm:$0xf] %vm6187_vm7, %v6184_v17  ;;  %v6040_v41 = vld [vmem:[#allocation6 + $0x4] ss:$8 sm:$0xf0] }
 0x966   :  { %6588 = vst.msk [vmem:[#allocation8 + $0x10] sm:$0xf] %vm6585_vm3, %v6566_v51  ;;  %v6227_v7 = vpop.permute.xlu1 %6226  ;;  %v5928_v33 = vadd.f32 %v11444_v44, %v5927_v56  ;;  %v6229_v45 = vpop.permute.xlu2 %6228  ;;  %v6039_v51 = vld [vmem:[#allocation6 + $0x4] ss:$8 sm:$0xf] }
 0x967   :  { %6248 = vst.msk [vmem:[#allocation8 + $0x18] sm:$0xf] %vm6244_vm13, %v6227_v7  ;;  %v6041_v7 = vor.u32 %v6040_v41, %v6039_v51  ;;  %v6058_v17 = vld [vmem:[#allocation6 + $0x5] ss:$8 sm:$0xf] }
 0x968   :  { %6305 = vst.msk [vmem:[#allocation8 + $0x18] sm:$0xf] %vm6301_vm14, %v6284_v2  ;;  %v5951_v38 = vmax.f32 %v5928_v33, 0.0 }
 0x969   :  { %6249 = vst.msk [vmem:[#allocation8 + $0x20] sm:$0xf] %vm6244_vm13, %v6229_v45 }
 0x96a   :  { %5968 = vst.msk [vmem:[#allocation6 + $0x60] sm:$0xff] %vm5955_vm5, %v5951_v38 }
 0x96b   :  { %6168 = vst.msk [vmem:[#allocation7 + $0xf1] sm:$0xff] %vm5955_vm5, %v5951_v38  ;;  %6289 = vrot.lane.b32.xlu2 %v6266_v39, %s7624_s16  ;;  %v6021_v39 = vld [vmem:[#allocation6 + $0x3] ss:$8 sm:$0xf0] }
 0x96d   :  { %v6640_v46 = vld [vmem:[#allocation8 + $0x10] sm:$0xff] }
 0x96e   :  { %6642 = vst [vmem:[#allocation1] ss:$2 sm:$0xff] %v6640_v46 }
 0x972   :  { %v6436_v47 = vld [vmem:[#allocation7 + $0xf2] ss:$2 sm:$0xf]  ;;  %v6379_v52 = vld [vmem:[#allocation7 + $0xf1] ss:$2 sm:$0xf] }
 0x973   :  { %6459 = vrot.lane.b32.xlu2 %v6436_v47, %s7631_s21  ;;  %6402 = vrot.lane.b32.xlu1 %v6379_v52, %s7629_s18  ;;  %v6322_v53 = vld [vmem:[#allocation7 + $0xf0] ss:$2 sm:$0xf]  ;;  %v6024_v52 = vld [vmem:[#allocation6 + $0x43] ss:$8 sm:$0xf] }
 0x974   :  { %6345 = vrot.lane.b32.xlu0 %v6322_v53, %s7627_s15 }
 0x975   :  { %v6643_v36 = vld.sshfl [vmem:[#allocation1] sm:$0xff pattern:$0x75316420]  ;;  %v6644_v43 = vld.sshfl [vmem:[#allocation1 + $0x8] sm:$0xff pattern:$0x75316420] }
 0x976   :  { %v6397_v54 = vpop.permute.xlu1 %6396  ;;  %v5930_v59 = vpop.f32.mrf.mxu1  ;;  %6647 = vst [vmem:[#allocation9 + $0x10] sm:$0xf] %v6643_v36 }
 0x977   :  { %v6340_v60 = vpop.permute.xlu0 %6339  ;;  %v5931_v63 = vadd.f32 %v11444_v44, %v5930_v59  ;;  %6648 = vst.msk [vmem:[#allocation9 + $0x18] sm:$0xf] %vm6187_vm7, %v6644_v43  ;;  %v6062_v59 = vld [vmem:[#allocation6 + $0x45] ss:$8 sm:$0xf] }
 0x978   :  { %6361 = vst.msk [vmem:[#allocation8 + $0x18] sm:$0xf] %vm6357_vm15, %v6340_v60  ;;  %v6078_v43 = vld [vmem:[#allocation6 + $0x6] ss:$8 sm:$0xf0] }
 0x979   :  { %6418 = vst.msk [vmem:[#allocation8 + $0x18] sm:$0xf] %vm6414_vm0, %v6397_v54  ;;  %v5952_v4 = vmax.f32 %v5931_v63, 0.0  ;;  %v6020_v54 = vld [vmem:[#allocation6 + $0x3] ss:$8 sm:$0xf] }
 0x97a   :  { %6475 = vst.msk [vmem:[#allocation8 + $0x18] sm:$0xf] %vm6471_vm1, %v6454_v16  ;;  %v6001_v16 = vld [vmem:[#allocation6 + $0x2] ss:$8 sm:$0xf]  ;;  %v6022_v63 = vor.u32 %v6021_v39, %v6020_v54 }
 0x97b   :  { %5969 = vst.msk [vmem:[#allocation6 + $0x68] sm:$0xff] %vm5955_vm5, %v5952_v4  ;;  %v6003_v18 = vor.u32 %v6002_v27, %v6001_v16 }
 0x97c   :  { %6169 = vst.msk [vmem:[#allocation7 + $0x101] sm:$0xff] %vm5955_vm5, %v5952_v4 }
 0x983   :  { %v6607_v5 = vld [vmem:[#allocation7 + $0x102] ss:$2 sm:$0xf]  ;;  %v6550_v8 = vld [vmem:[#allocation7 + $0x101] ss:$2 sm:$0xf] }
 0x984   :  { %6616 = vst.msk [vmem:[#allocation8 + $0x34] sm:$0xf] %vm6187_vm7, %v6607_v5  ;;  %6573 = vrot.lane.b32.xlu1 %v6550_v8, %s7635_s26  ;;  %v6493_v13 = vld [vmem:[#allocation7 + $0x100] ss:$2 sm:$0xf] }
 0x985   :  { %6516 = vrot.lane.b32.xlu0 %v6493_v13, %s7633_s25  ;;  %v6211_v44 = vld [vmem:[#allocation7 + $0x101] ss:$2 sm:$0xf]  ;;  %v6268_v23 = vld [vmem:[#allocation7 + $0x102] ss:$2 sm:$0xf]  ;;  %v6399_v3 = vpop.permute.xlu2 %6398 }
 0x986   :  { %6234 = vrot.lane.b32.xlu2 %v6211_v44, %s7620_s28  ;;  %v6186_v28 = vld [vmem:[#allocation7 + $0x100] ss:$2 sm:$0xf]  ;;  %v6059_v13 = vld [vmem:[#allocation6 + $0x5] ss:$8 sm:$0xf0] }
 0x987   :  { %v6568_v14 = vpop.permute.xlu1 %6567  ;;  %6195 = vst.msk [vmem:[#allocation8 + $0x38] sm:$0xf] %vm6187_vm7, %v6186_v28 }
 0x988   :  { %v6511_v22 = vpop.permute.xlu0 %6510 }
 0x989   :  { %6532 = vst.msk [vmem:[#allocation8 + $0x18] sm:$0xf] %vm6528_vm2, %v6511_v22  ;;  %v6060_v22 = vor.u32 %v6059_v13, %v6058_v17 }
 0x98a   :  { %6589 = vst.msk [vmem:[#allocation8 + $0x18] sm:$0xf] %vm6585_vm3, %v6568_v14 }
 0x98d   :  { %6291 = vrot.lane.b32.xlu0 %v6268_v23, %s7624_s16  ;;  %v5933_v26 = vpop.f32.mrf.mxu1  ;;  %v6043_v23 = vld [vmem:[#allocation6 + $0x44] ss:$8 sm:$0xf] }
 0x98e   :  { %v5934_v32 = vadd.f32 %v7540_v31, %v5933_v26 }
 0x990   :  { %v5953_v50 = vmax.f32 %v5934_v32, 0.0  ;;  %v6286_v20 = vpop.permute.xlu0 %6285 }
 0x991   :  { %v6650_v58 = vld [vmem:[#allocation8 + $0x18] sm:$0xff]  ;;  %6306 = vst.msk [vmem:[#allocation8 + $0x20] sm:$0xf] %vm6301_vm14, %v6286_v20 }
 0x992   :  { %5970 = vst.msk [vmem:[#allocation6 + $0x70] sm:$0xff] %vm5955_vm5, %v5953_v50 }
 0x993   :  { %6170 = vst.msk [vmem:[#allocation7 + $0x111] sm:$0xff] %vm5955_vm5, %v5953_v50  ;;  %v6081_v50 = vld [vmem:[#allocation6 + $0x46] ss:$8 sm:$0xf] }
 0x994   :  { %6653 = vst [vmem:[#allocation1 + $0x1] ss:$2 sm:$0xff] %v6650_v58  ;;  %v6077_v58 = vld [vmem:[#allocation6 + $0x6] ss:$8 sm:$0xf] }
 0x996   :  { %v6570_v9 = vpop.permute.xlu2 %6569 }
 0x99a   :  { %v6438_v61 = vld [vmem:[#allocation7 + $0x112] ss:$2 sm:$0xf]  ;;  %v6381_v1 = vld [vmem:[#allocation7 + $0x111] ss:$2 sm:$0xf] }
 0x99b   :  { %6461 = vrot.lane.b32.xlu0 %v6438_v61, %s7631_s21  ;;  %6404 = vrot.lane.b32.xlu2 %v6381_v1, %s7629_s18  ;;  %v6324_v29 = vld [vmem:[#allocation7 + $0x110] ss:$2 sm:$0xf]  ;;  %v6654_v55 = vld.sshfl [vmem:[#allocation1] sm:$0xff pattern:$0x75316420]  ;;  %v6079_v61 = vor.u32 %v6078_v43, %v6077_v58 }
 0x99c   :  { %6347 = vrot.lane.b32.xlu1 %v6324_v29, %s7627_s15  ;;  %6658 = vst [vmem:[#allocation9 + $0x10] sm:$0xf0] %v6654_v55  ;;  %v6655_v35 = vld.sshfl [vmem:[#allocation1 + $0x8] sm:$0xff pattern:$0x75316420]  ;;  %v6456_v12 = vpop.permute.xlu0 %6455 }
 0x99d   :  { %6659 = vst.msk [vmem:[#allocation9 + $0x18] sm:$0xf0] %vm6637_vm4, %v6655_v35  ;;  %v5976_v1 = vld [vmem:[#allocation6 + $0x40] ss:$8 sm:$0xf] }
 0x99e   :  { %v6342_v62 = vpop.permute.xlu1 %6341 }
 0x99f   :  { %6362 = vst.msk [vmem:[#allocation8 + $0x20] sm:$0xf] %vm6357_vm15, %v6342_v62  ;;  %v11819_v62 = vld [vmem:[%s11871_s6] ss:$0 sm:$0xff]  ;;  %s7637_s6 = smov [#allocation13]  }
 0x9a0   :  { %6419 = vst.msk [vmem:[#allocation8 + $0x20] sm:$0xf] %vm6414_vm0, %v6399_v3 }
 0x9a1   :  { %6476 = vst.msk [vmem:[#allocation8 + $0x20] sm:$0xf] %vm6471_vm1, %v6456_v12 }
 0x9a3   :  { %v6704_v24 = vld [vmem:[#allocation9 + $0x10] sm:$0xff]  ;;  %5991 = vrot.lane.b32.xlu0 %v5984_v21, %s7620_s28 }
 0x9a4   :  { %6763 = vmatmul.f32.gmra.mxu2 %v6704_v24  ;;  %v6705_v37 = vld [vmem:[#allocation9 + $0x18] sm:$0xff]  ;;  %v5936_v40 = vpop.f32.mrf.mxu1 }
 0x9a5   :  { %7494 = vmatmul.msk.f32.gmra.mxu3 %vm5955_vm5, %v6705_v37  ;;  %v5937_v48 = vadd.f32 %v7540_v31, %v5936_v40  ;;  %v6097_v21 = vld [vmem:[#allocation6 + $0x7] ss:$8 sm:$0xf0] }
 0x9a6   :  { %v6100_v24 = vld [vmem:[#allocation6 + $0x47] ss:$8 sm:$0xf] }
 0x9a7   :  { %v5954_v57 = vmax.f32 %v5937_v48, 0.0  ;;  %v6096_v40 = vld [vmem:[#allocation6 + $0x7] ss:$8 sm:$0xf] }
 0x9a8   :  { %v6344_v33 = vpop.permute.xlu2 %6343  ;;  %v6098_v48 = vor.u32 %v6097_v21, %v6096_v40 }
 0x9a9   :  { %5971 = vst.msk [vmem:[#allocation6 + $0x78] sm:$0xff] %vm5955_vm5, %v5954_v57 }
 0x9aa   :  { %6171 = vst.msk [vmem:[#allocation7 + $0x121] sm:$0xff] %vm5955_vm5, %v5954_v57 }
 0x9af   :  { %v6513_v25 = vpop.permute.xlu1 %6512  ;;  %v6231_v15 = vpop.permute.xlu0 %6230 }
 0x9b0   :  { %v6006_v30 = vld [vmem:[#allocation6 + $0x42] ss:$8 sm:$0xf0]  ;;  %6533 = vst.msk [vmem:[#allocation8 + $0x20] sm:$0xf] %vm6528_vm2, %v6513_v25 }
 0x9b1   :  { %v6609_v34 = vld [vmem:[#allocation7 + $0x122] ss:$2 sm:$0xf]  ;;  %v6552_v42 = vld [vmem:[#allocation7 + $0x121] ss:$2 sm:$0xf]  ;;  %v6007_v0 = vor.u32 %v6006_v30, %v6005_v19 }
 0x9b2   :  { %6617 = vst.msk [vmem:[#allocation8 + $0x3c] sm:$0xf] %vm6187_vm7, %v6609_v34  ;;  %6575 = vrot.lane.b32.xlu2 %v6552_v42, %s7635_s26  ;;  %v6495_v2 = vld [vmem:[#allocation7 + $0x120] ss:$2 sm:$0xf] }
 0x9b3   :  { %6518 = vrot.lane.b32.xlu1 %v6495_v2, %s7633_s25  ;;  %6012 = vrot.lane.b32.xlu0 %v6007_v0, %s7624_s16  ;;  %6590 = vst.msk [vmem:[#allocation8 + $0x20] sm:$0xf] %vm6585_vm3, %v6570_v9  ;;  %v5987_v6 = vld [vmem:[#allocation6 + $0x41] ss:$8 sm:$0xf0] }
 0x9b4   :  { %6250 = vst.msk [vmem:[#allocation8 + $0x28] sm:$0xf] %vm6244_vm13, %v6231_v15  ;;  %v5988_v56 = vor.u32 %v5987_v6, %v5986_v11  ;;  %v6025_v46 = vld [vmem:[#allocation6 + $0x43] ss:$8 sm:$0xf0] }
 0x9b5   :  { %v6063_v47 = vld [vmem:[#allocation6 + $0x45] ss:$8 sm:$0xf0]  ;;  %v6026_v53 = vor.u32 %v6025_v46, %v6024_v52  ;;  %v6044_v14 = vld [vmem:[#allocation6 + $0x44] ss:$8 sm:$0xf0] }
 0x9b6   :  { %v6064_v4 = vor.u32 %v6063_v47, %v6062_v59  ;;  %v6045_v26 = vor.u32 %v6044_v14, %v6043_v23  ;;  %v6082_v32 = vld [vmem:[#allocation6 + $0x46] ss:$8 sm:$0xf0]  ;;  %v5977_v29 = vld [vmem:[#allocation6 + $0x40] ss:$8 sm:$0xf0] }
 0x9b7   :  { %v6288_v38 = vpop.permute.xlu1 %6287  ;;  %v6083_v20 = vor.u32 %v6082_v32, %v6081_v50  ;;  %v5978_v55 = vor.u32 %v5977_v29, %v5976_v1  ;;  %v6101_v10 = vld [vmem:[#allocation6 + $0x47] ss:$8 sm:$0xf0] }
 0x9b8   :  { %6307 = vst.msk [vmem:[#allocation8 + $0x28] sm:$0xf] %vm6301_vm14, %v6288_v38  ;;  %v6102_v37 = vor.u32 %v6101_v10, %v6100_v24 }
 0x9b9   :  { %6363 = vst.msk [vmem:[#allocation8 + $0x28] sm:$0xf] %vm6357_vm15, %v6344_v33 }
 0x9ba   :  { %6010 = vrot.lane.b32.xlu2 %v6003_v18, %s7624_s16  ;;  %v6661_v45 = vld [vmem:[#allocation8 + $0x20] sm:$0xff]  ;;  %5980 = vst.msk [vmem:[#allocation13 + $0x8] sm:$0xff] %vm5955_vm5, %v5978_v55 }
 0x9bb   :  { %5993 = vrot.lane.b32.xlu1 %v5988_v56, %s7620_s28  ;;  %6048 = vrot.lane.b32.xlu0 %v6041_v7, %s7629_s18  ;;  %6663 = vst [vmem:[#allocation1] ss:$2 sm:$0xff] %v6661_v45 }
 0x9bd   :  { %v6515_v5 = vpop.permute.xlu2 %6514 }
 0x9bf   :  { %v6401_v60 = vpop.permute.xlu0 %6400  ;;  %v6458_v8 = vpop.permute.xlu1 %6457 }
 0x9c0   :  { %6420 = vst.msk [vmem:[#allocation8 + $0x28] sm:$0xf] %vm6414_vm0, %v6401_v60 }
 0x9c1   :  { %6477 = vst.msk [vmem:[#allocation8 + $0x28] sm:$0xf] %vm6471_vm1, %v6458_v8 }
 0x9c2   :  { %6031 = vrot.lane.b32.xlu2 %v6026_v53, %s7627_s15  ;;  %v6665_v44 = vld.sshfl [vmem:[#allocation1 + $0x8] sm:$0xff pattern:$0x75316420]  ;;  %6534 = vst.msk [vmem:[#allocation8 + $0x28] sm:$0xf] %vm6528_vm2, %v6515_v5 }
 0x9c3   :  { %6029 = vrot.lane.b32.xlu1 %v6022_v63, %s7627_s15  ;;  %6069 = vrot.lane.b32.xlu0 %v6064_v4, %s7631_s21  ;;  %6669 = vst.msk [vmem:[#allocation9 + $0x28] sm:$0xf] %vm6187_vm7, %v6665_v44  ;;  %v6664_v31 = vld.sshfl [vmem:[#allocation1] sm:$0xff pattern:$0x75316420]  ;;  %s6854_s15 = sshll.u32 %s7637_s6, 4  ;;  %s6855_s15 = int_to_ptr.vmem [resolvable:$true] %s6854_s15 }
 0x9c4   :  { %6668 = vst [vmem:[#allocation9 + $0x20] sm:$0xf] %v6664_v31 }
 0x9c5   :  { %v6290_v36 = vpop.permute.xlu2 %6289 }
 0x9ca   :  { %6067 = vrot.lane.b32.xlu2 %v6060_v22, %s7631_s21 }
 0x9cb   :  { %6050 = vrot.lane.b32.xlu1 %v6045_v26, %s7629_s18 }
 0x9cd   :  { %v6460_v28 = vpop.permute.xlu2 %6459 }
 0x9d2   :  { %6088 = vrot.lane.b32.xlu2 %v6083_v20, %s7633_s25 }
 0x9d3   :  { %6086 = vrot.lane.b32.xlu1 %v6079_v61, %s7633_s25 }
 0x9d4   :  { %v6572_v35 = vpop.permute.xlu0 %6571 }
 0x9d5   :  { %6591 = vst.msk [vmem:[#allocation8 + $0x28] sm:$0xf] %vm6585_vm3, %v6572_v35 }
 0x9d6   :  { %v6233_v49 = vpop.permute.xlu1 %6232 }
 0x9d7   :  { %6251 = vst.msk [vmem:[#allocation8 + $0x30] sm:$0xf] %vm6244_vm13, %v6233_v49 }
 0x9d8   :  { %6308 = vst.msk [vmem:[#allocation8 + $0x30] sm:$0xf] %vm6301_vm14, %v6290_v36 }
 0x9da   :  { %6107 = vrot.lane.b32.xlu2 %v6102_v37, %s7635_s26 }
 0x9db   :  { %6105 = vrot.lane.b32.xlu1 %v6098_v48, %s7635_s26 }
 0x9dc   :  { %v6671_v57 = vld [vmem:[#allocation8 + $0x28] sm:$0xff] }
 0x9dd   :  { %6674 = vst [vmem:[#allocation1 + $0x1] ss:$2 sm:$0xff] %v6671_v57 }
 0x9df   :  { %v6761_v3 = vpop.f32.mrf.mxu2 }
 0x9e0   :  { %v6762_v12 = vadd.f32 %v11819_v62, %v6761_v3  ;;  %v6235_v19 = vpop.permute.xlu2 %6234  ;;  %v6790_v30 = vpop.f32.mrf.mxu3 }
 0x9e1   :  { %6252 = vst.msk [vmem:[#allocation8 + $0x38] sm:$0xf] %vm6244_vm13, %v6235_v19  ;;  %vm6111_vm13 = vcmask 1048448  }
 0x9e2   :  { %v6791_v34 = vadd.f32 %v6790_v30, %v6762_v12 }
 0x9e4   :  { %v6802_v42 = vmax.f32 %v6791_v34, 0.0  ;;  %v6675_v0 = vld.sshfl [vmem:[#allocation1] sm:$0xff pattern:$0x75316420] }
 0x9e5   :  { %v6403_v2 = vpop.permute.xlu1 %6402  ;;  %6679 = vst [vmem:[#allocation9 + $0x20] sm:$0xf0] %v6675_v0  ;;  %v6676_v25 = vld.sshfl [vmem:[#allocation1 + $0x8] sm:$0xff pattern:$0x75316420] }
 0x9e6   :  { %6807 = vst.msk [vmem:[#allocation10] sm:$0xff] %vm6806_vm8, %v6802_v42  ;;  %v6346_v9 = vpop.permute.xlu0 %6345 }
 0x9e7   :  { %6364 = vst.msk [vmem:[#allocation8 + $0x30] sm:$0xf] %vm6357_vm15, %v6346_v9 }
 0x9e8   :  { %6421 = vst.msk [vmem:[#allocation8 + $0x30] sm:$0xf] %vm6414_vm0, %v6403_v2 }
 0x9e9   :  { %6478 = vst.msk [vmem:[#allocation8 + $0x30] sm:$0xf] %vm6471_vm1, %v6460_v28 }
 0x9ea   :  { %6680 = vst.msk [vmem:[#allocation9 + $0x28] sm:$0xf0] %vm6637_vm4, %v6676_v25 }
 0x9ec   :  { %v6706_v27 = vld [vmem:[#allocation9 + $0x20] sm:$0xff] }
 0x9ed   :  { %6766 = vmatmul.f32.gmra.mxu2 %v6706_v27 }
 0x9f1   :  { %v6707_v15 = vld [vmem:[#allocation9 + $0x28] sm:$0xff] }
 0x9f2   :  { %7495 = vmatmul.msk.f32.gmra.mxu3 %vm5955_vm5, %v6707_v15 }
 0x9f5   :  { %v6405_v11 = vpop.permute.xlu2 %6404 }
 0x9f6   :  { %v6574_v41 = vpop.permute.xlu1 %6573 }
 0x9f7   :  { %v6517_v6 = vpop.permute.xlu0 %6516 }
 0x9f8   :  { %6535 = vst.msk [vmem:[#allocation8 + $0x30] sm:$0xf] %vm6528_vm2, %v6517_v6 }
 0x9f9   :  { %6592 = vst.msk [vmem:[#allocation8 + $0x30] sm:$0xf] %vm6585_vm3, %v6574_v41 }
 0x9ff   :  { %v6292_v16 = vpop.permute.xlu0 %6291 }
 0xa00   :  { %v6682_v18 = vld [vmem:[#allocation8 + $0x30] sm:$0xff]  ;;  %6309 = vst.msk [vmem:[#allocation8 + $0x38] sm:$0xf] %vm6301_vm14, %v6292_v16  ;;  %vm6827_vm14 = vcmask 785920  }
 0xa01   :  { %6684 = vst [vmem:[#allocation1] ss:$2 sm:$0xff] %v6682_v18 }
 0xa08   :  { %v6685_v39 = vld.sshfl [vmem:[#allocation1] sm:$0xff pattern:$0x75316420]  ;;  %v6686_v45 = vld.sshfl [vmem:[#allocation1 + $0x8] sm:$0xff pattern:$0x75316420] }
 0xa09   :  { %6689 = vst [vmem:[#allocation9 + $0x30] sm:$0xf] %v6685_v39 }
 0xa0a   :  { %6690 = vst.msk [vmem:[#allocation9 + $0x38] sm:$0xf] %vm6187_vm7, %v6686_v45  ;;  %vm6092_vm7 = vcmask 917248  }
 0xa0c   :  { %v6576_v51 = vpop.permute.xlu2 %6575 }
 0xa0d   :  { %v6462_v56 = vpop.permute.xlu0 %6461 }
 0xa0e   :  { %v6348_v7 = vpop.permute.xlu1 %6347 }
 0xa0f   :  { %6365 = vst.msk [vmem:[#allocation8 + $0x38] sm:$0xf] %vm6357_vm15, %v6348_v7  ;;  %vm6835_vm15 = vcmask 1048320  }
 0xa10   :  { %6422 = vst.msk [vmem:[#allocation8 + $0x38] sm:$0xf] %vm6414_vm0, %v6405_v11 }
 0xa11   :  { %6479 = vst.msk [vmem:[#allocation8 + $0x38] sm:$0xf] %vm6471_vm1, %v6462_v56 }
 0xa14   :  { %v6011_v38 = vpop.permute.xlu2 %6010 }
 0xa15   :  { %v5992_v33 = vpop.permute.xlu0 %5991 }
 0xa16   :  { %5998 = vst.msk [vmem:[#allocation13] sm:$0xff] %vm5997_vm9, %v5992_v33 }
 0xa17   :  { %6017 = vst.msk [vmem:[#allocation13] sm:$0xff] %vm6016_vm10, %v6011_v38 }
 0xa1c   :  { %v6032_v46 = vpop.permute.xlu2 %6031 }
 0xa24   :  { %v6068_v4 = vpop.permute.xlu2 %6067 }
 0xa25   :  { %v6519_v47 = vpop.permute.xlu1 %6518  ;;  %v6013_v60 = vpop.permute.xlu0 %6012 }
 0xa26   :  { %6536 = vst.msk [vmem:[#allocation8 + $0x38] sm:$0xf] %vm6528_vm2, %v6519_v47 }
 0xa27   :  { %v6764_v52 = vpop.f32.mrf.mxu2  ;;  %6593 = vst.msk [vmem:[#allocation8 + $0x38] sm:$0xf] %vm6585_vm3, %v6576_v51 }
 0xa28   :  { %v6765_v53 = vadd.f32 %v11819_v62, %v6764_v52  ;;  %v6793_v54 = vpop.f32.mrf.mxu3 }
 0xa2a   :  { %v6794_v59 = vadd.f32 %v6793_v54, %v6765_v53 }
 0xa2c   :  { %v6803_v63 = vmax.f32 %v6794_v59, 0.0  ;;  %v6089_v14 = vpop.permute.xlu2 %6088 }
 0xa2d   :  { %v5994_v5 = vpop.permute.xlu1 %5993  ;;  %v6049_v13 = vpop.permute.xlu0 %6048 }
 0xa2e   :  { %6808 = vst.msk [vmem:[#allocation10 + $0x8] sm:$0xff] %vm6806_vm8, %v6803_v63  ;;  %v6692_v8 = vld [vmem:[#allocation8 + $0x38] sm:$0xff] }
 0xa2f   :  { %5999 = vst.msk [vmem:[#allocation13 + $0x8] sm:$0xff] %vm5997_vm9, %v5994_v5 }
 0xa30   :  { %6018 = vst.msk [vmem:[#allocation13 + $0x8] sm:$0xff] %vm6016_vm10, %v6013_v60 }
 0xa31   :  { %6037 = vst.msk [vmem:[#allocation13 + $0x8] sm:$0xff] %vm6035_vm12, %v6032_v46 }
 0xa32   :  { %6695 = vst [vmem:[#allocation1 + $0x1] ss:$2 sm:$0xff] %v6692_v8 }
 0xa34   :  { %v6108_v31 = vpop.permute.xlu2 %6107 }
 0xa35   :  { %v6030_v44 = vpop.permute.xlu1 %6029  ;;  %v6070_v26 = vpop.permute.xlu0 %6069 }
 0xa36   :  { %6036 = vst.msk [vmem:[#allocation13] sm:$0xff] %vm6035_vm12, %v6030_v44 }
 0xa37   :  { %6055 = vst.msk [vmem:[#allocation13] sm:$0xff] %vm6054_vm11, %v6049_v13 }
 0xa38   :  { %6074 = vst.msk [vmem:[#allocation13] sm:$0xff] %vm6073_vm6, %v6068_v4 }
 0xa39   :  { %v6696_v17 = vld.sshfl [vmem:[#allocation1] sm:$0xff pattern:$0x75316420]  ;;  %v6697_v22 = vld.sshfl [vmem:[#allocation1 + $0x8] sm:$0xff pattern:$0x75316420] }
 0xa3a   :  { %6700 = vst [vmem:[#allocation9 + $0x30] sm:$0xf0] %v6696_v17 }
 0xa3b   :  { %6701 = vst.msk [vmem:[#allocation9 + $0x38] sm:$0xf0] %vm6637_vm4, %v6697_v22 }
 0xa3d   :  { %v6051_v23 = vpop.permute.xlu1 %6050 }
 0xa3e   :  { %6056 = vst.msk [vmem:[#allocation13 + $0x8] sm:$0xff] %vm6054_vm11, %v6051_v23 }
 0xa3f   :  { %6075 = vst.msk [vmem:[#allocation13 + $0x8] sm:$0xff] %vm6073_vm6, %v6070_v26 }
 0xa40   :  { %6094 = vst.msk [vmem:[#allocation13 + $0x8] sm:$0xff] %vm6092_vm7, %v6089_v14 }
 0xa41   :  { %v6708_v32 = vld [vmem:[#allocation9 + $0x30] sm:$0xff]  ;;  %6113 = vst.msk [vmem:[#allocation13 + $0x8] sm:$0xff] %vm6111_vm13, %v6108_v31 }
 0xa42   :  { %6769 = vmatmul.f32.gmra.mxu2 %v6708_v32  ;;  %v6709_v36 = vld [vmem:[#allocation9 + $0x38] sm:$0xff] }
 0xa43   :  { %7496 = vmatmul.msk.f32.gmra.mxu3 %vm5955_vm5, %v6709_v36  ;;  %vm6819_vm5 = vcmask 523520  }
 0xa45   :  { %v6087_v43 = vpop.permute.xlu1 %6086 }
 0xa46   :  { %6093 = vst.msk [vmem:[#allocation13] sm:$0xff] %vm6092_vm7, %v6087_v43 }
 0xa4d   :  { %v6106_v50 = vpop.permute.xlu1 %6105 }
 0xa4e   :  { %6112 = vst.msk [vmem:[#allocation13] sm:$0xff] %vm6111_vm13, %v6106_v50 }
 0xa4f   :  { %6862 = dma.vmem_to_hbm [thread:$0]  %s6855_s15, 256, %s6857_s12, [#allocation14], %s7638_s0, %s7638_s0, %s7618_s24  }
 0xa70   :  { %v6767_v20 = vpop.f32.mrf.mxu2 }
 0xa71   :  { %v6768_v58 = vadd.f32 %v11819_v62, %v6767_v20 }
 0xa75   :  { %v6796_v61 = vpop.f32.mrf.mxu3 }
 0xa76   :  { %v6797_v1 = vadd.f32 %v6796_v61, %v6768_v58 }
 0xa78   :  { %v6804_v29 = vmax.f32 %v6797_v1, 0.0 }
 0xa7a   :  { %6809 = vst.msk [vmem:[#allocation10 + $0x10] sm:$0xff] %vm6806_vm8, %v6804_v29 }
 0xac5   :  { %v6770_v55 = vpop.f32.mrf.mxu2 }
 0xac6   :  { %v6771_v35 = vadd.f32 %v11819_v62, %v6770_v55  ;;  %v6799_v10 = vpop.f32.mrf.mxu3 }
 0xac8   :  { %v6800_v49 = vadd.f32 %v6799_v10, %v6771_v35 }
 0xaca   :  { %v6805_v21 = vmax.f32 %v6800_v49, 0.0 }
 0xacc   :  { %6810 = vst.msk [vmem:[#allocation10 + $0x18] sm:$0xff] %vm6806_vm8, %v6805_v21 }
 0xad3   :  { %v6830_v24 = vld [vmem:[#allocation10 + $0x3] ss:$4 sm:$0xff]  ;;  %v6814_v28 = vld [vmem:[#allocation10 + $0x1] ss:$4 sm:$0xff]  ;;  %v6822_v37 = vld [vmem:[#allocation10 + $0x2] ss:$4 sm:$0xff] }
 0xad4   :  { %6832 = vrot.lane.b32.xlu1 %v6830_v24, %s7633_s25  ;;  %6816 = vrot.lane.b32.xlu0 %v6814_v28, %s7624_s16  ;;  %v6811_v40 = vld [vmem:[#allocation10] ss:$4 sm:$0xff]  ;;  %s6868_s16 = sshll.u32 %s7640_s8, 4  ;;  %s6869_s16 = int_to_ptr.vmem [resolvable:$true] %s6868_s16 }
 0xad5   :  { %6812 = vst.msk [vmem:[#allocation15] sm:$0xff] %vm6806_vm8, %v6811_v40 }
 0xadc   :  { %6824 = vrot.lane.b32.xlu0 %v6822_v37, %s7629_s18 }
 0xb46   :  { %v6817_v48 = vpop.permute.xlu0 %6816  ;;  %v6833_v62 = vpop.permute.xlu1 %6832 }
 0xb47   :  { %6820 = vst.msk [vmem:[#allocation15] sm:$0xff] %vm6819_vm5, %v6817_v48 }
 0xb4e   :  { %v6825_v57 = vpop.permute.xlu0 %6824 }
 0xb4f   :  { %6828 = vst.msk [vmem:[#allocation15] sm:$0xff] %vm6827_vm14, %v6825_v57 }
 0xb50   :  { %6836 = vst.msk [vmem:[#allocation15] sm:$0xff] %vm6835_vm15, %v6833_v62 }
 0xb51   :  { %6873 = dma.vmem_to_hbm [thread:$0]  %s6869_s16, 128, %s6871_s7, [#allocation14]  }
 0xb52   :  { %7613 = dma.done.wait [#allocation12], 512  }
 0xb53   :  { %7614 = vsyncadd [#allocation12], 4294966784 }
 0xb54   :  { %7615 = dma.done.wait [#allocation14], 384  }
 0xb55   :  { %7616 = vsyncadd [#allocation14], 4294966912 }
 0xb56   :  { %6886 = vsyncpa [#allocation12], 1 }
 0xb57   :  { %6887 = vsyncpa [#allocation14], 1 }

</bundles_post_ra>
